<compile_context>
chip_gen: v7x
topology: tpu7x:2x2x1
jax: 0.10.0
libtpu: 0.0.40
codegen_flags: <defaults>
</compile_context>

<pallas_src>
import functools
import math

import jax
import jax.numpy as jnp
from jax import lax
from jax.experimental import pallas as pl
from jax.experimental.pallas import tpu as pltpu


# bf16 MXU operands (f32 accumulation) + bf16 inter-layer activations per the
# review. Set both to jnp.float32 when validating numerics against PyTorch.
MATMUL_DTYPE = jnp.bfloat16
ACT_DTYPE = jnp.bfloat16

# Explicit scoped-VMEM cap: raises v5e's 16 MiB default, matches v6e/v7x defaults.
_VMEM_LIMIT_BYTES = 32 * 1024 * 1024


# ----------------------------------------------------------------------------
# In-kernel math helpers
# ----------------------------------------------------------------------------
def _mm(a, b):
    return jnp.dot(a.astype(MATMUL_DTYPE), b.astype(MATMUL_DTYPE),
                   preferred_element_type=jnp.float32)


def _mm_nt(a, b):
    """a @ b.T with the transpose folded into dot_general dimension numbers."""
    return lax.dot_general(a.astype(MATMUL_DTYPE), b.astype(MATMUL_DTYPE),
                           (((1,), (1,)), ((), ())),
                           preferred_element_type=jnp.float32)


def _erf(x):
    # TODO(synk): exact erf lowering is not guaranteed in Mosaic; use the
    # Abramowitz-Stegun 7.1.26 rational approximation (|err| < 1.5e-7) built
    # from exp/mul/add, with the divide replaced by an EUP approx reciprocal.
    p = 0.3275911
    a1, a2, a3, a4, a5 = 0.254829592, -0.284496736, 1.421413741, -1.453152027, 1.061405429
    ax = jnp.abs(x)
    t = pl.reciprocal(1.0 + p * ax, approx=True)
    poly = t * (a1 + t * (a2 + t * (a3 + t * (a4 + t * a5))))
    y = 1.0 - poly * jnp.exp(-ax * ax)
    return jnp.where(x >= 0, y, -y)


def _gelu(x):
    # PyTorch 'gelu' (approximate='none'), erf-based.
    return 0.5 * x * (1.0 + _erf(x * (1.0 / math.sqrt(2.0))))


def _layer_norm(x, g, b, eps):
    mean = jnp.mean(x, axis=-1, keepdims=True)
    var = jnp.mean(jnp.square(x - mean), axis=-1, keepdims=True)   # biased, like torch
    return (x - mean) * lax.rsqrt(var + eps) * g + b


def _mha(q, k, v, bias, nhead, head_dim):
    """Per-head softmax attention for ONE batch element.

    q:(Lq,E)  k,v:(Lk,E)  bias broadcastable to (Lq,Lk), additive.
    The 1/sqrt(head_dim) scale is pre-folded into the Q projection at init.
    Returns the contiguous (Lq, E) concatenation of head outputs (the output
    projection is applied ONCE outside, on the full (rows, E) tile).
    """
    heads = []
    for h in range(nhead):
        cs = slice(h * head_dim, (h + 1) * head_dim)
        s = _mm_nt(q[:, cs], k[:, cs]) + bias                      # (Lq, Lk)
        m = jnp.max(s, axis=-1, keepdims=True)
        p = jnp.exp(s - m)
        p = p * pl.reciprocal(jnp.sum(p, axis=-1, keepdims=True), approx=True)
        heads.append(_mm(p, v[:, cs]))                             # (Lq, Dh)
    return jnp.concatenate(heads, axis=-1)                         # (Lq, E)


# ----------------------------------------------------------------------------
# Fused layer kernels (one pallas_call per transformer layer)
# ----------------------------------------------------------------------------
def _encoder_layer_kernel(x_ref, src_mask_ref, kpm_ref,
                          wqkv_ref, bqkv_ref, wo_ref, bo_ref,
                          w1_ref, b1_ref, w2_ref, b2_ref,
                          g1_ref, be1_ref, g2_ref, be2_ref,
                          gf_ref, bf_ref, o_ref,
                          *, nhead, head_dim, eps, apply_final_norm):
    E = nhead * head_dim
    bb, L, _ = x_ref.shape
    x = x_ref[...].astype(jnp.float32).reshape(bb * L, E)
    attn_mask = src_mask_ref[...]                                  # (L, L) additive
    kpm = kpm_ref[...]                                             # (bb, 1, L) additive

    # Fused QKV projection over all bb*L rows (one K=E MXU matmul).
    qkv = _mm(x, wqkv_ref[...]) + bqkv_ref[...]                    # (bb*L, 3E)
    q_all, k_all, v_all = qkv[:, :E], qkv[:, E:2 * E], qkv[:, 2 * E:]

    rows = []
    for b in range(bb):                                            # softmax is per batch elem
        r = slice(b * L, (b + 1) * L)
        rows.append(_mha(q_all[r], k_all[r], v_all[r],
                         attn_mask + kpm[b], nhead, head_dim))
    o_all = rows[0] if bb == 1 else jnp.concatenate(rows, axis=0)  # (bb*L, E)
    sa = _mm(o_all, wo_ref[...]) + bo_ref[...]                     # single out-projection

    x = _layer_norm(x + sa, g1_ref[...], be1_ref[...], eps)

    # Feed-forward (lin1 + erf-GELU + lin2) + residual + LayerNorm2.
    h = _gelu(_mm(x, w1_ref[...]) + b1_ref[...])
    ff = _mm(h, w2_ref[...]) + b2_ref[...]
    x = _layer_norm(x + ff, g2_ref[...], be2_ref[...], eps)

    if apply_final_norm:   # fused nn.TransformerEncoder final norm (last layer only)
        x = _layer_norm(x, gf_ref[...], bf_ref[...], eps)

    o_ref[...] = x.reshape(bb, L, E).astype(o_ref.dtype)


def _decoder_layer_kernel(x_ref, mem_ref, tgt_mask_ref, tgt_kpm_ref, mem_kpm_ref,
                          sa_wqkv_ref, sa_bqkv_ref, sa_wo_ref, sa_bo_ref,
                          ca_wq_ref, ca_bq_ref, ca_wkv_ref, ca_bkv_ref,
                          ca_wo_ref, ca_bo_ref,
                          w1_ref, b1_ref, w2_ref, b2_ref,
                          g1_ref, be1_ref, g2_ref, be2_ref, g3_ref, be3_ref,
                          o_ref, *, nhead, head_dim, eps):
    E = nhead * head_dim
    bb, T, _ = x_ref.shape
    S = mem_ref.shape[1]
    x = x_ref[...].astype(jnp.float32).reshape(bb * T, E)
    mem = mem_ref[...].reshape(bb * S, E)                          # bf16; cast inside _mm
    tgt_mask = tgt_mask_ref[...]                                   # (T, T)
    tgt_kpm = tgt_kpm_ref[...]                                     # (bb, 1, T)
    mem_kpm = mem_kpm_ref[...]                                     # (bb, 1, S)

    # ---- masked self-attention + residual + LayerNorm1
    qkv = _mm(x, sa_wqkv_ref[...]) + sa_bqkv_ref[...]              # (bb*T, 3E)
    q_all, k_all, v_all = qkv[:, :E], qkv[:, E:2 * E], qkv[:, 2 * E:]
    rows = []
    for b in range(bb):
        r = slice(b * T, (b + 1) * T)
        rows.append(_mha(q_all[r], k_all[r], v_all[r],
                         tgt_mask + tgt_kpm[b], nhead, head_dim))
    o_all = rows[0] if bb == 1 else jnp.concatenate(rows, axis=0)
    sa = _mm(o_all, sa_wo_ref[...]) + sa_bo_ref[...]
    x = _layer_norm(x + sa, g1_ref[...], be1_ref[...], eps)

    # ---- cross-attention over encoder memory + residual + LayerNorm2
    q = _mm(x, ca_wq_ref[...]) + ca_bq_ref[...]                    # (bb*T, E)
    kv = _mm(mem, ca_wkv_ref[...]) + ca_bkv_ref[...]               # (bb*S, 2E)
    k_all, v_all = kv[:, :E], kv[:, E:]
    rows = []
    for b in range(bb):
        rq = slice(b * T, (b + 1) * T)
        rk = slice(b * S, (b + 1) * S)
        rows.append(_mha(q[rq], k_all[rk], v_all[rk], mem_kpm[b], nhead, head_dim))
    o_all = rows[0] if bb == 1 else jnp.concatenate(rows, axis=0)
    ca = _mm(o_all, ca_wo_ref[...]) + ca_bo_ref[...]
    x = _layer_norm(x + ca, g2_ref[...], be2_ref[...], eps)

    # ---- feed-forward + residual + LayerNorm3
    h = _gelu(_mm(x, w1_ref[...]) + b1_ref[...])
    ff = _mm(h, w2_ref[...]) + b2_ref[...]
    x = _layer_norm(x + ff, g3_ref[...], be3_ref[...], eps)

    o_ref[...] = x.reshape(bb, T, E).astype(o_ref.dtype)


def _norm_generator_kernel(x_ref, g_ref, b_ref, w_ref, gb_ref, o_ref, *, eps):
    bb, T, E = x_ref.shape
    x = _layer_norm(x_ref[...].astype(jnp.float32).reshape(bb * T, E),
                    g_ref[...], b_ref[...], eps)
    y = _mm(x, w_ref[...]) + gb_ref[...]                           # (bb*T, tile_v)
    o_ref[...] = y.reshape(bb, T, -1).astype(o_ref.dtype)


# ----------------------------------------------------------------------------
# pallas_call wrappers
# ----------------------------------------------------------------------------
def _cparams(ngrid):
    return pltpu.CompilerParams(dimension_semantics=("parallel",) * ngrid,
                                vmem_limit_bytes=_VMEM_LIMIT_BYTES)


def _wspec(shape):
    """Full-array weight block, constant index map (DMA'd once).

    pipeline_mode=pl.Buffered(1) keeps a single resident copy instead of the
    default double buffer (halves weight VMEM — matters on v7x's 64 MiB).
    """
    rank = len(shape)
    idx = lambda *_, r=rank: (0,) * r
    try:
        return pl.BlockSpec(shape, idx, pipeline_mode=pl.Buffered(1))
    except Exception:   # older jax without pipeline_mode: fall back gracefully
        return pl.BlockSpec(shape, idx)


def _num_batch_blocks(N):
    # >=2 grid steps when possible so the 'parallel' axis splits across v7x's
    # two TensorCores; otherwise one big block (more rows per MXU matmul).
    return 2 if (N >= 2 and N % 2 == 0) else 1


def _pick_vocab_tile(V, target=512, align=128):
    """Largest 128-aligned tile <= target that divides V; full V otherwise."""
    if V % align != 0 or V <= target:
        return V
    t = (target // align) * align
    while V % t != 0:
        t -= align
    return t


def encoder_layer(x, src_mask, src_kpm_add, p, enc_norm_g, enc_norm_b, *,
                  nhead, eps=1e-5, apply_final_norm=False):
    N, L, E = x.shape
    FF = p["w1"].shape[1]
    nb = _num_batch_blocks(N)
    bb = N // nb
    kernel = functools.partial(_encoder_layer_kernel, nhead=nhead,
                               head_dim=E // nhead, eps=eps,
                               apply_final_norm=apply_final_norm)
    xspec = pl.BlockSpec((bb, L, E), lambda n: (n, 0, 0))
    in_specs = [
        xspec,
        _wspec((L, L)),                                  # shared additive attn mask
        pl.BlockSpec((bb, 1, L), lambda n: (n, 0, 0)),   # key-padding bias
        _wspec((E, 3 * E)), _wspec((1, 3 * E)),
        _wspec((E, E)), _wspec((1, E)),
        _wspec((E, FF)), _wspec((1, FF)),
        _wspec((FF, E)), _wspec((1, E)),
        _wspec((1, E)), _wspec((1, E)), _wspec((1, E)), _wspec((1, E)),
        _wspec((1, E)), _wspec((1, E)),                  # fused final encoder norm
    ]
    return pl.pallas_call(
        kernel,
        out_shape=jax.ShapeDtypeStruct((N, L, E), ACT_DTYPE),
        grid=(nb,),
        in_specs=in_specs,
        out_specs=xspec,
        compiler_params=_cparams(1),
    )(x, src_mask, src_kpm_add,
      p["sa_wqkv"], p["sa_bqkv"], p["sa_wo"], p["sa_bo"],
      p["w1"], p["b1"], p["w2"], p["b2"],
      p["norm1_g"], p["norm1_b"], p["norm2_g"], p["norm2_b"],
      enc_norm_g, enc_norm_b)


def decoder_layer(x, memory, tgt_mask, tgt_kpm_add, mem_kpm_add, p, *, nhead, eps=1e-5):
    N, T, E = x.shape
    S = memory.shape[1]
    FF = p["w1"].shape[1]
    nb = _num_batch_blocks(N)
    bb = N // nb
    kernel = functools.partial(_decoder_layer_kernel, nhead=nhead,
                               head_dim=E // nhead, eps=eps)
    xspec = pl.BlockSpec((bb, T, E), lambda n: (n, 0, 0))
    mspec = pl.BlockSpec((bb, S, E), lambda n: (n, 0, 0))
    in_specs = [
        xspec, mspec,
        _wspec((T, T)),                                  # tgt attn mask
        pl.BlockSpec((bb, 1, T), lambda n: (n, 0, 0)),   # tgt key-padding bias
        pl.BlockSpec((bb, 1, S), lambda n: (n, 0, 0)),   # memory key-padding bias
        _wspec((E, 3 * E)), _wspec((1, 3 * E)), _wspec((E, E)), _wspec((1, E)),   # self-attn
        _wspec((E, E)), _wspec((1, E)),                                            # cross q
        _wspec((E, 2 * E)), _wspec((1, 2 * E)),                                    # cross kv
        _wspec((E, E)), _wspec((1, E)),                                            # cross out
        _wspec((E, FF)), _wspec((1, FF)), _wspec((FF, E)), _wspec((1, E)),         # ffn
        _wspec((1, E)), _wspec((1, E)), _wspec((1, E)), _wspec((1, E)),
        _wspec((1, E)), _wspec((1, E)),
    ]
    return pl.pallas_call(
        kernel,
        out_shape=jax.ShapeDtypeStruct((N, T, E), ACT_DTYPE),
        grid=(nb,),
        in_specs=in_specs,
        out_specs=xspec,
        compiler_params=_cparams(1),
    )(x, memory, tgt_mask, tgt_kpm_add, mem_kpm_add,
      p["sa_wqkv"], p["sa_bqkv"], p["sa_wo"], p["sa_bo"],
      p["ca_wq"], p["ca_bq"], p["ca_wkv"], p["ca_bkv"], p["ca_wo"], p["ca_bo"],
      p["w1"], p["b1"], p["w2"], p["b2"],
      p["norm1_g"], p["norm1_b"], p["norm2_g"], p["norm2_b"],
      p["norm3_g"], p["norm3_b"])


def norm_generator(x, g, b, w, gb, eps=1e-5):
    N, T, E = x.shape
    V = w.shape[1]
    nb = _num_batch_blocks(N)
    bb = N // nb
    tile_v = _pick_vocab_tile(V)
    nv = V // tile_v
    xspec = pl.BlockSpec((bb, T, E), lambda n, v: (n, 0, 0))
    return pl.pallas_call(
        functools.partial(_norm_generator_kernel, eps=eps),
        out_shape=jax.ShapeDtypeStruct((N, T, V), jnp.float32),
        grid=(nb, nv),
        in_specs=[xspec,
                  _wspec((1, E)), _wspec((1, E)),
                  pl.BlockSpec((E, tile_v), lambda n, v: (0, v)),
                  pl.BlockSpec((1, tile_v), lambda n, v: (0, v))],
        out_specs=pl.BlockSpec((bb, T, tile_v), lambda n, v: (n, 0, v)),
        compiler_params=_cparams(2),
    )(x, g, b, w, gb)


# ----------------------------------------------------------------------------
# Full forward (== Seq2SeqTransformer.forward, eval mode, dropout = identity)
# ----------------------------------------------------------------------------
def generate_square_subsequent_mask(sz):
    mask = jnp.tril(jnp.ones((sz, sz), dtype=bool))
    return jnp.where(mask, 0.0, float("-inf")).astype(jnp.float32)


def _additive_mask(mask, big_neg):
    """PyTorch attn_mask -> additive f32 bias (bool masks map True -> -1e9)."""
    if mask.dtype == jnp.bool_:
        return jnp.where(mask, big_neg, 0.0).astype(jnp.float32)
    return jnp.maximum(mask.astype(jnp.float32), big_neg)


def seq2seq_forward(params, src, trg, src_mask, tgt_mask,
                    src_padding_mask, tgt_padding_mask, memory_key_padding_mask,
                    *, nhead, compute_unused_src_emb=False):
    S, N, E = src.shape
    T = trg.shape[0]
    big_neg = jnp.float32(-1e9)   # finite "-inf": identical softmax, NaN-safe

    # Tiny mask prep (once per forward; combined with attn_mask inside kernels).
    src_mask_f = _additive_mask(src_mask, big_neg)
    tgt_mask_f = _additive_mask(tgt_mask, big_neg)
    src_kpm = jnp.where(src_padding_mask, big_neg, 0.0).astype(jnp.float32)[:, None, :]
    tgt_kpm = jnp.where(tgt_padding_mask, big_neg, 0.0).astype(jnp.float32)[:, None, :]
    mem_kpm = jnp.where(memory_key_padding_mask, big_neg, 0.0).astype(jnp.float32)[:, None, :]

    if compute_unused_src_emb:
        # Faithful quirk of the reference: src_emb is computed but the encoder
        # consumes the RAW src, so this value is dead. Off by default.
        _ = (jnp.dot(src, params["ff_src_w"]) + params["ff_src_b"]
             + params["pos_emb"][:S])

    # TODO(synk): token-embedding gather + positional add kept in XLA glue.
    tgt_emb = params["tgt_emb_table"][trg] * math.sqrt(E) + params["pos_emb"][:T]

    # Batch-first internally; inter-layer activations cross HBM in ACT_DTYPE.
    memory = jnp.transpose(src, (1, 0, 2)).astype(ACT_DTYPE)        # (N, S, E)
    x = jnp.transpose(tgt_emb, (1, 0, 2)).astype(ACT_DTYPE)         # (N, T, E)

    n_enc = len(params["enc_layers"])
    for i, lp in enumerate(params["enc_layers"]):
        memory = encoder_layer(memory, src_mask_f, src_kpm, lp,
                               params["enc_norm_g"], params["enc_norm_b"],
                               nhead=nhead, apply_final_norm=(i == n_enc - 1))

    for lp in params["dec_layers"]:
        x = decoder_layer(x, memory, tgt_mask_f, tgt_kpm, mem_kpm, lp, nhead=nhead)

    logits = norm_generator(x, params["dec_norm_g"], params["dec_norm_b"],
                            params["gen_w"], params["gen_b"])        # (N, T, V)
    return jnp.transpose(logits, (1, 0, 2))                          # (T, N, V)


# ----------------------------------------------------------------------------
# Deterministic parameter construction
#   * matmul weights pre-transposed (in_features, out_features), stored bf16
#   * 1/sqrt(head_dim) folded into the Q projection
#   * cross-attention q / kv projections stored separately
# ----------------------------------------------------------------------------
def init_params(key, num_encoder_layers, num_decoder_layers, emb_size, nhead,
                tgt_vocab_size, dim_feedforward, maxlen=128):
    keys = iter(jax.random.split(key, 512))
    E, FF, V = emb_size, dim_feedforward, tgt_vocab_size
    q_scale = 1.0 / math.sqrt(E // nhead)

    def w(shape, scale=0.02):
        return (scale * jax.random.normal(next(keys), shape)).astype(jnp.float32)

    def mw(shape, scale=0.02):
        return w(shape, scale).astype(MATMUL_DTYPE)

    def zeros(shape):
        return jnp.zeros(shape, jnp.float32)

    def ones(shape):
        return jnp.ones(shape, jnp.float32)

    def self_attn_p(prefix):
        wqkv = w((E, 3 * E))                 # == torch in_proj_weight.T
        bqkv = zeros((1, 3 * E))
        wqkv = wqkv.at[:, :E].multiply(q_scale)   # fold attention scale into Q
        bqkv = bqkv.at[:, :E].multiply(q_scale)
        return {prefix + "wqkv": wqkv.astype(MATMUL_DTYPE),
                prefix + "bqkv": bqkv,
                prefix + "wo": mw((E, E)),   # == torch out_proj.weight.T
                prefix + "bo": zeros((1, E))}

    def cross_attn_p():
        return {"ca_wq": (w((E, E)) * q_scale).astype(MATMUL_DTYPE),
                "ca_bq": zeros((1, E)),
                "ca_wkv": mw((E, 2 * E)),
                "ca_bkv": zeros((1, 2 * E)),
                "ca_wo": mw((E, E)),
                "ca_bo": zeros((1, E))}

    def enc_p():
        d = self_attn_p("sa_")
        d.update({"w1": mw((E, FF)), "b1": zeros((1, FF)),
                  "w2": mw((FF, E)), "b2": zeros((1, E)),
                  "norm1_g": ones((1, E)), "norm1_b": zeros((1, E)),
                  "norm2_g": ones((1, E)), "norm2_b": zeros((1, E))})
        return d

    def dec_p():
        d = enc_p()
        d.update(cross_attn_p())
        d.update({"norm3_g": ones((1, E)), "norm3_b": zeros((1, E))})
        return d

    # PositionalEncoding buffer (maxlen, 1, emb)
    den = jnp.exp(-jnp.arange(0, E, 2, dtype=jnp.float32) * math.log(10000.0) / E)
    pos = jnp.arange(0, maxlen, dtype=jnp.float32).reshape(maxlen, 1)
    pe = jnp.zeros((maxlen, E), jnp.float32)
    pe = pe.at[:, 0::2].set(jnp.sin(pos * den))
    pe = pe.at[:, 1::2].set(jnp.cos(pos * den))
    pe = pe[:, None, :]

    return {
        "enc_layers": [enc_p() for _ in range(num_encoder_layers)],
        "dec_layers": [dec_p() for _ in range(num_decoder_layers)],
        "enc_norm_g": ones((1, E)), "enc_norm_b": zeros((1, E)),
        "dec_norm_g": ones((1, E)), "dec_norm_b": zeros((1, E)),
        "gen_w": mw((E, V)), "gen_b": zeros((1, V)),
        "ff_src_w": w((E, E)), "ff_src_b": zeros((1, E)),
        "tgt_emb_table": w((V, E), scale=1.0),
        "pos_emb": pe,
    }


# ----------------------------------------------------------------------------
# Main
# ----------------------------------------------------------------------------
if __name__ == "__main__":
    # TODO(synk): toy dims (E=32, head_dim=8, V=16, L=8) keep lanes mostly
    # masked; pad E/head_dim/V to 128-multiples for real-model MXU utilization.
    num_encoder_layers = 2
    num_decoder_layers = 2
    emb_size = 32
    nhead = 4
    tgt_vocab_size = 16
    dim_feedforward = 64
    S, T, N = 8, 8, 2

    root = jax.random.PRNGKey(0)
    kp, ks, kt = jax.random.split(root, 3)

    params = init_params(kp, num_encoder_layers, num_decoder_layers,
                         emb_size, nhead, tgt_vocab_size, dim_feedforward)

    src = jax.random.normal(ks, (S, N, emb_size), jnp.float32)       # (S, N, E)
    trg = jax.random.randint(kt, (T, N), 0, tgt_vocab_size)          # (T, N) ids

    src_mask = jnp.zeros((S, S), jnp.float32)
    tgt_mask = generate_square_subsequent_mask(T)
    src_padding_mask = jnp.zeros((N, S), bool).at[1, -1].set(True)   # pad last src tok of batch 1
    tgt_padding_mask = jnp.zeros((N, T), bool)
    memory_key_padding_mask = src_padding_mask

    fwd = jax.jit(functools.partial(seq2seq_forward, nhead=nhead))
    logits = fwd(params, src, trg, src_mask, tgt_mask,
                 src_padding_mask, tgt_padding_mask, memory_key_padding_mask)
    jax.block_until_ready(logits)

    assert logits.shape == (T, N, tgt_vocab_size), logits.shape
    assert bool(jnp.all(jnp.isfinite(logits)))
    print("KERNEL_OK")
</pallas_src>

<mosaic_0001>
module attributes {stable_mosaic.version = 11 : i64} {
  func.func @_decoder_layer_kernel(%arg0: i32, %arg1: memref<1x8x32xbf16, #tpu.memory_space<vmem>>, %arg2: memref<1x8x32xbf16, #tpu.memory_space<vmem>>, %arg3: memref<8x8xf32, #tpu.memory_space<vmem>>, %arg4: memref<1x1x8xf32, #tpu.memory_space<vmem>>, %arg5: memref<1x1x8xf32, #tpu.memory_space<vmem>>, %arg6: memref<32x96xbf16, #tpu.memory_space<vmem>>, %arg7: memref<1x96xf32, #tpu.memory_space<vmem>>, %arg8: memref<32x32xbf16, #tpu.memory_space<vmem>>, %arg9: memref<1x32xf32, #tpu.memory_space<vmem>>, %arg10: memref<32x32xbf16, #tpu.memory_space<vmem>>, %arg11: memref<1x32xf32, #tpu.memory_space<vmem>>, %arg12: memref<32x64xbf16, #tpu.memory_space<vmem>>, %arg13: memref<1x64xf32, #tpu.memory_space<vmem>>, %arg14: memref<32x32xbf16, #tpu.memory_space<vmem>>, %arg15: memref<1x32xf32, #tpu.memory_space<vmem>>, %arg16: memref<32x64xbf16, #tpu.memory_space<vmem>>, %arg17: memref<1x64xf32, #tpu.memory_space<vmem>>, %arg18: memref<64x32xbf16, #tpu.memory_space<vmem>>, %arg19: memref<1x32xf32, #tpu.memory_space<vmem>>, %arg20: memref<1x32xf32, #tpu.memory_space<vmem>>, %arg21: memref<1x32xf32, #tpu.memory_space<vmem>>, %arg22: memref<1x32xf32, #tpu.memory_space<vmem>>, %arg23: memref<1x32xf32, #tpu.memory_space<vmem>>, %arg24: memref<1x32xf32, #tpu.memory_space<vmem>>, %arg25: memref<1x32xf32, #tpu.memory_space<vmem>>, %arg26: memref<1x8x32xbf16, #tpu.memory_space<vmem>>) attributes {dimension_semantics = [#tpu.dimension_semantics<parallel>], iteration_bounds = array<i64: 2>, scalar_prefetch = 0 : i64, scratch_operands = 0 : i64, tpu.core_type = #tpu.core_type<tc>, window_params = [{transform_indices = @transform_0, window_bounds = array<i64: 1, 8, 32>}, {transform_indices = @transform_1, window_bounds = array<i64: 1, 8, 32>}, {pipeline_mode = #tpu.pipeline_mode<synchronous>, transform_indices = @transform_2, window_bounds = array<i64: 8, 8>}, {transform_indices = @transform_3, window_bounds = array<i64: 1, 1, 8>}, {transform_indices = @transform_4, window_bounds = array<i64: 1, 1, 8>}, {pipeline_mode = #tpu.pipeline_mode<synchronous>, transform_indices = @transform_5, window_bounds = array<i64: 32, 96>}, {pipeline_mode = #tpu.pipeline_mode<synchronous>, transform_indices = @transform_6, window_bounds = array<i64: 1, 96>}, {pipeline_mode = #tpu.pipeline_mode<synchronous>, transform_indices = @transform_7, window_bounds = array<i64: 32, 32>}, {pipeline_mode = #tpu.pipeline_mode<synchronous>, transform_indices = @transform_8, window_bounds = array<i64: 1, 32>}, {pipeline_mode = #tpu.pipeline_mode<synchronous>, transform_indices = @transform_9, window_bounds = array<i64: 32, 32>}, {pipeline_mode = #tpu.pipeline_mode<synchronous>, transform_indices = @transform_10, window_bounds = array<i64: 1, 32>}, {pipeline_mode = #tpu.pipeline_mode<synchronous>, transform_indices = @transform_11, window_bounds = array<i64: 32, 64>}, {pipeline_mode = #tpu.pipeline_mode<synchronous>, transform_indices = @transform_12, window_bounds = array<i64: 1, 64>}, {pipeline_mode = #tpu.pipeline_mode<synchronous>, transform_indices = @transform_13, window_bounds = array<i64: 32, 32>}, {pipeline_mode = #tpu.pipeline_mode<synchronous>, transform_indices = @transform_14, window_bounds = array<i64: 1, 32>}, {pipeline_mode = #tpu.pipeline_mode<synchronous>, transform_indices = @transform_15, window_bounds = array<i64: 32, 64>}, {pipeline_mode = #tpu.pipeline_mode<synchronous>, transform_indices = @transform_16, window_bounds = array<i64: 1, 64>}, {pipeline_mode = #tpu.pipeline_mode<synchronous>, transform_indices = @transform_17, window_bounds = array<i64: 64, 32>}, {pipeline_mode = #tpu.pipeline_mode<synchronous>, transform_indices = @transform_18, window_bounds = array<i64: 1, 32>}, {pipeline_mode = #tpu.pipeline_mode<synchronous>, transform_indices = @transform_19, window_bounds = array<i64: 1, 32>}, {pipeline_mode = #tpu.pipeline_mode<synchronous>, transform_indices = @transform_20, window_bounds = array<i64: 1, 32>}, {pipeline_mode = #tpu.pipeline_mode<synchronous>, transform_indices = @transform_21, window_bounds = array<i64: 1, 32>}, {pipeline_mode = #tpu.pipeline_mode<synchronous>, transform_indices = @transform_22, window_bounds = array<i64: 1, 32>}, {pipeline_mode = #tpu.pipeline_mode<synchronous>, transform_indices = @transform_23, window_bounds = array<i64: 1, 32>}, {pipeline_mode = #tpu.pipeline_mode<synchronous>, transform_indices = @transform_24, window_bounds = array<i64: 1, 32>}, {transform_indices = @transform_25, window_bounds = array<i64: 1, 8, 32>}]} {
    %c0 = arith.constant 0 : index
    %c0_0 = arith.constant 0 : index
    %c0_1 = arith.constant 0 : index
    %0 = vector.load %arg1[%c0, %c0_0, %c0_1] : memref<1x8x32xbf16, #tpu.memory_space<vmem>>, vector<1x8x32xbf16>
    %1 = arith.extf %0 : vector<1x8x32xbf16> to vector<1x8x32xf32>
    %2 = vector.shape_cast %1 : vector<1x8x32xf32> to vector<8x32xf32>
    %c0_2 = arith.constant 0 : index
    %c0_3 = arith.constant 0 : index
    %c0_4 = arith.constant 0 : index
    %3 = vector.load %arg2[%c0_2, %c0_3, %c0_4] : memref<1x8x32xbf16, #tpu.memory_space<vmem>>, vector<1x8x32xbf16>
    %4 = vector.shape_cast %3 : vector<1x8x32xbf16> to vector<8x32xbf16>
    %c0_5 = arith.constant 0 : index
    %c0_6 = arith.constant 0 : index
    %5 = vector.load %arg3[%c0_5, %c0_6] : memref<8x8xf32, #tpu.memory_space<vmem>>, vector<8x8xf32>
    %c0_7 = arith.constant 0 : index
    %c0_8 = arith.constant 0 : index
    %c0_9 = arith.constant 0 : index
    %6 = vector.load %arg4[%c0_7, %c0_8, %c0_9] : memref<1x1x8xf32, #tpu.memory_space<vmem>>, vector<1x1x8xf32>
    %c0_10 = arith.constant 0 : index
    %c0_11 = arith.constant 0 : index
    %c0_12 = arith.constant 0 : index
    %7 = vector.load %arg5[%c0_10, %c0_11, %c0_12] : memref<1x1x8xf32, #tpu.memory_space<vmem>>, vector<1x1x8xf32>
    %c0_13 = arith.constant 0 : index
    %c0_14 = arith.constant 0 : index
    %8 = vector.load %arg6[%c0_13, %c0_14] : memref<32x96xbf16, #tpu.memory_space<vmem>>, vector<32x96xbf16>
    %9 = arith.truncf %2 : vector<8x32xf32> to vector<8x32xbf16>
    %cst = arith.constant dense<0.000000e+00> : vector<8x96xf32>
    %10 = tpu.matmul %9, %8, %cst {dimension_numbers = #tpu.dot_dimension_numbers<[1], [0], [0], [1], [0, 0, 1, 1], [], []>} : vector<8x32xbf16>, vector<32x96xbf16>, vector<8x96xf32> -> vector<8x96xf32>
    %c0_15 = arith.constant 0 : index
    %c0_16 = arith.constant 0 : index
    %11 = vector.load %arg7[%c0_15, %c0_16] : memref<1x96xf32, #tpu.memory_space<vmem>>, vector<1x96xf32>
    %12 = vector.broadcast %11 : vector<1x96xf32> to vector<8x96xf32>
    %13 = arith.addf %10, %12 : vector<8x96xf32>
    %14 = vector.extract_strided_slice %13 {offsets = [0, 0], sizes = [8, 32], strides = [1, 1]} : vector<8x96xf32> to vector<8x32xf32>
    %15 = vector.extract_strided_slice %13 {offsets = [0, 32], sizes = [8, 32], strides = [1, 1]} : vector<8x96xf32> to vector<8x32xf32>
    %16 = vector.extract_strided_slice %13 {offsets = [0, 64], sizes = [8, 32], strides = [1, 1]} : vector<8x96xf32> to vector<8x32xf32>
    %17 = vector.shape_cast %6 : vector<1x1x8xf32> to vector<1x8xf32>
    %18 = vector.broadcast %17 : vector<1x8xf32> to vector<8x8xf32>
    %19 = arith.addf %5, %18 : vector<8x8xf32>
    %20 = vector.extract_strided_slice %14 {offsets = [0, 0], sizes = [8, 8], strides = [1, 1]} : vector<8x32xf32> to vector<8x8xf32>
    %21 = vector.extract_strided_slice %15 {offsets = [0, 0], sizes = [8, 8], strides = [1, 1]} : vector<8x32xf32> to vector<8x8xf32>
    %22 = arith.truncf %20 : vector<8x8xf32> to vector<8x8xbf16>
    %23 = arith.truncf %21 : vector<8x8xf32> to vector<8x8xbf16>
    %cst_17 = arith.constant dense<0.000000e+00> : vector<8x8xf32>
    %24 = tpu.matmul %22, %23, %cst_17 {dimension_numbers = #tpu.dot_dimension_numbers<[1], [1], [0], [0], [0, 0, 1, 0], [], []>} : vector<8x8xbf16>, vector<8x8xbf16>, vector<8x8xf32> -> vector<8x8xf32>
    %25 = arith.addf %24, %19 : vector<8x8xf32>
    %cst_18 = arith.constant dense<0xFF800000> : vector<8xf32>
    %26 = vector.multi_reduction <maximumf>, %25, %cst_18 [1] : vector<8x8xf32> to vector<8xf32>
    %27 = vector.shape_cast %26 : vector<8xf32> to vector<8x1xf32>
    %28 = vector.broadcast %27 : vector<8x1xf32> to vector<8x8xf32>
    %29 = arith.subf %25, %28 : vector<8x8xf32>
    %30 = math.exp %29 : vector<8x8xf32>
    %cst_19 = arith.constant dense<0.000000e+00> : vector<8xf32>
    %31 = vector.multi_reduction <add>, %30, %cst_19 [1] : vector<8x8xf32> to vector<8xf32>
    %32 = vector.shape_cast %31 : vector<8xf32> to vector<8x1xf32>
    %33 = tpu.reciprocal %32 {approx = true} : vector<8x1xf32> -> vector<8x1xf32>
    %34 = vector.broadcast %33 : vector<8x1xf32> to vector<8x8xf32>
    %35 = arith.mulf %30, %34 : vector<8x8xf32>
    %36 = vector.extract_strided_slice %16 {offsets = [0, 0], sizes = [8, 8], strides = [1, 1]} : vector<8x32xf32> to vector<8x8xf32>
    %37 = arith.truncf %35 : vector<8x8xf32> to vector<8x8xbf16>
    %38 = arith.truncf %36 : vector<8x8xf32> to vector<8x8xbf16>
    %cst_20 = arith.constant dense<0.000000e+00> : vector<8x8xf32>
    %39 = tpu.matmul %37, %38, %cst_20 {dimension_numbers = #tpu.dot_dimension_numbers<[1], [0], [0], [1], [0, 0, 1, 1], [], []>} : vector<8x8xbf16>, vector<8x8xbf16>, vector<8x8xf32> -> vector<8x8xf32>
    %40 = vector.extract_strided_slice %14 {offsets = [0, 8], sizes = [8, 8], strides = [1, 1]} : vector<8x32xf32> to vector<8x8xf32>
    %41 = vector.extract_strided_slice %15 {offsets = [0, 8], sizes = [8, 8], strides = [1, 1]} : vector<8x32xf32> to vector<8x8xf32>
    %42 = arith.truncf %40 : vector<8x8xf32> to vector<8x8xbf16>
    %43 = arith.truncf %41 : vector<8x8xf32> to vector<8x8xbf16>
    %cst_21 = arith.constant dense<0.000000e+00> : vector<8x8xf32>
    %44 = tpu.matmul %42, %43, %cst_21 {dimension_numbers = #tpu.dot_dimension_numbers<[1], [1], [0], [0], [0, 0, 1, 0], [], []>} : vector<8x8xbf16>, vector<8x8xbf16>, vector<8x8xf32> -> vector<8x8xf32>
    %45 = arith.addf %44, %19 : vector<8x8xf32>
    %cst_22 = arith.constant dense<0xFF800000> : vector<8xf32>
    %46 = vector.multi_reduction <maximumf>, %45, %cst_22 [1] : vector<8x8xf32> to vector<8xf32>
    %47 = vector.shape_cast %46 : vector<8xf32> to vector<8x1xf32>
    %48 = vector.broadcast %47 : vector<8x1xf32> to vector<8x8xf32>
    %49 = arith.subf %45, %48 : vector<8x8xf32>
    %50 = math.exp %49 : vector<8x8xf32>
    %cst_23 = arith.constant dense<0.000000e+00> : vector<8xf32>
    %51 = vector.multi_reduction <add>, %50, %cst_23 [1] : vector<8x8xf32> to vector<8xf32>
    %52 = vector.shape_cast %51 : vector<8xf32> to vector<8x1xf32>
    %53 = tpu.reciprocal %52 {approx = true} : vector<8x1xf32> -> vector<8x1xf32>
    %54 = vector.broadcast %53 : vector<8x1xf32> to vector<8x8xf32>
    %55 = arith.mulf %50, %54 : vector<8x8xf32>
    %56 = vector.extract_strided_slice %16 {offsets = [0, 8], sizes = [8, 8], strides = [1, 1]} : vector<8x32xf32> to vector<8x8xf32>
    %57 = arith.truncf %55 : vector<8x8xf32> to vector<8x8xbf16>
    %58 = arith.truncf %56 : vector<8x8xf32> to vector<8x8xbf16>
    %cst_24 = arith.constant dense<0.000000e+00> : vector<8x8xf32>
    %59 = tpu.matmul %57, %58, %cst_24 {dimension_numbers = #tpu.dot_dimension_numbers<[1], [0], [0], [1], [0, 0, 1, 1], [], []>} : vector<8x8xbf16>, vector<8x8xbf16>, vector<8x8xf32> -> vector<8x8xf32>
    %60 = vector.extract_strided_slice %14 {offsets = [0, 16], sizes = [8, 8], strides = [1, 1]} : vector<8x32xf32> to vector<8x8xf32>
    %61 = vector.extract_strided_slice %15 {offsets = [0, 16], sizes = [8, 8], strides = [1, 1]} : vector<8x32xf32> to vector<8x8xf32>
    %62 = arith.truncf %60 : vector<8x8xf32> to vector<8x8xbf16>
    %63 = arith.truncf %61 : vector<8x8xf32> to vector<8x8xbf16>
    %cst_25 = arith.constant dense<0.000000e+00> : vector<8x8xf32>
    %64 = tpu.matmul %62, %63, %cst_25 {dimension_numbers = #tpu.dot_dimension_numbers<[1], [1], [0], [0], [0, 0, 1, 0], [], []>} : vector<8x8xbf16>, vector<8x8xbf16>, vector<8x8xf32> -> vector<8x8xf32>
    %65 = arith.addf %64, %19 : vector<8x8xf32>
    %cst_26 = arith.constant dense<0xFF800000> : vector<8xf32>
    %66 = vector.multi_reduction <maximumf>, %65, %cst_26 [1] : vector<8x8xf32> to vector<8xf32>
    %67 = vector.shape_cast %66 : vector<8xf32> to vector<8x1xf32>
    %68 = vector.broadcast %67 : vector<8x1xf32> to vector<8x8xf32>
    %69 = arith.subf %65, %68 : vector<8x8xf32>
    %70 = math.exp %69 : vector<8x8xf32>
    %cst_27 = arith.constant dense<0.000000e+00> : vector<8xf32>
    %71 = vector.multi_reduction <add>, %70, %cst_27 [1] : vector<8x8xf32> to vector<8xf32>
    %72 = vector.shape_cast %71 : vector<8xf32> to vector<8x1xf32>
    %73 = tpu.reciprocal %72 {approx = true} : vector<8x1xf32> -> vector<8x1xf32>
    %74 = vector.broadcast %73 : vector<8x1xf32> to vector<8x8xf32>
    %75 = arith.mulf %70, %74 : vector<8x8xf32>
    %76 = vector.extract_strided_slice %16 {offsets = [0, 16], sizes = [8, 8], strides = [1, 1]} : vector<8x32xf32> to vector<8x8xf32>
    %77 = arith.truncf %75 : vector<8x8xf32> to vector<8x8xbf16>
    %78 = arith.truncf %76 : vector<8x8xf32> to vector<8x8xbf16>
    %cst_28 = arith.constant dense<0.000000e+00> : vector<8x8xf32>
    %79 = tpu.matmul %77, %78, %cst_28 {dimension_numbers = #tpu.dot_dimension_numbers<[1], [0], [0], [1], [0, 0, 1, 1], [], []>} : vector<8x8xbf16>, vector<8x8xbf16>, vector<8x8xf32> -> vector<8x8xf32>
    %80 = vector.extract_strided_slice %14 {offsets = [0, 24], sizes = [8, 8], strides = [1, 1]} : vector<8x32xf32> to vector<8x8xf32>
    %81 = vector.extract_strided_slice %15 {offsets = [0, 24], sizes = [8, 8], strides = [1, 1]} : vector<8x32xf32> to vector<8x8xf32>
    %82 = arith.truncf %80 : vector<8x8xf32> to vector<8x8xbf16>
    %83 = arith.truncf %81 : vector<8x8xf32> to vector<8x8xbf16>
    %cst_29 = arith.constant dense<0.000000e+00> : vector<8x8xf32>
    %84 = tpu.matmul %82, %83, %cst_29 {dimension_numbers = #tpu.dot_dimension_numbers<[1], [1], [0], [0], [0, 0, 1, 0], [], []>} : vector<8x8xbf16>, vector<8x8xbf16>, vector<8x8xf32> -> vector<8x8xf32>
    %85 = arith.addf %84, %19 : vector<8x8xf32>
    %cst_30 = arith.constant dense<0xFF800000> : vector<8xf32>
    %86 = vector.multi_reduction <maximumf>, %85, %cst_30 [1] : vector<8x8xf32> to vector<8xf32>
    %87 = vector.shape_cast %86 : vector<8xf32> to vector<8x1xf32>
    %88 = vector.broadcast %87 : vector<8x1xf32> to vector<8x8xf32>
    %89 = arith.subf %85, %88 : vector<8x8xf32>
    %90 = math.exp %89 : vector<8x8xf32>
    %cst_31 = arith.constant dense<0.000000e+00> : vector<8xf32>
    %91 = vector.multi_reduction <add>, %90, %cst_31 [1] : vector<8x8xf32> to vector<8xf32>
    %92 = vector.shape_cast %91 : vector<8xf32> to vector<8x1xf32>
    %93 = tpu.reciprocal %92 {approx = true} : vector<8x1xf32> -> vector<8x1xf32>
    %94 = vector.broadcast %93 : vector<8x1xf32> to vector<8x8xf32>
    %95 = arith.mulf %90, %94 : vector<8x8xf32>
    %96 = vector.extract_strided_slice %16 {offsets = [0, 24], sizes = [8, 8], strides = [1, 1]} : vector<8x32xf32> to vector<8x8xf32>
    %97 = arith.truncf %95 : vector<8x8xf32> to vector<8x8xbf16>
    %98 = arith.truncf %96 : vector<8x8xf32> to vector<8x8xbf16>
    %cst_32 = arith.constant dense<0.000000e+00> : vector<8x8xf32>
    %99 = tpu.matmul %97, %98, %cst_32 {dimension_numbers = #tpu.dot_dimension_numbers<[1], [0], [0], [1], [0, 0, 1, 1], [], []>} : vector<8x8xbf16>, vector<8x8xbf16>, vector<8x8xf32> -> vector<8x8xf32>
    %100 = tpu.concatenate %39, %59, %79, %99 in 1 : vector<8x8xf32>, vector<8x8xf32>, vector<8x8xf32>, vector<8x8xf32> -> vector<8x32xf32>
    %c0_33 = arith.constant 0 : index
    %c0_34 = arith.constant 0 : index
    %101 = vector.load %arg8[%c0_33, %c0_34] : memref<32x32xbf16, #tpu.memory_space<vmem>>, vector<32x32xbf16>
    %102 = arith.truncf %100 : vector<8x32xf32> to vector<8x32xbf16>
    %cst_35 = arith.constant dense<0.000000e+00> : vector<8x32xf32>
    %103 = tpu.matmul %102, %101, %cst_35 {dimension_numbers = #tpu.dot_dimension_numbers<[1], [0], [0], [1], [0, 0, 1, 1], [], []>} : vector<8x32xbf16>, vector<32x32xbf16>, vector<8x32xf32> -> vector<8x32xf32>
    %c0_36 = arith.constant 0 : index
    %c0_37 = arith.constant 0 : index
    %104 = vector.load %arg9[%c0_36, %c0_37] : memref<1x32xf32, #tpu.memory_space<vmem>>, vector<1x32xf32>
    %105 = vector.broadcast %104 : vector<1x32xf32> to vector<8x32xf32>
    %106 = arith.addf %103, %105 : vector<8x32xf32>
    %107 = arith.addf %2, %106 : vector<8x32xf32>
    %c0_38 = arith.constant 0 : index
    %c0_39 = arith.constant 0 : index
    %108 = vector.load %arg20[%c0_38, %c0_39] : memref<1x32xf32, #tpu.memory_space<vmem>>, vector<1x32xf32>
    %c0_40 = arith.constant 0 : index
    %c0_41 = arith.constant 0 : index
    %109 = vector.load %arg21[%c0_40, %c0_41] : memref<1x32xf32, #tpu.memory_space<vmem>>, vector<1x32xf32>
    %cst_42 = arith.constant dense<0.000000e+00> : vector<8xf32>
    %110 = vector.multi_reduction <add>, %107, %cst_42 [1] : vector<8x32xf32> to vector<8xf32>
    %111 = vector.shape_cast %110 : vector<8xf32> to vector<8x1xf32>
    %cst_43 = arith.constant 3.200000e+01 : f32
    %112 = vector.broadcast %cst_43 : f32 to vector<8x1xf32>
    %113 = arith.divf %111, %112 : vector<8x1xf32>
    %114 = vector.broadcast %113 : vector<8x1xf32> to vector<8x32xf32>
    %115 = arith.subf %107, %114 : vector<8x32xf32>
    %116 = arith.mulf %115, %115 : vector<8x32xf32>
    %cst_44 = arith.constant dense<0.000000e+00> : vector<8xf32>
    %117 = vector.multi_reduction <add>, %116, %cst_44 [1] : vector<8x32xf32> to vector<8xf32>
    %118 = vector.shape_cast %117 : vector<8xf32> to vector<8x1xf32>
    %cst_45 = arith.constant 3.200000e+01 : f32
    %119 = vector.broadcast %cst_45 : f32 to vector<8x1xf32>
    %120 = arith.divf %118, %119 : vector<8x1xf32>
    %121 = vector.broadcast %113 : vector<8x1xf32> to vector<8x32xf32>
    %122 = arith.subf %107, %121 : vector<8x32xf32>
    %cst_46 = arith.constant 9.99999974E-6 : f32
    %123 = vector.broadcast %cst_46 : f32 to vector<8x1xf32>
    %124 = arith.addf %120, %123 : vector<8x1xf32>
    %125 = math.rsqrt %124 : vector<8x1xf32>
    %126 = vector.broadcast %125 : vector<8x1xf32> to vector<8x32xf32>
    %127 = arith.mulf %122, %126 : vector<8x32xf32>
    %128 = vector.broadcast %108 : vector<1x32xf32> to vector<8x32xf32>
    %129 = arith.mulf %127, %128 : vector<8x32xf32>
    %130 = vector.broadcast %109 : vector<1x32xf32> to vector<8x32xf32>
    %131 = arith.addf %129, %130 : vector<8x32xf32>
    %c0_47 = arith.constant 0 : index
    %c0_48 = arith.constant 0 : index
    %132 = vector.load %arg10[%c0_47, %c0_48] : memref<32x32xbf16, #tpu.memory_space<vmem>>, vector<32x32xbf16>
    %133 = arith.truncf %131 : vector<8x32xf32> to vector<8x32xbf16>
    %cst_49 = arith.constant dense<0.000000e+00> : vector<8x32xf32>
    %134 = tpu.matmul %133, %132, %cst_49 {dimension_numbers = #tpu.dot_dimension_numbers<[1], [0], [0], [1], [0, 0, 1, 1], [], []>} : vector<8x32xbf16>, vector<32x32xbf16>, vector<8x32xf32> -> vector<8x32xf32>
    %c0_50 = arith.constant 0 : index
    %c0_51 = arith.constant 0 : index
    %135 = vector.load %arg11[%c0_50, %c0_51] : memref<1x32xf32, #tpu.memory_space<vmem>>, vector<1x32xf32>
    %136 = vector.broadcast %135 : vector<1x32xf32> to vector<8x32xf32>
    %137 = arith.addf %134, %136 : vector<8x32xf32>
    %c0_52 = arith.constant 0 : index
    %c0_53 = arith.constant 0 : index
    %138 = vector.load %arg12[%c0_52, %c0_53] : memref<32x64xbf16, #tpu.memory_space<vmem>>, vector<32x64xbf16>
    %cst_54 = arith.constant dense<0.000000e+00> : vector<8x64xf32>
    %139 = tpu.matmul %4, %138, %cst_54 {dimension_numbers = #tpu.dot_dimension_numbers<[1], [0], [0], [1], [0, 0, 1, 1], [], []>} : vector<8x32xbf16>, vector<32x64xbf16>, vector<8x64xf32> -> vector<8x64xf32>
    %c0_55 = arith.constant 0 : index
    %c0_56 = arith.constant 0 : index
    %140 = vector.load %arg13[%c0_55, %c0_56] : memref<1x64xf32, #tpu.memory_space<vmem>>, vector<1x64xf32>
    %141 = vector.broadcast %140 : vector<1x64xf32> to vector<8x64xf32>
    %142 = arith.addf %139, %141 : vector<8x64xf32>
    %143 = vector.extract_strided_slice %142 {offsets = [0, 0], sizes = [8, 32], strides = [1, 1]} : vector<8x64xf32> to vector<8x32xf32>
    %144 = vector.extract_strided_slice %142 {offsets = [0, 32], sizes = [8, 32], strides = [1, 1]} : vector<8x64xf32> to vector<8x32xf32>
    %145 = vector.shape_cast %7 : vector<1x1x8xf32> to vector<1x8xf32>
    %146 = vector.extract_strided_slice %137 {offsets = [0, 0], sizes = [8, 8], strides = [1, 1]} : vector<8x32xf32> to vector<8x8xf32>
    %147 = vector.extract_strided_slice %143 {offsets = [0, 0], sizes = [8, 8], strides = [1, 1]} : vector<8x32xf32> to vector<8x8xf32>
    %148 = arith.truncf %146 : vector<8x8xf32> to vector<8x8xbf16>
    %149 = arith.truncf %147 : vector<8x8xf32> to vector<8x8xbf16>
    %cst_57 = arith.constant dense<0.000000e+00> : vector<8x8xf32>
    %150 = tpu.matmul %148, %149, %cst_57 {dimension_numbers = #tpu.dot_dimension_numbers<[1], [1], [0], [0], [0, 0, 1, 0], [], []>} : vector<8x8xbf16>, vector<8x8xbf16>, vector<8x8xf32> -> vector<8x8xf32>
    %151 = vector.broadcast %145 : vector<1x8xf32> to vector<8x8xf32>
    %152 = arith.addf %150, %151 : vector<8x8xf32>
    %cst_58 = arith.constant dense<0xFF800000> : vector<8xf32>
    %153 = vector.multi_reduction <maximumf>, %152, %cst_58 [1] : vector<8x8xf32> to vector<8xf32>
    %154 = vector.shape_cast %153 : vector<8xf32> to vector<8x1xf32>
    %155 = vector.broadcast %154 : vector<8x1xf32> to vector<8x8xf32>
    %156 = arith.subf %152, %155 : vector<8x8xf32>
    %157 = math.exp %156 : vector<8x8xf32>
    %cst_59 = arith.constant dense<0.000000e+00> : vector<8xf32>
    %158 = vector.multi_reduction <add>, %157, %cst_59 [1] : vector<8x8xf32> to vector<8xf32>
    %159 = vector.shape_cast %158 : vector<8xf32> to vector<8x1xf32>
    %160 = tpu.reciprocal %159 {approx = true} : vector<8x1xf32> -> vector<8x1xf32>
    %161 = vector.broadcast %160 : vector<8x1xf32> to vector<8x8xf32>
    %162 = arith.mulf %157, %161 : vector<8x8xf32>
    %163 = vector.extract_strided_slice %144 {offsets = [0, 0], sizes = [8, 8], strides = [1, 1]} : vector<8x32xf32> to vector<8x8xf32>
    %164 = arith.truncf %162 : vector<8x8xf32> to vector<8x8xbf16>
    %165 = arith.truncf %163 : vector<8x8xf32> to vector<8x8xbf16>
    %cst_60 = arith.constant dense<0.000000e+00> : vector<8x8xf32>
    %166 = tpu.matmul %164, %165, %cst_60 {dimension_numbers = #tpu.dot_dimension_numbers<[1], [0], [0], [1], [0, 0, 1, 1], [], []>} : vector<8x8xbf16>, vector<8x8xbf16>, vector<8x8xf32> -> vector<8x8xf32>
    %167 = vector.extract_strided_slice %137 {offsets = [0, 8], sizes = [8, 8], strides = [1, 1]} : vector<8x32xf32> to vector<8x8xf32>
    %168 = vector.extract_strided_slice %143 {offsets = [0, 8], sizes = [8, 8], strides = [1, 1]} : vector<8x32xf32> to vector<8x8xf32>
    %169 = arith.truncf %167 : vector<8x8xf32> to vector<8x8xbf16>
    %170 = arith.truncf %168 : vector<8x8xf32> to vector<8x8xbf16>
    %cst_61 = arith.constant dense<0.000000e+00> : vector<8x8xf32>
    %171 = tpu.matmul %169, %170, %cst_61 {dimension_numbers = #tpu.dot_dimension_numbers<[1], [1], [0], [0], [0, 0, 1, 0], [], []>} : vector<8x8xbf16>, vector<8x8xbf16>, vector<8x8xf32> -> vector<8x8xf32>
    %172 = vector.broadcast %145 : vector<1x8xf32> to vector<8x8xf32>
    %173 = arith.addf %171, %172 : vector<8x8xf32>
    %cst_62 = arith.constant dense<0xFF800000> : vector<8xf32>
    %174 = vector.multi_reduction <maximumf>, %173, %cst_62 [1] : vector<8x8xf32> to vector<8xf32>
    %175 = vector.shape_cast %174 : vector<8xf32> to vector<8x1xf32>
    %176 = vector.broadcast %175 : vector<8x1xf32> to vector<8x8xf32>
    %177 = arith.subf %173, %176 : vector<8x8xf32>
    %178 = math.exp %177 : vector<8x8xf32>
    %cst_63 = arith.constant dense<0.000000e+00> : vector<8xf32>
    %179 = vector.multi_reduction <add>, %178, %cst_63 [1] : vector<8x8xf32> to vector<8xf32>
    %180 = vector.shape_cast %179 : vector<8xf32> to vector<8x1xf32>
    %181 = tpu.reciprocal %180 {approx = true} : vector<8x1xf32> -> vector<8x1xf32>
    %182 = vector.broadcast %181 : vector<8x1xf32> to vector<8x8xf32>
    %183 = arith.mulf %178, %182 : vector<8x8xf32>
    %184 = vector.extract_strided_slice %144 {offsets = [0, 8], sizes = [8, 8], strides = [1, 1]} : vector<8x32xf32> to vector<8x8xf32>
    %185 = arith.truncf %183 : vector<8x8xf32> to vector<8x8xbf16>
    %186 = arith.truncf %184 : vector<8x8xf32> to vector<8x8xbf16>
    %cst_64 = arith.constant dense<0.000000e+00> : vector<8x8xf32>
    %187 = tpu.matmul %185, %186, %cst_64 {dimension_numbers = #tpu.dot_dimension_numbers<[1], [0], [0], [1], [0, 0, 1, 1], [], []>} : vector<8x8xbf16>, vector<8x8xbf16>, vector<8x8xf32> -> vector<8x8xf32>
    %188 = vector.extract_strided_slice %137 {offsets = [0, 16], sizes = [8, 8], strides = [1, 1]} : vector<8x32xf32> to vector<8x8xf32>
    %189 = vector.extract_strided_slice %143 {offsets = [0, 16], sizes = [8, 8], strides = [1, 1]} : vector<8x32xf32> to vector<8x8xf32>
    %190 = arith.truncf %188 : vector<8x8xf32> to vector<8x8xbf16>
    %191 = arith.truncf %189 : vector<8x8xf32> to vector<8x8xbf16>
    %cst_65 = arith.constant dense<0.000000e+00> : vector<8x8xf32>
    %192 = tpu.matmul %190, %191, %cst_65 {dimension_numbers = #tpu.dot_dimension_numbers<[1], [1], [0], [0], [0, 0, 1, 0], [], []>} : vector<8x8xbf16>, vector<8x8xbf16>, vector<8x8xf32> -> vector<8x8xf32>
    %193 = vector.broadcast %145 : vector<1x8xf32> to vector<8x8xf32>
    %194 = arith.addf %192, %193 : vector<8x8xf32>
    %cst_66 = arith.constant dense<0xFF800000> : vector<8xf32>
    %195 = vector.multi_reduction <maximumf>, %194, %cst_66 [1] : vector<8x8xf32> to vector<8xf32>
    %196 = vector.shape_cast %195 : vector<8xf32> to vector<8x1xf32>
    %197 = vector.broadcast %196 : vector<8x1xf32> to vector<8x8xf32>
    %198 = arith.subf %194, %197 : vector<8x8xf32>
    %199 = math.exp %198 : vector<8x8xf32>
    %cst_67 = arith.constant dense<0.000000e+00> : vector<8xf32>
    %200 = vector.multi_reduction <add>, %199, %cst_67 [1] : vector<8x8xf32> to vector<8xf32>
    %201 = vector.shape_cast %200 : vector<8xf32> to vector<8x1xf32>
    %202 = tpu.reciprocal %201 {approx = true} : vector<8x1xf32> -> vector<8x1xf32>
    %203 = vector.broadcast %202 : vector<8x1xf32> to vector<8x8xf32>
    %204 = arith.mulf %199, %203 : vector<8x8xf32>
    %205 = vector.extract_strided_slice %144 {offsets = [0, 16], sizes = [8, 8], strides = [1, 1]} : vector<8x32xf32> to vector<8x8xf32>
    %206 = arith.truncf %204 : vector<8x8xf32> to vector<8x8xbf16>
    %207 = arith.truncf %205 : vector<8x8xf32> to vector<8x8xbf16>
    %cst_68 = arith.constant dense<0.000000e+00> : vector<8x8xf32>
    %208 = tpu.matmul %206, %207, %cst_68 {dimension_numbers = #tpu.dot_dimension_numbers<[1], [0], [0], [1], [0, 0, 1, 1], [], []>} : vector<8x8xbf16>, vector<8x8xbf16>, vector<8x8xf32> -> vector<8x8xf32>
    %209 = vector.extract_strided_slice %137 {offsets = [0, 24], sizes = [8, 8], strides = [1, 1]} : vector<8x32xf32> to vector<8x8xf32>
    %210 = vector.extract_strided_slice %143 {offsets = [0, 24], sizes = [8, 8], strides = [1, 1]} : vector<8x32xf32> to vector<8x8xf32>
    %211 = arith.truncf %209 : vector<8x8xf32> to vector<8x8xbf16>
    %212 = arith.truncf %210 : vector<8x8xf32> to vector<8x8xbf16>
    %cst_69 = arith.constant dense<0.000000e+00> : vector<8x8xf32>
    %213 = tpu.matmul %211, %212, %cst_69 {dimension_numbers = #tpu.dot_dimension_numbers<[1], [1], [0], [0], [0, 0, 1, 0], [], []>} : vector<8x8xbf16>, vector<8x8xbf16>, vector<8x8xf32> -> vector<8x8xf32>
    %214 = vector.broadcast %145 : vector<1x8xf32> to vector<8x8xf32>
    %215 = arith.addf %213, %214 : vector<8x8xf32>
    %cst_70 = arith.constant dense<0xFF800000> : vector<8xf32>
    %216 = vector.multi_reduction <maximumf>, %215, %cst_70 [1] : vector<8x8xf32> to vector<8xf32>
    %217 = vector.shape_cast %216 : vector<8xf32> to vector<8x1xf32>
    %218 = vector.broadcast %217 : vector<8x1xf32> to vector<8x8xf32>
    %219 = arith.subf %215, %218 : vector<8x8xf32>
    %220 = math.exp %219 : vector<8x8xf32>
    %cst_71 = arith.constant dense<0.000000e+00> : vector<8xf32>
    %221 = vector.multi_reduction <add>, %220, %cst_71 [1] : vector<8x8xf32> to vector<8xf32>
    %222 = vector.shape_cast %221 : vector<8xf32> to vector<8x1xf32>
    %223 = tpu.reciprocal %222 {approx = true} : vector<8x1xf32> -> vector<8x1xf32>
    %224 = vector.broadcast %223 : vector<8x1xf32> to vector<8x8xf32>
    %225 = arith.mulf %220, %224 : vector<8x8xf32>
    %226 = vector.extract_strided_slice %144 {offsets = [0, 24], sizes = [8, 8], strides = [1, 1]} : vector<8x32xf32> to vector<8x8xf32>
    %227 = arith.truncf %225 : vector<8x8xf32> to vector<8x8xbf16>
    %228 = arith.truncf %226 : vector<8x8xf32> to vector<8x8xbf16>
    %cst_72 = arith.constant dense<0.000000e+00> : vector<8x8xf32>
    %229 = tpu.matmul %227, %228, %cst_72 {dimension_numbers = #tpu.dot_dimension_numbers<[1], [0], [0], [1], [0, 0, 1, 1], [], []>} : vector<8x8xbf16>, vector<8x8xbf16>, vector<8x8xf32> -> vector<8x8xf32>
    %230 = tpu.concatenate %166, %187, %208, %229 in 1 : vector<8x8xf32>, vector<8x8xf32>, vector<8x8xf32>, vector<8x8xf32> -> vector<8x32xf32>
    %c0_73 = arith.constant 0 : index
    %c0_74 = arith.constant 0 : index
    %231 = vector.load %arg14[%c0_73, %c0_74] : memref<32x32xbf16, #tpu.memory_space<vmem>>, vector<32x32xbf16>
    %232 = arith.truncf %230 : vector<8x32xf32> to vector<8x32xbf16>
    %cst_75 = arith.constant dense<0.000000e+00> : vector<8x32xf32>
    %233 = tpu.matmul %232, %231, %cst_75 {dimension_numbers = #tpu.dot_dimension_numbers<[1], [0], [0], [1], [0, 0, 1, 1], [], []>} : vector<8x32xbf16>, vector<32x32xbf16>, vector<8x32xf32> -> vector<8x32xf32>
    %c0_76 = arith.constant 0 : index
    %c0_77 = arith.constant 0 : index
    %234 = vector.load %arg15[%c0_76, %c0_77] : memref<1x32xf32, #tpu.memory_space<vmem>>, vector<1x32xf32>
    %235 = vector.broadcast %234 : vector<1x32xf32> to vector<8x32xf32>
    %236 = arith.addf %233, %235 : vector<8x32xf32>
    %237 = arith.addf %131, %236 : vector<8x32xf32>
    %c0_78 = arith.constant 0 : index
    %c0_79 = arith.constant 0 : index
    %238 = vector.load %arg22[%c0_78, %c0_79] : memref<1x32xf32, #tpu.memory_space<vmem>>, vector<1x32xf32>
    %c0_80 = arith.constant 0 : index
    %c0_81 = arith.constant 0 : index
    %239 = vector.load %arg23[%c0_80, %c0_81] : memref<1x32xf32, #tpu.memory_space<vmem>>, vector<1x32xf32>
    %cst_82 = arith.constant dense<0.000000e+00> : vector<8xf32>
    %240 = vector.multi_reduction <add>, %237, %cst_82 [1] : vector<8x32xf32> to vector<8xf32>
    %241 = vector.shape_cast %240 : vector<8xf32> to vector<8x1xf32>
    %cst_83 = arith.constant 3.200000e+01 : f32
    %242 = vector.broadcast %cst_83 : f32 to vector<8x1xf32>
    %243 = arith.divf %241, %242 : vector<8x1xf32>
    %244 = vector.broadcast %243 : vector<8x1xf32> to vector<8x32xf32>
    %245 = arith.subf %237, %244 : vector<8x32xf32>
    %246 = arith.mulf %245, %245 : vector<8x32xf32>
    %cst_84 = arith.constant dense<0.000000e+00> : vector<8xf32>
    %247 = vector.multi_reduction <add>, %246, %cst_84 [1] : vector<8x32xf32> to vector<8xf32>
    %248 = vector.shape_cast %247 : vector<8xf32> to vector<8x1xf32>
    %cst_85 = arith.constant 3.200000e+01 : f32
    %249 = vector.broadcast %cst_85 : f32 to vector<8x1xf32>
    %250 = arith.divf %248, %249 : vector<8x1xf32>
    %251 = vector.broadcast %243 : vector<8x1xf32> to vector<8x32xf32>
    %252 = arith.subf %237, %251 : vector<8x32xf32>
    %cst_86 = arith.constant 9.99999974E-6 : f32
    %253 = vector.broadcast %cst_86 : f32 to vector<8x1xf32>
    %254 = arith.addf %250, %253 : vector<8x1xf32>
    %255 = math.rsqrt %254 : vector<8x1xf32>
    %256 = vector.broadcast %255 : vector<8x1xf32> to vector<8x32xf32>
    %257 = arith.mulf %252, %256 : vector<8x32xf32>
    %258 = vector.broadcast %238 : vector<1x32xf32> to vector<8x32xf32>
    %259 = arith.mulf %257, %258 : vector<8x32xf32>
    %260 = vector.broadcast %239 : vector<1x32xf32> to vector<8x32xf32>
    %261 = arith.addf %259, %260 : vector<8x32xf32>
    %c0_87 = arith.constant 0 : index
    %c0_88 = arith.constant 0 : index
    %262 = vector.load %arg16[%c0_87, %c0_88] : memref<32x64xbf16, #tpu.memory_space<vmem>>, vector<32x64xbf16>
    %263 = arith.truncf %261 : vector<8x32xf32> to vector<8x32xbf16>
    %cst_89 = arith.constant dense<0.000000e+00> : vector<8x64xf32>
    %264 = tpu.matmul %263, %262, %cst_89 {dimension_numbers = #tpu.dot_dimension_numbers<[1], [0], [0], [1], [0, 0, 1, 1], [], []>} : vector<8x32xbf16>, vector<32x64xbf16>, vector<8x64xf32> -> vector<8x64xf32>
    %c0_90 = arith.constant 0 : index
    %c0_91 = arith.constant 0 : index
    %265 = vector.load %arg17[%c0_90, %c0_91] : memref<1x64xf32, #tpu.memory_space<vmem>>, vector<1x64xf32>
    %266 = vector.broadcast %265 : vector<1x64xf32> to vector<8x64xf32>
    %267 = arith.addf %264, %266 : vector<8x64xf32>
    %cst_92 = arith.constant 5.000000e-01 : f32
    %268 = vector.broadcast %cst_92 : f32 to vector<8x64xf32>
    %269 = arith.mulf %268, %267 : vector<8x64xf32>
    %cst_93 = arith.constant 0.707106769 : f32
    %270 = vector.broadcast %cst_93 : f32 to vector<8x64xf32>
    %271 = arith.mulf %267, %270 : vector<8x64xf32>
    %272 = math.absf %271 : vector<8x64xf32>
    %cst_94 = arith.constant 0.327591091 : f32
    %273 = vector.broadcast %cst_94 : f32 to vector<8x64xf32>
    %274 = arith.mulf %273, %272 : vector<8x64xf32>
    %cst_95 = arith.constant 1.000000e+00 : f32
    %275 = vector.broadcast %cst_95 : f32 to vector<8x64xf32>
    %276 = arith.addf %275, %274 : vector<8x64xf32>
    %277 = tpu.reciprocal %276 {approx = true} : vector<8x64xf32> -> vector<8x64xf32>
    %cst_96 = arith.constant 1.06140542 : f32
    %278 = vector.broadcast %cst_96 : f32 to vector<8x64xf32>
    %279 = arith.mulf %277, %278 : vector<8x64xf32>
    %cst_97 = arith.constant -1.45315206 : f32
    %280 = vector.broadcast %cst_97 : f32 to vector<8x64xf32>
    %281 = arith.addf %280, %279 : vector<8x64xf32>
    %282 = arith.mulf %277, %281 : vector<8x64xf32>
    %cst_98 = arith.constant 1.42141378 : f32
    %283 = vector.broadcast %cst_98 : f32 to vector<8x64xf32>
    %284 = arith.addf %283, %282 : vector<8x64xf32>
    %285 = arith.mulf %277, %284 : vector<8x64xf32>
    %cst_99 = arith.constant -0.284496725 : f32
    %286 = vector.broadcast %cst_99 : f32 to vector<8x64xf32>
    %287 = arith.addf %286, %285 : vector<8x64xf32>
    %288 = arith.mulf %277, %287 : vector<8x64xf32>
    %cst_100 = arith.constant 0.254829586 : f32
    %289 = vector.broadcast %cst_100 : f32 to vector<8x64xf32>
    %290 = arith.addf %289, %288 : vector<8x64xf32>
    %291 = arith.mulf %277, %290 : vector<8x64xf32>
    %cst_101 = arith.constant 0.000000e+00 : f32
    %292 = vector.broadcast %cst_101 : f32 to vector<8x64xf32>
    %293 = arith.subf %292, %272 : vector<8x64xf32>
    %294 = arith.mulf %293, %272 : vector<8x64xf32>
    %295 = math.exp %294 : vector<8x64xf32>
    %296 = arith.mulf %291, %295 : vector<8x64xf32>
    %cst_102 = arith.constant 1.000000e+00 : f32
    %297 = vector.broadcast %cst_102 : f32 to vector<8x64xf32>
    %298 = arith.subf %297, %296 : vector<8x64xf32>
    %cst_103 = arith.constant 0.000000e+00 : f32
    %299 = vector.broadcast %cst_103 : f32 to vector<8x64xf32>
    %300 = arith.cmpf oge, %271, %299 : vector<8x64xf32>
    %cst_104 = arith.constant 0.000000e+00 : f32
    %301 = vector.broadcast %cst_104 : f32 to vector<8x64xf32>
    %302 = arith.subf %301, %298 : vector<8x64xf32>
    %303 = arith.select %300, %298, %302 : vector<8x64xi1>, vector<8x64xf32>
    %cst_105 = arith.constant 1.000000e+00 : f32
    %304 = vector.broadcast %cst_105 : f32 to vector<8x64xf32>
    %305 = arith.addf %304, %303 : vector<8x64xf32>
    %306 = arith.mulf %269, %305 : vector<8x64xf32>
    %c0_106 = arith.constant 0 : index
    %c0_107 = arith.constant 0 : index
    %307 = vector.load %arg18[%c0_106, %c0_107] : memref<64x32xbf16, #tpu.memory_space<vmem>>, vector<64x32xbf16>
    %308 = arith.truncf %306 : vector<8x64xf32> to vector<8x64xbf16>
    %cst_108 = arith.constant dense<0.000000e+00> : vector<8x32xf32>
    %309 = tpu.matmul %308, %307, %cst_108 {dimension_numbers = #tpu.dot_dimension_numbers<[1], [0], [0], [1], [0, 0, 1, 1], [], []>} : vector<8x64xbf16>, vector<64x32xbf16>, vector<8x32xf32> -> vector<8x32xf32>
    %c0_109 = arith.constant 0 : index
    %c0_110 = arith.constant 0 : index
    %310 = vector.load %arg19[%c0_109, %c0_110] : memref<1x32xf32, #tpu.memory_space<vmem>>, vector<1x32xf32>
    %311 = vector.broadcast %310 : vector<1x32xf32> to vector<8x32xf32>
    %312 = arith.addf %309, %311 : vector<8x32xf32>
    %313 = arith.addf %261, %312 : vector<8x32xf32>
    %c0_111 = arith.constant 0 : index
    %c0_112 = arith.constant 0 : index
    %314 = vector.load %arg24[%c0_111, %c0_112] : memref<1x32xf32, #tpu.memory_space<vmem>>, vector<1x32xf32>
    %c0_113 = arith.constant 0 : index
    %c0_114 = arith.constant 0 : index
    %315 = vector.load %arg25[%c0_113, %c0_114] : memref<1x32xf32, #tpu.memory_space<vmem>>, vector<1x32xf32>
    %cst_115 = arith.constant dense<0.000000e+00> : vector<8xf32>
    %316 = vector.multi_reduction <add>, %313, %cst_115 [1] : vector<8x32xf32> to vector<8xf32>
    %317 = vector.shape_cast %316 : vector<8xf32> to vector<8x1xf32>
    %cst_116 = arith.constant 3.200000e+01 : f32
    %318 = vector.broadcast %cst_116 : f32 to vector<8x1xf32>
    %319 = arith.divf %317, %318 : vector<8x1xf32>
    %320 = vector.broadcast %319 : vector<8x1xf32> to vector<8x32xf32>
    %321 = arith.subf %313, %320 : vector<8x32xf32>
    %322 = arith.mulf %321, %321 : vector<8x32xf32>
    %cst_117 = arith.constant dense<0.000000e+00> : vector<8xf32>
    %323 = vector.multi_reduction <add>, %322, %cst_117 [1] : vector<8x32xf32> to vector<8xf32>
    %324 = vector.shape_cast %323 : vector<8xf32> to vector<8x1xf32>
    %cst_118 = arith.constant 3.200000e+01 : f32
    %325 = vector.broadcast %cst_118 : f32 to vector<8x1xf32>
    %326 = arith.divf %324, %325 : vector<8x1xf32>
    %327 = vector.broadcast %319 : vector<8x1xf32> to vector<8x32xf32>
    %328 = arith.subf %313, %327 : vector<8x32xf32>
    %cst_119 = arith.constant 9.99999974E-6 : f32
    %329 = vector.broadcast %cst_119 : f32 to vector<8x1xf32>
    %330 = arith.addf %326, %329 : vector<8x1xf32>
    %331 = math.rsqrt %330 : vector<8x1xf32>
    %332 = vector.broadcast %331 : vector<8x1xf32> to vector<8x32xf32>
    %333 = arith.mulf %328, %332 : vector<8x32xf32>
    %334 = vector.broadcast %314 : vector<1x32xf32> to vector<8x32xf32>
    %335 = arith.mulf %333, %334 : vector<8x32xf32>
    %336 = vector.broadcast %315 : vector<1x32xf32> to vector<8x32xf32>
    %337 = arith.addf %335, %336 : vector<8x32xf32>
    %338 = vector.shape_cast %337 : vector<8x32xf32> to vector<1x8x32xf32>
    %339 = arith.truncf %338 : vector<1x8x32xf32> to vector<1x8x32xbf16>
    %c0_120 = arith.constant 0 : index
    %c0_121 = arith.constant 0 : index
    %c0_122 = arith.constant 0 : index
    %340 = vector.load %arg26[%c0_120, %c0_121, %c0_122] : memref<1x8x32xbf16, #tpu.memory_space<vmem>>, vector<1x8x32xbf16>
    tpu.vector_store %arg26[%c0_120, %c0_121, %c0_122], %339 {strides = array<i32>} : memref<1x8x32xbf16, #tpu.memory_space<vmem>>, vector<1x8x32xbf16>,
    return
  }
  func.func @transform_0(%arg0: i32) -> (i32, i32, i32) {
    %c0_i32 = arith.constant 0 : i32
    %c0_i32_0 = arith.constant 0 : i32
    %c0_i32_1 = arith.constant 0 : i32
    return %arg0, %c0_i32, %c0_i32_0 : i32, i32, i32
  }
  func.func @transform_1(%arg0: i32) -> (i32, i32, i32) {
    %c0_i32 = arith.constant 0 : i32
    %c0_i32_0 = arith.constant 0 : i32
    %c0_i32_1 = arith.constant 0 : i32
    return %arg0, %c0_i32, %c0_i32_0 : i32, i32, i32
  }
  func.func @transform_2(%arg0: i32) -> (i32, i32) {
    %c0_i32 = arith.constant 0 : i32
    %c0_i32_0 = arith.constant 0 : i32
    %c0_i32_1 = arith.constant 0 : i32
    return %c0_i32, %c0_i32_0 : i32, i32
  }
  func.func @transform_3(%arg0: i32) -> (i32, i32, i32) {
    %c0_i32 = arith.constant 0 : i32
    %c0_i32_0 = arith.constant 0 : i32
    %c0_i32_1 = arith.constant 0 : i32
    return %arg0, %c0_i32, %c0_i32_0 : i32, i32, i32
  }
  func.func @transform_4(%arg0: i32) -> (i32, i32, i32) {
    %c0_i32 = arith.constant 0 : i32
    %c0_i32_0 = arith.constant 0 : i32
    %c0_i32_1 = arith.constant 0 : i32
    return %arg0, %c0_i32, %c0_i32_0 : i32, i32, i32
  }
  func.func @transform_5(%arg0: i32) -> (i32, i32) {
    %c0_i32 = arith.constant 0 : i32
    %c0_i32_0 = arith.constant 0 : i32
    %c0_i32_1 = arith.constant 0 : i32
    return %c0_i32, %c0_i32_0 : i32, i32
  }
  func.func @transform_6(%arg0: i32) -> (i32, i32) {
    %c0_i32 = arith.constant 0 : i32
    %c0_i32_0 = arith.constant 0 : i32
    %c0_i32_1 = arith.constant 0 : i32
    return %c0_i32, %c0_i32_0 : i32, i32
  }
  func.func @transform_7(%arg0: i32) -> (i32, i32) {
    %c0_i32 = arith.constant 0 : i32
    %c0_i32_0 = arith.constant 0 : i32
    %c0_i32_1 = arith.constant 0 : i32
    return %c0_i32, %c0_i32_0 : i32, i32
  }
  func.func @transform_8(%arg0: i32) -> (i32, i32) {
    %c0_i32 = arith.constant 0 : i32
    %c0_i32_0 = arith.constant 0 : i32
    %c0_i32_1 = arith.constant 0 : i32
    return %c0_i32, %c0_i32_0 : i32, i32
  }
  func.func @transform_9(%arg0: i32) -> (i32, i32) {
    %c0_i32 = arith.constant 0 : i32
    %c0_i32_0 = arith.constant 0 : i32
    %c0_i32_1 = arith.constant 0 : i32
    return %c0_i32, %c0_i32_0 : i32, i32
  }
  func.func @transform_10(%arg0: i32) -> (i32, i32) {
    %c0_i32 = arith.constant 0 : i32
    %c0_i32_0 = arith.constant 0 : i32
    %c0_i32_1 = arith.constant 0 : i32
    return %c0_i32, %c0_i32_0 : i32, i32
  }
  func.func @transform_11(%arg0: i32) -> (i32, i32) {
    %c0_i32 = arith.constant 0 : i32
    %c0_i32_0 = arith.constant 0 : i32
    %c0_i32_1 = arith.constant 0 : i32
    return %c0_i32, %c0_i32_0 : i32, i32
  }
  func.func @transform_12(%arg0: i32) -> (i32, i32) {
    %c0_i32 = arith.constant 0 : i32
    %c0_i32_0 = arith.constant 0 : i32
    %c0_i32_1 = arith.constant 0 : i32
    return %c0_i32, %c0_i32_0 : i32, i32
  }
  func.func @transform_13(%arg0: i32) -> (i32, i32) {
    %c0_i32 = arith.constant 0 : i32
    %c0_i32_0 = arith.constant 0 : i32
    %c0_i32_1 = arith.constant 0 : i32
    return %c0_i32, %c0_i32_0 : i32, i32
  }
  func.func @transform_14(%arg0: i32) -> (i32, i32) {
    %c0_i32 = arith.constant 0 : i32
    %c0_i32_0 = arith.constant 0 : i32
    %c0_i32_1 = arith.constant 0 : i32
    return %c0_i32, %c0_i32_0 : i32, i32
  }
  func.func @transform_15(%arg0: i32) -> (i32, i32) {
    %c0_i32 = arith.constant 0 : i32
    %c0_i32_0 = arith.constant 0 : i32
    %c0_i32_1 = arith.constant 0 : i32
    return %c0_i32, %c0_i32_0 : i32, i32
  }
  func.func @transform_16(%arg0: i32) -> (i32, i32) {
    %c0_i32 = arith.constant 0 : i32
    %c0_i32_0 = arith.constant 0 : i32
    %c0_i32_1 = arith.constant 0 : i32
    return %c0_i32, %c0_i32_0 : i32, i32
  }
  func.func @transform_17(%arg0: i32) -> (i32, i32) {
    %c0_i32 = arith.constant 0 : i32
    %c0_i32_0 = arith.constant 0 : i32
    %c0_i32_1 = arith.constant 0 : i32
    return %c0_i32, %c0_i32_0 : i32, i32
  }
  func.func @transform_18(%arg0: i32) -> (i32, i32) {
    %c0_i32 = arith.constant 0 : i32
    %c0_i32_0 = arith.constant 0 : i32
    %c0_i32_1 = arith.constant 0 : i32
    return %c0_i32, %c0_i32_0 : i32, i32
  }
  func.func @transform_19(%arg0: i32) -> (i32, i32) {
    %c0_i32 = arith.constant 0 : i32
    %c0_i32_0 = arith.constant 0 : i32
    %c0_i32_1 = arith.constant 0 : i32
    return %c0_i32, %c0_i32_0 : i32, i32
  }
  func.func @transform_20(%arg0: i32) -> (i32, i32) {
    %c0_i32 = arith.constant 0 : i32
    %c0_i32_0 = arith.constant 0 : i32
    %c0_i32_1 = arith.constant 0 : i32
    return %c0_i32, %c0_i32_0 : i32, i32
  }
  func.func @transform_21(%arg0: i32) -> (i32, i32) {
    %c0_i32 = arith.constant 0 : i32
    %c0_i32_0 = arith.constant 0 : i32
    %c0_i32_1 = arith.constant 0 : i32
    return %c0_i32, %c0_i32_0 : i32, i32
  }
  func.func @transform_22(%arg0: i32) -> (i32, i32) {
    %c0_i32 = arith.constant 0 : i32
    %c0_i32_0 = arith.constant 0 : i32
    %c0_i32_1 = arith.constant 0 : i32
    return %c0_i32, %c0_i32_0 : i32, i32
  }
  func.func @transform_23(%arg0: i32) -> (i32, i32) {
    %c0_i32 = arith.constant 0 : i32
    %c0_i32_0 = arith.constant 0 : i32
    %c0_i32_1 = arith.constant 0 : i32
    return %c0_i32, %c0_i32_0 : i32, i32
  }
  func.func @transform_24(%arg0: i32) -> (i32, i32) {
    %c0_i32 = arith.constant 0 : i32
    %c0_i32_0 = arith.constant 0 : i32
    %c0_i32_1 = arith.constant 0 : i32
    return %c0_i32, %c0_i32_0 : i32, i32
  }
  func.func @transform_25(%arg0: i32) -> (i32, i32, i32) {
    %c0_i32 = arith.constant 0 : i32
    %c0_i32_0 = arith.constant 0 : i32
    %c0_i32_1 = arith.constant 0 : i32
    return %arg0, %c0_i32, %c0_i32_0 : i32, i32, i32
  }
}

module attributes {stable_mosaic.version = 11 : i64} {
  func.func @_encoder_layer_kernel(%arg0: i32, %arg1: memref<1x8x32xbf16, #tpu.memory_space<vmem>>, %arg2: memref<8x8xf32, #tpu.memory_space<vmem>>, %arg3: memref<1x1x8xf32, #tpu.memory_space<vmem>>, %arg4: memref<32x96xbf16, #tpu.memory_space<vmem>>, %arg5: memref<1x96xf32, #tpu.memory_space<vmem>>, %arg6: memref<32x32xbf16, #tpu.memory_space<vmem>>, %arg7: memref<1x32xf32, #tpu.memory_space<vmem>>, %arg8: memref<32x64xbf16, #tpu.memory_space<vmem>>, %arg9: memref<1x64xf32, #tpu.memory_space<vmem>>, %arg10: memref<64x32xbf16, #tpu.memory_space<vmem>>, %arg11: memref<1x32xf32, #tpu.memory_space<vmem>>, %arg12: memref<1x32xf32, #tpu.memory_space<vmem>>, %arg13: memref<1x32xf32, #tpu.memory_space<vmem>>, %arg14: memref<1x32xf32, #tpu.memory_space<vmem>>, %arg15: memref<1x32xf32, #tpu.memory_space<vmem>>, %arg16: memref<1x32xf32, #tpu.memory_space<vmem>>, %arg17: memref<1x32xf32, #tpu.memory_space<vmem>>, %arg18: memref<1x8x32xbf16, #tpu.memory_space<vmem>>) attributes {dimension_semantics = [#tpu.dimension_semantics<parallel>], iteration_bounds = array<i64: 2>, scalar_prefetch = 0 : i64, scratch_operands = 0 : i64, tpu.core_type = #tpu.core_type<tc>, window_params = [{transform_indices = @transform_0, window_bounds = array<i64: 1, 8, 32>}, {pipeline_mode = #tpu.pipeline_mode<synchronous>, transform_indices = @transform_1, window_bounds = array<i64: 8, 8>}, {transform_indices = @transform_2, window_bounds = array<i64: 1, 1, 8>}, {pipeline_mode = #tpu.pipeline_mode<synchronous>, transform_indices = @transform_3, window_bounds = array<i64: 32, 96>}, {pipeline_mode = #tpu.pipeline_mode<synchronous>, transform_indices = @transform_4, window_bounds = array<i64: 1, 96>}, {pipeline_mode = #tpu.pipeline_mode<synchronous>, transform_indices = @transform_5, window_bounds = array<i64: 32, 32>}, {pipeline_mode = #tpu.pipeline_mode<synchronous>, transform_indices = @transform_6, window_bounds = array<i64: 1, 32>}, {pipeline_mode = #tpu.pipeline_mode<synchronous>, transform_indices = @transform_7, window_bounds = array<i64: 32, 64>}, {pipeline_mode = #tpu.pipeline_mode<synchronous>, transform_indices = @transform_8, window_bounds = array<i64: 1, 64>}, {pipeline_mode = #tpu.pipeline_mode<synchronous>, transform_indices = @transform_9, window_bounds = array<i64: 64, 32>}, {pipeline_mode = #tpu.pipeline_mode<synchronous>, transform_indices = @transform_10, window_bounds = array<i64: 1, 32>}, {pipeline_mode = #tpu.pipeline_mode<synchronous>, transform_indices = @transform_11, window_bounds = array<i64: 1, 32>}, {pipeline_mode = #tpu.pipeline_mode<synchronous>, transform_indices = @transform_12, window_bounds = array<i64: 1, 32>}, {pipeline_mode = #tpu.pipeline_mode<synchronous>, transform_indices = @transform_13, window_bounds = array<i64: 1, 32>}, {pipeline_mode = #tpu.pipeline_mode<synchronous>, transform_indices = @transform_14, window_bounds = array<i64: 1, 32>}, {pipeline_mode = #tpu.pipeline_mode<synchronous>, transform_indices = @transform_15, window_bounds = array<i64: 1, 32>}, {pipeline_mode = #tpu.pipeline_mode<synchronous>, transform_indices = @transform_16, window_bounds = array<i64: 1, 32>}, {transform_indices = @transform_17, window_bounds = array<i64: 1, 8, 32>}]} {
    %c0 = arith.constant 0 : index
    %c0_0 = arith.constant 0 : index
    %c0_1 = arith.constant 0 : index
    %0 = vector.load %arg1[%c0, %c0_0, %c0_1] : memref<1x8x32xbf16, #tpu.memory_space<vmem>>, vector<1x8x32xbf16>
    %1 = arith.extf %0 : vector<1x8x32xbf16> to vector<1x8x32xf32>
    %2 = vector.shape_cast %1 : vector<1x8x32xf32> to vector<8x32xf32>
    %c0_2 = arith.constant 0 : index
    %c0_3 = arith.constant 0 : index
    %3 = vector.load %arg2[%c0_2, %c0_3] : memref<8x8xf32, #tpu.memory_space<vmem>>, vector<8x8xf32>
    %c0_4 = arith.constant 0 : index
    %c0_5 = arith.constant 0 : index
    %c0_6 = arith.constant 0 : index
    %4 = vector.load %arg3[%c0_4, %c0_5, %c0_6] : memref<1x1x8xf32, #tpu.memory_space<vmem>>, vector<1x1x8xf32>
    %c0_7 = arith.constant 0 : index
    %c0_8 = arith.constant 0 : index
    %5 = vector.load %arg4[%c0_7, %c0_8] : memref<32x96xbf16, #tpu.memory_space<vmem>>, vector<32x96xbf16>
    %6 = arith.truncf %2 : vector<8x32xf32> to vector<8x32xbf16>
    %cst = arith.constant dense<0.000000e+00> : vector<8x96xf32>
    %7 = tpu.matmul %6, %5, %cst {dimension_numbers = #tpu.dot_dimension_numbers<[1], [0], [0], [1], [0, 0, 1, 1], [], []>} : vector<8x32xbf16>, vector<32x96xbf16>, vector<8x96xf32> -> vector<8x96xf32>
    %c0_9 = arith.constant 0 : index
    %c0_10 = arith.constant 0 : index
    %8 = vector.load %arg5[%c0_9, %c0_10] : memref<1x96xf32, #tpu.memory_space<vmem>>, vector<1x96xf32>
    %9 = vector.broadcast %8 : vector<1x96xf32> to vector<8x96xf32>
    %10 = arith.addf %7, %9 : vector<8x96xf32>
    %11 = vector.extract_strided_slice %10 {offsets = [0, 0], sizes = [8, 32], strides = [1, 1]} : vector<8x96xf32> to vector<8x32xf32>
    %12 = vector.extract_strided_slice %10 {offsets = [0, 32], sizes = [8, 32], strides = [1, 1]} : vector<8x96xf32> to vector<8x32xf32>
    %13 = vector.extract_strided_slice %10 {offsets = [0, 64], sizes = [8, 32], strides = [1, 1]} : vector<8x96xf32> to vector<8x32xf32>
    %14 = vector.shape_cast %4 : vector<1x1x8xf32> to vector<1x8xf32>
    %15 = vector.broadcast %14 : vector<1x8xf32> to vector<8x8xf32>
    %16 = arith.addf %3, %15 : vector<8x8xf32>
    %17 = vector.extract_strided_slice %11 {offsets = [0, 0], sizes = [8, 8], strides = [1, 1]} : vector<8x32xf32> to vector<8x8xf32>
    %18 = vector.extract_strided_slice %12 {offsets = [0, 0], sizes = [8, 8], strides = [1, 1]} : vector<8x32xf32> to vector<8x8xf32>
    %19 = arith.truncf %17 : vector<8x8xf32> to vector<8x8xbf16>
    %20 = arith.truncf %18 : vector<8x8xf32> to vector<8x8xbf16>
    %cst_11 = arith.constant dense<0.000000e+00> : vector<8x8xf32>
    %21 = tpu.matmul %19, %20, %cst_11 {dimension_numbers = #tpu.dot_dimension_numbers<[1], [1], [0], [0], [0, 0, 1, 0], [], []>} : vector<8x8xbf16>, vector<8x8xbf16>, vector<8x8xf32> -> vector<8x8xf32>
    %22 = arith.addf %21, %16 : vector<8x8xf32>
    %cst_12 = arith.constant dense<0xFF800000> : vector<8xf32>
    %23 = vector.multi_reduction <maximumf>, %22, %cst_12 [1] : vector<8x8xf32> to vector<8xf32>
    %24 = vector.shape_cast %23 : vector<8xf32> to vector<8x1xf32>
    %25 = vector.broadcast %24 : vector<8x1xf32> to vector<8x8xf32>
    %26 = arith.subf %22, %25 : vector<8x8xf32>
    %27 = math.exp %26 : vector<8x8xf32>
    %cst_13 = arith.constant dense<0.000000e+00> : vector<8xf32>
    %28 = vector.multi_reduction <add>, %27, %cst_13 [1] : vector<8x8xf32> to vector<8xf32>
    %29 = vector.shape_cast %28 : vector<8xf32> to vector<8x1xf32>
    %30 = tpu.reciprocal %29 {approx = true} : vector<8x1xf32> -> vector<8x1xf32>
    %31 = vector.broadcast %30 : vector<8x1xf32> to vector<8x8xf32>
    %32 = arith.mulf %27, %31 : vector<8x8xf32>
    %33 = vector.extract_strided_slice %13 {offsets = [0, 0], sizes = [8, 8], strides = [1, 1]} : vector<8x32xf32> to vector<8x8xf32>
    %34 = arith.truncf %32 : vector<8x8xf32> to vector<8x8xbf16>
    %35 = arith.truncf %33 : vector<8x8xf32> to vector<8x8xbf16>
    %cst_14 = arith.constant dense<0.000000e+00> : vector<8x8xf32>
    %36 = tpu.matmul %34, %35, %cst_14 {dimension_numbers = #tpu.dot_dimension_numbers<[1], [0], [0], [1], [0, 0, 1, 1], [], []>} : vector<8x8xbf16>, vector<8x8xbf16>, vector<8x8xf32> -> vector<8x8xf32>
    %37 = vector.extract_strided_slice %11 {offsets = [0, 8], sizes = [8, 8], strides = [1, 1]} : vector<8x32xf32> to vector<8x8xf32>
    %38 = vector.extract_strided_slice %12 {offsets = [0, 8], sizes = [8, 8], strides = [1, 1]} : vector<8x32xf32> to vector<8x8xf32>
    %39 = arith.truncf %37 : vector<8x8xf32> to vector<8x8xbf16>
    %40 = arith.truncf %38 : vector<8x8xf32> to vector<8x8xbf16>
    %cst_15 = arith.constant dense<0.000000e+00> : vector<8x8xf32>
    %41 = tpu.matmul %39, %40, %cst_15 {dimension_numbers = #tpu.dot_dimension_numbers<[1], [1], [0], [0], [0, 0, 1, 0], [], []>} : vector<8x8xbf16>, vector<8x8xbf16>, vector<8x8xf32> -> vector<8x8xf32>
    %42 = arith.addf %41, %16 : vector<8x8xf32>
    %cst_16 = arith.constant dense<0xFF800000> : vector<8xf32>
    %43 = vector.multi_reduction <maximumf>, %42, %cst_16 [1] : vector<8x8xf32> to vector<8xf32>
    %44 = vector.shape_cast %43 : vector<8xf32> to vector<8x1xf32>
    %45 = vector.broadcast %44 : vector<8x1xf32> to vector<8x8xf32>
    %46 = arith.subf %42, %45 : vector<8x8xf32>
    %47 = math.exp %46 : vector<8x8xf32>
    %cst_17 = arith.constant dense<0.000000e+00> : vector<8xf32>
    %48 = vector.multi_reduction <add>, %47, %cst_17 [1] : vector<8x8xf32> to vector<8xf32>
    %49 = vector.shape_cast %48 : vector<8xf32> to vector<8x1xf32>
    %50 = tpu.reciprocal %49 {approx = true} : vector<8x1xf32> -> vector<8x1xf32>
    %51 = vector.broadcast %50 : vector<8x1xf32> to vector<8x8xf32>
    %52 = arith.mulf %47, %51 : vector<8x8xf32>
    %53 = vector.extract_strided_slice %13 {offsets = [0, 8], sizes = [8, 8], strides = [1, 1]} : vector<8x32xf32> to vector<8x8xf32>
    %54 = arith.truncf %52 : vector<8x8xf32> to vector<8x8xbf16>
    %55 = arith.truncf %53 : vector<8x8xf32> to vector<8x8xbf16>
    %cst_18 = arith.constant dense<0.000000e+00> : vector<8x8xf32>
    %56 = tpu.matmul %54, %55, %cst_18 {dimension_numbers = #tpu.dot_dimension_numbers<[1], [0], [0], [1], [0, 0, 1, 1], [], []>} : vector<8x8xbf16>, vector<8x8xbf16>, vector<8x8xf32> -> vector<8x8xf32>
    %57 = vector.extract_strided_slice %11 {offsets = [0, 16], sizes = [8, 8], strides = [1, 1]} : vector<8x32xf32> to vector<8x8xf32>
    %58 = vector.extract_strided_slice %12 {offsets = [0, 16], sizes = [8, 8], strides = [1, 1]} : vector<8x32xf32> to vector<8x8xf32>
    %59 = arith.truncf %57 : vector<8x8xf32> to vector<8x8xbf16>
    %60 = arith.truncf %58 : vector<8x8xf32> to vector<8x8xbf16>
    %cst_19 = arith.constant dense<0.000000e+00> : vector<8x8xf32>
    %61 = tpu.matmul %59, %60, %cst_19 {dimension_numbers = #tpu.dot_dimension_numbers<[1], [1], [0], [0], [0, 0, 1, 0], [], []>} : vector<8x8xbf16>, vector<8x8xbf16>, vector<8x8xf32> -> vector<8x8xf32>
    %62 = arith.addf %61, %16 : vector<8x8xf32>
    %cst_20 = arith.constant dense<0xFF800000> : vector<8xf32>
    %63 = vector.multi_reduction <maximumf>, %62, %cst_20 [1] : vector<8x8xf32> to vector<8xf32>
    %64 = vector.shape_cast %63 : vector<8xf32> to vector<8x1xf32>
    %65 = vector.broadcast %64 : vector<8x1xf32> to vector<8x8xf32>
    %66 = arith.subf %62, %65 : vector<8x8xf32>
    %67 = math.exp %66 : vector<8x8xf32>
    %cst_21 = arith.constant dense<0.000000e+00> : vector<8xf32>
    %68 = vector.multi_reduction <add>, %67, %cst_21 [1] : vector<8x8xf32> to vector<8xf32>
    %69 = vector.shape_cast %68 : vector<8xf32> to vector<8x1xf32>
    %70 = tpu.reciprocal %69 {approx = true} : vector<8x1xf32> -> vector<8x1xf32>
    %71 = vector.broadcast %70 : vector<8x1xf32> to vector<8x8xf32>
    %72 = arith.mulf %67, %71 : vector<8x8xf32>
    %73 = vector.extract_strided_slice %13 {offsets = [0, 16], sizes = [8, 8], strides = [1, 1]} : vector<8x32xf32> to vector<8x8xf32>
    %74 = arith.truncf %72 : vector<8x8xf32> to vector<8x8xbf16>
    %75 = arith.truncf %73 : vector<8x8xf32> to vector<8x8xbf16>
    %cst_22 = arith.constant dense<0.000000e+00> : vector<8x8xf32>
    %76 = tpu.matmul %74, %75, %cst_22 {dimension_numbers = #tpu.dot_dimension_numbers<[1], [0], [0], [1], [0, 0, 1, 1], [], []>} : vector<8x8xbf16>, vector<8x8xbf16>, vector<8x8xf32> -> vector<8x8xf32>
    %77 = vector.extract_strided_slice %11 {offsets = [0, 24], sizes = [8, 8], strides = [1, 1]} : vector<8x32xf32> to vector<8x8xf32>
    %78 = vector.extract_strided_slice %12 {offsets = [0, 24], sizes = [8, 8], strides = [1, 1]} : vector<8x32xf32> to vector<8x8xf32>
    %79 = arith.truncf %77 : vector<8x8xf32> to vector<8x8xbf16>
    %80 = arith.truncf %78 : vector<8x8xf32> to vector<8x8xbf16>
    %cst_23 = arith.constant dense<0.000000e+00> : vector<8x8xf32>
    %81 = tpu.matmul %79, %80, %cst_23 {dimension_numbers = #tpu.dot_dimension_numbers<[1], [1], [0], [0], [0, 0, 1, 0], [], []>} : vector<8x8xbf16>, vector<8x8xbf16>, vector<8x8xf32> -> vector<8x8xf32>
    %82 = arith.addf %81, %16 : vector<8x8xf32>
    %cst_24 = arith.constant dense<0xFF800000> : vector<8xf32>
    %83 = vector.multi_reduction <maximumf>, %82, %cst_24 [1] : vector<8x8xf32> to vector<8xf32>
    %84 = vector.shape_cast %83 : vector<8xf32> to vector<8x1xf32>
    %85 = vector.broadcast %84 : vector<8x1xf32> to vector<8x8xf32>
    %86 = arith.subf %82, %85 : vector<8x8xf32>
    %87 = math.exp %86 : vector<8x8xf32>
    %cst_25 = arith.constant dense<0.000000e+00> : vector<8xf32>
    %88 = vector.multi_reduction <add>, %87, %cst_25 [1] : vector<8x8xf32> to vector<8xf32>
    %89 = vector.shape_cast %88 : vector<8xf32> to vector<8x1xf32>
    %90 = tpu.reciprocal %89 {approx = true} : vector<8x1xf32> -> vector<8x1xf32>
    %91 = vector.broadcast %90 : vector<8x1xf32> to vector<8x8xf32>
    %92 = arith.mulf %87, %91 : vector<8x8xf32>
    %93 = vector.extract_strided_slice %13 {offsets = [0, 24], sizes = [8, 8], strides = [1, 1]} : vector<8x32xf32> to vector<8x8xf32>
    %94 = arith.truncf %92 : vector<8x8xf32> to vector<8x8xbf16>
    %95 = arith.truncf %93 : vector<8x8xf32> to vector<8x8xbf16>
    %cst_26 = arith.constant dense<0.000000e+00> : vector<8x8xf32>
    %96 = tpu.matmul %94, %95, %cst_26 {dimension_numbers = #tpu.dot_dimension_numbers<[1], [0], [0], [1], [0, 0, 1, 1], [], []>} : vector<8x8xbf16>, vector<8x8xbf16>, vector<8x8xf32> -> vector<8x8xf32>
    %97 = tpu.concatenate %36, %56, %76, %96 in 1 : vector<8x8xf32>, vector<8x8xf32>, vector<8x8xf32>, vector<8x8xf32> -> vector<8x32xf32>
    %c0_27 = arith.constant 0 : index
    %c0_28 = arith.constant 0 : index
    %98 = vector.load %arg6[%c0_27, %c0_28] : memref<32x32xbf16, #tpu.memory_space<vmem>>, vector<32x32xbf16>
    %99 = arith.truncf %97 : vector<8x32xf32> to vector<8x32xbf16>
    %cst_29 = arith.constant dense<0.000000e+00> : vector<8x32xf32>
    %100 = tpu.matmul %99, %98, %cst_29 {dimension_numbers = #tpu.dot_dimension_numbers<[1], [0], [0], [1], [0, 0, 1, 1], [], []>} : vector<8x32xbf16>, vector<32x32xbf16>, vector<8x32xf32> -> vector<8x32xf32>
    %c0_30 = arith.constant 0 : index
    %c0_31 = arith.constant 0 : index
    %101 = vector.load %arg7[%c0_30, %c0_31] : memref<1x32xf32, #tpu.memory_space<vmem>>, vector<1x32xf32>
    %102 = vector.broadcast %101 : vector<1x32xf32> to vector<8x32xf32>
    %103 = arith.addf %100, %102 : vector<8x32xf32>
    %104 = arith.addf %2, %103 : vector<8x32xf32>
    %c0_32 = arith.constant 0 : index
    %c0_33 = arith.constant 0 : index
    %105 = vector.load %arg12[%c0_32, %c0_33] : memref<1x32xf32, #tpu.memory_space<vmem>>, vector<1x32xf32>
    %c0_34 = arith.constant 0 : index
    %c0_35 = arith.constant 0 : index
    %106 = vector.load %arg13[%c0_34, %c0_35] : memref<1x32xf32, #tpu.memory_space<vmem>>, vector<1x32xf32>
    %cst_36 = arith.constant dense<0.000000e+00> : vector<8xf32>
    %107 = vector.multi_reduction <add>, %104, %cst_36 [1] : vector<8x32xf32> to vector<8xf32>
    %108 = vector.shape_cast %107 : vector<8xf32> to vector<8x1xf32>
    %cst_37 = arith.constant 3.200000e+01 : f32
    %109 = vector.broadcast %cst_37 : f32 to vector<8x1xf32>
    %110 = arith.divf %108, %109 : vector<8x1xf32>
    %111 = vector.broadcast %110 : vector<8x1xf32> to vector<8x32xf32>
    %112 = arith.subf %104, %111 : vector<8x32xf32>
    %113 = arith.mulf %112, %112 : vector<8x32xf32>
    %cst_38 = arith.constant dense<0.000000e+00> : vector<8xf32>
    %114 = vector.multi_reduction <add>, %113, %cst_38 [1] : vector<8x32xf32> to vector<8xf32>
    %115 = vector.shape_cast %114 : vector<8xf32> to vector<8x1xf32>
    %cst_39 = arith.constant 3.200000e+01 : f32
    %116 = vector.broadcast %cst_39 : f32 to vector<8x1xf32>
    %117 = arith.divf %115, %116 : vector<8x1xf32>
    %118 = vector.broadcast %110 : vector<8x1xf32> to vector<8x32xf32>
    %119 = arith.subf %104, %118 : vector<8x32xf32>
    %cst_40 = arith.constant 9.99999974E-6 : f32
    %120 = vector.broadcast %cst_40 : f32 to vector<8x1xf32>
    %121 = arith.addf %117, %120 : vector<8x1xf32>
    %122 = math.rsqrt %121 : vector<8x1xf32>
    %123 = vector.broadcast %122 : vector<8x1xf32> to vector<8x32xf32>
    %124 = arith.mulf %119, %123 : vector<8x32xf32>
    %125 = vector.broadcast %105 : vector<1x32xf32> to vector<8x32xf32>
    %126 = arith.mulf %124, %125 : vector<8x32xf32>
    %127 = vector.broadcast %106 : vector<1x32xf32> to vector<8x32xf32>
    %128 = arith.addf %126, %127 : vector<8x32xf32>
    %c0_41 = arith.constant 0 : index
    %c0_42 = arith.constant 0 : index
    %129 = vector.load %arg8[%c0_41, %c0_42] : memref<32x64xbf16, #tpu.memory_space<vmem>>, vector<32x64xbf16>
    %130 = arith.truncf %128 : vector<8x32xf32> to vector<8x32xbf16>
    %cst_43 = arith.constant dense<0.000000e+00> : vector<8x64xf32>
    %131 = tpu.matmul %130, %129, %cst_43 {dimension_numbers = #tpu.dot_dimension_numbers<[1], [0], [0], [1], [0, 0, 1, 1], [], []>} : vector<8x32xbf16>, vector<32x64xbf16>, vector<8x64xf32> -> vector<8x64xf32>
    %c0_44 = arith.constant 0 : index
    %c0_45 = arith.constant 0 : index
    %132 = vector.load %arg9[%c0_44, %c0_45] : memref<1x64xf32, #tpu.memory_space<vmem>>, vector<1x64xf32>
    %133 = vector.broadcast %132 : vector<1x64xf32> to vector<8x64xf32>
    %134 = arith.addf %131, %133 : vector<8x64xf32>
    %cst_46 = arith.constant 5.000000e-01 : f32
    %135 = vector.broadcast %cst_46 : f32 to vector<8x64xf32>
    %136 = arith.mulf %135, %134 : vector<8x64xf32>
    %cst_47 = arith.constant 0.707106769 : f32
    %137 = vector.broadcast %cst_47 : f32 to vector<8x64xf32>
    %138 = arith.mulf %134, %137 : vector<8x64xf32>
    %139 = math.absf %138 : vector<8x64xf32>
    %cst_48 = arith.constant 0.327591091 : f32
    %140 = vector.broadcast %cst_48 : f32 to vector<8x64xf32>
    %141 = arith.mulf %140, %139 : vector<8x64xf32>
    %cst_49 = arith.constant 1.000000e+00 : f32
    %142 = vector.broadcast %cst_49 : f32 to vector<8x64xf32>
    %143 = arith.addf %142, %141 : vector<8x64xf32>
    %144 = tpu.reciprocal %143 {approx = true} : vector<8x64xf32> -> vector<8x64xf32>
    %cst_50 = arith.constant 1.06140542 : f32
    %145 = vector.broadcast %cst_50 : f32 to vector<8x64xf32>
    %146 = arith.mulf %144, %145 : vector<8x64xf32>
    %cst_51 = arith.constant -1.45315206 : f32
    %147 = vector.broadcast %cst_51 : f32 to vector<8x64xf32>
    %148 = arith.addf %147, %146 : vector<8x64xf32>
    %149 = arith.mulf %144, %148 : vector<8x64xf32>
    %cst_52 = arith.constant 1.42141378 : f32
    %150 = vector.broadcast %cst_52 : f32 to vector<8x64xf32>
    %151 = arith.addf %150, %149 : vector<8x64xf32>
    %152 = arith.mulf %144, %151 : vector<8x64xf32>
    %cst_53 = arith.constant -0.284496725 : f32
    %153 = vector.broadcast %cst_53 : f32 to vector<8x64xf32>
    %154 = arith.addf %153, %152 : vector<8x64xf32>
    %155 = arith.mulf %144, %154 : vector<8x64xf32>
    %cst_54 = arith.constant 0.254829586 : f32
    %156 = vector.broadcast %cst_54 : f32 to vector<8x64xf32>
    %157 = arith.addf %156, %155 : vector<8x64xf32>
    %158 = arith.mulf %144, %157 : vector<8x64xf32>
    %cst_55 = arith.constant 0.000000e+00 : f32
    %159 = vector.broadcast %cst_55 : f32 to vector<8x64xf32>
    %160 = arith.subf %159, %139 : vector<8x64xf32>
    %161 = arith.mulf %160, %139 : vector<8x64xf32>
    %162 = math.exp %161 : vector<8x64xf32>
    %163 = arith.mulf %158, %162 : vector<8x64xf32>
    %cst_56 = arith.constant 1.000000e+00 : f32
    %164 = vector.broadcast %cst_56 : f32 to vector<8x64xf32>
    %165 = arith.subf %164, %163 : vector<8x64xf32>
    %cst_57 = arith.constant 0.000000e+00 : f32
    %166 = vector.broadcast %cst_57 : f32 to vector<8x64xf32>
    %167 = arith.cmpf oge, %138, %166 : vector<8x64xf32>
    %cst_58 = arith.constant 0.000000e+00 : f32
    %168 = vector.broadcast %cst_58 : f32 to vector<8x64xf32>
    %169 = arith.subf %168, %165 : vector<8x64xf32>
    %170 = arith.select %167, %165, %169 : vector<8x64xi1>, vector<8x64xf32>
    %cst_59 = arith.constant 1.000000e+00 : f32
    %171 = vector.broadcast %cst_59 : f32 to vector<8x64xf32>
    %172 = arith.addf %171, %170 : vector<8x64xf32>
    %173 = arith.mulf %136, %172 : vector<8x64xf32>
    %c0_60 = arith.constant 0 : index
    %c0_61 = arith.constant 0 : index
    %174 = vector.load %arg10[%c0_60, %c0_61] : memref<64x32xbf16, #tpu.memory_space<vmem>>, vector<64x32xbf16>
    %175 = arith.truncf %173 : vector<8x64xf32> to vector<8x64xbf16>
    %cst_62 = arith.constant dense<0.000000e+00> : vector<8x32xf32>
    %176 = tpu.matmul %175, %174, %cst_62 {dimension_numbers = #tpu.dot_dimension_numbers<[1], [0], [0], [1], [0, 0, 1, 1], [], []>} : vector<8x64xbf16>, vector<64x32xbf16>, vector<8x32xf32> -> vector<8x32xf32>
    %c0_63 = arith.constant 0 : index
    %c0_64 = arith.constant 0 : index
    %177 = vector.load %arg11[%c0_63, %c0_64] : memref<1x32xf32, #tpu.memory_space<vmem>>, vector<1x32xf32>
    %178 = vector.broadcast %177 : vector<1x32xf32> to vector<8x32xf32>
    %179 = arith.addf %176, %178 : vector<8x32xf32>
    %180 = arith.addf %128, %179 : vector<8x32xf32>
    %c0_65 = arith.constant 0 : index
    %c0_66 = arith.constant 0 : index
    %181 = vector.load %arg14[%c0_65, %c0_66] : memref<1x32xf32, #tpu.memory_space<vmem>>, vector<1x32xf32>
    %c0_67 = arith.constant 0 : index
    %c0_68 = arith.constant 0 : index
    %182 = vector.load %arg15[%c0_67, %c0_68] : memref<1x32xf32, #tpu.memory_space<vmem>>, vector<1x32xf32>
    %cst_69 = arith.constant dense<0.000000e+00> : vector<8xf32>
    %183 = vector.multi_reduction <add>, %180, %cst_69 [1] : vector<8x32xf32> to vector<8xf32>
    %184 = vector.shape_cast %183 : vector<8xf32> to vector<8x1xf32>
    %cst_70 = arith.constant 3.200000e+01 : f32
    %185 = vector.broadcast %cst_70 : f32 to vector<8x1xf32>
    %186 = arith.divf %184, %185 : vector<8x1xf32>
    %187 = vector.broadcast %186 : vector<8x1xf32> to vector<8x32xf32>
    %188 = arith.subf %180, %187 : vector<8x32xf32>
    %189 = arith.mulf %188, %188 : vector<8x32xf32>
    %cst_71 = arith.constant dense<0.000000e+00> : vector<8xf32>
    %190 = vector.multi_reduction <add>, %189, %cst_71 [1] : vector<8x32xf32> to vector<8xf32>
    %191 = vector.shape_cast %190 : vector<8xf32> to vector<8x1xf32>
    %cst_72 = arith.constant 3.200000e+01 : f32
    %192 = vector.broadcast %cst_72 : f32 to vector<8x1xf32>
    %193 = arith.divf %191, %192 : vector<8x1xf32>
    %194 = vector.broadcast %186 : vector<8x1xf32> to vector<8x32xf32>
    %195 = arith.subf %180, %194 : vector<8x32xf32>
    %cst_73 = arith.constant 9.99999974E-6 : f32
    %196 = vector.broadcast %cst_73 : f32 to vector<8x1xf32>
    %197 = arith.addf %193, %196 : vector<8x1xf32>
    %198 = math.rsqrt %197 : vector<8x1xf32>
    %199 = vector.broadcast %198 : vector<8x1xf32> to vector<8x32xf32>
    %200 = arith.mulf %195, %199 : vector<8x32xf32>
    %201 = vector.broadcast %181 : vector<1x32xf32> to vector<8x32xf32>
    %202 = arith.mulf %200, %201 : vector<8x32xf32>
    %203 = vector.broadcast %182 : vector<1x32xf32> to vector<8x32xf32>
    %204 = arith.addf %202, %203 : vector<8x32xf32>
    %205 = vector.shape_cast %204 : vector<8x32xf32> to vector<1x8x32xf32>
    %206 = arith.truncf %205 : vector<1x8x32xf32> to vector<1x8x32xbf16>
    %c0_74 = arith.constant 0 : index
    %c0_75 = arith.constant 0 : index
    %c0_76 = arith.constant 0 : index
    %207 = vector.load %arg18[%c0_74, %c0_75, %c0_76] : memref<1x8x32xbf16, #tpu.memory_space<vmem>>, vector<1x8x32xbf16>
    tpu.vector_store %arg18[%c0_74, %c0_75, %c0_76], %206 {strides = array<i32>} : memref<1x8x32xbf16, #tpu.memory_space<vmem>>, vector<1x8x32xbf16>,
    return
  }
  func.func @transform_0(%arg0: i32) -> (i32, i32, i32) {
    %c0_i32 = arith.constant 0 : i32
    %c0_i32_0 = arith.constant 0 : i32
    %c0_i32_1 = arith.constant 0 : i32
    return %arg0, %c0_i32, %c0_i32_0 : i32, i32, i32
  }
  func.func @transform_1(%arg0: i32) -> (i32, i32) {
    %c0_i32 = arith.constant 0 : i32
    %c0_i32_0 = arith.constant 0 : i32
    %c0_i32_1 = arith.constant 0 : i32
    return %c0_i32, %c0_i32_0 : i32, i32
  }
  func.func @transform_2(%arg0: i32) -> (i32, i32, i32) {
    %c0_i32 = arith.constant 0 : i32
    %c0_i32_0 = arith.constant 0 : i32
    %c0_i32_1 = arith.constant 0 : i32
    return %arg0, %c0_i32, %c0_i32_0 : i32, i32, i32
  }
  func.func @transform_3(%arg0: i32) -> (i32, i32) {
    %c0_i32 = arith.constant 0 : i32
    %c0_i32_0 = arith.constant 0 : i32
    %c0_i32_1 = arith.constant 0 : i32
    return %c0_i32, %c0_i32_0 : i32, i32
  }
  func.func @transform_4(%arg0: i32) -> (i32, i32) {
    %c0_i32 = arith.constant 0 : i32
    %c0_i32_0 = arith.constant 0 : i32
    %c0_i32_1 = arith.constant 0 : i32
    return %c0_i32, %c0_i32_0 : i32, i32
  }
  func.func @transform_5(%arg0: i32) -> (i32, i32) {
    %c0_i32 = arith.constant 0 : i32
    %c0_i32_0 = arith.constant 0 : i32
    %c0_i32_1 = arith.constant 0 : i32
    return %c0_i32, %c0_i32_0 : i32, i32
  }
  func.func @transform_6(%arg0: i32) -> (i32, i32) {
    %c0_i32 = arith.constant 0 : i32
    %c0_i32_0 = arith.constant 0 : i32
    %c0_i32_1 = arith.constant 0 : i32
    return %c0_i32, %c0_i32_0 : i32, i32
  }
  func.func @transform_7(%arg0: i32) -> (i32, i32) {
    %c0_i32 = arith.constant 0 : i32
    %c0_i32_0 = arith.constant 0 : i32
    %c0_i32_1 = arith.constant 0 : i32
    return %c0_i32, %c0_i32_0 : i32, i32
  }
  func.func @transform_8(%arg0: i32) -> (i32, i32) {
    %c0_i32 = arith.constant 0 : i32
    %c0_i32_0 = arith.constant 0 : i32
    %c0_i32_1 = arith.constant 0 : i32
    return %c0_i32, %c0_i32_0 : i32, i32
  }
  func.func @transform_9(%arg0: i32) -> (i32, i32) {
    %c0_i32 = arith.constant 0 : i32
    %c0_i32_0 = arith.constant 0 : i32
    %c0_i32_1 = arith.constant 0 : i32
    return %c0_i32, %c0_i32_0 : i32, i32
  }
  func.func @transform_10(%arg0: i32) -> (i32, i32) {
    %c0_i32 = arith.constant 0 : i32
    %c0_i32_0 = arith.constant 0 : i32
    %c0_i32_1 = arith.constant 0 : i32
    return %c0_i32, %c0_i32_0 : i32, i32
  }
  func.func @transform_11(%arg0: i32) -> (i32, i32) {
    %c0_i32 = arith.constant 0 : i32
    %c0_i32_0 = arith.constant 0 : i32
    %c0_i32_1 = arith.constant 0 : i32
    return %c0_i32, %c0_i32_0 : i32, i32
  }
  func.func @transform_12(%arg0: i32) -> (i32, i32) {
    %c0_i32 = arith.constant 0 : i32
    %c0_i32_0 = arith.constant 0 : i32
    %c0_i32_1 = arith.constant 0 : i32
    return %c0_i32, %c0_i32_0 : i32, i32
  }
  func.func @transform_13(%arg0: i32) -> (i32, i32) {
    %c0_i32 = arith.constant 0 : i32
    %c0_i32_0 = arith.constant 0 : i32
    %c0_i32_1 = arith.constant 0 : i32
    return %c0_i32, %c0_i32_0 : i32, i32
  }
  func.func @transform_14(%arg0: i32) -> (i32, i32) {
    %c0_i32 = arith.constant 0 : i32
    %c0_i32_0 = arith.constant 0 : i32
    %c0_i32_1 = arith.constant 0 : i32
    return %c0_i32, %c0_i32_0 : i32, i32
  }
  func.func @transform_15(%arg0: i32) -> (i32, i32) {
    %c0_i32 = arith.constant 0 : i32
    %c0_i32_0 = arith.constant 0 : i32
    %c0_i32_1 = arith.constant 0 : i32
    return %c0_i32, %c0_i32_0 : i32, i32
  }
  func.func @transform_16(%arg0: i32) -> (i32, i32) {
    %c0_i32 = arith.constant 0 : i32
    %c0_i32_0 = arith.constant 0 : i32
    %c0_i32_1 = arith.constant 0 : i32
    return %c0_i32, %c0_i32_0 : i32, i32
  }
  func.func @transform_17(%arg0: i32) -> (i32, i32, i32) {
    %c0_i32 = arith.constant 0 : i32
    %c0_i32_0 = arith.constant 0 : i32
    %c0_i32_1 = arith.constant 0 : i32
    return %arg0, %c0_i32, %c0_i32_0 : i32, i32, i32
  }
}

module attributes {stable_mosaic.version = 11 : i64} {
  func.func @_encoder_layer_kernel(%arg0: i32, %arg1: memref<1x8x32xbf16, #tpu.memory_space<vmem>>, %arg2: memref<8x8xf32, #tpu.memory_space<vmem>>, %arg3: memref<1x1x8xf32, #tpu.memory_space<vmem>>, %arg4: memref<32x96xbf16, #tpu.memory_space<vmem>>, %arg5: memref<1x96xf32, #tpu.memory_space<vmem>>, %arg6: memref<32x32xbf16, #tpu.memory_space<vmem>>, %arg7: memref<1x32xf32, #tpu.memory_space<vmem>>, %arg8: memref<32x64xbf16, #tpu.memory_space<vmem>>, %arg9: memref<1x64xf32, #tpu.memory_space<vmem>>, %arg10: memref<64x32xbf16, #tpu.memory_space<vmem>>, %arg11: memref<1x32xf32, #tpu.memory_space<vmem>>, %arg12: memref<1x32xf32, #tpu.memory_space<vmem>>, %arg13: memref<1x32xf32, #tpu.memory_space<vmem>>, %arg14: memref<1x32xf32, #tpu.memory_space<vmem>>, %arg15: memref<1x32xf32, #tpu.memory_space<vmem>>, %arg16: memref<1x32xf32, #tpu.memory_space<vmem>>, %arg17: memref<1x32xf32, #tpu.memory_space<vmem>>, %arg18: memref<1x8x32xbf16, #tpu.memory_space<vmem>>) attributes {dimension_semantics = [#tpu.dimension_semantics<parallel>], iteration_bounds = array<i64: 2>, scalar_prefetch = 0 : i64, scratch_operands = 0 : i64, tpu.core_type = #tpu.core_type<tc>, window_params = [{transform_indices = @transform_0, window_bounds = array<i64: 1, 8, 32>}, {pipeline_mode = #tpu.pipeline_mode<synchronous>, transform_indices = @transform_1, window_bounds = array<i64: 8, 8>}, {transform_indices = @transform_2, window_bounds = array<i64: 1, 1, 8>}, {pipeline_mode = #tpu.pipeline_mode<synchronous>, transform_indices = @transform_3, window_bounds = array<i64: 32, 96>}, {pipeline_mode = #tpu.pipeline_mode<synchronous>, transform_indices = @transform_4, window_bounds = array<i64: 1, 96>}, {pipeline_mode = #tpu.pipeline_mode<synchronous>, transform_indices = @transform_5, window_bounds = array<i64: 32, 32>}, {pipeline_mode = #tpu.pipeline_mode<synchronous>, transform_indices = @transform_6, window_bounds = array<i64: 1, 32>}, {pipeline_mode = #tpu.pipeline_mode<synchronous>, transform_indices = @transform_7, window_bounds = array<i64: 32, 64>}, {pipeline_mode = #tpu.pipeline_mode<synchronous>, transform_indices = @transform_8, window_bounds = array<i64: 1, 64>}, {pipeline_mode = #tpu.pipeline_mode<synchronous>, transform_indices = @transform_9, window_bounds = array<i64: 64, 32>}, {pipeline_mode = #tpu.pipeline_mode<synchronous>, transform_indices = @transform_10, window_bounds = array<i64: 1, 32>}, {pipeline_mode = #tpu.pipeline_mode<synchronous>, transform_indices = @transform_11, window_bounds = array<i64: 1, 32>}, {pipeline_mode = #tpu.pipeline_mode<synchronous>, transform_indices = @transform_12, window_bounds = array<i64: 1, 32>}, {pipeline_mode = #tpu.pipeline_mode<synchronous>, transform_indices = @transform_13, window_bounds = array<i64: 1, 32>}, {pipeline_mode = #tpu.pipeline_mode<synchronous>, transform_indices = @transform_14, window_bounds = array<i64: 1, 32>}, {pipeline_mode = #tpu.pipeline_mode<synchronous>, transform_indices = @transform_15, window_bounds = array<i64: 1, 32>}, {pipeline_mode = #tpu.pipeline_mode<synchronous>, transform_indices = @transform_16, window_bounds = array<i64: 1, 32>}, {transform_indices = @transform_17, window_bounds = array<i64: 1, 8, 32>}]} {
    %c0 = arith.constant 0 : index
    %c0_0 = arith.constant 0 : index
    %c0_1 = arith.constant 0 : index
    %0 = vector.load %arg1[%c0, %c0_0, %c0_1] : memref<1x8x32xbf16, #tpu.memory_space<vmem>>, vector<1x8x32xbf16>
    %1 = arith.extf %0 : vector<1x8x32xbf16> to vector<1x8x32xf32>
    %2 = vector.shape_cast %1 : vector<1x8x32xf32> to vector<8x32xf32>
    %c0_2 = arith.constant 0 : index
    %c0_3 = arith.constant 0 : index
    %3 = vector.load %arg2[%c0_2, %c0_3] : memref<8x8xf32, #tpu.memory_space<vmem>>, vector<8x8xf32>
    %c0_4 = arith.constant 0 : index
    %c0_5 = arith.constant 0 : index
    %c0_6 = arith.constant 0 : index
    %4 = vector.load %arg3[%c0_4, %c0_5, %c0_6] : memref<1x1x8xf32, #tpu.memory_space<vmem>>, vector<1x1x8xf32>
    %c0_7 = arith.constant 0 : index
    %c0_8 = arith.constant 0 : index
    %5 = vector.load %arg4[%c0_7, %c0_8] : memref<32x96xbf16, #tpu.memory_space<vmem>>, vector<32x96xbf16>
    %6 = arith.truncf %2 : vector<8x32xf32> to vector<8x32xbf16>
    %cst = arith.constant dense<0.000000e+00> : vector<8x96xf32>
    %7 = tpu.matmul %6, %5, %cst {dimension_numbers = #tpu.dot_dimension_numbers<[1], [0], [0], [1], [0, 0, 1, 1], [], []>} : vector<8x32xbf16>, vector<32x96xbf16>, vector<8x96xf32> -> vector<8x96xf32>
    %c0_9 = arith.constant 0 : index
    %c0_10 = arith.constant 0 : index
    %8 = vector.load %arg5[%c0_9, %c0_10] : memref<1x96xf32, #tpu.memory_space<vmem>>, vector<1x96xf32>
    %9 = vector.broadcast %8 : vector<1x96xf32> to vector<8x96xf32>
    %10 = arith.addf %7, %9 : vector<8x96xf32>
    %11 = vector.extract_strided_slice %10 {offsets = [0, 0], sizes = [8, 32], strides = [1, 1]} : vector<8x96xf32> to vector<8x32xf32>
    %12 = vector.extract_strided_slice %10 {offsets = [0, 32], sizes = [8, 32], strides = [1, 1]} : vector<8x96xf32> to vector<8x32xf32>
    %13 = vector.extract_strided_slice %10 {offsets = [0, 64], sizes = [8, 32], strides = [1, 1]} : vector<8x96xf32> to vector<8x32xf32>
    %14 = vector.shape_cast %4 : vector<1x1x8xf32> to vector<1x8xf32>
    %15 = vector.broadcast %14 : vector<1x8xf32> to vector<8x8xf32>
    %16 = arith.addf %3, %15 : vector<8x8xf32>
    %17 = vector.extract_strided_slice %11 {offsets = [0, 0], sizes = [8, 8], strides = [1, 1]} : vector<8x32xf32> to vector<8x8xf32>
    %18 = vector.extract_strided_slice %12 {offsets = [0, 0], sizes = [8, 8], strides = [1, 1]} : vector<8x32xf32> to vector<8x8xf32>
    %19 = arith.truncf %17 : vector<8x8xf32> to vector<8x8xbf16>
    %20 = arith.truncf %18 : vector<8x8xf32> to vector<8x8xbf16>
    %cst_11 = arith.constant dense<0.000000e+00> : vector<8x8xf32>
    %21 = tpu.matmul %19, %20, %cst_11 {dimension_numbers = #tpu.dot_dimension_numbers<[1], [1], [0], [0], [0, 0, 1, 0], [], []>} : vector<8x8xbf16>, vector<8x8xbf16>, vector<8x8xf32> -> vector<8x8xf32>
    %22 = arith.addf %21, %16 : vector<8x8xf32>
    %cst_12 = arith.constant dense<0xFF800000> : vector<8xf32>
    %23 = vector.multi_reduction <maximumf>, %22, %cst_12 [1] : vector<8x8xf32> to vector<8xf32>
    %24 = vector.shape_cast %23 : vector<8xf32> to vector<8x1xf32>
    %25 = vector.broadcast %24 : vector<8x1xf32> to vector<8x8xf32>
    %26 = arith.subf %22, %25 : vector<8x8xf32>
    %27 = math.exp %26 : vector<8x8xf32>
    %cst_13 = arith.constant dense<0.000000e+00> : vector<8xf32>
    %28 = vector.multi_reduction <add>, %27, %cst_13 [1] : vector<8x8xf32> to vector<8xf32>
    %29 = vector.shape_cast %28 : vector<8xf32> to vector<8x1xf32>
    %30 = tpu.reciprocal %29 {approx = true} : vector<8x1xf32> -> vector<8x1xf32>
    %31 = vector.broadcast %30 : vector<8x1xf32> to vector<8x8xf32>
    %32 = arith.mulf %27, %31 : vector<8x8xf32>
    %33 = vector.extract_strided_slice %13 {offsets = [0, 0], sizes = [8, 8], strides = [1, 1]} : vector<8x32xf32> to vector<8x8xf32>
    %34 = arith.truncf %32 : vector<8x8xf32> to vector<8x8xbf16>
    %35 = arith.truncf %33 : vector<8x8xf32> to vector<8x8xbf16>
    %cst_14 = arith.constant dense<0.000000e+00> : vector<8x8xf32>
    %36 = tpu.matmul %34, %35, %cst_14 {dimension_numbers = #tpu.dot_dimension_numbers<[1], [0], [0], [1], [0, 0, 1, 1], [], []>} : vector<8x8xbf16>, vector<8x8xbf16>, vector<8x8xf32> -> vector<8x8xf32>
    %37 = vector.extract_strided_slice %11 {offsets = [0, 8], sizes = [8, 8], strides = [1, 1]} : vector<8x32xf32> to vector<8x8xf32>
    %38 = vector.extract_strided_slice %12 {offsets = [0, 8], sizes = [8, 8], strides = [1, 1]} : vector<8x32xf32> to vector<8x8xf32>
    %39 = arith.truncf %37 : vector<8x8xf32> to vector<8x8xbf16>
    %40 = arith.truncf %38 : vector<8x8xf32> to vector<8x8xbf16>
    %cst_15 = arith.constant dense<0.000000e+00> : vector<8x8xf32>
    %41 = tpu.matmul %39, %40, %cst_15 {dimension_numbers = #tpu.dot_dimension_numbers<[1], [1], [0], [0], [0, 0, 1, 0], [], []>} : vector<8x8xbf16>, vector<8x8xbf16>, vector<8x8xf32> -> vector<8x8xf32>
    %42 = arith.addf %41, %16 : vector<8x8xf32>
    %cst_16 = arith.constant dense<0xFF800000> : vector<8xf32>
    %43 = vector.multi_reduction <maximumf>, %42, %cst_16 [1] : vector<8x8xf32> to vector<8xf32>
    %44 = vector.shape_cast %43 : vector<8xf32> to vector<8x1xf32>
    %45 = vector.broadcast %44 : vector<8x1xf32> to vector<8x8xf32>
    %46 = arith.subf %42, %45 : vector<8x8xf32>
    %47 = math.exp %46 : vector<8x8xf32>
    %cst_17 = arith.constant dense<0.000000e+00> : vector<8xf32>
    %48 = vector.multi_reduction <add>, %47, %cst_17 [1] : vector<8x8xf32> to vector<8xf32>
    %49 = vector.shape_cast %48 : vector<8xf32> to vector<8x1xf32>
    %50 = tpu.reciprocal %49 {approx = true} : vector<8x1xf32> -> vector<8x1xf32>
    %51 = vector.broadcast %50 : vector<8x1xf32> to vector<8x8xf32>
    %52 = arith.mulf %47, %51 : vector<8x8xf32>
    %53 = vector.extract_strided_slice %13 {offsets = [0, 8], sizes = [8, 8], strides = [1, 1]} : vector<8x32xf32> to vector<8x8xf32>
    %54 = arith.truncf %52 : vector<8x8xf32> to vector<8x8xbf16>
    %55 = arith.truncf %53 : vector<8x8xf32> to vector<8x8xbf16>
    %cst_18 = arith.constant dense<0.000000e+00> : vector<8x8xf32>
    %56 = tpu.matmul %54, %55, %cst_18 {dimension_numbers = #tpu.dot_dimension_numbers<[1], [0], [0], [1], [0, 0, 1, 1], [], []>} : vector<8x8xbf16>, vector<8x8xbf16>, vector<8x8xf32> -> vector<8x8xf32>
    %57 = vector.extract_strided_slice %11 {offsets = [0, 16], sizes = [8, 8], strides = [1, 1]} : vector<8x32xf32> to vector<8x8xf32>
    %58 = vector.extract_strided_slice %12 {offsets = [0, 16], sizes = [8, 8], strides = [1, 1]} : vector<8x32xf32> to vector<8x8xf32>
    %59 = arith.truncf %57 : vector<8x8xf32> to vector<8x8xbf16>
    %60 = arith.truncf %58 : vector<8x8xf32> to vector<8x8xbf16>
    %cst_19 = arith.constant dense<0.000000e+00> : vector<8x8xf32>
    %61 = tpu.matmul %59, %60, %cst_19 {dimension_numbers = #tpu.dot_dimension_numbers<[1], [1], [0], [0], [0, 0, 1, 0], [], []>} : vector<8x8xbf16>, vector<8x8xbf16>, vector<8x8xf32> -> vector<8x8xf32>
    %62 = arith.addf %61, %16 : vector<8x8xf32>
    %cst_20 = arith.constant dense<0xFF800000> : vector<8xf32>
    %63 = vector.multi_reduction <maximumf>, %62, %cst_20 [1] : vector<8x8xf32> to vector<8xf32>
    %64 = vector.shape_cast %63 : vector<8xf32> to vector<8x1xf32>
    %65 = vector.broadcast %64 : vector<8x1xf32> to vector<8x8xf32>
    %66 = arith.subf %62, %65 : vector<8x8xf32>
    %67 = math.exp %66 : vector<8x8xf32>
    %cst_21 = arith.constant dense<0.000000e+00> : vector<8xf32>
    %68 = vector.multi_reduction <add>, %67, %cst_21 [1] : vector<8x8xf32> to vector<8xf32>
    %69 = vector.shape_cast %68 : vector<8xf32> to vector<8x1xf32>
    %70 = tpu.reciprocal %69 {approx = true} : vector<8x1xf32> -> vector<8x1xf32>
    %71 = vector.broadcast %70 : vector<8x1xf32> to vector<8x8xf32>
    %72 = arith.mulf %67, %71 : vector<8x8xf32>
    %73 = vector.extract_strided_slice %13 {offsets = [0, 16], sizes = [8, 8], strides = [1, 1]} : vector<8x32xf32> to vector<8x8xf32>
    %74 = arith.truncf %72 : vector<8x8xf32> to vector<8x8xbf16>
    %75 = arith.truncf %73 : vector<8x8xf32> to vector<8x8xbf16>
    %cst_22 = arith.constant dense<0.000000e+00> : vector<8x8xf32>
    %76 = tpu.matmul %74, %75, %cst_22 {dimension_numbers = #tpu.dot_dimension_numbers<[1], [0], [0], [1], [0, 0, 1, 1], [], []>} : vector<8x8xbf16>, vector<8x8xbf16>, vector<8x8xf32> -> vector<8x8xf32>
    %77 = vector.extract_strided_slice %11 {offsets = [0, 24], sizes = [8, 8], strides = [1, 1]} : vector<8x32xf32> to vector<8x8xf32>
    %78 = vector.extract_strided_slice %12 {offsets = [0, 24], sizes = [8, 8], strides = [1, 1]} : vector<8x32xf32> to vector<8x8xf32>
    %79 = arith.truncf %77 : vector<8x8xf32> to vector<8x8xbf16>
    %80 = arith.truncf %78 : vector<8x8xf32> to vector<8x8xbf16>
    %cst_23 = arith.constant dense<0.000000e+00> : vector<8x8xf32>
    %81 = tpu.matmul %79, %80, %cst_23 {dimension_numbers = #tpu.dot_dimension_numbers<[1], [1], [0], [0], [0, 0, 1, 0], [], []>} : vector<8x8xbf16>, vector<8x8xbf16>, vector<8x8xf32> -> vector<8x8xf32>
    %82 = arith.addf %81, %16 : vector<8x8xf32>
    %cst_24 = arith.constant dense<0xFF800000> : vector<8xf32>
    %83 = vector.multi_reduction <maximumf>, %82, %cst_24 [1] : vector<8x8xf32> to vector<8xf32>
    %84 = vector.shape_cast %83 : vector<8xf32> to vector<8x1xf32>
    %85 = vector.broadcast %84 : vector<8x1xf32> to vector<8x8xf32>
    %86 = arith.subf %82, %85 : vector<8x8xf32>
    %87 = math.exp %86 : vector<8x8xf32>
    %cst_25 = arith.constant dense<0.000000e+00> : vector<8xf32>
    %88 = vector.multi_reduction <add>, %87, %cst_25 [1] : vector<8x8xf32> to vector<8xf32>
    %89 = vector.shape_cast %88 : vector<8xf32> to vector<8x1xf32>
    %90 = tpu.reciprocal %89 {approx = true} : vector<8x1xf32> -> vector<8x1xf32>
    %91 = vector.broadcast %90 : vector<8x1xf32> to vector<8x8xf32>
    %92 = arith.mulf %87, %91 : vector<8x8xf32>
    %93 = vector.extract_strided_slice %13 {offsets = [0, 24], sizes = [8, 8], strides = [1, 1]} : vector<8x32xf32> to vector<8x8xf32>
    %94 = arith.truncf %92 : vector<8x8xf32> to vector<8x8xbf16>
    %95 = arith.truncf %93 : vector<8x8xf32> to vector<8x8xbf16>
    %cst_26 = arith.constant dense<0.000000e+00> : vector<8x8xf32>
    %96 = tpu.matmul %94, %95, %cst_26 {dimension_numbers = #tpu.dot_dimension_numbers<[1], [0], [0], [1], [0, 0, 1, 1], [], []>} : vector<8x8xbf16>, vector<8x8xbf16>, vector<8x8xf32> -> vector<8x8xf32>
    %97 = tpu.concatenate %36, %56, %76, %96 in 1 : vector<8x8xf32>, vector<8x8xf32>, vector<8x8xf32>, vector<8x8xf32> -> vector<8x32xf32>
    %c0_27 = arith.constant 0 : index
    %c0_28 = arith.constant 0 : index
    %98 = vector.load %arg6[%c0_27, %c0_28] : memref<32x32xbf16, #tpu.memory_space<vmem>>, vector<32x32xbf16>
    %99 = arith.truncf %97 : vector<8x32xf32> to vector<8x32xbf16>
    %cst_29 = arith.constant dense<0.000000e+00> : vector<8x32xf32>
    %100 = tpu.matmul %99, %98, %cst_29 {dimension_numbers = #tpu.dot_dimension_numbers<[1], [0], [0], [1], [0, 0, 1, 1], [], []>} : vector<8x32xbf16>, vector<32x32xbf16>, vector<8x32xf32> -> vector<8x32xf32>
    %c0_30 = arith.constant 0 : index
    %c0_31 = arith.constant 0 : index
    %101 = vector.load %arg7[%c0_30, %c0_31] : memref<1x32xf32, #tpu.memory_space<vmem>>, vector<1x32xf32>
    %102 = vector.broadcast %101 : vector<1x32xf32> to vector<8x32xf32>
    %103 = arith.addf %100, %102 : vector<8x32xf32>
    %104 = arith.addf %2, %103 : vector<8x32xf32>
    %c0_32 = arith.constant 0 : index
    %c0_33 = arith.constant 0 : index
    %105 = vector.load %arg12[%c0_32, %c0_33] : memref<1x32xf32, #tpu.memory_space<vmem>>, vector<1x32xf32>
    %c0_34 = arith.constant 0 : index
    %c0_35 = arith.constant 0 : index
    %106 = vector.load %arg13[%c0_34, %c0_35] : memref<1x32xf32, #tpu.memory_space<vmem>>, vector<1x32xf32>
    %cst_36 = arith.constant dense<0.000000e+00> : vector<8xf32>
    %107 = vector.multi_reduction <add>, %104, %cst_36 [1] : vector<8x32xf32> to vector<8xf32>
    %108 = vector.shape_cast %107 : vector<8xf32> to vector<8x1xf32>
    %cst_37 = arith.constant 3.200000e+01 : f32
    %109 = vector.broadcast %cst_37 : f32 to vector<8x1xf32>
    %110 = arith.divf %108, %109 : vector<8x1xf32>
    %111 = vector.broadcast %110 : vector<8x1xf32> to vector<8x32xf32>
    %112 = arith.subf %104, %111 : vector<8x32xf32>
    %113 = arith.mulf %112, %112 : vector<8x32xf32>
    %cst_38 = arith.constant dense<0.000000e+00> : vector<8xf32>
    %114 = vector.multi_reduction <add>, %113, %cst_38 [1] : vector<8x32xf32> to vector<8xf32>
    %115 = vector.shape_cast %114 : vector<8xf32> to vector<8x1xf32>
    %cst_39 = arith.constant 3.200000e+01 : f32
    %116 = vector.broadcast %cst_39 : f32 to vector<8x1xf32>
    %117 = arith.divf %115, %116 : vector<8x1xf32>
    %118 = vector.broadcast %110 : vector<8x1xf32> to vector<8x32xf32>
    %119 = arith.subf %104, %118 : vector<8x32xf32>
    %cst_40 = arith.constant 9.99999974E-6 : f32
    %120 = vector.broadcast %cst_40 : f32 to vector<8x1xf32>
    %121 = arith.addf %117, %120 : vector<8x1xf32>
    %122 = math.rsqrt %121 : vector<8x1xf32>
    %123 = vector.broadcast %122 : vector<8x1xf32> to vector<8x32xf32>
    %124 = arith.mulf %119, %123 : vector<8x32xf32>
    %125 = vector.broadcast %105 : vector<1x32xf32> to vector<8x32xf32>
    %126 = arith.mulf %124, %125 : vector<8x32xf32>
    %127 = vector.broadcast %106 : vector<1x32xf32> to vector<8x32xf32>
    %128 = arith.addf %126, %127 : vector<8x32xf32>
    %c0_41 = arith.constant 0 : index
    %c0_42 = arith.constant 0 : index
    %129 = vector.load %arg8[%c0_41, %c0_42] : memref<32x64xbf16, #tpu.memory_space<vmem>>, vector<32x64xbf16>
    %130 = arith.truncf %128 : vector<8x32xf32> to vector<8x32xbf16>
    %cst_43 = arith.constant dense<0.000000e+00> : vector<8x64xf32>
    %131 = tpu.matmul %130, %129, %cst_43 {dimension_numbers = #tpu.dot_dimension_numbers<[1], [0], [0], [1], [0, 0, 1, 1], [], []>} : vector<8x32xbf16>, vector<32x64xbf16>, vector<8x64xf32> -> vector<8x64xf32>
    %c0_44 = arith.constant 0 : index
    %c0_45 = arith.constant 0 : index
    %132 = vector.load %arg9[%c0_44, %c0_45] : memref<1x64xf32, #tpu.memory_space<vmem>>, vector<1x64xf32>
    %133 = vector.broadcast %132 : vector<1x64xf32> to vector<8x64xf32>
    %134 = arith.addf %131, %133 : vector<8x64xf32>
    %cst_46 = arith.constant 5.000000e-01 : f32
    %135 = vector.broadcast %cst_46 : f32 to vector<8x64xf32>
    %136 = arith.mulf %135, %134 : vector<8x64xf32>
    %cst_47 = arith.constant 0.707106769 : f32
    %137 = vector.broadcast %cst_47 : f32 to vector<8x64xf32>
    %138 = arith.mulf %134, %137 : vector<8x64xf32>
    %139 = math.absf %138 : vector<8x64xf32>
    %cst_48 = arith.constant 0.327591091 : f32
    %140 = vector.broadcast %cst_48 : f32 to vector<8x64xf32>
    %141 = arith.mulf %140, %139 : vector<8x64xf32>
    %cst_49 = arith.constant 1.000000e+00 : f32
    %142 = vector.broadcast %cst_49 : f32 to vector<8x64xf32>
    %143 = arith.addf %142, %141 : vector<8x64xf32>
    %144 = tpu.reciprocal %143 {approx = true} : vector<8x64xf32> -> vector<8x64xf32>
    %cst_50 = arith.constant 1.06140542 : f32
    %145 = vector.broadcast %cst_50 : f32 to vector<8x64xf32>
    %146 = arith.mulf %144, %145 : vector<8x64xf32>
    %cst_51 = arith.constant -1.45315206 : f32
    %147 = vector.broadcast %cst_51 : f32 to vector<8x64xf32>
    %148 = arith.addf %147, %146 : vector<8x64xf32>
    %149 = arith.mulf %144, %148 : vector<8x64xf32>
    %cst_52 = arith.constant 1.42141378 : f32
    %150 = vector.broadcast %cst_52 : f32 to vector<8x64xf32>
    %151 = arith.addf %150, %149 : vector<8x64xf32>
    %152 = arith.mulf %144, %151 : vector<8x64xf32>
    %cst_53 = arith.constant -0.284496725 : f32
    %153 = vector.broadcast %cst_53 : f32 to vector<8x64xf32>
    %154 = arith.addf %153, %152 : vector<8x64xf32>
    %155 = arith.mulf %144, %154 : vector<8x64xf32>
    %cst_54 = arith.constant 0.254829586 : f32
    %156 = vector.broadcast %cst_54 : f32 to vector<8x64xf32>
    %157 = arith.addf %156, %155 : vector<8x64xf32>
    %158 = arith.mulf %144, %157 : vector<8x64xf32>
    %cst_55 = arith.constant 0.000000e+00 : f32
    %159 = vector.broadcast %cst_55 : f32 to vector<8x64xf32>
    %160 = arith.subf %159, %139 : vector<8x64xf32>
    %161 = arith.mulf %160, %139 : vector<8x64xf32>
    %162 = math.exp %161 : vector<8x64xf32>
    %163 = arith.mulf %158, %162 : vector<8x64xf32>
    %cst_56 = arith.constant 1.000000e+00 : f32
    %164 = vector.broadcast %cst_56 : f32 to vector<8x64xf32>
    %165 = arith.subf %164, %163 : vector<8x64xf32>
    %cst_57 = arith.constant 0.000000e+00 : f32
    %166 = vector.broadcast %cst_57 : f32 to vector<8x64xf32>
    %167 = arith.cmpf oge, %138, %166 : vector<8x64xf32>
    %cst_58 = arith.constant 0.000000e+00 : f32
    %168 = vector.broadcast %cst_58 : f32 to vector<8x64xf32>
    %169 = arith.subf %168, %165 : vector<8x64xf32>
    %170 = arith.select %167, %165, %169 : vector<8x64xi1>, vector<8x64xf32>
    %cst_59 = arith.constant 1.000000e+00 : f32
    %171 = vector.broadcast %cst_59 : f32 to vector<8x64xf32>
    %172 = arith.addf %171, %170 : vector<8x64xf32>
    %173 = arith.mulf %136, %172 : vector<8x64xf32>
    %c0_60 = arith.constant 0 : index
    %c0_61 = arith.constant 0 : index
    %174 = vector.load %arg10[%c0_60, %c0_61] : memref<64x32xbf16, #tpu.memory_space<vmem>>, vector<64x32xbf16>
    %175 = arith.truncf %173 : vector<8x64xf32> to vector<8x64xbf16>
    %cst_62 = arith.constant dense<0.000000e+00> : vector<8x32xf32>
    %176 = tpu.matmul %175, %174, %cst_62 {dimension_numbers = #tpu.dot_dimension_numbers<[1], [0], [0], [1], [0, 0, 1, 1], [], []>} : vector<8x64xbf16>, vector<64x32xbf16>, vector<8x32xf32> -> vector<8x32xf32>
    %c0_63 = arith.constant 0 : index
    %c0_64 = arith.constant 0 : index
    %177 = vector.load %arg11[%c0_63, %c0_64] : memref<1x32xf32, #tpu.memory_space<vmem>>, vector<1x32xf32>
    %178 = vector.broadcast %177 : vector<1x32xf32> to vector<8x32xf32>
    %179 = arith.addf %176, %178 : vector<8x32xf32>
    %180 = arith.addf %128, %179 : vector<8x32xf32>
    %c0_65 = arith.constant 0 : index
    %c0_66 = arith.constant 0 : index
    %181 = vector.load %arg14[%c0_65, %c0_66] : memref<1x32xf32, #tpu.memory_space<vmem>>, vector<1x32xf32>
    %c0_67 = arith.constant 0 : index
    %c0_68 = arith.constant 0 : index
    %182 = vector.load %arg15[%c0_67, %c0_68] : memref<1x32xf32, #tpu.memory_space<vmem>>, vector<1x32xf32>
    %cst_69 = arith.constant dense<0.000000e+00> : vector<8xf32>
    %183 = vector.multi_reduction <add>, %180, %cst_69 [1] : vector<8x32xf32> to vector<8xf32>
    %184 = vector.shape_cast %183 : vector<8xf32> to vector<8x1xf32>
    %cst_70 = arith.constant 3.200000e+01 : f32
    %185 = vector.broadcast %cst_70 : f32 to vector<8x1xf32>
    %186 = arith.divf %184, %185 : vector<8x1xf32>
    %187 = vector.broadcast %186 : vector<8x1xf32> to vector<8x32xf32>
    %188 = arith.subf %180, %187 : vector<8x32xf32>
    %189 = arith.mulf %188, %188 : vector<8x32xf32>
    %cst_71 = arith.constant dense<0.000000e+00> : vector<8xf32>
    %190 = vector.multi_reduction <add>, %189, %cst_71 [1] : vector<8x32xf32> to vector<8xf32>
    %191 = vector.shape_cast %190 : vector<8xf32> to vector<8x1xf32>
    %cst_72 = arith.constant 3.200000e+01 : f32
    %192 = vector.broadcast %cst_72 : f32 to vector<8x1xf32>
    %193 = arith.divf %191, %192 : vector<8x1xf32>
    %194 = vector.broadcast %186 : vector<8x1xf32> to vector<8x32xf32>
    %195 = arith.subf %180, %194 : vector<8x32xf32>
    %cst_73 = arith.constant 9.99999974E-6 : f32
    %196 = vector.broadcast %cst_73 : f32 to vector<8x1xf32>
    %197 = arith.addf %193, %196 : vector<8x1xf32>
    %198 = math.rsqrt %197 : vector<8x1xf32>
    %199 = vector.broadcast %198 : vector<8x1xf32> to vector<8x32xf32>
    %200 = arith.mulf %195, %199 : vector<8x32xf32>
    %201 = vector.broadcast %181 : vector<1x32xf32> to vector<8x32xf32>
    %202 = arith.mulf %200, %201 : vector<8x32xf32>
    %203 = vector.broadcast %182 : vector<1x32xf32> to vector<8x32xf32>
    %204 = arith.addf %202, %203 : vector<8x32xf32>
    %c0_74 = arith.constant 0 : index
    %c0_75 = arith.constant 0 : index
    %205 = vector.load %arg16[%c0_74, %c0_75] : memref<1x32xf32, #tpu.memory_space<vmem>>, vector<1x32xf32>
    %c0_76 = arith.constant 0 : index
    %c0_77 = arith.constant 0 : index
    %206 = vector.load %arg17[%c0_76, %c0_77] : memref<1x32xf32, #tpu.memory_space<vmem>>, vector<1x32xf32>
    %cst_78 = arith.constant dense<0.000000e+00> : vector<8xf32>
    %207 = vector.multi_reduction <add>, %204, %cst_78 [1] : vector<8x32xf32> to vector<8xf32>
    %208 = vector.shape_cast %207 : vector<8xf32> to vector<8x1xf32>
    %cst_79 = arith.constant 3.200000e+01 : f32
    %209 = vector.broadcast %cst_79 : f32 to vector<8x1xf32>
    %210 = arith.divf %208, %209 : vector<8x1xf32>
    %211 = vector.broadcast %210 : vector<8x1xf32> to vector<8x32xf32>
    %212 = arith.subf %204, %211 : vector<8x32xf32>
    %213 = arith.mulf %212, %212 : vector<8x32xf32>
    %cst_80 = arith.constant dense<0.000000e+00> : vector<8xf32>
    %214 = vector.multi_reduction <add>, %213, %cst_80 [1] : vector<8x32xf32> to vector<8xf32>
    %215 = vector.shape_cast %214 : vector<8xf32> to vector<8x1xf32>
    %cst_81 = arith.constant 3.200000e+01 : f32
    %216 = vector.broadcast %cst_81 : f32 to vector<8x1xf32>
    %217 = arith.divf %215, %216 : vector<8x1xf32>
    %218 = vector.broadcast %210 : vector<8x1xf32> to vector<8x32xf32>
    %219 = arith.subf %204, %218 : vector<8x32xf32>
    %cst_82 = arith.constant 9.99999974E-6 : f32
    %220 = vector.broadcast %cst_82 : f32 to vector<8x1xf32>
    %221 = arith.addf %217, %220 : vector<8x1xf32>
    %222 = math.rsqrt %221 : vector<8x1xf32>
    %223 = vector.broadcast %222 : vector<8x1xf32> to vector<8x32xf32>
    %224 = arith.mulf %219, %223 : vector<8x32xf32>
    %225 = vector.broadcast %205 : vector<1x32xf32> to vector<8x32xf32>
    %226 = arith.mulf %224, %225 : vector<8x32xf32>
    %227 = vector.broadcast %206 : vector<1x32xf32> to vector<8x32xf32>
    %228 = arith.addf %226, %227 : vector<8x32xf32>
    %229 = vector.shape_cast %228 : vector<8x32xf32> to vector<1x8x32xf32>
    %230 = arith.truncf %229 : vector<1x8x32xf32> to vector<1x8x32xbf16>
    %c0_83 = arith.constant 0 : index
    %c0_84 = arith.constant 0 : index
    %c0_85 = arith.constant 0 : index
    %231 = vector.load %arg18[%c0_83, %c0_84, %c0_85] : memref<1x8x32xbf16, #tpu.memory_space<vmem>>, vector<1x8x32xbf16>
    tpu.vector_store %arg18[%c0_83, %c0_84, %c0_85], %230 {strides = array<i32>} : memref<1x8x32xbf16, #tpu.memory_space<vmem>>, vector<1x8x32xbf16>,
    return
  }
  func.func @transform_0(%arg0: i32) -> (i32, i32, i32) {
    %c0_i32 = arith.constant 0 : i32
    %c0_i32_0 = arith.constant 0 : i32
    %c0_i32_1 = arith.constant 0 : i32
    return %arg0, %c0_i32, %c0_i32_0 : i32, i32, i32
  }
  func.func @transform_1(%arg0: i32) -> (i32, i32) {
    %c0_i32 = arith.constant 0 : i32
    %c0_i32_0 = arith.constant 0 : i32
    %c0_i32_1 = arith.constant 0 : i32
    return %c0_i32, %c0_i32_0 : i32, i32
  }
  func.func @transform_2(%arg0: i32) -> (i32, i32, i32) {
    %c0_i32 = arith.constant 0 : i32
    %c0_i32_0 = arith.constant 0 : i32
    %c0_i32_1 = arith.constant 0 : i32
    return %arg0, %c0_i32, %c0_i32_0 : i32, i32, i32
  }
  func.func @transform_3(%arg0: i32) -> (i32, i32) {
    %c0_i32 = arith.constant 0 : i32
    %c0_i32_0 = arith.constant 0 : i32
    %c0_i32_1 = arith.constant 0 : i32
    return %c0_i32, %c0_i32_0 : i32, i32
  }
  func.func @transform_4(%arg0: i32) -> (i32, i32) {
    %c0_i32 = arith.constant 0 : i32
    %c0_i32_0 = arith.constant 0 : i32
    %c0_i32_1 = arith.constant 0 : i32
    return %c0_i32, %c0_i32_0 : i32, i32
  }
  func.func @transform_5(%arg0: i32) -> (i32, i32) {
    %c0_i32 = arith.constant 0 : i32
    %c0_i32_0 = arith.constant 0 : i32
    %c0_i32_1 = arith.constant 0 : i32
    return %c0_i32, %c0_i32_0 : i32, i32
  }
  func.func @transform_6(%arg0: i32) -> (i32, i32) {
    %c0_i32 = arith.constant 0 : i32
    %c0_i32_0 = arith.constant 0 : i32
    %c0_i32_1 = arith.constant 0 : i32
    return %c0_i32, %c0_i32_0 : i32, i32
  }
  func.func @transform_7(%arg0: i32) -> (i32, i32) {
    %c0_i32 = arith.constant 0 : i32
    %c0_i32_0 = arith.constant 0 : i32
    %c0_i32_1 = arith.constant 0 : i32
    return %c0_i32, %c0_i32_0 : i32, i32
  }
  func.func @transform_8(%arg0: i32) -> (i32, i32) {
    %c0_i32 = arith.constant 0 : i32
    %c0_i32_0 = arith.constant 0 : i32
    %c0_i32_1 = arith.constant 0 : i32
    return %c0_i32, %c0_i32_0 : i32, i32
  }
  func.func @transform_9(%arg0: i32) -> (i32, i32) {
    %c0_i32 = arith.constant 0 : i32
    %c0_i32_0 = arith.constant 0 : i32
    %c0_i32_1 = arith.constant 0 : i32
    return %c0_i32, %c0_i32_0 : i32, i32
  }
  func.func @transform_10(%arg0: i32) -> (i32, i32) {
    %c0_i32 = arith.constant 0 : i32
    %c0_i32_0 = arith.constant 0 : i32
    %c0_i32_1 = arith.constant 0 : i32
    return %c0_i32, %c0_i32_0 : i32, i32
  }
  func.func @transform_11(%arg0: i32) -> (i32, i32) {
    %c0_i32 = arith.constant 0 : i32
    %c0_i32_0 = arith.constant 0 : i32
    %c0_i32_1 = arith.constant 0 : i32
    return %c0_i32, %c0_i32_0 : i32, i32
  }
  func.func @transform_12(%arg0: i32) -> (i32, i32) {
    %c0_i32 = arith.constant 0 : i32
    %c0_i32_0 = arith.constant 0 : i32
    %c0_i32_1 = arith.constant 0 : i32
    return %c0_i32, %c0_i32_0 : i32, i32
  }
  func.func @transform_13(%arg0: i32) -> (i32, i32) {
    %c0_i32 = arith.constant 0 : i32
    %c0_i32_0 = arith.constant 0 : i32
    %c0_i32_1 = arith.constant 0 : i32
    return %c0_i32, %c0_i32_0 : i32, i32
  }
  func.func @transform_14(%arg0: i32) -> (i32, i32) {
    %c0_i32 = arith.constant 0 : i32
    %c0_i32_0 = arith.constant 0 : i32
    %c0_i32_1 = arith.constant 0 : i32
    return %c0_i32, %c0_i32_0 : i32, i32
  }
  func.func @transform_15(%arg0: i32) -> (i32, i32) {
    %c0_i32 = arith.constant 0 : i32
    %c0_i32_0 = arith.constant 0 : i32
    %c0_i32_1 = arith.constant 0 : i32
    return %c0_i32, %c0_i32_0 : i32, i32
  }
  func.func @transform_16(%arg0: i32) -> (i32, i32) {
    %c0_i32 = arith.constant 0 : i32
    %c0_i32_0 = arith.constant 0 : i32
    %c0_i32_1 = arith.constant 0 : i32
    return %c0_i32, %c0_i32_0 : i32, i32
  }
  func.func @transform_17(%arg0: i32) -> (i32, i32, i32) {
    %c0_i32 = arith.constant 0 : i32
    %c0_i32_0 = arith.constant 0 : i32
    %c0_i32_1 = arith.constant 0 : i32
    return %arg0, %c0_i32, %c0_i32_0 : i32, i32, i32
  }
}

module attributes {stable_mosaic.version = 11 : i64} {
  func.func @_decoder_layer_kernel(%arg0: i32, %arg1: memref<1x8x32xbf16, #tpu.memory_space<vmem>>, %arg2: memref<1x8x32xbf16, #tpu.memory_space<vmem>>, %arg3: memref<8x8xf32, #tpu.memory_space<vmem>>, %arg4: memref<1x1x8xf32, #tpu.memory_space<vmem>>, %arg5: memref<1x1x8xf32, #tpu.memory_space<vmem>>, %arg6: memref<32x96xbf16, #tpu.memory_space<vmem>>, %arg7: memref<1x96xf32, #tpu.memory_space<vmem>>, %arg8: memref<32x32xbf16, #tpu.memory_space<vmem>>, %arg9: memref<1x32xf32, #tpu.memory_space<vmem>>, %arg10: memref<32x32xbf16, #tpu.memory_space<vmem>>, %arg11: memref<1x32xf32, #tpu.memory_space<vmem>>, %arg12: memref<32x64xbf16, #tpu.memory_space<vmem>>, %arg13: memref<1x64xf32, #tpu.memory_space<vmem>>, %arg14: memref<32x32xbf16, #tpu.memory_space<vmem>>, %arg15: memref<1x32xf32, #tpu.memory_space<vmem>>, %arg16: memref<32x64xbf16, #tpu.memory_space<vmem>>, %arg17: memref<1x64xf32, #tpu.memory_space<vmem>>, %arg18: memref<64x32xbf16, #tpu.memory_space<vmem>>, %arg19: memref<1x32xf32, #tpu.memory_space<vmem>>, %arg20: memref<1x32xf32, #tpu.memory_space<vmem>>, %arg21: memref<1x32xf32, #tpu.memory_space<vmem>>, %arg22: memref<1x32xf32, #tpu.memory_space<vmem>>, %arg23: memref<1x32xf32, #tpu.memory_space<vmem>>, %arg24: memref<1x32xf32, #tpu.memory_space<vmem>>, %arg25: memref<1x32xf32, #tpu.memory_space<vmem>>, %arg26: memref<1x8x32xbf16, #tpu.memory_space<vmem>>) attributes {dimension_semantics = [#tpu.dimension_semantics<parallel>], iteration_bounds = array<i64: 2>, scalar_prefetch = 0 : i64, scratch_operands = 0 : i64, tpu.core_type = #tpu.core_type<tc>, window_params = [{transform_indices = @transform_0, window_bounds = array<i64: 1, 8, 32>}, {transform_indices = @transform_1, window_bounds = array<i64: 1, 8, 32>}, {pipeline_mode = #tpu.pipeline_mode<synchronous>, transform_indices = @transform_2, window_bounds = array<i64: 8, 8>}, {transform_indices = @transform_3, window_bounds = array<i64: 1, 1, 8>}, {transform_indices = @transform_4, window_bounds = array<i64: 1, 1, 8>}, {pipeline_mode = #tpu.pipeline_mode<synchronous>, transform_indices = @transform_5, window_bounds = array<i64: 32, 96>}, {pipeline_mode = #tpu.pipeline_mode<synchronous>, transform_indices = @transform_6, window_bounds = array<i64: 1, 96>}, {pipeline_mode = #tpu.pipeline_mode<synchronous>, transform_indices = @transform_7, window_bounds = array<i64: 32, 32>}, {pipeline_mode = #tpu.pipeline_mode<synchronous>, transform_indices = @transform_8, window_bounds = array<i64: 1, 32>}, {pipeline_mode = #tpu.pipeline_mode<synchronous>, transform_indices = @transform_9, window_bounds = array<i64: 32, 32>}, {pipeline_mode = #tpu.pipeline_mode<synchronous>, transform_indices = @transform_10, window_bounds = array<i64: 1, 32>}, {pipeline_mode = #tpu.pipeline_mode<synchronous>, transform_indices = @transform_11, window_bounds = array<i64: 32, 64>}, {pipeline_mode = #tpu.pipeline_mode<synchronous>, transform_indices = @transform_12, window_bounds = array<i64: 1, 64>}, {pipeline_mode = #tpu.pipeline_mode<synchronous>, transform_indices = @transform_13, window_bounds = array<i64: 32, 32>}, {pipeline_mode = #tpu.pipeline_mode<synchronous>, transform_indices = @transform_14, window_bounds = array<i64: 1, 32>}, {pipeline_mode = #tpu.pipeline_mode<synchronous>, transform_indices = @transform_15, window_bounds = array<i64: 32, 64>}, {pipeline_mode = #tpu.pipeline_mode<synchronous>, transform_indices = @transform_16, window_bounds = array<i64: 1, 64>}, {pipeline_mode = #tpu.pipeline_mode<synchronous>, transform_indices = @transform_17, window_bounds = array<i64: 64, 32>}, {pipeline_mode = #tpu.pipeline_mode<synchronous>, transform_indices = @transform_18, window_bounds = array<i64: 1, 32>}, {pipeline_mode = #tpu.pipeline_mode<synchronous>, transform_indices = @transform_19, window_bounds = array<i64: 1, 32>}, {pipeline_mode = #tpu.pipeline_mode<synchronous>, transform_indices = @transform_20, window_bounds = array<i64: 1, 32>}, {pipeline_mode = #tpu.pipeline_mode<synchronous>, transform_indices = @transform_21, window_bounds = array<i64: 1, 32>}, {pipeline_mode = #tpu.pipeline_mode<synchronous>, transform_indices = @transform_22, window_bounds = array<i64: 1, 32>}, {pipeline_mode = #tpu.pipeline_mode<synchronous>, transform_indices = @transform_23, window_bounds = array<i64: 1, 32>}, {pipeline_mode = #tpu.pipeline_mode<synchronous>, transform_indices = @transform_24, window_bounds = array<i64: 1, 32>}, {transform_indices = @transform_25, window_bounds = array<i64: 1, 8, 32>}]} {
    %c0 = arith.constant 0 : index
    %c0_0 = arith.constant 0 : index
    %c0_1 = arith.constant 0 : index
    %0 = vector.load %arg1[%c0, %c0_0, %c0_1] : memref<1x8x32xbf16, #tpu.memory_space<vmem>>, vector<1x8x32xbf16>
    %1 = arith.extf %0 : vector<1x8x32xbf16> to vector<1x8x32xf32>
    %2 = vector.shape_cast %1 : vector<1x8x32xf32> to vector<8x32xf32>
    %c0_2 = arith.constant 0 : index
    %c0_3 = arith.constant 0 : index
    %c0_4 = arith.constant 0 : index
    %3 = vector.load %arg2[%c0_2, %c0_3, %c0_4] : memref<1x8x32xbf16, #tpu.memory_space<vmem>>, vector<1x8x32xbf16>
    %4 = vector.shape_cast %3 : vector<1x8x32xbf16> to vector<8x32xbf16>
    %c0_5 = arith.constant 0 : index
    %c0_6 = arith.constant 0 : index
    %5 = vector.load %arg3[%c0_5, %c0_6] : memref<8x8xf32, #tpu.memory_space<vmem>>, vector<8x8xf32>
    %c0_7 = arith.constant 0 : index
    %c0_8 = arith.constant 0 : index
    %c0_9 = arith.constant 0 : index
    %6 = vector.load %arg4[%c0_7, %c0_8, %c0_9] : memref<1x1x8xf32, #tpu.memory_space<vmem>>, vector<1x1x8xf32>
    %c0_10 = arith.constant 0 : index
    %c0_11 = arith.constant 0 : index
    %c0_12 = arith.constant 0 : index
    %7 = vector.load %arg5[%c0_10, %c0_11, %c0_12] : memref<1x1x8xf32, #tpu.memory_space<vmem>>, vector<1x1x8xf32>
    %c0_13 = arith.constant 0 : index
    %c0_14 = arith.constant 0 : index
    %8 = vector.load %arg6[%c0_13, %c0_14] : memref<32x96xbf16, #tpu.memory_space<vmem>>, vector<32x96xbf16>
    %9 = arith.truncf %2 : vector<8x32xf32> to vector<8x32xbf16>
    %cst = arith.constant dense<0.000000e+00> : vector<8x96xf32>
    %10 = tpu.matmul %9, %8, %cst {dimension_numbers = #tpu.dot_dimension_numbers<[1], [0], [0], [1], [0, 0, 1, 1], [], []>} : vector<8x32xbf16>, vector<32x96xbf16>, vector<8x96xf32> -> vector<8x96xf32>
    %c0_15 = arith.constant 0 : index
    %c0_16 = arith.constant 0 : index
    %11 = vector.load %arg7[%c0_15, %c0_16] : memref<1x96xf32, #tpu.memory_space<vmem>>, vector<1x96xf32>
    %12 = vector.broadcast %11 : vector<1x96xf32> to vector<8x96xf32>
    %13 = arith.addf %10, %12 : vector<8x96xf32>
    %14 = vector.extract_strided_slice %13 {offsets = [0, 0], sizes = [8, 32], strides = [1, 1]} : vector<8x96xf32> to vector<8x32xf32>
    %15 = vector.extract_strided_slice %13 {offsets = [0, 32], sizes = [8, 32], strides = [1, 1]} : vector<8x96xf32> to vector<8x32xf32>
    %16 = vector.extract_strided_slice %13 {offsets = [0, 64], sizes = [8, 32], strides = [1, 1]} : vector<8x96xf32> to vector<8x32xf32>
    %17 = vector.shape_cast %6 : vector<1x1x8xf32> to vector<1x8xf32>
    %18 = vector.broadcast %17 : vector<1x8xf32> to vector<8x8xf32>
    %19 = arith.addf %5, %18 : vector<8x8xf32>
    %20 = vector.extract_strided_slice %14 {offsets = [0, 0], sizes = [8, 8], strides = [1, 1]} : vector<8x32xf32> to vector<8x8xf32>
    %21 = vector.extract_strided_slice %15 {offsets = [0, 0], sizes = [8, 8], strides = [1, 1]} : vector<8x32xf32> to vector<8x8xf32>
    %22 = arith.truncf %20 : vector<8x8xf32> to vector<8x8xbf16>
    %23 = arith.truncf %21 : vector<8x8xf32> to vector<8x8xbf16>
    %cst_17 = arith.constant dense<0.000000e+00> : vector<8x8xf32>
    %24 = tpu.matmul %22, %23, %cst_17 {dimension_numbers = #tpu.dot_dimension_numbers<[1], [1], [0], [0], [0, 0, 1, 0], [], []>} : vector<8x8xbf16>, vector<8x8xbf16>, vector<8x8xf32> -> vector<8x8xf32>
    %25 = arith.addf %24, %19 : vector<8x8xf32>
    %cst_18 = arith.constant dense<0xFF800000> : vector<8xf32>
    %26 = vector.multi_reduction <maximumf>, %25, %cst_18 [1] : vector<8x8xf32> to vector<8xf32>
    %27 = vector.shape_cast %26 : vector<8xf32> to vector<8x1xf32>
    %28 = vector.broadcast %27 : vector<8x1xf32> to vector<8x8xf32>
    %29 = arith.subf %25, %28 : vector<8x8xf32>
    %30 = math.exp %29 : vector<8x8xf32>
    %cst_19 = arith.constant dense<0.000000e+00> : vector<8xf32>
    %31 = vector.multi_reduction <add>, %30, %cst_19 [1] : vector<8x8xf32> to vector<8xf32>
    %32 = vector.shape_cast %31 : vector<8xf32> to vector<8x1xf32>
    %33 = tpu.reciprocal %32 {approx = true} : vector<8x1xf32> -> vector<8x1xf32>
    %34 = vector.broadcast %33 : vector<8x1xf32> to vector<8x8xf32>
    %35 = arith.mulf %30, %34 : vector<8x8xf32>
    %36 = vector.extract_strided_slice %16 {offsets = [0, 0], sizes = [8, 8], strides = [1, 1]} : vector<8x32xf32> to vector<8x8xf32>
    %37 = arith.truncf %35 : vector<8x8xf32> to vector<8x8xbf16>
    %38 = arith.truncf %36 : vector<8x8xf32> to vector<8x8xbf16>
    %cst_20 = arith.constant dense<0.000000e+00> : vector<8x8xf32>
    %39 = tpu.matmul %37, %38, %cst_20 {dimension_numbers = #tpu.dot_dimension_numbers<[1], [0], [0], [1], [0, 0, 1, 1], [], []>} : vector<8x8xbf16>, vector<8x8xbf16>, vector<8x8xf32> -> vector<8x8xf32>
    %40 = vector.extract_strided_slice %14 {offsets = [0, 8], sizes = [8, 8], strides = [1, 1]} : vector<8x32xf32> to vector<8x8xf32>
    %41 = vector.extract_strided_slice %15 {offsets = [0, 8], sizes = [8, 8], strides = [1, 1]} : vector<8x32xf32> to vector<8x8xf32>
    %42 = arith.truncf %40 : vector<8x8xf32> to vector<8x8xbf16>
    %43 = arith.truncf %41 : vector<8x8xf32> to vector<8x8xbf16>
    %cst_21 = arith.constant dense<0.000000e+00> : vector<8x8xf32>
    %44 = tpu.matmul %42, %43, %cst_21 {dimension_numbers = #tpu.dot_dimension_numbers<[1], [1], [0], [0], [0, 0, 1, 0], [], []>} : vector<8x8xbf16>, vector<8x8xbf16>, vector<8x8xf32> -> vector<8x8xf32>
    %45 = arith.addf %44, %19 : vector<8x8xf32>
    %cst_22 = arith.constant dense<0xFF800000> : vector<8xf32>
    %46 = vector.multi_reduction <maximumf>, %45, %cst_22 [1] : vector<8x8xf32> to vector<8xf32>
    %47 = vector.shape_cast %46 : vector<8xf32> to vector<8x1xf32>
    %48 = vector.broadcast %47 : vector<8x1xf32> to vector<8x8xf32>
    %49 = arith.subf %45, %48 : vector<8x8xf32>
    %50 = math.exp %49 : vector<8x8xf32>
    %cst_23 = arith.constant dense<0.000000e+00> : vector<8xf32>
    %51 = vector.multi_reduction <add>, %50, %cst_23 [1] : vector<8x8xf32> to vector<8xf32>
    %52 = vector.shape_cast %51 : vector<8xf32> to vector<8x1xf32>
    %53 = tpu.reciprocal %52 {approx = true} : vector<8x1xf32> -> vector<8x1xf32>
    %54 = vector.broadcast %53 : vector<8x1xf32> to vector<8x8xf32>
    %55 = arith.mulf %50, %54 : vector<8x8xf32>
    %56 = vector.extract_strided_slice %16 {offsets = [0, 8], sizes = [8, 8], strides = [1, 1]} : vector<8x32xf32> to vector<8x8xf32>
    %57 = arith.truncf %55 : vector<8x8xf32> to vector<8x8xbf16>
    %58 = arith.truncf %56 : vector<8x8xf32> to vector<8x8xbf16>
    %cst_24 = arith.constant dense<0.000000e+00> : vector<8x8xf32>
    %59 = tpu.matmul %57, %58, %cst_24 {dimension_numbers = #tpu.dot_dimension_numbers<[1], [0], [0], [1], [0, 0, 1, 1], [], []>} : vector<8x8xbf16>, vector<8x8xbf16>, vector<8x8xf32> -> vector<8x8xf32>
    %60 = vector.extract_strided_slice %14 {offsets = [0, 16], sizes = [8, 8], strides = [1, 1]} : vector<8x32xf32> to vector<8x8xf32>
    %61 = vector.extract_strided_slice %15 {offsets = [0, 16], sizes = [8, 8], strides = [1, 1]} : vector<8x32xf32> to vector<8x8xf32>
    %62 = arith.truncf %60 : vector<8x8xf32> to vector<8x8xbf16>
    %63 = arith.truncf %61 : vector<8x8xf32> to vector<8x8xbf16>
    %cst_25 = arith.constant dense<0.000000e+00> : vector<8x8xf32>
    %64 = tpu.matmul %62, %63, %cst_25 {dimension_numbers = #tpu.dot_dimension_numbers<[1], [1], [0], [0], [0, 0, 1, 0], [], []>} : vector<8x8xbf16>, vector<8x8xbf16>, vector<8x8xf32> -> vector<8x8xf32>
    %65 = arith.addf %64, %19 : vector<8x8xf32>
    %cst_26 = arith.constant dense<0xFF800000> : vector<8xf32>
    %66 = vector.multi_reduction <maximumf>, %65, %cst_26 [1] : vector<8x8xf32> to vector<8xf32>
    %67 = vector.shape_cast %66 : vector<8xf32> to vector<8x1xf32>
    %68 = vector.broadcast %67 : vector<8x1xf32> to vector<8x8xf32>
    %69 = arith.subf %65, %68 : vector<8x8xf32>
    %70 = math.exp %69 : vector<8x8xf32>
    %cst_27 = arith.constant dense<0.000000e+00> : vector<8xf32>
    %71 = vector.multi_reduction <add>, %70, %cst_27 [1] : vector<8x8xf32> to vector<8xf32>
    %72 = vector.shape_cast %71 : vector<8xf32> to vector<8x1xf32>
    %73 = tpu.reciprocal %72 {approx = true} : vector<8x1xf32> -> vector<8x1xf32>
    %74 = vector.broadcast %73 : vector<8x1xf32> to vector<8x8xf32>
    %75 = arith.mulf %70, %74 : vector<8x8xf32>
    %76 = vector.extract_strided_slice %16 {offsets = [0, 16], sizes = [8, 8], strides = [1, 1]} : vector<8x32xf32> to vector<8x8xf32>
    %77 = arith.truncf %75 : vector<8x8xf32> to vector<8x8xbf16>
    %78 = arith.truncf %76 : vector<8x8xf32> to vector<8x8xbf16>
    %cst_28 = arith.constant dense<0.000000e+00> : vector<8x8xf32>
    %79 = tpu.matmul %77, %78, %cst_28 {dimension_numbers = #tpu.dot_dimension_numbers<[1], [0], [0], [1], [0, 0, 1, 1], [], []>} : vector<8x8xbf16>, vector<8x8xbf16>, vector<8x8xf32> -> vector<8x8xf32>
    %80 = vector.extract_strided_slice %14 {offsets = [0, 24], sizes = [8, 8], strides = [1, 1]} : vector<8x32xf32> to vector<8x8xf32>
    %81 = vector.extract_strided_slice %15 {offsets = [0, 24], sizes = [8, 8], strides = [1, 1]} : vector<8x32xf32> to vector<8x8xf32>
    %82 = arith.truncf %80 : vector<8x8xf32> to vector<8x8xbf16>
    %83 = arith.truncf %81 : vector<8x8xf32> to vector<8x8xbf16>
    %cst_29 = arith.constant dense<0.000000e+00> : vector<8x8xf32>
    %84 = tpu.matmul %82, %83, %cst_29 {dimension_numbers = #tpu.dot_dimension_numbers<[1], [1], [0], [0], [0, 0, 1, 0], [], []>} : vector<8x8xbf16>, vector<8x8xbf16>, vector<8x8xf32> -> vector<8x8xf32>
    %85 = arith.addf %84, %19 : vector<8x8xf32>
    %cst_30 = arith.constant dense<0xFF800000> : vector<8xf32>
    %86 = vector.multi_reduction <maximumf>, %85, %cst_30 [1] : vector<8x8xf32> to vector<8xf32>
    %87 = vector.shape_cast %86 : vector<8xf32> to vector<8x1xf32>
    %88 = vector.broadcast %87 : vector<8x1xf32> to vector<8x8xf32>
    %89 = arith.subf %85, %88 : vector<8x8xf32>
    %90 = math.exp %89 : vector<8x8xf32>
    %cst_31 = arith.constant dense<0.000000e+00> : vector<8xf32>
    %91 = vector.multi_reduction <add>, %90, %cst_31 [1] : vector<8x8xf32> to vector<8xf32>
    %92 = vector.shape_cast %91 : vector<8xf32> to vector<8x1xf32>
    %93 = tpu.reciprocal %92 {approx = true} : vector<8x1xf32> -> vector<8x1xf32>
    %94 = vector.broadcast %93 : vector<8x1xf32> to vector<8x8xf32>
    %95 = arith.mulf %90, %94 : vector<8x8xf32>
    %96 = vector.extract_strided_slice %16 {offsets = [0, 24], sizes = [8, 8], strides = [1, 1]} : vector<8x32xf32> to vector<8x8xf32>
    %97 = arith.truncf %95 : vector<8x8xf32> to vector<8x8xbf16>
    %98 = arith.truncf %96 : vector<8x8xf32> to vector<8x8xbf16>
    %cst_32 = arith.constant dense<0.000000e+00> : vector<8x8xf32>
    %99 = tpu.matmul %97, %98, %cst_32 {dimension_numbers = #tpu.dot_dimension_numbers<[1], [0], [0], [1], [0, 0, 1, 1], [], []>} : vector<8x8xbf16>, vector<8x8xbf16>, vector<8x8xf32> -> vector<8x8xf32>
    %100 = tpu.concatenate %39, %59, %79, %99 in 1 : vector<8x8xf32>, vector<8x8xf32>, vector<8x8xf32>, vector<8x8xf32> -> vector<8x32xf32>
    %c0_33 = arith.constant 0 : index
    %c0_34 = arith.constant 0 : index
    %101 = vector.load %arg8[%c0_33, %c0_34] : memref<32x32xbf16, #tpu.memory_space<vmem>>, vector<32x32xbf16>
    %102 = arith.truncf %100 : vector<8x32xf32> to vector<8x32xbf16>
    %cst_35 = arith.constant dense<0.000000e+00> : vector<8x32xf32>
    %103 = tpu.matmul %102, %101, %cst_35 {dimension_numbers = #tpu.dot_dimension_numbers<[1], [0], [0], [1], [0, 0, 1, 1], [], []>} : vector<8x32xbf16>, vector<32x32xbf16>, vector<8x32xf32> -> vector<8x32xf32>
    %c0_36 = arith.constant 0 : index
    %c0_37 = arith.constant 0 : index
    %104 = vector.load %arg9[%c0_36, %c0_37] : memref<1x32xf32, #tpu.memory_space<vmem>>, vector<1x32xf32>
    %105 = vector.broadcast %104 : vector<1x32xf32> to vector<8x32xf32>
    %106 = arith.addf %103, %105 : vector<8x32xf32>
    %107 = arith.addf %2, %106 : vector<8x32xf32>
    %c0_38 = arith.constant 0 : index
    %c0_39 = arith.constant 0 : index
    %108 = vector.load %arg20[%c0_38, %c0_39] : memref<1x32xf32, #tpu.memory_space<vmem>>, vector<1x32xf32>
    %c0_40 = arith.constant 0 : index
    %c0_41 = arith.constant 0 : index
    %109 = vector.load %arg21[%c0_40, %c0_41] : memref<1x32xf32, #tpu.memory_space<vmem>>, vector<1x32xf32>
    %cst_42 = arith.constant dense<0.000000e+00> : vector<8xf32>
    %110 = vector.multi_reduction <add>, %107, %cst_42 [1] : vector<8x32xf32> to vector<8xf32>
    %111 = vector.shape_cast %110 : vector<8xf32> to vector<8x1xf32>
    %cst_43 = arith.constant 3.200000e+01 : f32
    %112 = vector.broadcast %cst_43 : f32 to vector<8x1xf32>
    %113 = arith.divf %111, %112 : vector<8x1xf32>
    %114 = vector.broadcast %113 : vector<8x1xf32> to vector<8x32xf32>
    %115 = arith.subf %107, %114 : vector<8x32xf32>
    %116 = arith.mulf %115, %115 : vector<8x32xf32>
    %cst_44 = arith.constant dense<0.000000e+00> : vector<8xf32>
    %117 = vector.multi_reduction <add>, %116, %cst_44 [1] : vector<8x32xf32> to vector<8xf32>
    %118 = vector.shape_cast %117 : vector<8xf32> to vector<8x1xf32>
    %cst_45 = arith.constant 3.200000e+01 : f32
    %119 = vector.broadcast %cst_45 : f32 to vector<8x1xf32>
    %120 = arith.divf %118, %119 : vector<8x1xf32>
    %121 = vector.broadcast %113 : vector<8x1xf32> to vector<8x32xf32>
    %122 = arith.subf %107, %121 : vector<8x32xf32>
    %cst_46 = arith.constant 9.99999974E-6 : f32
    %123 = vector.broadcast %cst_46 : f32 to vector<8x1xf32>
    %124 = arith.addf %120, %123 : vector<8x1xf32>
    %125 = math.rsqrt %124 : vector<8x1xf32>
    %126 = vector.broadcast %125 : vector<8x1xf32> to vector<8x32xf32>
    %127 = arith.mulf %122, %126 : vector<8x32xf32>
    %128 = vector.broadcast %108 : vector<1x32xf32> to vector<8x32xf32>
    %129 = arith.mulf %127, %128 : vector<8x32xf32>
    %130 = vector.broadcast %109 : vector<1x32xf32> to vector<8x32xf32>
    %131 = arith.addf %129, %130 : vector<8x32xf32>
    %c0_47 = arith.constant 0 : index
    %c0_48 = arith.constant 0 : index
    %132 = vector.load %arg10[%c0_47, %c0_48] : memref<32x32xbf16, #tpu.memory_space<vmem>>, vector<32x32xbf16>
    %133 = arith.truncf %131 : vector<8x32xf32> to vector<8x32xbf16>
    %cst_49 = arith.constant dense<0.000000e+00> : vector<8x32xf32>
    %134 = tpu.matmul %133, %132, %cst_49 {dimension_numbers = #tpu.dot_dimension_numbers<[1], [0], [0], [1], [0, 0, 1, 1], [], []>} : vector<8x32xbf16>, vector<32x32xbf16>, vector<8x32xf32> -> vector<8x32xf32>
    %c0_50 = arith.constant 0 : index
    %c0_51 = arith.constant 0 : index
    %135 = vector.load %arg11[%c0_50, %c0_51] : memref<1x32xf32, #tpu.memory_space<vmem>>, vector<1x32xf32>
    %136 = vector.broadcast %135 : vector<1x32xf32> to vector<8x32xf32>
    %137 = arith.addf %134, %136 : vector<8x32xf32>
    %c0_52 = arith.constant 0 : index
    %c0_53 = arith.constant 0 : index
    %138 = vector.load %arg12[%c0_52, %c0_53] : memref<32x64xbf16, #tpu.memory_space<vmem>>, vector<32x64xbf16>
    %cst_54 = arith.constant dense<0.000000e+00> : vector<8x64xf32>
    %139 = tpu.matmul %4, %138, %cst_54 {dimension_numbers = #tpu.dot_dimension_numbers<[1], [0], [0], [1], [0, 0, 1, 1], [], []>} : vector<8x32xbf16>, vector<32x64xbf16>, vector<8x64xf32> -> vector<8x64xf32>
    %c0_55 = arith.constant 0 : index
    %c0_56 = arith.constant 0 : index
    %140 = vector.load %arg13[%c0_55, %c0_56] : memref<1x64xf32, #tpu.memory_space<vmem>>, vector<1x64xf32>
    %141 = vector.broadcast %140 : vector<1x64xf32> to vector<8x64xf32>
    %142 = arith.addf %139, %141 : vector<8x64xf32>
    %143 = vector.extract_strided_slice %142 {offsets = [0, 0], sizes = [8, 32], strides = [1, 1]} : vector<8x64xf32> to vector<8x32xf32>
    %144 = vector.extract_strided_slice %142 {offsets = [0, 32], sizes = [8, 32], strides = [1, 1]} : vector<8x64xf32> to vector<8x32xf32>
    %145 = vector.shape_cast %7 : vector<1x1x8xf32> to vector<1x8xf32>
    %146 = vector.extract_strided_slice %137 {offsets = [0, 0], sizes = [8, 8], strides = [1, 1]} : vector<8x32xf32> to vector<8x8xf32>
    %147 = vector.extract_strided_slice %143 {offsets = [0, 0], sizes = [8, 8], strides = [1, 1]} : vector<8x32xf32> to vector<8x8xf32>
    %148 = arith.truncf %146 : vector<8x8xf32> to vector<8x8xbf16>
    %149 = arith.truncf %147 : vector<8x8xf32> to vector<8x8xbf16>
    %cst_57 = arith.constant dense<0.000000e+00> : vector<8x8xf32>
    %150 = tpu.matmul %148, %149, %cst_57 {dimension_numbers = #tpu.dot_dimension_numbers<[1], [1], [0], [0], [0, 0, 1, 0], [], []>} : vector<8x8xbf16>, vector<8x8xbf16>, vector<8x8xf32> -> vector<8x8xf32>
    %151 = vector.broadcast %145 : vector<1x8xf32> to vector<8x8xf32>
    %152 = arith.addf %150, %151 : vector<8x8xf32>
    %cst_58 = arith.constant dense<0xFF800000> : vector<8xf32>
    %153 = vector.multi_reduction <maximumf>, %152, %cst_58 [1] : vector<8x8xf32> to vector<8xf32>
    %154 = vector.shape_cast %153 : vector<8xf32> to vector<8x1xf32>
    %155 = vector.broadcast %154 : vector<8x1xf32> to vector<8x8xf32>
    %156 = arith.subf %152, %155 : vector<8x8xf32>
    %157 = math.exp %156 : vector<8x8xf32>
    %cst_59 = arith.constant dense<0.000000e+00> : vector<8xf32>
    %158 = vector.multi_reduction <add>, %157, %cst_59 [1] : vector<8x8xf32> to vector<8xf32>
    %159 = vector.shape_cast %158 : vector<8xf32> to vector<8x1xf32>
    %160 = tpu.reciprocal %159 {approx = true} : vector<8x1xf32> -> vector<8x1xf32>
    %161 = vector.broadcast %160 : vector<8x1xf32> to vector<8x8xf32>
    %162 = arith.mulf %157, %161 : vector<8x8xf32>
    %163 = vector.extract_strided_slice %144 {offsets = [0, 0], sizes = [8, 8], strides = [1, 1]} : vector<8x32xf32> to vector<8x8xf32>
    %164 = arith.truncf %162 : vector<8x8xf32> to vector<8x8xbf16>
    %165 = arith.truncf %163 : vector<8x8xf32> to vector<8x8xbf16>
    %cst_60 = arith.constant dense<0.000000e+00> : vector<8x8xf32>
    %166 = tpu.matmul %164, %165, %cst_60 {dimension_numbers = #tpu.dot_dimension_numbers<[1], [0], [0], [1], [0, 0, 1, 1], [], []>} : vector<8x8xbf16>, vector<8x8xbf16>, vector<8x8xf32> -> vector<8x8xf32>
    %167 = vector.extract_strided_slice %137 {offsets = [0, 8], sizes = [8, 8], strides = [1, 1]} : vector<8x32xf32> to vector<8x8xf32>
    %168 = vector.extract_strided_slice %143 {offsets = [0, 8], sizes = [8, 8], strides = [1, 1]} : vector<8x32xf32> to vector<8x8xf32>
    %169 = arith.truncf %167 : vector<8x8xf32> to vector<8x8xbf16>
    %170 = arith.truncf %168 : vector<8x8xf32> to vector<8x8xbf16>
    %cst_61 = arith.constant dense<0.000000e+00> : vector<8x8xf32>
    %171 = tpu.matmul %169, %170, %cst_61 {dimension_numbers = #tpu.dot_dimension_numbers<[1], [1], [0], [0], [0, 0, 1, 0], [], []>} : vector<8x8xbf16>, vector<8x8xbf16>, vector<8x8xf32> -> vector<8x8xf32>
    %172 = vector.broadcast %145 : vector<1x8xf32> to vector<8x8xf32>
    %173 = arith.addf %171, %172 : vector<8x8xf32>
    %cst_62 = arith.constant dense<0xFF800000> : vector<8xf32>
    %174 = vector.multi_reduction <maximumf>, %173, %cst_62 [1] : vector<8x8xf32> to vector<8xf32>
    %175 = vector.shape_cast %174 : vector<8xf32> to vector<8x1xf32>
    %176 = vector.broadcast %175 : vector<8x1xf32> to vector<8x8xf32>
    %177 = arith.subf %173, %176 : vector<8x8xf32>
    %178 = math.exp %177 : vector<8x8xf32>
    %cst_63 = arith.constant dense<0.000000e+00> : vector<8xf32>
    %179 = vector.multi_reduction <add>, %178, %cst_63 [1] : vector<8x8xf32> to vector<8xf32>
    %180 = vector.shape_cast %179 : vector<8xf32> to vector<8x1xf32>
    %181 = tpu.reciprocal %180 {approx = true} : vector<8x1xf32> -> vector<8x1xf32>
    %182 = vector.broadcast %181 : vector<8x1xf32> to vector<8x8xf32>
    %183 = arith.mulf %178, %182 : vector<8x8xf32>
    %184 = vector.extract_strided_slice %144 {offsets = [0, 8], sizes = [8, 8], strides = [1, 1]} : vector<8x32xf32> to vector<8x8xf32>
    %185 = arith.truncf %183 : vector<8x8xf32> to vector<8x8xbf16>
    %186 = arith.truncf %184 : vector<8x8xf32> to vector<8x8xbf16>
    %cst_64 = arith.constant dense<0.000000e+00> : vector<8x8xf32>
    %187 = tpu.matmul %185, %186, %cst_64 {dimension_numbers = #tpu.dot_dimension_numbers<[1], [0], [0], [1], [0, 0, 1, 1], [], []>} : vector<8x8xbf16>, vector<8x8xbf16>, vector<8x8xf32> -> vector<8x8xf32>
    %188 = vector.extract_strided_slice %137 {offsets = [0, 16], sizes = [8, 8], strides = [1, 1]} : vector<8x32xf32> to vector<8x8xf32>
    %189 = vector.extract_strided_slice %143 {offsets = [0, 16], sizes = [8, 8], strides = [1, 1]} : vector<8x32xf32> to vector<8x8xf32>
    %190 = arith.truncf %188 : vector<8x8xf32> to vector<8x8xbf16>
    %191 = arith.truncf %189 : vector<8x8xf32> to vector<8x8xbf16>
    %cst_65 = arith.constant dense<0.000000e+00> : vector<8x8xf32>
    %192 = tpu.matmul %190, %191, %cst_65 {dimension_numbers = #tpu.dot_dimension_numbers<[1], [1], [0], [0], [0, 0, 1, 0], [], []>} : vector<8x8xbf16>, vector<8x8xbf16>, vector<8x8xf32> -> vector<8x8xf32>
    %193 = vector.broadcast %145 : vector<1x8xf32> to vector<8x8xf32>
    %194 = arith.addf %192, %193 : vector<8x8xf32>
    %cst_66 = arith.constant dense<0xFF800000> : vector<8xf32>
    %195 = vector.multi_reduction <maximumf>, %194, %cst_66 [1] : vector<8x8xf32> to vector<8xf32>
    %196 = vector.shape_cast %195 : vector<8xf32> to vector<8x1xf32>
    %197 = vector.broadcast %196 : vector<8x1xf32> to vector<8x8xf32>
    %198 = arith.subf %194, %197 : vector<8x8xf32>
    %199 = math.exp %198 : vector<8x8xf32>
    %cst_67 = arith.constant dense<0.000000e+00> : vector<8xf32>
    %200 = vector.multi_reduction <add>, %199, %cst_67 [1] : vector<8x8xf32> to vector<8xf32>
    %201 = vector.shape_cast %200 : vector<8xf32> to vector<8x1xf32>
    %202 = tpu.reciprocal %201 {approx = true} : vector<8x1xf32> -> vector<8x1xf32>
    %203 = vector.broadcast %202 : vector<8x1xf32> to vector<8x8xf32>
    %204 = arith.mulf %199, %203 : vector<8x8xf32>
    %205 = vector.extract_strided_slice %144 {offsets = [0, 16], sizes = [8, 8], strides = [1, 1]} : vector<8x32xf32> to vector<8x8xf32>
    %206 = arith.truncf %204 : vector<8x8xf32> to vector<8x8xbf16>
    %207 = arith.truncf %205 : vector<8x8xf32> to vector<8x8xbf16>
    %cst_68 = arith.constant dense<0.000000e+00> : vector<8x8xf32>
    %208 = tpu.matmul %206, %207, %cst_68 {dimension_numbers = #tpu.dot_dimension_numbers<[1], [0], [0], [1], [0, 0, 1, 1], [], []>} : vector<8x8xbf16>, vector<8x8xbf16>, vector<8x8xf32> -> vector<8x8xf32>
    %209 = vector.extract_strided_slice %137 {offsets = [0, 24], sizes = [8, 8], strides = [1, 1]} : vector<8x32xf32> to vector<8x8xf32>
    %210 = vector.extract_strided_slice %143 {offsets = [0, 24], sizes = [8, 8], strides = [1, 1]} : vector<8x32xf32> to vector<8x8xf32>
    %211 = arith.truncf %209 : vector<8x8xf32> to vector<8x8xbf16>
    %212 = arith.truncf %210 : vector<8x8xf32> to vector<8x8xbf16>
    %cst_69 = arith.constant dense<0.000000e+00> : vector<8x8xf32>
    %213 = tpu.matmul %211, %212, %cst_69 {dimension_numbers = #tpu.dot_dimension_numbers<[1], [1], [0], [0], [0, 0, 1, 0], [], []>} : vector<8x8xbf16>, vector<8x8xbf16>, vector<8x8xf32> -> vector<8x8xf32>
    %214 = vector.broadcast %145 : vector<1x8xf32> to vector<8x8xf32>
    %215 = arith.addf %213, %214 : vector<8x8xf32>
    %cst_70 = arith.constant dense<0xFF800000> : vector<8xf32>
    %216 = vector.multi_reduction <maximumf>, %215, %cst_70 [1] : vector<8x8xf32> to vector<8xf32>
    %217 = vector.shape_cast %216 : vector<8xf32> to vector<8x1xf32>
    %218 = vector.broadcast %217 : vector<8x1xf32> to vector<8x8xf32>
    %219 = arith.subf %215, %218 : vector<8x8xf32>
    %220 = math.exp %219 : vector<8x8xf32>
    %cst_71 = arith.constant dense<0.000000e+00> : vector<8xf32>
    %221 = vector.multi_reduction <add>, %220, %cst_71 [1] : vector<8x8xf32> to vector<8xf32>
    %222 = vector.shape_cast %221 : vector<8xf32> to vector<8x1xf32>
    %223 = tpu.reciprocal %222 {approx = true} : vector<8x1xf32> -> vector<8x1xf32>
    %224 = vector.broadcast %223 : vector<8x1xf32> to vector<8x8xf32>
    %225 = arith.mulf %220, %224 : vector<8x8xf32>
    %226 = vector.extract_strided_slice %144 {offsets = [0, 24], sizes = [8, 8], strides = [1, 1]} : vector<8x32xf32> to vector<8x8xf32>
    %227 = arith.truncf %225 : vector<8x8xf32> to vector<8x8xbf16>
    %228 = arith.truncf %226 : vector<8x8xf32> to vector<8x8xbf16>
    %cst_72 = arith.constant dense<0.000000e+00> : vector<8x8xf32>
    %229 = tpu.matmul %227, %228, %cst_72 {dimension_numbers = #tpu.dot_dimension_numbers<[1], [0], [0], [1], [0, 0, 1, 1], [], []>} : vector<8x8xbf16>, vector<8x8xbf16>, vector<8x8xf32> -> vector<8x8xf32>
    %230 = tpu.concatenate %166, %187, %208, %229 in 1 : vector<8x8xf32>, vector<8x8xf32>, vector<8x8xf32>, vector<8x8xf32> -> vector<8x32xf32>
    %c0_73 = arith.constant 0 : index
    %c0_74 = arith.constant 0 : index
    %231 = vector.load %arg14[%c0_73, %c0_74] : memref<32x32xbf16, #tpu.memory_space<vmem>>, vector<32x32xbf16>
    %232 = arith.truncf %230 : vector<8x32xf32> to vector<8x32xbf16>
    %cst_75 = arith.constant dense<0.000000e+00> : vector<8x32xf32>
    %233 = tpu.matmul %232, %231, %cst_75 {dimension_numbers = #tpu.dot_dimension_numbers<[1], [0], [0], [1], [0, 0, 1, 1], [], []>} : vector<8x32xbf16>, vector<32x32xbf16>, vector<8x32xf32> -> vector<8x32xf32>
    %c0_76 = arith.constant 0 : index
    %c0_77 = arith.constant 0 : index
    %234 = vector.load %arg15[%c0_76, %c0_77] : memref<1x32xf32, #tpu.memory_space<vmem>>, vector<1x32xf32>
    %235 = vector.broadcast %234 : vector<1x32xf32> to vector<8x32xf32>
    %236 = arith.addf %233, %235 : vector<8x32xf32>
    %237 = arith.addf %131, %236 : vector<8x32xf32>
    %c0_78 = arith.constant 0 : index
    %c0_79 = arith.constant 0 : index
    %238 = vector.load %arg22[%c0_78, %c0_79] : memref<1x32xf32, #tpu.memory_space<vmem>>, vector<1x32xf32>
    %c0_80 = arith.constant 0 : index
    %c0_81 = arith.constant 0 : index
    %239 = vector.load %arg23[%c0_80, %c0_81] : memref<1x32xf32, #tpu.memory_space<vmem>>, vector<1x32xf32>
    %cst_82 = arith.constant dense<0.000000e+00> : vector<8xf32>
    %240 = vector.multi_reduction <add>, %237, %cst_82 [1] : vector<8x32xf32> to vector<8xf32>
    %241 = vector.shape_cast %240 : vector<8xf32> to vector<8x1xf32>
    %cst_83 = arith.constant 3.200000e+01 : f32
    %242 = vector.broadcast %cst_83 : f32 to vector<8x1xf32>
    %243 = arith.divf %241, %242 : vector<8x1xf32>
    %244 = vector.broadcast %243 : vector<8x1xf32> to vector<8x32xf32>
    %245 = arith.subf %237, %244 : vector<8x32xf32>
    %246 = arith.mulf %245, %245 : vector<8x32xf32>
    %cst_84 = arith.constant dense<0.000000e+00> : vector<8xf32>
    %247 = vector.multi_reduction <add>, %246, %cst_84 [1] : vector<8x32xf32> to vector<8xf32>
    %248 = vector.shape_cast %247 : vector<8xf32> to vector<8x1xf32>
    %cst_85 = arith.constant 3.200000e+01 : f32
    %249 = vector.broadcast %cst_85 : f32 to vector<8x1xf32>
    %250 = arith.divf %248, %249 : vector<8x1xf32>
    %251 = vector.broadcast %243 : vector<8x1xf32> to vector<8x32xf32>
    %252 = arith.subf %237, %251 : vector<8x32xf32>
    %cst_86 = arith.constant 9.99999974E-6 : f32
    %253 = vector.broadcast %cst_86 : f32 to vector<8x1xf32>
    %254 = arith.addf %250, %253 : vector<8x1xf32>
    %255 = math.rsqrt %254 : vector<8x1xf32>
    %256 = vector.broadcast %255 : vector<8x1xf32> to vector<8x32xf32>
    %257 = arith.mulf %252, %256 : vector<8x32xf32>
    %258 = vector.broadcast %238 : vector<1x32xf32> to vector<8x32xf32>
    %259 = arith.mulf %257, %258 : vector<8x32xf32>
    %260 = vector.broadcast %239 : vector<1x32xf32> to vector<8x32xf32>
    %261 = arith.addf %259, %260 : vector<8x32xf32>
    %c0_87 = arith.constant 0 : index
    %c0_88 = arith.constant 0 : index
    %262 = vector.load %arg16[%c0_87, %c0_88] : memref<32x64xbf16, #tpu.memory_space<vmem>>, vector<32x64xbf16>
    %263 = arith.truncf %261 : vector<8x32xf32> to vector<8x32xbf16>
    %cst_89 = arith.constant dense<0.000000e+00> : vector<8x64xf32>
    %264 = tpu.matmul %263, %262, %cst_89 {dimension_numbers = #tpu.dot_dimension_numbers<[1], [0], [0], [1], [0, 0, 1, 1], [], []>} : vector<8x32xbf16>, vector<32x64xbf16>, vector<8x64xf32> -> vector<8x64xf32>
    %c0_90 = arith.constant 0 : index
    %c0_91 = arith.constant 0 : index
    %265 = vector.load %arg17[%c0_90, %c0_91] : memref<1x64xf32, #tpu.memory_space<vmem>>, vector<1x64xf32>
    %266 = vector.broadcast %265 : vector<1x64xf32> to vector<8x64xf32>
    %267 = arith.addf %264, %266 : vector<8x64xf32>
    %cst_92 = arith.constant 5.000000e-01 : f32
    %268 = vector.broadcast %cst_92 : f32 to vector<8x64xf32>
    %269 = arith.mulf %268, %267 : vector<8x64xf32>
    %cst_93 = arith.constant 0.707106769 : f32
    %270 = vector.broadcast %cst_93 : f32 to vector<8x64xf32>
    %271 = arith.mulf %267, %270 : vector<8x64xf32>
    %272 = math.absf %271 : vector<8x64xf32>
    %cst_94 = arith.constant 0.327591091 : f32
    %273 = vector.broadcast %cst_94 : f32 to vector<8x64xf32>
    %274 = arith.mulf %273, %272 : vector<8x64xf32>
    %cst_95 = arith.constant 1.000000e+00 : f32
    %275 = vector.broadcast %cst_95 : f32 to vector<8x64xf32>
    %276 = arith.addf %275, %274 : vector<8x64xf32>
    %277 = tpu.reciprocal %276 {approx = true} : vector<8x64xf32> -> vector<8x64xf32>
    %cst_96 = arith.constant 1.06140542 : f32
    %278 = vector.broadcast %cst_96 : f32 to vector<8x64xf32>
    %279 = arith.mulf %277, %278 : vector<8x64xf32>
    %cst_97 = arith.constant -1.45315206 : f32
    %280 = vector.broadcast %cst_97 : f32 to vector<8x64xf32>
    %281 = arith.addf %280, %279 : vector<8x64xf32>
    %282 = arith.mulf %277, %281 : vector<8x64xf32>
    %cst_98 = arith.constant 1.42141378 : f32
    %283 = vector.broadcast %cst_98 : f32 to vector<8x64xf32>
    %284 = arith.addf %283, %282 : vector<8x64xf32>
    %285 = arith.mulf %277, %284 : vector<8x64xf32>
    %cst_99 = arith.constant -0.284496725 : f32
    %286 = vector.broadcast %cst_99 : f32 to vector<8x64xf32>
    %287 = arith.addf %286, %285 : vector<8x64xf32>
    %288 = arith.mulf %277, %287 : vector<8x64xf32>
    %cst_100 = arith.constant 0.254829586 : f32
    %289 = vector.broadcast %cst_100 : f32 to vector<8x64xf32>
    %290 = arith.addf %289, %288 : vector<8x64xf32>
    %291 = arith.mulf %277, %290 : vector<8x64xf32>
    %cst_101 = arith.constant 0.000000e+00 : f32
    %292 = vector.broadcast %cst_101 : f32 to vector<8x64xf32>
    %293 = arith.subf %292, %272 : vector<8x64xf32>
    %294 = arith.mulf %293, %272 : vector<8x64xf32>
    %295 = math.exp %294 : vector<8x64xf32>
    %296 = arith.mulf %291, %295 : vector<8x64xf32>
    %cst_102 = arith.constant 1.000000e+00 : f32
    %297 = vector.broadcast %cst_102 : f32 to vector<8x64xf32>
    %298 = arith.subf %297, %296 : vector<8x64xf32>
    %cst_103 = arith.constant 0.000000e+00 : f32
    %299 = vector.broadcast %cst_103 : f32 to vector<8x64xf32>
    %300 = arith.cmpf oge, %271, %299 : vector<8x64xf32>
    %cst_104 = arith.constant 0.000000e+00 : f32
    %301 = vector.broadcast %cst_104 : f32 to vector<8x64xf32>
    %302 = arith.subf %301, %298 : vector<8x64xf32>
    %303 = arith.select %300, %298, %302 : vector<8x64xi1>, vector<8x64xf32>
    %cst_105 = arith.constant 1.000000e+00 : f32
    %304 = vector.broadcast %cst_105 : f32 to vector<8x64xf32>
    %305 = arith.addf %304, %303 : vector<8x64xf32>
    %306 = arith.mulf %269, %305 : vector<8x64xf32>
    %c0_106 = arith.constant 0 : index
    %c0_107 = arith.constant 0 : index
    %307 = vector.load %arg18[%c0_106, %c0_107] : memref<64x32xbf16, #tpu.memory_space<vmem>>, vector<64x32xbf16>
    %308 = arith.truncf %306 : vector<8x64xf32> to vector<8x64xbf16>
    %cst_108 = arith.constant dense<0.000000e+00> : vector<8x32xf32>
    %309 = tpu.matmul %308, %307, %cst_108 {dimension_numbers = #tpu.dot_dimension_numbers<[1], [0], [0], [1], [0, 0, 1, 1], [], []>} : vector<8x64xbf16>, vector<64x32xbf16>, vector<8x32xf32> -> vector<8x32xf32>
    %c0_109 = arith.constant 0 : index
    %c0_110 = arith.constant 0 : index
    %310 = vector.load %arg19[%c0_109, %c0_110] : memref<1x32xf32, #tpu.memory_space<vmem>>, vector<1x32xf32>
    %311 = vector.broadcast %310 : vector<1x32xf32> to vector<8x32xf32>
    %312 = arith.addf %309, %311 : vector<8x32xf32>
    %313 = arith.addf %261, %312 : vector<8x32xf32>
    %c0_111 = arith.constant 0 : index
    %c0_112 = arith.constant 0 : index
    %314 = vector.load %arg24[%c0_111, %c0_112] : memref<1x32xf32, #tpu.memory_space<vmem>>, vector<1x32xf32>
    %c0_113 = arith.constant 0 : index
    %c0_114 = arith.constant 0 : index
    %315 = vector.load %arg25[%c0_113, %c0_114] : memref<1x32xf32, #tpu.memory_space<vmem>>, vector<1x32xf32>
    %cst_115 = arith.constant dense<0.000000e+00> : vector<8xf32>
    %316 = vector.multi_reduction <add>, %313, %cst_115 [1] : vector<8x32xf32> to vector<8xf32>
    %317 = vector.shape_cast %316 : vector<8xf32> to vector<8x1xf32>
    %cst_116 = arith.constant 3.200000e+01 : f32
    %318 = vector.broadcast %cst_116 : f32 to vector<8x1xf32>
    %319 = arith.divf %317, %318 : vector<8x1xf32>
    %320 = vector.broadcast %319 : vector<8x1xf32> to vector<8x32xf32>
    %321 = arith.subf %313, %320 : vector<8x32xf32>
    %322 = arith.mulf %321, %321 : vector<8x32xf32>
    %cst_117 = arith.constant dense<0.000000e+00> : vector<8xf32>
    %323 = vector.multi_reduction <add>, %322, %cst_117 [1] : vector<8x32xf32> to vector<8xf32>
    %324 = vector.shape_cast %323 : vector<8xf32> to vector<8x1xf32>
    %cst_118 = arith.constant 3.200000e+01 : f32
    %325 = vector.broadcast %cst_118 : f32 to vector<8x1xf32>
    %326 = arith.divf %324, %325 : vector<8x1xf32>
    %327 = vector.broadcast %319 : vector<8x1xf32> to vector<8x32xf32>
    %328 = arith.subf %313, %327 : vector<8x32xf32>
    %cst_119 = arith.constant 9.99999974E-6 : f32
    %329 = vector.broadcast %cst_119 : f32 to vector<8x1xf32>
    %330 = arith.addf %326, %329 : vector<8x1xf32>
    %331 = math.rsqrt %330 : vector<8x1xf32>
    %332 = vector.broadcast %331 : vector<8x1xf32> to vector<8x32xf32>
    %333 = arith.mulf %328, %332 : vector<8x32xf32>
    %334 = vector.broadcast %314 : vector<1x32xf32> to vector<8x32xf32>
    %335 = arith.mulf %333, %334 : vector<8x32xf32>
    %336 = vector.broadcast %315 : vector<1x32xf32> to vector<8x32xf32>
    %337 = arith.addf %335, %336 : vector<8x32xf32>
    %338 = vector.shape_cast %337 : vector<8x32xf32> to vector<1x8x32xf32>
    %339 = arith.truncf %338 : vector<1x8x32xf32> to vector<1x8x32xbf16>
    %c0_120 = arith.constant 0 : index
    %c0_121 = arith.constant 0 : index
    %c0_122 = arith.constant 0 : index
    %340 = vector.load %arg26[%c0_120, %c0_121, %c0_122] : memref<1x8x32xbf16, #tpu.memory_space<vmem>>, vector<1x8x32xbf16>
    tpu.vector_store %arg26[%c0_120, %c0_121, %c0_122], %339 {strides = array<i32>} : memref<1x8x32xbf16, #tpu.memory_space<vmem>>, vector<1x8x32xbf16>,
    return
  }
  func.func @transform_0(%arg0: i32) -> (i32, i32, i32) {
    %c0_i32 = arith.constant 0 : i32
    %c0_i32_0 = arith.constant 0 : i32
    %c0_i32_1 = arith.constant 0 : i32
    return %arg0, %c0_i32, %c0_i32_0 : i32, i32, i32
  }
  func.func @transform_1(%arg0: i32) -> (i32, i32, i32) {
    %c0_i32 = arith.constant 0 : i32
    %c0_i32_0 = arith.constant 0 : i32
    %c0_i32_1 = arith.constant 0 : i32
    return %arg0, %c0_i32, %c0_i32_0 : i32, i32, i32
  }
  func.func @transform_2(%arg0: i32) -> (i32, i32) {
    %c0_i32 = arith.constant 0 : i32
    %c0_i32_0 = arith.constant 0 : i32
    %c0_i32_1 = arith.constant 0 : i32
    return %c0_i32, %c0_i32_0 : i32, i32
  }
  func.func @transform_3(%arg0: i32) -> (i32, i32, i32) {
    %c0_i32 = arith.constant 0 : i32
    %c0_i32_0 = arith.constant 0 : i32
    %c0_i32_1 = arith.constant 0 : i32
    return %arg0, %c0_i32, %c0_i32_0 : i32, i32, i32
  }
  func.func @transform_4(%arg0: i32) -> (i32, i32, i32) {
    %c0_i32 = arith.constant 0 : i32
    %c0_i32_0 = arith.constant 0 : i32
    %c0_i32_1 = arith.constant 0 : i32
    return %arg0, %c0_i32, %c0_i32_0 : i32, i32, i32
  }
  func.func @transform_5(%arg0: i32) -> (i32, i32) {
    %c0_i32 = arith.constant 0 : i32
    %c0_i32_0 = arith.constant 0 : i32
    %c0_i32_1 = arith.constant 0 : i32
    return %c0_i32, %c0_i32_0 : i32, i32
  }
  func.func @transform_6(%arg0: i32) -> (i32, i32) {
    %c0_i32 = arith.constant 0 : i32
    %c0_i32_0 = arith.constant 0 : i32
    %c0_i32_1 = arith.constant 0 : i32
    return %c0_i32, %c0_i32_0 : i32, i32
  }
  func.func @transform_7(%arg0: i32) -> (i32, i32) {
    %c0_i32 = arith.constant 0 : i32
    %c0_i32_0 = arith.constant 0 : i32
    %c0_i32_1 = arith.constant 0 : i32
    return %c0_i32, %c0_i32_0 : i32, i32
  }
  func.func @transform_8(%arg0: i32) -> (i32, i32) {
    %c0_i32 = arith.constant 0 : i32
    %c0_i32_0 = arith.constant 0 : i32
    %c0_i32_1 = arith.constant 0 : i32
    return %c0_i32, %c0_i32_0 : i32, i32
  }
  func.func @transform_9(%arg0: i32) -> (i32, i32) {
    %c0_i32 = arith.constant 0 : i32
    %c0_i32_0 = arith.constant 0 : i32
    %c0_i32_1 = arith.constant 0 : i32
    return %c0_i32, %c0_i32_0 : i32, i32
  }
  func.func @transform_10(%arg0: i32) -> (i32, i32) {
    %c0_i32 = arith.constant 0 : i32
    %c0_i32_0 = arith.constant 0 : i32
    %c0_i32_1 = arith.constant 0 : i32
    return %c0_i32, %c0_i32_0 : i32, i32
  }
  func.func @transform_11(%arg0: i32) -> (i32, i32) {
    %c0_i32 = arith.constant 0 : i32
    %c0_i32_0 = arith.constant 0 : i32
    %c0_i32_1 = arith.constant 0 : i32
    return %c0_i32, %c0_i32_0 : i32, i32
  }
  func.func @transform_12(%arg0: i32) -> (i32, i32) {
    %c0_i32 = arith.constant 0 : i32
    %c0_i32_0 = arith.constant 0 : i32
    %c0_i32_1 = arith.constant 0 : i32
    return %c0_i32, %c0_i32_0 : i32, i32
  }
  func.func @transform_13(%arg0: i32) -> (i32, i32) {
    %c0_i32 = arith.constant 0 : i32
    %c0_i32_0 = arith.constant 0 : i32
    %c0_i32_1 = arith.constant 0 : i32
    return %c0_i32, %c0_i32_0 : i32, i32
  }
  func.func @transform_14(%arg0: i32) -> (i32, i32) {
    %c0_i32 = arith.constant 0 : i32
    %c0_i32_0 = arith.constant 0 : i32
    %c0_i32_1 = arith.constant 0 : i32
    return %c0_i32, %c0_i32_0 : i32, i32
  }
  func.func @transform_15(%arg0: i32) -> (i32, i32) {
    %c0_i32 = arith.constant 0 : i32
    %c0_i32_0 = arith.constant 0 : i32
    %c0_i32_1 = arith.constant 0 : i32
    return %c0_i32, %c0_i32_0 : i32, i32
  }
  func.func @transform_16(%arg0: i32) -> (i32, i32) {
    %c0_i32 = arith.constant 0 : i32
    %c0_i32_0 = arith.constant 0 : i32
    %c0_i32_1 = arith.constant 0 : i32
    return %c0_i32, %c0_i32_0 : i32, i32
  }
  func.func @transform_17(%arg0: i32) -> (i32, i32) {
    %c0_i32 = arith.constant 0 : i32
    %c0_i32_0 = arith.constant 0 : i32
    %c0_i32_1 = arith.constant 0 : i32
    return %c0_i32, %c0_i32_0 : i32, i32
  }
  func.func @transform_18(%arg0: i32) -> (i32, i32) {
    %c0_i32 = arith.constant 0 : i32
    %c0_i32_0 = arith.constant 0 : i32
    %c0_i32_1 = arith.constant 0 : i32
    return %c0_i32, %c0_i32_0 : i32, i32
  }
  func.func @transform_19(%arg0: i32) -> (i32, i32) {
    %c0_i32 = arith.constant 0 : i32
    %c0_i32_0 = arith.constant 0 : i32
    %c0_i32_1 = arith.constant 0 : i32
    return %c0_i32, %c0_i32_0 : i32, i32
  }
  func.func @transform_20(%arg0: i32) -> (i32, i32) {
    %c0_i32 = arith.constant 0 : i32
    %c0_i32_0 = arith.constant 0 : i32
    %c0_i32_1 = arith.constant 0 : i32
    return %c0_i32, %c0_i32_0 : i32, i32
  }
  func.func @transform_21(%arg0: i32) -> (i32, i32) {
    %c0_i32 = arith.constant 0 : i32
    %c0_i32_0 = arith.constant 0 : i32
    %c0_i32_1 = arith.constant 0 : i32
    return %c0_i32, %c0_i32_0 : i32, i32
  }
  func.func @transform_22(%arg0: i32) -> (i32, i32) {
    %c0_i32 = arith.constant 0 : i32
    %c0_i32_0 = arith.constant 0 : i32
    %c0_i32_1 = arith.constant 0 : i32
    return %c0_i32, %c0_i32_0 : i32, i32
  }
  func.func @transform_23(%arg0: i32) -> (i32, i32) {
    %c0_i32 = arith.constant 0 : i32
    %c0_i32_0 = arith.constant 0 : i32
    %c0_i32_1 = arith.constant 0 : i32
    return %c0_i32, %c0_i32_0 : i32, i32
  }
  func.func @transform_24(%arg0: i32) -> (i32, i32) {
    %c0_i32 = arith.constant 0 : i32
    %c0_i32_0 = arith.constant 0 : i32
    %c0_i32_1 = arith.constant 0 : i32
    return %c0_i32, %c0_i32_0 : i32, i32
  }
  func.func @transform_25(%arg0: i32) -> (i32, i32, i32) {
    %c0_i32 = arith.constant 0 : i32
    %c0_i32_0 = arith.constant 0 : i32
    %c0_i32_1 = arith.constant 0 : i32
    return %arg0, %c0_i32, %c0_i32_0 : i32, i32, i32
  }
}

module attributes {stable_mosaic.version = 11 : i64} {
  func.func @_norm_generator_kernel(%arg0: i32, %arg1: i32, %arg2: memref<1x8x32xbf16, #tpu.memory_space<vmem>>, %arg3: memref<1x32xf32, #tpu.memory_space<vmem>>, %arg4: memref<1x32xf32, #tpu.memory_space<vmem>>, %arg5: memref<32x16xbf16, #tpu.memory_space<vmem>>, %arg6: memref<1x16xf32, #tpu.memory_space<vmem>>, %arg7: memref<1x8x16xf32, #tpu.memory_space<vmem>>) attributes {dimension_semantics = [#tpu.dimension_semantics<parallel>, #tpu.dimension_semantics<parallel>], iteration_bounds = array<i64: 2, 1>, scalar_prefetch = 0 : i64, scratch_operands = 0 : i64, tpu.core_type = #tpu.core_type<tc>, window_params = [{transform_indices = @transform_0, window_bounds = array<i64: 1, 8, 32>}, {pipeline_mode = #tpu.pipeline_mode<synchronous>, transform_indices = @transform_1, window_bounds = array<i64: 1, 32>}, {pipeline_mode = #tpu.pipeline_mode<synchronous>, transform_indices = @transform_2, window_bounds = array<i64: 1, 32>}, {transform_indices = @transform_3, window_bounds = array<i64: 32, 16>}, {transform_indices = @transform_4, window_bounds = array<i64: 1, 16>}, {transform_indices = @transform_5, window_bounds = array<i64: 1, 8, 16>}]} {
    %c0 = arith.constant 0 : index
    %c0_0 = arith.constant 0 : index
    %c0_1 = arith.constant 0 : index
    %0 = vector.load %arg2[%c0, %c0_0, %c0_1] : memref<1x8x32xbf16, #tpu.memory_space<vmem>>, vector<1x8x32xbf16>
    %1 = arith.extf %0 : vector<1x8x32xbf16> to vector<1x8x32xf32>
    %2 = vector.shape_cast %1 : vector<1x8x32xf32> to vector<8x32xf32>
    %c0_2 = arith.constant 0 : index
    %c0_3 = arith.constant 0 : index
    %3 = vector.load %arg3[%c0_2, %c0_3] : memref<1x32xf32, #tpu.memory_space<vmem>>, vector<1x32xf32>
    %c0_4 = arith.constant 0 : index
    %c0_5 = arith.constant 0 : index
    %4 = vector.load %arg4[%c0_4, %c0_5] : memref<1x32xf32, #tpu.memory_space<vmem>>, vector<1x32xf32>
    %cst = arith.constant dense<0.000000e+00> : vector<8xf32>
    %5 = vector.multi_reduction <add>, %2, %cst [1] : vector<8x32xf32> to vector<8xf32>
    %6 = vector.shape_cast %5 : vector<8xf32> to vector<8x1xf32>
    %cst_6 = arith.constant 3.200000e+01 : f32
    %7 = vector.broadcast %cst_6 : f32 to vector<8x1xf32>
    %8 = arith.divf %6, %7 : vector<8x1xf32>
    %9 = vector.broadcast %8 : vector<8x1xf32> to vector<8x32xf32>
    %10 = arith.subf %2, %9 : vector<8x32xf32>
    %11 = arith.mulf %10, %10 : vector<8x32xf32>
    %cst_7 = arith.constant dense<0.000000e+00> : vector<8xf32>
    %12 = vector.multi_reduction <add>, %11, %cst_7 [1] : vector<8x32xf32> to vector<8xf32>
    %13 = vector.shape_cast %12 : vector<8xf32> to vector<8x1xf32>
    %cst_8 = arith.constant 3.200000e+01 : f32
    %14 = vector.broadcast %cst_8 : f32 to vector<8x1xf32>
    %15 = arith.divf %13, %14 : vector<8x1xf32>
    %16 = vector.broadcast %8 : vector<8x1xf32> to vector<8x32xf32>
    %17 = arith.subf %2, %16 : vector<8x32xf32>
    %cst_9 = arith.constant 9.99999974E-6 : f32
    %18 = vector.broadcast %cst_9 : f32 to vector<8x1xf32>
    %19 = arith.addf %15, %18 : vector<8x1xf32>
    %20 = math.rsqrt %19 : vector<8x1xf32>
    %21 = vector.broadcast %20 : vector<8x1xf32> to vector<8x32xf32>
    %22 = arith.mulf %17, %21 : vector<8x32xf32>
    %23 = vector.broadcast %3 : vector<1x32xf32> to vector<8x32xf32>
    %24 = arith.mulf %22, %23 : vector<8x32xf32>
    %25 = vector.broadcast %4 : vector<1x32xf32> to vector<8x32xf32>
    %26 = arith.addf %24, %25 : vector<8x32xf32>
    %c0_10 = arith.constant 0 : index
    %c0_11 = arith.constant 0 : index
    %27 = vector.load %arg5[%c0_10, %c0_11] : memref<32x16xbf16, #tpu.memory_space<vmem>>, vector<32x16xbf16>
    %28 = arith.truncf %26 : vector<8x32xf32> to vector<8x32xbf16>
    %cst_12 = arith.constant dense<0.000000e+00> : vector<8x16xf32>
    %29 = tpu.matmul %28, %27, %cst_12 {dimension_numbers = #tpu.dot_dimension_numbers<[1], [0], [0], [1], [0, 0, 1, 1], [], []>} : vector<8x32xbf16>, vector<32x16xbf16>, vector<8x16xf32> -> vector<8x16xf32>
    %c0_13 = arith.constant 0 : index
    %c0_14 = arith.constant 0 : index
    %30 = vector.load %arg6[%c0_13, %c0_14] : memref<1x16xf32, #tpu.memory_space<vmem>>, vector<1x16xf32>
    %31 = vector.broadcast %30 : vector<1x16xf32> to vector<8x16xf32>
    %32 = arith.addf %29, %31 : vector<8x16xf32>
    %33 = vector.shape_cast %32 : vector<8x16xf32> to vector<1x8x16xf32>
    %c0_15 = arith.constant 0 : index
    %c0_16 = arith.constant 0 : index
    %c0_17 = arith.constant 0 : index
    %34 = vector.load %arg7[%c0_15, %c0_16, %c0_17] : memref<1x8x16xf32, #tpu.memory_space<vmem>>, vector<1x8x16xf32>
    tpu.vector_store %arg7[%c0_15, %c0_16, %c0_17], %33 {strides = array<i32>} : memref<1x8x16xf32, #tpu.memory_space<vmem>>, vector<1x8x16xf32>,
    return
  }
  func.func @transform_0(%arg0: i32, %arg1: i32) -> (i32, i32, i32) {
    %c0_i32 = arith.constant 0 : i32
    %c0_i32_0 = arith.constant 0 : i32
    %c0_i32_1 = arith.constant 0 : i32
    return %arg0, %c0_i32, %c0_i32_0 : i32, i32, i32
  }
  func.func @transform_1(%arg0: i32, %arg1: i32) -> (i32, i32) {
    %c0_i32 = arith.constant 0 : i32
    %c0_i32_0 = arith.constant 0 : i32
    %c0_i32_1 = arith.constant 0 : i32
    return %c0_i32, %c0_i32_0 : i32, i32
  }
  func.func @transform_2(%arg0: i32, %arg1: i32) -> (i32, i32) {
    %c0_i32 = arith.constant 0 : i32
    %c0_i32_0 = arith.constant 0 : i32
    %c0_i32_1 = arith.constant 0 : i32
    return %c0_i32, %c0_i32_0 : i32, i32
  }
  func.func @transform_3(%arg0: i32, %arg1: i32) -> (i32, i32) {
    %c0_i32 = arith.constant 0 : i32
    %c0_i32_0 = arith.constant 0 : i32
    return %c0_i32, %arg1 : i32, i32
  }
  func.func @transform_4(%arg0: i32, %arg1: i32) -> (i32, i32) {
    %c0_i32 = arith.constant 0 : i32
    %c0_i32_0 = arith.constant 0 : i32
    return %c0_i32, %arg1 : i32, i32
  }
  func.func @transform_5(%arg0: i32, %arg1: i32) -> (i32, i32, i32) {
    %c0_i32 = arith.constant 0 : i32
    %c0_i32_0 = arith.constant 0 : i32
    return %arg0, %c0_i32, %arg1 : i32, i32, i32
  }
}

</mosaic_0001>

<bundles_post_ra>
// kernel: seq2seq_forward.5
= control target key start
LH: loop header
LB: loop body
LE: loop exit
PB: predicated region body
PF: predicated region fallthrough
CT: control target
= control target key end

     0   :  { %s1795_s24 = smov 0   ;;  %s1973_s0 = inlined_call_operand.vmem [shape: bf16[2,8,32], index: 0, kind: input, shape index: {}]   ;;  %s1974_s1 = inlined_call_operand.vmem [shape: f32[8,8], index: 1, kind: input, shape index: {}]   ;;  %s1975_s2 = inlined_call_operand.vmem [shape: f32[2,1,8], index: 2, kind: input, shape index: {}]   ;;  %s1976_s3 = inlined_call_operand.vmem [shape: bf16[32,96], index: 3, kind: input, shape index: {}]   ;;  %s1977_s4 = inlined_call_operand.vmem [shape: f32[1,96], index: 4, kind: input, shape index: {}]   ;;  %s1978_s5 = inlined_call_operand.vmem [shape: bf16[32,32], index: 5, kind: input, shape index: {}]   ;;  %s1979_s6 = inlined_call_operand.vmem [shape: f32[1,32], index: 6, kind: input, shape index: {}]   ;;  %s1980_s7 = inlined_call_operand.vmem [shape: bf16[32,64], index: 7, kind: input, shape index: {}]   ;;  %s1981_s8 = inlined_call_operand.vmem [shape: f32[1,64], index: 8, kind: input, shape index: {}]   ;;  %s1982_s9 = inlined_call_operand.vmem [shape: bf16[64,32], index: 9, kind: input, shape index: {}]   ;;  %s1983_s10 = inlined_call_operand.vmem [shape: f32[1,32], index: 10, kind: input, shape index: {}]   ;;  %s1984_s11 = inlined_call_operand.vmem [shape: f32[1,32], index: 11, kind: input, shape index: {}]   ;;  %s1985_s12 = inlined_call_operand.vmem [shape: f32[1,32], index: 12, kind: input, shape index: {}]   ;;  %s1986_s13 = inlined_call_operand.vmem [shape: f32[1,32], index: 13, kind: input, shape index: {}]   ;;  %s1987_s14 = inlined_call_operand.vmem [shape: f32[1,32], index: 14, kind: input, shape index: {}]   ;;  %s1988_s15 = inlined_call_operand.vmem [shape: f32[1,32], index: 15, kind: input, shape index: {}]   ;;  %s1989_s16 = inlined_call_operand.vmem [shape: f32[1,32], index: 16, kind: input, shape index: {}]   ;;  %s1990_s17 = inlined_call_operand.vmem [shape: bf16[2,8,32], index: 17, kind: output, shape index: {}]  }
   0x1   :  { %1991 = sst [smem:[#allocation2_spill]] %s1973_s0 }
   0x2   :  { %1992 = sst [smem:[#allocation3_spill]] %s1974_s1 }
   0x3 LB: > { %s1467_s25 = sadd.s32 4294967295, %s1687_s24   ;;  %p1471_p0 = scmp.ge.s32.totalorder %s1687_s24, 1  ;;  %s1687_s24 = sphi %s1795_s24, %s27_s24  }
   0x4   : > { %p494_p1 = scmp.lt.s32.totalorder %s1687_s24, 3 }
   0x6   : > { %p495_p2 = pnand %p1471_p0, %p494_p1 }
   0x7   : > { %v1646_v0 = vld [vmem:[%s1976_s3] sm:$0xff] (!%p495_p2)   ;;  %v1689_v1 = vmov (!%p495_p2), 0.0   ;;  %v1647_v2 = vld [vmem:[%s1976_s3 + $0x8] sm:$0xff] (!%p495_p2)   ;;  %vm1690_vm0 = vmmov (!%p495_p2), 0   ;;  %p547_p3 = scmp.lt.s32.totalorder (!%p495_p2), %s1467_s25, 1  ;;  %vm587_vm1 = vcmask (!%p495_p2), 261120  }
   0x8   : > { %498 = sbr.rel (%p495_p2) target bundleno = 2609 (0xa31), region = 88  ;;  %1538 = vmatprep.subr.bf16.mxu0 (!%p495_p2), %v1689_v1  ;;  %1546 = vmatprep.subr.bf16.mxu1 (!%p495_p2), %v1689_v1  ;;  %s1993_s30 = sld [smem:[#allocation2_spill]] (!%p495_p2)  ;;  %v1475_v5 = vld [vmem:[%s1977_s4] ss:$0 sm:$0xff] (!%p495_p2)  ;;  %vm642_vm2 = vcmask (!%p495_p2), 64512   ;;  %vm706_vm3 = vcmask (!%p495_p2), 1043456  }
   0x9   : > { %1539 = vmatpush3.bf16.msra.mxu0 (!%p495_p2), %v1646_v0  ;;  %1542 = vmatprep.mubr.msk.bf16.mxu0 (!%p495_p2), %vm1690_vm0, %v1689_v1  ;;  %s1691_s20 = smov (!%p495_p2), 120   ;;  %s1692_s21 = smov (!%p495_p2), 96   ;;  %vm1093_vm4 = vcmask (!%p495_p2), 130048   ;;  %vm1095_vm5 = vcmask (!%p495_p2), 195584   ;;  %vm1328_vm7 = vcmask (!%p495_p2), 523264   ;;  %vm1403_vm8 = vcmask (!%p495_p2), 257024  }
   0xa   : > { %1540 = vmatprep.subr.bf16.mxu0 (!%p495_p2), %v1689_v1  ;;  %1548 = vmatprep.mubr.msk.bf16.mxu1 (!%p495_p2), %vm1690_vm0, %v1689_v1  ;;  %s1693_s22 = smov (!%p495_p2), 80   ;;  %s1694_s23 = smov (!%p495_p2), 88  }
   0xb   : > { %s1695_s15 = smov (!%p495_p2), 72   ;;  %s1696_s16 = smov (!%p495_p2), 112  }
   0xc   : > { %s1697_s26 = smov (!%p495_p2), 104   ;;  %s1994_s19 = sld [smem:[#allocation3_spill]] (!%p495_p2) }
   0xd   : > { %1541 = vmatpush3.bf16.msra.mxu0 (!%p495_p2), %v1647_v2  ;;  %s1698_s1 = smov (!%p495_p2), 56   ;;  %s1703_s29 = smov (!%p495_p2), 16  }
   0xe   : > { %1552 = vmatprep.subr.bf16.mxu0 (!%p495_p2), %v1689_v1 }
   0xf   : > { %s1996_s25 = smov (!%p547_p3, %s1467_s25), 1 }
  0x10   : > { %s1472_s28 = sshll.u32 %s1996_s25, 2  ;;  %s553_s0 = scalar_lea.vmem %s1975_s2, %s1996_s25 }
  0x11   : > { %s550_s18 = scalar_lea.vmem %s1993_s30, %s1472_s28  ;;  %v1479_v24 = vld [vmem:[%s553_s0] ss:$0 sm:$0xff]  ;;  %s1704_s0 = smov 24  }
  0x12   : > { %v1825_v3 = vld [vmem:[%s550_s18] sm:$0xf]  ;;  %s557_s30 = scalar_lea.vmem %s1990_s17, %s1472_s28 }
  0x13   : > { %v1474_v4 = vcombine.low %v1825_v3, %v1825_v3  ;;  %v561_v23 = vld [vmem:[%s1994_s19] sm:$0xff] }
  0x14   : > { %v637_v25 = vadd.f32 %v1479_v24, %v561_v23 }
  0x15   : > { %1543 = vmatmul.mubr.msk.bf16.vlgmr.msra.gmra.mrb[0].mxu0 %vm587_vm1, %v1474_v4 }
  0x16   : > { %1554 = vmatprep.mubr.msk.bf16.mxu0 %vm1690_vm0, %v1689_v1 }
  0xe8   : > { %v625_v6 = vpop.f32.mrb[0].mxu0 }
  0xe9   : > { %v626_v7 = vadd.f32 %v1475_v5, %v625_v6  ;;  %v1544_v8 = vpop.f32.mrb[1].mxu0 }
  0xea   : > { %v628_v9 = vpop.f32.mrb[2].mxu0 }
  0xeb   : > { %v1835_v10 = vpack.c.bf16 %v626_v7, %v626_v7  ;;  %v1545_v11 = vpop.f32.mrb[3].mxu0 }
  0xed   : > { %750 = vrot.lane.b32.xlu1 %v1835_v10, %s1691_s20  ;;  %640 = vrot.lane.b32.xlu0 %v1835_v10, %s1692_s21  ;;  %s1699_s20 = smov 64   ;;  %s1700_s21 = smov 40  }
  0xf1   : > { %862 = vrot.lane.b32.xlu1 %v1835_v10, %s1693_s22  ;;  %752 = vrot.lane.b32.xlu0 %v1835_v10, %s1694_s23  ;;  %s1701_s22 = smov 48   ;;  %s1702_s23 = smov 8  }
  0xf5   : > { %972 = vrot.lane.b32.xlu1 %v1835_v10, %s1695_s15  ;;  %860 = vrot.lane.b32.xlu0 %v1835_v10, %s1696_s16 }
  0xf9   : > { %970 = vrot.lane.b32.xlu0 %v1835_v10, %s1697_s26 }
 0x15f   : > { %v641_v12 = vpop.permute.xlu0 %640  ;;  %v751_v15 = vpop.permute.xlu1 %750 }
 0x160   : > { %v647_v13 = vsel %vm642_vm2, %v641_v12, 0 }
 0x161   : > { %1547 = vmatpush3.bf16.xpose.msra.mxu1 %v647_v13 }
 0x162   : > { %1558 = vmatprep.subr.bf16.mxu1 %v1689_v1 }
 0x163   : > { %v753_v14 = vpop.permute.xlu0 %752  ;;  %v863_v17 = vpop.permute.xlu1 %862 }
 0x164   : > { %v758_v16 = vsel %vm642_vm2, %v753_v14, 0  ;;  %v868_v18 = vsel %vm642_vm2, %v863_v17, 0 }
 0x167   : > { %v973_v19 = vpop.permute.xlu1 %972  ;;  %v861_v20 = vpop.permute.xlu0 %860 }
 0x168   : > { %1549 = vmatmul.mubr.msk.bf16.vlgmr.msra.gmra.mrb[0].mxu1 %vm642_vm2, %v1835_v10  ;;  %v978_v21 = vsel %vm642_vm2, %v973_v19, 0 }
 0x169   : > { %1559 = vmatpush3.bf16.xpose.msra.mxu1 %v758_v16  ;;  %1560 = vmatprep.mubr.msk.bf16.mxu1 %vm1690_vm0, %v1689_v1 }
 0x16a   : > { %1570 = vmatprep.subr.bf16.mxu1 %v1689_v1 }
 0x16b   : > { %v971_v22 = vpop.permute.xlu0 %970 }
 0x170   : > { %1561 = vmatmul.mubr.msk.bf16.vlgmr.msra.gmra.mrb[4].mxu1 %vm642_vm2, %v751_v15 }
 0x171   : > { %1571 = vmatpush3.bf16.xpose.msra.mxu1 %v868_v18  ;;  %1572 = vmatprep.mubr.msk.bf16.mxu1 %vm1690_vm0, %v1689_v1 }
 0x172   : > { %1582 = vmatprep.subr.bf16.mxu1 %v1689_v1 }
 0x178   : > { %1573 = vmatmul.mubr.msk.bf16.vlgmr.msra.gmra.mrb[8].mxu1 %vm642_vm2, %v861_v20 }
 0x179   : > { %1583 = vmatpush3.bf16.xpose.msra.mxu1 %v978_v21  ;;  %1584 = vmatprep.mubr.msk.bf16.mxu1 %vm1690_vm0, %v1689_v1 }
 0x17a   : > { %1594 = vmatprep.subr.bf16.mxu1 %v1689_v1 }
 0x180   : > { %1585 = vmatmul.mubr.msk.bf16.vlgmr.msra.gmra.mrb[12].mxu1 %vm642_vm2, %v971_v22 }
 0x181   : > { %1598 = vmatprep.mubr.msk.bf16.mxu1 %vm1690_vm0, %v1689_v1 }
 0x23b   : > { %v683_v26 = vpop.f32.mrb[0].mxu1 }
 0x23c   : > { %v684_v27 = vadd.f32 %v683_v26, %v637_v25  ;;  %v1550_v28 = vpop.f32.mrb[1].mxu1 }
 0x23d   : > { %v686_v29 = vpop.f32.mrb[2].mxu1 }
 0x23e   : > { %v1551_v30 = vpop.f32.mrb[3].mxu1  ;;  %v689_v31 = vsel %vm642_vm2, %v684_v27, -inf }
 0x23f   : > { %690 = vmax.xlane.f32.xlu1 %v689_v31 }
 0x243   : > { %v794_v32 = vpop.f32.mrb[4].mxu1 }
 0x244   : > { %v795_v33 = vadd.f32 %v794_v32, %v637_v25  ;;  %v1562_v34 = vpop.f32.mrb[5].mxu1 }
 0x245   : > { %v797_v35 = vpop.f32.mrb[6].mxu1 }
 0x246   : > { %v1563_v36 = vpop.f32.mrb[7].mxu1  ;;  %v800_v37 = vsel %vm642_vm2, %v795_v33, -inf }
 0x247   : > { %801 = vmax.xlane.f32.xlu0 %v800_v37 }
 0x24b   : > { %v904_v38 = vpop.f32.mrb[8].mxu1 }
 0x24c   : > { %v905_v39 = vadd.f32 %v904_v38, %v637_v25  ;;  %v1574_v40 = vpop.f32.mrb[9].mxu1 }
 0x24d   : > { %v907_v41 = vpop.f32.mrb[10].mxu1  ;;  %v1649_v40 = vld [vmem:[%s1978_s5] sm:$0xff]  }
 0x24e   : > { %v1575_v42 = vpop.f32.mrb[11].mxu1  ;;  %v910_v43 = vsel %vm642_vm2, %v905_v39, -inf  ;;  %1595 = vmatpush3.bf16.msra.mxu1 %v1649_v40  ;;  %v1650_v41 = vld [vmem:[%s1978_s5 + $0x8] sm:$0xff]  }
 0x24f   : > { %911 = vmax.xlane.f32.xlu0 %v910_v43  ;;  %1596 = vmatprep.subr.bf16.mxu1 %v1689_v1 }
 0x252   : > { %1597 = vmatpush3.bf16.msra.mxu1 %v1650_v41 }
 0x253   : > { %v1014_v44 = vpop.f32.mrb[12].mxu1  ;;  %1610 = vmatprep.subr.bf16.mxu1 %v1689_v1 }
 0x254   : > { %v1015_v45 = vadd.f32 %v1014_v44, %v637_v25  ;;  %v1586_v46 = vpop.f32.mrb[13].mxu1 }
 0x255   : > { %v1017_v47 = vpop.f32.mrb[14].mxu1 }
 0x256   : > { %v1587_v48 = vpop.f32.mrb[15].mxu1  ;;  %v1020_v49 = vsel %vm642_vm2, %v1015_v45, -inf }
 0x257   : > { %1021 = vmax.xlane.f32.xlu1 %v1020_v49 }
 0x2cc   : > { %v691_v50 = vpop.xlane.xlu1 %690 }
 0x2cd   : > { %v692_v51 = vsub.f32 %v684_v27, %v691_v50 }
 0x2cf   : > { %v693_v52 = vmul.f32 1.442695, %v692_v51 }
 0x2d1   : > { %1657 = vpow2.f32 %v693_v52 }
 0x2d4   : > { %v802_v53 = vpop.xlane.xlu0 %801 }
 0x2d5   : > { %v803_v54 = vsub.f32 %v795_v33, %v802_v53 }
 0x2d7   : > { %v804_v55 = vmul.f32 1.442695, %v803_v54 }
 0x2d9   : > { %1659 = vpow2.f32 %v804_v55 }
 0x2db   : > { %v1658_v56 = vpop.eup %1657 }
 0x2dc   : > { %v912_v57 = vpop.xlane.xlu0 %911  ;;  %v695_v58 = vsel %vm642_vm2, %v1658_v56, 0.0 }
 0x2dd   : > { %v913_v59 = vsub.f32 %v905_v39, %v912_v57  ;;  %696 = vadd.xlane.f32.xlu0 %v695_v58  ;;  %v1488_v57 = vld [vmem:[%s1979_s6] ss:$0 sm:$0xff]  ;;  %v560_v58 = vunpack.c.l.bf16 %v1825_v3 }
 0x2de   : > { %v1651_v3 = vld [vmem:[%s1980_s7] sm:$0xff]  }
 0x2df   : > { %v914_v60 = vmul.f32 1.442695, %v913_v59 }
 0x2e1   : > { %1661 = vpow2.f32 %v914_v60 }
 0x2e3   : > { %v1660_v61 = vpop.eup %1659 }
 0x2e4   : > { %v806_v62 = vsel %vm642_vm2, %v1660_v61, 0.0  ;;  %v1022_v2 = vpop.xlane.xlu1 %1021 }
 0x2e5   : > { %807 = vadd.xlane.f32.xlu1 %v806_v62  ;;  %v1023_v4 = vsub.f32 %v1015_v45, %v1022_v2 }
 0x2e7   : > { %v1024_v5 = vmul.f32 1.442695, %v1023_v4 }
 0x2e9   : > { %1663 = vpow2.f32 %v1024_v5 }
 0x2eb   : > { %v1662_v63 = vpop.eup %1661 }
 0x2ec   : > { %v916_v0 = vsel %vm642_vm2, %v1662_v63, 0.0 }
 0x2ed   : > { %917 = vadd.xlane.f32.xlu0 %v916_v0 }
 0x2f3   : > { %v1664_v6 = vpop.eup %1663 }
 0x2f4   : > { %v1026_v7 = vsel %vm642_vm2, %v1664_v6, 0.0 }
 0x2f6   : > { %812 = vrot.lane.b32.xlu1 %v1835_v10, %s1698_s1 }
 0x303   : > { %701 = vrot.lane.b32.xlu0 %v1835_v10, %s1699_s20 }
 0x307   : > { %1032 = vrot.lane.b32.xlu0 %v1835_v10, %s1700_s21 }
 0x31a   : > { %1027 = vadd.xlane.f32.xlu1 %v1026_v7 }
 0x32b   : > { %922 = vrot.lane.b32.xlu1 %v1835_v10, %s1701_s22 }
 0x36a   : > { %v697_v8 = vpop.xlane.xlu0 %696 }
 0x36b   : > { %1665 = vrcp.f32 %v697_v8 }
 0x372   : > { %v808_v9 = vpop.xlane.xlu1 %807 }
 0x373   : > { %1667 = vrcp.f32 %v808_v9  ;;  %v1652_v9 = vld [vmem:[%s1980_s7 + $0x8] sm:$0xff]  }
 0x375   : > { %v1666_v11 = vpop.eup %1665 }
 0x376   : > { %v699_v13 = vmul.f32 %v1666_v11, %v1658_v56  ;;  %v813_v16 = vpop.permute.xlu1 %812 }
 0x377   : > { %v818_v19 = vsel %vm706_vm3, %v813_v16, 0 }
 0x378   : > { %v700_v17 = vpack.c.bf16 %v699_v13, %v699_v13 }
 0x37a   : > { %v918_v12 = vpop.xlane.xlu0 %917 }
 0x37b   : > { %1669 = vrcp.f32 %v918_v12 }
 0x37d   : > { %v1668_v18 = vpop.eup %1667 }
 0x37e   : > { %v702_v14 = vpop.permute.xlu0 %701  ;;  %v810_v10 = vmul.f32 %v1668_v18, %v1660_v61 }
 0x37f   : > { %v708_v15 = vsel %vm706_vm3, %v702_v14, 0 }
 0x380   : > { %1553 = vmatpush3.bf16.msra.mxu0 %v708_v15  ;;  %v811_v20 = vpack.c.bf16 %v810_v10, %v810_v10  ;;  %v1492_v15 = vld [vmem:[%s1984_s11] ss:$0 sm:$0xff] }
 0x381   : > { %1564 = vmatprep.subr.bf16.mxu0 %v1689_v1 }
 0x382   : > { %v1033_v26 = vpop.permute.xlu0 %1032 }
 0x383   : > { %1555 = vmatmul.mubr.msk.bf16.vlgmr.msra.gmra.mrb[4].mxu0 %vm642_vm2, %v700_v17  ;;  %v1038_v28 = vsel %vm706_vm3, %v1033_v26, 0  ;;  %v1493_v17 = vld [vmem:[%s1985_s12] ss:$0 sm:$0xff] }
 0x384   : > { %1565 = vmatpush3.bf16.msra.mxu0 %v818_v19  ;;  %1566 = vmatprep.mubr.msk.bf16.mxu0 %vm1690_vm0, %v1689_v1 }
 0x385   : > { %1576 = vmatprep.subr.bf16.mxu0 %v1689_v1  ;;  %v1670_v21 = vpop.eup %1669 }
 0x386   : > { %v920_v23 = vmul.f32 %v1670_v21, %v1662_v63  ;;  %v1654_v21 = vld [vmem:[%s1982_s9 + $0x8] sm:$0xff]  }
 0x388   : > { %v921_v27 = vpack.c.bf16 %v920_v23, %v920_v23  ;;  %v1656_v23 = vld [vmem:[%s1982_s9 + $0x18] sm:$0xff]  }
 0x38b   : > { %1567 = vmatmul.mubr.msk.bf16.vlgmr.msra.gmra.mrb[8].mxu0 %vm642_vm2, %v811_v20  ;;  %v1653_v20 = vld [vmem:[%s1982_s9] sm:$0xff]  }
 0x38c   : > { %1578 = vmatprep.mubr.msk.bf16.mxu0 %vm1690_vm0, %v1689_v1 }
 0x3a7   : > { %v1028_v22 = vpop.xlane.xlu1 %1027 }
 0x3a8   : > { %1671 = vrcp.f32 %v1028_v22  ;;  %v1655_v22 = vld [vmem:[%s1982_s9 + $0x10] sm:$0xff]  }
 0x3ab   : > { %v923_v24 = vpop.permute.xlu1 %922 }
 0x3ac   : > { %v928_v25 = vsel %vm706_vm3, %v923_v24, 0  ;;  %v1494_v24 = vld [vmem:[%s1981_s8] ss:$0 sm:$0xff] }
 0x3ad   : > { %1577 = vmatpush3.bf16.msra.mxu0 %v928_v25 }
 0x3ae   : > { %1588 = vmatprep.subr.bf16.mxu0 %v1689_v1 }
 0x3b0   : > { %1579 = vmatmul.mubr.msk.bf16.vlgmr.msra.gmra.mrb[12].mxu0 %vm642_vm2, %v921_v27 }
 0x3b1   : > { %1589 = vmatpush3.bf16.msra.mxu0 %v1038_v28  ;;  %1590 = vmatprep.mubr.msk.bf16.mxu0 %vm1690_vm0, %v1689_v1 }
 0x3b2   : > { %v1672_v29 = vpop.eup %1671  ;;  %1602 = vmatprep.subr.bf16.mxu0 %v1689_v1 }
 0x3b3   : > { %v1030_v30 = vmul.f32 %v1672_v29, %v1664_v6 }
 0x3b5   : > { %v1031_v31 = vpack.c.bf16 %v1030_v30, %v1030_v30 }
 0x3b8   : > { %1591 = vmatmul.mubr.msk.bf16.vlgmr.msra.gmra.mrb[16].mxu0 %vm642_vm2, %v1031_v31 }
 0x3b9   : > { %1606 = vmatprep.mubr.msk.bf16.mxu0 %vm1690_vm0, %v1689_v1  ;;  %1603 = vmatpush3.bf16.msra.mxu0 %v1651_v3 }
 0x3ba   : > { %1604 = vmatprep.subr.bf16.mxu0 %v1689_v1 }
 0x3bd   : > { %1605 = vmatpush3.bf16.msra.mxu0 %v1652_v9  ;;  %v1504_v9 = vld [vmem:[%s1986_s13] ss:$0 sm:$0xff] }
 0x456   : > { %v744_v32 = vpop.f32.mrb[4].mxu0 }
 0x457   : > { %v1556_v33 = vpop.f32.mrb[5].mxu0 }
 0x458   : > { %v747_v34 = vpop.f32.mrb[6].mxu0 }
 0x459   : > { %v1557_v35 = vpop.f32.mrb[7].mxu0 }
 0x45e   : > { %v854_v36 = vpop.f32.mrb[8].mxu0 }
 0x45f   : > { %1081 = vrot.lane.b32.xlu1 %v854_v36, %s1702_s23  ;;  %v1568_v37 = vpop.f32.mrb[9].mxu0 }
 0x460   : > { %v857_v38 = vpop.f32.mrb[10].mxu0 }
 0x461   : > { %v1569_v39 = vpop.f32.mrb[11].mxu0 }
 0x483   : > { %v964_v42 = vpop.f32.mrb[12].mxu0 }
 0x484   : > { %1085 = vrot.lane.b32.xlu0 %v964_v42, %s1703_s29  ;;  %v1580_v43 = vpop.f32.mrb[13].mxu0 }
 0x485   : > { %v967_v44 = vpop.f32.mrb[14].mxu0 }
 0x486   : > { %v1581_v45 = vpop.f32.mrb[15].mxu0 }
 0x48b   : > { %v1074_v46 = vpop.f32.mrb[16].mxu0 }
 0x48c   : > { %1089 = vrot.lane.b32.xlu1 %v1074_v46, %s1704_s0  ;;  %v1592_v47 = vpop.f32.mrb[17].mxu0 }
 0x48d   : > { %v1077_v48 = vpop.f32.mrb[18].mxu0 }
 0x48e   : > { %v1593_v49 = vpop.f32.mrb[19].mxu0 }
 0x4d1   : > { %v1082_v50 = vpop.permute.xlu1 %1081 }
 0x4d2   : > { %v1092_v52 = vsel %vm642_vm2, %v744_v32, %v1082_v50 }
 0x4f6   : > { %v1086_v51 = vpop.permute.xlu0 %1085 }
 0x4f7   : > { %v1094_v53 = vsel %vm1093_vm4, %v1092_v52, %v1086_v51 }
 0x4fe   : > { %v1090_v54 = vpop.permute.xlu1 %1089 }
 0x4ff   : > { %v1096_v55 = vsel %vm1095_vm5, %v1094_v53, %v1090_v54 }
 0x500   : > { %v1101_v56 = vpack.c.bf16 %v1096_v55, %v1096_v55  ;;  %v1498_v55 = vld [vmem:[%s1983_s10] ss:$0 sm:$0xff] }
 0x502   : > { %1599 = vmatmul.mubr.msk.bf16.vlgmr.msra.gmra.mrb[16].mxu1 %vm587_vm1, %v1101_v56 }
 0x503   : > { %1618 = vmatprep.mubr.msk.bf16.mxu1 %vm1690_vm0, %v1689_v1  ;;  %1611 = vmatpush3.bf16.msra.mxu1 %v1653_v20 }
 0x504   : > { %1612 = vmatprep.subr.bf16.mxu1 %v1689_v1 }
 0x507   : > { %1613 = vmatpush3.bf16.msra.mxu1 %v1654_v21 }
 0x508   : > { %1614 = vmatprep.subr.bf16.mxu1 %v1689_v1 }
 0x50b   : > { %1615 = vmatpush3.bf16.msra.mxu1 %v1655_v22 }
 0x50c   : > { %1616 = vmatprep.subr.bf16.mxu1 %v1689_v1 }
 0x50f   : > { %1617 = vmatpush3.bf16.msra.mxu1 %v1656_v23 }
 0x5d5   : > { %v1158_v59 = vpop.f32.mrb[16].mxu1 }
 0x5d6   : > { %v1159_v60 = vadd.f32 %v1488_v57, %v1158_v59  ;;  %v1600_v61 = vpop.f32.mrb[17].mxu1 }
 0x5d7   : > { %v1161_v62 = vpop.f32.mrb[18].mxu1 }
 0x5d8   : > { %v1601_v63 = vpop.f32.mrb[19].mxu1  ;;  %v1164_v0 = vadd.f32 %v1159_v60, %v560_v58 }
 0x5da   : > { %v1167_v2 = vsel %vm587_vm1, %v1164_v0, 0.0 }
 0x5db   : > { %1168 = vadd.xlane.f32.xlu0 %v1167_v2 }
 0x668   : > { %v1169_v4 = vpop.xlane.xlu0 %1168 }
 0x669   : > { %v1171_v5 = vmul.f32 0.03125, %v1169_v4 }
 0x66b   : > { %v1172_v6 = vsub.f32 %v1164_v0, %v1171_v5 }
 0x66d   : > { %v1173_v7 = vmul.f32 %v1172_v6, %v1172_v6 }
 0x66f   : > { %v1174_v8 = vsel %vm587_vm1, %v1173_v7, 0.0 }
 0x670   : > { %1175 = vadd.xlane.f32.xlu1 %v1174_v8 }
 0x6fd   : > { %v1176_v11 = vpop.xlane.xlu1 %1175 }
 0x6fe   : > { %v1177_v12 = vmul.f32 0.03125, %v1176_v11 }
 0x700   : > { %v1178_v13 = vadd.f32 1e-05, %v1177_v12  ;;  %v1505_v12 = vld [vmem:[%s1987_s14] ss:$0 sm:$0xff] }
 0x702   : > { %1673 = vrsqrt.f32 %v1178_v13 }
 0x70c   : > { %v1674_v14 = vpop.eup %1673 }
 0x70d   : > { %v1180_v16 = vmul.f32 %v1674_v14, %v1172_v6 }
 0x70f   : > { %v1187_v18 = vmul.f32 %v1492_v15, %v1180_v16 }
 0x711   : > { %v1194_v19 = vadd.f32 %v1493_v17, %v1187_v18 }
 0x713   : > { %v1199_v10 = vpack.c.bf16 %v1194_v19, %v1194_v19 }
 0x715   : > { %1607 = vmatmul.mubr.msk.bf16.vlgmr.msra.gmra.mrb[20].mxu0 %vm587_vm1, %v1199_v10 }
 0x7e8   : > { %v1256_v25 = vpop.f32.mrb[20].mxu0 }
 0x7e9   : > { %v1257_v26 = vadd.f32 %v1494_v24, %v1256_v25  ;;  %v1608_v27 = vpop.f32.mrb[21].mxu0 }
 0x7ea   : > { %v1259_v28 = vpop.f32.mrb[22].mxu0 }
 0x7eb   : > { %v1263_v29 = vmul.f32 0.70710677, %v1257_v26  ;;  %v1609_v30 = vpop.f32.mrb[23].mxu0  ;;  %v1262_v51 = vmul.f32 0.5, %v1257_v26 }
 0x7ed   : > { %v1264_v31 = vand.u32 2147483647, %v1263_v29  ;;  %vm1283_vm6 = vcmp.ge.f32.partialorder %v1263_v29, 0.0 }
 0x7ef   : > { %v1265_v32 = vmul.f32 0.3275911, %v1264_v31  ;;  %v1277_v1 = vsub.f32 0.0, %v1264_v31 }
 0x7f1   : > { %v1266_v33 = vadd.f32 1.0, %v1265_v32  ;;  %v1278_v35 = vmul.f32 %v1277_v1, %v1264_v31 }
 0x7f3   : > { %1675 = vrcp.f32 %v1266_v33  ;;  %v1279_v38 = vmul.f32 1.442695, %v1278_v35 }
 0x7f5   : > { %1677 = vpow2.f32 %v1279_v38 }
 0x7fd   : > { %v1676_v34 = vpop.eup %1675 }
 0x7fe   : > { %v1268_v36 = vmul.f32 1.0614054, %v1676_v34 }
 0x7ff   : > { %v1678_v46 = vpop.eup %1677 }
 0x800   : > { %v1269_v37 = vadd.f32 -1.4531521, %v1268_v36 }
 0x802   : > { %v1270_v39 = vmul.f32 %v1676_v34, %v1269_v37 }
 0x804   : > { %v1271_v40 = vadd.f32 1.4214138, %v1270_v39 }
 0x806   : > { %v1272_v41 = vmul.f32 %v1676_v34, %v1271_v40 }
 0x808   : > { %v1273_v42 = vadd.f32 -0.28449672, %v1272_v41 }
 0x80a   : > { %v1274_v43 = vmul.f32 %v1676_v34, %v1273_v42 }
 0x80c   : > { %v1275_v44 = vadd.f32 0.2548296, %v1274_v43 }
 0x80e   : > { %v1276_v45 = vmul.f32 %v1676_v34, %v1275_v44 }
 0x810   : > { %v1281_v47 = vmul.f32 %v1678_v46, %v1276_v45 }
 0x812   : > { %v1282_v48 = vsub.f32 1.0, %v1281_v47 }
 0x814   : > { %v1284_v49 = vsub.f32 0.0, %v1282_v48 }
 0x816   : > { %v1285_v50 = vsel %vm1283_vm6, %v1282_v48, %v1284_v49 }
 0x817   : > { %v1286_v52 = vadd.f32 1.0, %v1285_v50 }
 0x819   : > { %v1287_v53 = vmul.f32 %v1286_v52, %v1262_v51 }
 0x81b   : > { %v1296_v54 = vpack.c.bf16 %v1287_v53, %v1287_v53 }
 0x81d   : > { %1619 = vmatmul.mubr.msk.bf16.vlgmr.msra.gmra.mrb[20].mxu1 %vm1328_vm7, %v1296_v54 }
 0x8f0   : > { %v1366_v56 = vpop.f32.mrb[20].mxu1 }
 0x8f1   : > { %v1367_v57 = vadd.f32 %v1498_v55, %v1366_v56  ;;  %v1620_v58 = vpop.f32.mrb[21].mxu1 }
 0x8f2   : > { %v1369_v59 = vpop.f32.mrb[22].mxu1 }
 0x8f3   : > { %v1621_v60 = vpop.f32.mrb[23].mxu1  ;;  %v1372_v61 = vadd.f32 %v1367_v57, %v1194_v19 }
 0x8f5   : > { %v1375_v62 = vsel %vm587_vm1, %v1372_v61, 0.0 }
 0x8f6   : > { %1376 = vadd.xlane.f32.xlu0 %v1375_v62 }
 0x983   : > { %v1377_v63 = vpop.xlane.xlu0 %1376 }
 0x984   : > { %v1378_v0 = vmul.f32 0.03125, %v1377_v63 }
 0x986   : > { %v1379_v2 = vsub.f32 %v1372_v61, %v1378_v0 }
 0x988   : > { %v1380_v4 = vmul.f32 %v1379_v2, %v1379_v2 }
 0x98a   : > { %v1381_v5 = vsel %vm587_vm1, %v1380_v4, 0.0 }
 0x98b   : > { %1382 = vadd.xlane.f32.xlu0 %v1381_v5 }
 0xa18   : > { %v1383_v6 = vpop.xlane.xlu0 %1382 }
 0xa19   : > { %v1384_v7 = vmul.f32 0.03125, %v1383_v6 }
 0xa1b   : > { %v1385_v8 = vadd.f32 1e-05, %v1384_v7 }
 0xa1d   : > { %1679 = vrsqrt.f32 %v1385_v8 }
 0xa27   : > { %v1680_v3 = vpop.eup %1679 }
 0xa28   : > { %v1387_v11 = vmul.f32 %v1680_v3, %v1379_v2 }
 0xa2a   : > { %v1394_v13 = vmul.f32 %v1504_v9, %v1387_v11 }
 0xa2c   : > { %v1401_v14 = vadd.f32 %v1505_v12, %v1394_v13 }
 0xa2e   : > { %v1402_v15 = vpack.c.bf16 %v1401_v14, %v1401_v14 }
 0xa30   : > { %1404 = vst.msk [vmem:[%s557_s30] sm:$0xf] %vm1403_vm8, %v1402_v15 }
 0xa31 PF: > { %s27_s24 = sadd.s32 1, %s1687_s24  }
 0xa32   : > { %p24_p4 = scmp.ge.s32.totalorder %s27_s24, 4  }
 0xa34   :  { %26 = sbr.rel (!%p24_p4) target bundleno = 3 (0x3), region = 121 }

// kernel: seq2seq_forward.6
= control target key start
LH: loop header
LB: loop body
LE: loop exit
PB: predicated region body
PF: predicated region fallthrough
CT: control target
= control target key end

     0   :  { %s1828_s24 = smov 0   ;;  %s2014_s0 = inlined_call_operand.vmem [shape: bf16[2,8,32], index: 0, kind: input, shape index: {}]   ;;  %s2015_s1 = inlined_call_operand.vmem [shape: f32[8,8], index: 1, kind: input, shape index: {}]   ;;  %s2016_s2 = inlined_call_operand.vmem [shape: f32[2,1,8], index: 2, kind: input, shape index: {}]   ;;  %s2017_s3 = inlined_call_operand.vmem [shape: bf16[32,96], index: 3, kind: input, shape index: {}]   ;;  %s2018_s4 = inlined_call_operand.vmem [shape: f32[1,96], index: 4, kind: input, shape index: {}]   ;;  %s2019_s5 = inlined_call_operand.vmem [shape: bf16[32,32], index: 5, kind: input, shape index: {}]   ;;  %s2020_s6 = inlined_call_operand.vmem [shape: f32[1,32], index: 6, kind: input, shape index: {}]   ;;  %s2021_s7 = inlined_call_operand.vmem [shape: bf16[32,64], index: 7, kind: input, shape index: {}]   ;;  %s2022_s8 = inlined_call_operand.vmem [shape: f32[1,64], index: 8, kind: input, shape index: {}]   ;;  %s2023_s9 = inlined_call_operand.vmem [shape: bf16[64,32], index: 9, kind: input, shape index: {}]   ;;  %s2024_s10 = inlined_call_operand.vmem [shape: f32[1,32], index: 10, kind: input, shape index: {}]   ;;  %s2025_s11 = inlined_call_operand.vmem [shape: f32[1,32], index: 11, kind: input, shape index: {}]   ;;  %s2026_s12 = inlined_call_operand.vmem [shape: f32[1,32], index: 12, kind: input, shape index: {}]   ;;  %s2027_s13 = inlined_call_operand.vmem [shape: f32[1,32], index: 13, kind: input, shape index: {}]   ;;  %s2028_s14 = inlined_call_operand.vmem [shape: f32[1,32], index: 14, kind: input, shape index: {}]   ;;  %s2029_s15 = inlined_call_operand.vmem [shape: f32[1,32], index: 15, kind: input, shape index: {}]   ;;  %s2030_s16 = inlined_call_operand.vmem [shape: f32[1,32], index: 16, kind: input, shape index: {}]   ;;  %s2031_s17 = inlined_call_operand.vmem [shape: bf16[2,8,32], index: 17, kind: output, shape index: {}]  }
   0x1   :  { %2032 = sst [smem:[#allocation2_spill]] %s2014_s0 }
   0x2   :  { %2033 = sst [smem:[#allocation3_spill]] %s2015_s1 }
   0x3 LB: > { %s1496_s25 = sadd.s32 4294967295, %s1720_s24   ;;  %p1500_p0 = scmp.ge.s32.totalorder %s1720_s24, 1  ;;  %s1720_s24 = sphi %s1828_s24, %s27_s24  }
   0x4   : > { %p494_p1 = scmp.lt.s32.totalorder %s1720_s24, 3 }
   0x6   : > { %p495_p2 = pnand %p1500_p0, %p494_p1 }
   0x7   : > { %v1677_v0 = vld [vmem:[%s2017_s3] sm:$0xff] (!%p495_p2)   ;;  %v1722_v1 = vmov (!%p495_p2), 0.0   ;;  %v1678_v2 = vld [vmem:[%s2017_s3 + $0x8] sm:$0xff] (!%p495_p2)   ;;  %vm1723_vm0 = vmmov (!%p495_p2), 0   ;;  %p547_p3 = scmp.lt.s32.totalorder (!%p495_p2), %s1496_s25, 1  ;;  %vm587_vm1 = vcmask (!%p495_p2), 261120  }
   0x8   : > { %498 = sbr.rel (%p495_p2) target bundleno = 2922 (0xb6a), region = 88  ;;  %1569 = vmatprep.subr.bf16.mxu0 (!%p495_p2), %v1722_v1  ;;  %1577 = vmatprep.subr.bf16.mxu1 (!%p495_p2), %v1722_v1  ;;  %s2034_s19 = sld [smem:[#allocation2_spill]] (!%p495_p2)  ;;  %v1504_v5 = vld [vmem:[%s2018_s4] ss:$0 sm:$0xff] (!%p495_p2)  ;;  %vm642_vm2 = vcmask (!%p495_p2), 64512   ;;  %vm706_vm3 = vcmask (!%p495_p2), 1043456  }
   0x9   : > { %1570 = vmatpush3.bf16.msra.mxu0 (!%p495_p2), %v1677_v0  ;;  %1573 = vmatprep.mubr.msk.bf16.mxu0 (!%p495_p2), %vm1723_vm0, %v1722_v1  ;;  %s1724_s22 = smov (!%p495_p2), 120   ;;  %s1725_s23 = smov (!%p495_p2), 96   ;;  %vm1093_vm4 = vcmask (!%p495_p2), 130048   ;;  %vm1095_vm5 = vcmask (!%p495_p2), 195584   ;;  %vm1328_vm7 = vcmask (!%p495_p2), 523264   ;;  %vm1432_vm8 = vcmask (!%p495_p2), 257024  }
   0xa   : > { %1571 = vmatprep.subr.bf16.mxu0 (!%p495_p2), %v1722_v1  ;;  %1579 = vmatprep.mubr.msk.bf16.mxu1 (!%p495_p2), %vm1723_vm0, %v1722_v1  ;;  %s1726_s26 = smov (!%p495_p2), 80   ;;  %s1727_s27 = smov (!%p495_p2), 88  }
   0xb   : > { %s1728_s28 = smov (!%p495_p2), 72   ;;  %s1729_s29 = smov (!%p495_p2), 112  }
   0xc   : > { %s1730_s30 = smov (!%p495_p2), 104   ;;  %s1736_s20 = smov (!%p495_p2), 16  }
   0xd   : > { %1572 = vmatpush3.bf16.msra.mxu0 (!%p495_p2), %v1678_v2  ;;  %s1737_s21 = smov (!%p495_p2), 24  }
   0xe   : > { %1583 = vmatprep.subr.bf16.mxu0 (!%p495_p2), %v1722_v1 }
   0xf   : > { %s2037_s25 = smov (!%p547_p3, %s1496_s25), 1 }
  0x10   : > { %s1501_s0 = sshll.u32 %s2037_s25, 2 }
  0x11   : > { %s550_s1 = scalar_lea.vmem %s2034_s19, %s1501_s0  ;;  %s557_s19 = scalar_lea.vmem %s2031_s17, %s1501_s0 }
  0x12   : > { %v1858_v3 = vld [vmem:[%s550_s1] sm:$0xf]  ;;  %s553_s1 = scalar_lea.vmem %s2016_s2, %s2037_s25 }
  0x13   : > { %v1503_v4 = vcombine.low %v1858_v3, %v1858_v3  ;;  %v1508_v24 = vld [vmem:[%s553_s1] ss:$0 sm:$0xff] }
  0x15   : > { %1574 = vmatmul.mubr.msk.bf16.vlgmr.msra.gmra.mrb[0].mxu0 %vm587_vm1, %v1503_v4 }
  0x16   : > { %1585 = vmatprep.mubr.msk.bf16.mxu0 %vm1723_vm0, %v1722_v1 }
  0xe8   : > { %v625_v6 = vpop.f32.mrb[0].mxu0 }
  0xe9   : > { %v626_v7 = vadd.f32 %v1504_v5, %v625_v6  ;;  %v1575_v8 = vpop.f32.mrb[1].mxu0 }
  0xea   : > { %v628_v9 = vpop.f32.mrb[2].mxu0 }
  0xeb   : > { %v1868_v10 = vpack.c.bf16 %v626_v7, %v626_v7  ;;  %v1576_v11 = vpop.f32.mrb[3].mxu0 }
  0xed   : > { %750 = vrot.lane.b32.xlu1 %v1868_v10, %s1724_s22  ;;  %640 = vrot.lane.b32.xlu0 %v1868_v10, %s1725_s23  ;;  %s2035_s22 = sld [smem:[#allocation3_spill]]  ;;  %s1731_s23 = smov 56  }
  0xf1   : > { %862 = vrot.lane.b32.xlu1 %v1868_v10, %s1726_s26  ;;  %752 = vrot.lane.b32.xlu0 %v1868_v10, %s1727_s27  ;;  %s1732_s26 = smov 64   ;;  %s1733_s27 = smov 40  }
  0xf3   : > { %v561_v23 = vld [vmem:[%s2035_s22] sm:$0xff] }
  0xf4   : > { %v637_v25 = vadd.f32 %v1508_v24, %v561_v23 }
  0xf5   : > { %972 = vrot.lane.b32.xlu1 %v1868_v10, %s1728_s28  ;;  %860 = vrot.lane.b32.xlu0 %v1868_v10, %s1729_s29  ;;  %s1734_s28 = smov 48   ;;  %s1735_s29 = smov 8  }
  0xf9   : > { %970 = vrot.lane.b32.xlu0 %v1868_v10, %s1730_s30 }
 0x15f   : > { %v641_v12 = vpop.permute.xlu0 %640  ;;  %v751_v15 = vpop.permute.xlu1 %750 }
 0x160   : > { %v647_v13 = vsel %vm642_vm2, %v641_v12, 0 }
 0x161   : > { %1578 = vmatpush3.bf16.xpose.msra.mxu1 %v647_v13 }
 0x162   : > { %1589 = vmatprep.subr.bf16.mxu1 %v1722_v1 }
 0x163   : > { %v753_v14 = vpop.permute.xlu0 %752  ;;  %v863_v17 = vpop.permute.xlu1 %862 }
 0x164   : > { %v758_v16 = vsel %vm642_vm2, %v753_v14, 0  ;;  %v868_v18 = vsel %vm642_vm2, %v863_v17, 0 }
 0x167   : > { %v973_v19 = vpop.permute.xlu1 %972  ;;  %v861_v20 = vpop.permute.xlu0 %860 }
 0x168   : > { %1580 = vmatmul.mubr.msk.bf16.vlgmr.msra.gmra.mrb[0].mxu1 %vm642_vm2, %v1868_v10  ;;  %v978_v21 = vsel %vm642_vm2, %v973_v19, 0 }
 0x169   : > { %1590 = vmatpush3.bf16.xpose.msra.mxu1 %v758_v16  ;;  %1591 = vmatprep.mubr.msk.bf16.mxu1 %vm1723_vm0, %v1722_v1 }
 0x16a   : > { %1601 = vmatprep.subr.bf16.mxu1 %v1722_v1 }
 0x16b   : > { %v971_v22 = vpop.permute.xlu0 %970 }
 0x170   : > { %1592 = vmatmul.mubr.msk.bf16.vlgmr.msra.gmra.mrb[4].mxu1 %vm642_vm2, %v751_v15 }
 0x171   : > { %1602 = vmatpush3.bf16.xpose.msra.mxu1 %v868_v18  ;;  %1603 = vmatprep.mubr.msk.bf16.mxu1 %vm1723_vm0, %v1722_v1 }
 0x172   : > { %1613 = vmatprep.subr.bf16.mxu1 %v1722_v1 }
 0x178   : > { %1604 = vmatmul.mubr.msk.bf16.vlgmr.msra.gmra.mrb[8].mxu1 %vm642_vm2, %v861_v20 }
 0x179   : > { %1614 = vmatpush3.bf16.xpose.msra.mxu1 %v978_v21  ;;  %1615 = vmatprep.mubr.msk.bf16.mxu1 %vm1723_vm0, %v1722_v1 }
 0x17a   : > { %1625 = vmatprep.subr.bf16.mxu1 %v1722_v1 }
 0x180   : > { %1616 = vmatmul.mubr.msk.bf16.vlgmr.msra.gmra.mrb[12].mxu1 %vm642_vm2, %v971_v22 }
 0x181   : > { %1629 = vmatprep.mubr.msk.bf16.mxu1 %vm1723_vm0, %v1722_v1 }
 0x23b   : > { %v683_v26 = vpop.f32.mrb[0].mxu1 }
 0x23c   : > { %v684_v27 = vadd.f32 %v683_v26, %v637_v25  ;;  %v1581_v28 = vpop.f32.mrb[1].mxu1 }
 0x23d   : > { %v686_v29 = vpop.f32.mrb[2].mxu1 }
 0x23e   : > { %v1582_v30 = vpop.f32.mrb[3].mxu1  ;;  %v689_v31 = vsel %vm642_vm2, %v684_v27, -inf }
 0x23f   : > { %690 = vmax.xlane.f32.xlu1 %v689_v31 }
 0x243   : > { %v794_v32 = vpop.f32.mrb[4].mxu1 }
 0x244   : > { %v795_v33 = vadd.f32 %v794_v32, %v637_v25  ;;  %v1593_v34 = vpop.f32.mrb[5].mxu1 }
 0x245   : > { %v797_v35 = vpop.f32.mrb[6].mxu1 }
 0x246   : > { %v1594_v36 = vpop.f32.mrb[7].mxu1  ;;  %v800_v37 = vsel %vm642_vm2, %v795_v33, -inf }
 0x247   : > { %801 = vmax.xlane.f32.xlu0 %v800_v37 }
 0x24b   : > { %v904_v38 = vpop.f32.mrb[8].mxu1 }
 0x24c   : > { %v905_v39 = vadd.f32 %v904_v38, %v637_v25  ;;  %v1605_v40 = vpop.f32.mrb[9].mxu1 }
 0x24d   : > { %v907_v41 = vpop.f32.mrb[10].mxu1  ;;  %v1680_v40 = vld [vmem:[%s2019_s5] sm:$0xff]  }
 0x24e   : > { %v1606_v42 = vpop.f32.mrb[11].mxu1  ;;  %v910_v43 = vsel %vm642_vm2, %v905_v39, -inf  ;;  %1626 = vmatpush3.bf16.msra.mxu1 %v1680_v40  ;;  %v1681_v41 = vld [vmem:[%s2019_s5 + $0x8] sm:$0xff]  }
 0x24f   : > { %911 = vmax.xlane.f32.xlu0 %v910_v43  ;;  %1627 = vmatprep.subr.bf16.mxu1 %v1722_v1 }
 0x252   : > { %1628 = vmatpush3.bf16.msra.mxu1 %v1681_v41 }
 0x253   : > { %v1014_v44 = vpop.f32.mrb[12].mxu1  ;;  %1641 = vmatprep.subr.bf16.mxu1 %v1722_v1 }
 0x254   : > { %v1015_v45 = vadd.f32 %v1014_v44, %v637_v25  ;;  %v1617_v46 = vpop.f32.mrb[13].mxu1 }
 0x255   : > { %v1017_v47 = vpop.f32.mrb[14].mxu1 }
 0x256   : > { %v1618_v48 = vpop.f32.mrb[15].mxu1  ;;  %v1020_v49 = vsel %vm642_vm2, %v1015_v45, -inf }
 0x257   : > { %1021 = vmax.xlane.f32.xlu1 %v1020_v49 }
 0x2cc   : > { %v691_v50 = vpop.xlane.xlu1 %690 }
 0x2cd   : > { %v692_v51 = vsub.f32 %v684_v27, %v691_v50 }
 0x2cf   : > { %v693_v52 = vmul.f32 1.442695, %v692_v51 }
 0x2d1   : > { %1688 = vpow2.f32 %v693_v52 }
 0x2d4   : > { %v802_v53 = vpop.xlane.xlu0 %801 }
 0x2d5   : > { %v803_v54 = vsub.f32 %v795_v33, %v802_v53 }
 0x2d7   : > { %v804_v55 = vmul.f32 1.442695, %v803_v54 }
 0x2d9   : > { %1690 = vpow2.f32 %v804_v55 }
 0x2db   : > { %v1689_v56 = vpop.eup %1688 }
 0x2dc   : > { %v912_v57 = vpop.xlane.xlu0 %911  ;;  %v695_v58 = vsel %vm642_vm2, %v1689_v56, 0.0 }
 0x2dd   : > { %v913_v59 = vsub.f32 %v905_v39, %v912_v57  ;;  %696 = vadd.xlane.f32.xlu0 %v695_v58  ;;  %v1517_v57 = vld [vmem:[%s2020_s6] ss:$0 sm:$0xff]  ;;  %v560_v58 = vunpack.c.l.bf16 %v1858_v3 }
 0x2de   : > { %v1682_v3 = vld [vmem:[%s2021_s7] sm:$0xff]  }
 0x2df   : > { %v914_v60 = vmul.f32 1.442695, %v913_v59 }
 0x2e1   : > { %1692 = vpow2.f32 %v914_v60 }
 0x2e3   : > { %v1691_v61 = vpop.eup %1690 }
 0x2e4   : > { %v806_v62 = vsel %vm642_vm2, %v1691_v61, 0.0  ;;  %v1022_v2 = vpop.xlane.xlu1 %1021 }
 0x2e5   : > { %807 = vadd.xlane.f32.xlu1 %v806_v62  ;;  %v1023_v4 = vsub.f32 %v1015_v45, %v1022_v2 }
 0x2e7   : > { %v1024_v5 = vmul.f32 1.442695, %v1023_v4 }
 0x2e9   : > { %1694 = vpow2.f32 %v1024_v5 }
 0x2eb   : > { %v1693_v63 = vpop.eup %1692 }
 0x2ec   : > { %v916_v0 = vsel %vm642_vm2, %v1693_v63, 0.0 }
 0x2ed   : > { %917 = vadd.xlane.f32.xlu0 %v916_v0 }
 0x2f3   : > { %v1695_v6 = vpop.eup %1694 }
 0x2f4   : > { %v1026_v7 = vsel %vm642_vm2, %v1695_v6, 0.0 }
 0x2f6   : > { %812 = vrot.lane.b32.xlu1 %v1868_v10, %s1731_s23 }
 0x303   : > { %701 = vrot.lane.b32.xlu0 %v1868_v10, %s1732_s26 }
 0x307   : > { %1032 = vrot.lane.b32.xlu0 %v1868_v10, %s1733_s27 }
 0x31a   : > { %1027 = vadd.xlane.f32.xlu1 %v1026_v7 }
 0x32b   : > { %922 = vrot.lane.b32.xlu1 %v1868_v10, %s1734_s28 }
 0x36a   : > { %v697_v8 = vpop.xlane.xlu0 %696 }
 0x36b   : > { %1696 = vrcp.f32 %v697_v8 }
 0x372   : > { %v808_v9 = vpop.xlane.xlu1 %807 }
 0x373   : > { %1698 = vrcp.f32 %v808_v9  ;;  %v1683_v9 = vld [vmem:[%s2021_s7 + $0x8] sm:$0xff]  }
 0x375   : > { %v1697_v11 = vpop.eup %1696 }
 0x376   : > { %v699_v13 = vmul.f32 %v1697_v11, %v1689_v56  ;;  %v813_v16 = vpop.permute.xlu1 %812 }
 0x377   : > { %v818_v19 = vsel %vm706_vm3, %v813_v16, 0 }
 0x378   : > { %v700_v17 = vpack.c.bf16 %v699_v13, %v699_v13 }
 0x37a   : > { %v918_v12 = vpop.xlane.xlu0 %917 }
 0x37b   : > { %1700 = vrcp.f32 %v918_v12 }
 0x37d   : > { %v1699_v18 = vpop.eup %1698 }
 0x37e   : > { %v702_v14 = vpop.permute.xlu0 %701  ;;  %v810_v10 = vmul.f32 %v1699_v18, %v1691_v61 }
 0x37f   : > { %v708_v15 = vsel %vm706_vm3, %v702_v14, 0 }
 0x380   : > { %1584 = vmatpush3.bf16.msra.mxu0 %v708_v15  ;;  %v811_v20 = vpack.c.bf16 %v810_v10, %v810_v10  ;;  %v1521_v15 = vld [vmem:[%s2025_s11] ss:$0 sm:$0xff] }
 0x381   : > { %1595 = vmatprep.subr.bf16.mxu0 %v1722_v1 }
 0x382   : > { %v1033_v26 = vpop.permute.xlu0 %1032 }
 0x383   : > { %1586 = vmatmul.mubr.msk.bf16.vlgmr.msra.gmra.mrb[4].mxu0 %vm642_vm2, %v700_v17  ;;  %v1038_v28 = vsel %vm706_vm3, %v1033_v26, 0  ;;  %v1522_v17 = vld [vmem:[%s2026_s12] ss:$0 sm:$0xff] }
 0x384   : > { %1596 = vmatpush3.bf16.msra.mxu0 %v818_v19  ;;  %1597 = vmatprep.mubr.msk.bf16.mxu0 %vm1723_vm0, %v1722_v1 }
 0x385   : > { %1607 = vmatprep.subr.bf16.mxu0 %v1722_v1  ;;  %v1701_v21 = vpop.eup %1700 }
 0x386   : > { %v920_v23 = vmul.f32 %v1701_v21, %v1693_v63  ;;  %v1685_v21 = vld [vmem:[%s2023_s9 + $0x8] sm:$0xff]  }
 0x388   : > { %v921_v27 = vpack.c.bf16 %v920_v23, %v920_v23  ;;  %v1687_v23 = vld [vmem:[%s2023_s9 + $0x18] sm:$0xff]  }
 0x38b   : > { %1598 = vmatmul.mubr.msk.bf16.vlgmr.msra.gmra.mrb[8].mxu0 %vm642_vm2, %v811_v20  ;;  %v1684_v20 = vld [vmem:[%s2023_s9] sm:$0xff]  }
 0x38c   : > { %1609 = vmatprep.mubr.msk.bf16.mxu0 %vm1723_vm0, %v1722_v1 }
 0x3a7   : > { %v1028_v22 = vpop.xlane.xlu1 %1027 }
 0x3a8   : > { %1702 = vrcp.f32 %v1028_v22  ;;  %v1686_v22 = vld [vmem:[%s2023_s9 + $0x10] sm:$0xff]  }
 0x3ab   : > { %v923_v24 = vpop.permute.xlu1 %922 }
 0x3ac   : > { %v928_v25 = vsel %vm706_vm3, %v923_v24, 0  ;;  %v1523_v24 = vld [vmem:[%s2022_s8] ss:$0 sm:$0xff] }
 0x3ad   : > { %1608 = vmatpush3.bf16.msra.mxu0 %v928_v25 }
 0x3ae   : > { %1619 = vmatprep.subr.bf16.mxu0 %v1722_v1 }
 0x3b0   : > { %1610 = vmatmul.mubr.msk.bf16.vlgmr.msra.gmra.mrb[12].mxu0 %vm642_vm2, %v921_v27 }
 0x3b1   : > { %1620 = vmatpush3.bf16.msra.mxu0 %v1038_v28  ;;  %1621 = vmatprep.mubr.msk.bf16.mxu0 %vm1723_vm0, %v1722_v1 }
 0x3b2   : > { %v1703_v29 = vpop.eup %1702  ;;  %1633 = vmatprep.subr.bf16.mxu0 %v1722_v1 }
 0x3b3   : > { %v1030_v30 = vmul.f32 %v1703_v29, %v1695_v6 }
 0x3b5   : > { %v1031_v31 = vpack.c.bf16 %v1030_v30, %v1030_v30 }
 0x3b8   : > { %1622 = vmatmul.mubr.msk.bf16.vlgmr.msra.gmra.mrb[16].mxu0 %vm642_vm2, %v1031_v31 }
 0x3b9   : > { %1637 = vmatprep.mubr.msk.bf16.mxu0 %vm1723_vm0, %v1722_v1  ;;  %1634 = vmatpush3.bf16.msra.mxu0 %v1682_v3 }
 0x3ba   : > { %1635 = vmatprep.subr.bf16.mxu0 %v1722_v1 }
 0x3bd   : > { %1636 = vmatpush3.bf16.msra.mxu0 %v1683_v9  ;;  %v1533_v9 = vld [vmem:[%s2027_s13] ss:$0 sm:$0xff] }
 0x456   : > { %v744_v32 = vpop.f32.mrb[4].mxu0 }
 0x457   : > { %v1587_v33 = vpop.f32.mrb[5].mxu0 }
 0x458   : > { %v747_v34 = vpop.f32.mrb[6].mxu0 }
 0x459   : > { %v1588_v35 = vpop.f32.mrb[7].mxu0 }
 0x45e   : > { %v854_v36 = vpop.f32.mrb[8].mxu0 }
 0x45f   : > { %1081 = vrot.lane.b32.xlu1 %v854_v36, %s1735_s29  ;;  %v1599_v37 = vpop.f32.mrb[9].mxu0 }
 0x460   : > { %v857_v38 = vpop.f32.mrb[10].mxu0 }
 0x461   : > { %v1600_v39 = vpop.f32.mrb[11].mxu0 }
 0x483   : > { %v964_v42 = vpop.f32.mrb[12].mxu0 }
 0x484   : > { %1085 = vrot.lane.b32.xlu0 %v964_v42, %s1736_s20  ;;  %v1611_v43 = vpop.f32.mrb[13].mxu0 }
 0x485   : > { %v967_v44 = vpop.f32.mrb[14].mxu0 }
 0x486   : > { %v1612_v45 = vpop.f32.mrb[15].mxu0 }
 0x48b   : > { %v1074_v46 = vpop.f32.mrb[16].mxu0 }
 0x48c   : > { %1089 = vrot.lane.b32.xlu1 %v1074_v46, %s1737_s21  ;;  %v1623_v47 = vpop.f32.mrb[17].mxu0 }
 0x48d   : > { %v1077_v48 = vpop.f32.mrb[18].mxu0 }
 0x48e   : > { %v1624_v49 = vpop.f32.mrb[19].mxu0 }
 0x4d1   : > { %v1082_v50 = vpop.permute.xlu1 %1081 }
 0x4d2   : > { %v1092_v52 = vsel %vm642_vm2, %v744_v32, %v1082_v50 }
 0x4f6   : > { %v1086_v51 = vpop.permute.xlu0 %1085 }
 0x4f7   : > { %v1094_v53 = vsel %vm1093_vm4, %v1092_v52, %v1086_v51 }
 0x4fe   : > { %v1090_v54 = vpop.permute.xlu1 %1089 }
 0x4ff   : > { %v1096_v55 = vsel %vm1095_vm5, %v1094_v53, %v1090_v54 }
 0x500   : > { %v1101_v56 = vpack.c.bf16 %v1096_v55, %v1096_v55  ;;  %v1527_v55 = vld [vmem:[%s2024_s10] ss:$0 sm:$0xff] }
 0x502   : > { %1630 = vmatmul.mubr.msk.bf16.vlgmr.msra.gmra.mrb[16].mxu1 %vm587_vm1, %v1101_v56 }
 0x503   : > { %1649 = vmatprep.mubr.msk.bf16.mxu1 %vm1723_vm0, %v1722_v1  ;;  %1642 = vmatpush3.bf16.msra.mxu1 %v1684_v20 }
 0x504   : > { %1643 = vmatprep.subr.bf16.mxu1 %v1722_v1 }
 0x507   : > { %1644 = vmatpush3.bf16.msra.mxu1 %v1685_v21 }
 0x508   : > { %1645 = vmatprep.subr.bf16.mxu1 %v1722_v1 }
 0x50b   : > { %1646 = vmatpush3.bf16.msra.mxu1 %v1686_v22 }
 0x50c   : > { %1647 = vmatprep.subr.bf16.mxu1 %v1722_v1 }
 0x50f   : > { %1648 = vmatpush3.bf16.msra.mxu1 %v1687_v23 }
 0x5d5   : > { %v1158_v59 = vpop.f32.mrb[16].mxu1 }
 0x5d6   : > { %v1159_v60 = vadd.f32 %v1517_v57, %v1158_v59  ;;  %v1631_v61 = vpop.f32.mrb[17].mxu1 }
 0x5d7   : > { %v1161_v62 = vpop.f32.mrb[18].mxu1 }
 0x5d8   : > { %v1632_v63 = vpop.f32.mrb[19].mxu1  ;;  %v1164_v0 = vadd.f32 %v1159_v60, %v560_v58 }
 0x5da   : > { %v1167_v2 = vsel %vm587_vm1, %v1164_v0, 0.0 }
 0x5db   : > { %1168 = vadd.xlane.f32.xlu0 %v1167_v2 }
 0x668   : > { %v1169_v4 = vpop.xlane.xlu0 %1168 }
 0x669   : > { %v1171_v5 = vmul.f32 0.03125, %v1169_v4 }
 0x66b   : > { %v1172_v6 = vsub.f32 %v1164_v0, %v1171_v5 }
 0x66d   : > { %v1173_v7 = vmul.f32 %v1172_v6, %v1172_v6 }
 0x66f   : > { %v1174_v8 = vsel %vm587_vm1, %v1173_v7, 0.0 }
 0x670   : > { %1175 = vadd.xlane.f32.xlu1 %v1174_v8 }
 0x6fd   : > { %v1176_v11 = vpop.xlane.xlu1 %1175 }
 0x6fe   : > { %v1177_v12 = vmul.f32 0.03125, %v1176_v11 }
 0x700   : > { %v1178_v13 = vadd.f32 1e-05, %v1177_v12  ;;  %v1534_v12 = vld [vmem:[%s2028_s14] ss:$0 sm:$0xff] }
 0x702   : > { %1704 = vrsqrt.f32 %v1178_v13 }
 0x70c   : > { %v1705_v14 = vpop.eup %1704 }
 0x70d   : > { %v1180_v16 = vmul.f32 %v1705_v14, %v1172_v6 }
 0x70f   : > { %v1187_v18 = vmul.f32 %v1521_v15, %v1180_v16 }
 0x711   : > { %v1194_v19 = vadd.f32 %v1522_v17, %v1187_v18 }
 0x713   : > { %v1199_v10 = vpack.c.bf16 %v1194_v19, %v1194_v19 }
 0x715   : > { %1638 = vmatmul.mubr.msk.bf16.vlgmr.msra.gmra.mrb[20].mxu0 %vm587_vm1, %v1199_v10 }
 0x7e8   : > { %v1256_v25 = vpop.f32.mrb[20].mxu0 }
 0x7e9   : > { %v1257_v26 = vadd.f32 %v1523_v24, %v1256_v25  ;;  %v1639_v27 = vpop.f32.mrb[21].mxu0  ;;  %v1535_v24 = vld [vmem:[%s2029_s15] ss:$0 sm:$0xff] }
 0x7ea   : > { %v1259_v28 = vpop.f32.mrb[22].mxu0 }
 0x7eb   : > { %v1263_v29 = vmul.f32 0.70710677, %v1257_v26  ;;  %v1640_v30 = vpop.f32.mrb[23].mxu0  ;;  %v1262_v51 = vmul.f32 0.5, %v1257_v26  ;;  %v1536_v26 = vld [vmem:[%s2030_s16] ss:$0 sm:$0xff] }
 0x7ed   : > { %v1264_v31 = vand.u32 2147483647, %v1263_v29  ;;  %vm1283_vm6 = vcmp.ge.f32.partialorder %v1263_v29, 0.0 }
 0x7ef   : > { %v1265_v32 = vmul.f32 0.3275911, %v1264_v31  ;;  %v1277_v1 = vsub.f32 0.0, %v1264_v31 }
 0x7f1   : > { %v1266_v33 = vadd.f32 1.0, %v1265_v32  ;;  %v1278_v35 = vmul.f32 %v1277_v1, %v1264_v31 }
 0x7f3   : > { %1706 = vrcp.f32 %v1266_v33  ;;  %v1279_v38 = vmul.f32 1.442695, %v1278_v35 }
 0x7f5   : > { %1708 = vpow2.f32 %v1279_v38 }
 0x7fd   : > { %v1707_v34 = vpop.eup %1706 }
 0x7fe   : > { %v1268_v36 = vmul.f32 1.0614054, %v1707_v34 }
 0x7ff   : > { %v1709_v46 = vpop.eup %1708 }
 0x800   : > { %v1269_v37 = vadd.f32 -1.4531521, %v1268_v36 }
 0x802   : > { %v1270_v39 = vmul.f32 %v1707_v34, %v1269_v37 }
 0x804   : > { %v1271_v40 = vadd.f32 1.4214138, %v1270_v39 }
 0x806   : > { %v1272_v41 = vmul.f32 %v1707_v34, %v1271_v40 }
 0x808   : > { %v1273_v42 = vadd.f32 -0.28449672, %v1272_v41 }
 0x80a   : > { %v1274_v43 = vmul.f32 %v1707_v34, %v1273_v42 }
 0x80c   : > { %v1275_v44 = vadd.f32 0.2548296, %v1274_v43 }
 0x80e   : > { %v1276_v45 = vmul.f32 %v1707_v34, %v1275_v44 }
 0x810   : > { %v1281_v47 = vmul.f32 %v1709_v46, %v1276_v45 }
 0x812   : > { %v1282_v48 = vsub.f32 1.0, %v1281_v47 }
 0x814   : > { %v1284_v49 = vsub.f32 0.0, %v1282_v48 }
 0x816   : > { %v1285_v50 = vsel %vm1283_vm6, %v1282_v48, %v1284_v49 }
 0x817   : > { %v1286_v52 = vadd.f32 1.0, %v1285_v50 }
 0x819   : > { %v1287_v53 = vmul.f32 %v1286_v52, %v1262_v51 }
 0x81b   : > { %v1296_v54 = vpack.c.bf16 %v1287_v53, %v1287_v53 }
 0x81d   : > { %1650 = vmatmul.mubr.msk.bf16.vlgmr.msra.gmra.mrb[20].mxu1 %vm1328_vm7, %v1296_v54 }
 0x8f0   : > { %v1366_v56 = vpop.f32.mrb[20].mxu1 }
 0x8f1   : > { %v1367_v57 = vadd.f32 %v1527_v55, %v1366_v56  ;;  %v1651_v58 = vpop.f32.mrb[21].mxu1 }
 0x8f2   : > { %v1369_v59 = vpop.f32.mrb[22].mxu1 }
 0x8f3   : > { %v1652_v60 = vpop.f32.mrb[23].mxu1  ;;  %v1372_v61 = vadd.f32 %v1367_v57, %v1194_v19 }
 0x8f5   : > { %v1375_v62 = vsel %vm587_vm1, %v1372_v61, 0.0 }
 0x8f6   : > { %1376 = vadd.xlane.f32.xlu0 %v1375_v62 }
 0x983   : > { %v1377_v63 = vpop.xlane.xlu0 %1376 }
 0x984   : > { %v1378_v0 = vmul.f32 0.03125, %v1377_v63 }
 0x986   : > { %v1379_v2 = vsub.f32 %v1372_v61, %v1378_v0 }
 0x988   : > { %v1380_v4 = vmul.f32 %v1379_v2, %v1379_v2 }
 0x98a   : > { %v1381_v5 = vsel %vm587_vm1, %v1380_v4, 0.0 }
 0x98b   : > { %1382 = vadd.xlane.f32.xlu0 %v1381_v5 }
 0xa18   : > { %v1383_v6 = vpop.xlane.xlu0 %1382 }
 0xa19   : > { %v1384_v7 = vmul.f32 0.03125, %v1383_v6 }
 0xa1b   : > { %v1385_v8 = vadd.f32 1e-05, %v1384_v7 }
 0xa1d   : > { %1710 = vrsqrt.f32 %v1385_v8 }
 0xa27   : > { %v1711_v3 = vpop.eup %1710 }
 0xa28   : > { %v1387_v11 = vmul.f32 %v1711_v3, %v1379_v2 }
 0xa2a   : > { %v1394_v13 = vmul.f32 %v1533_v9, %v1387_v11 }
 0xa2c   : > { %v1401_v14 = vadd.f32 %v1534_v12, %v1394_v13 }
 0xa2e   : > { %v1404_v15 = vsel %vm587_vm1, %v1401_v14, 0.0 }
 0xa2f   : > { %1405 = vadd.xlane.f32.xlu1 %v1404_v15 }
 0xabc   : > { %v1406_v16 = vpop.xlane.xlu1 %1405 }
 0xabd   : > { %v1407_v17 = vmul.f32 0.03125, %v1406_v16 }
 0xabf   : > { %v1408_v18 = vsub.f32 %v1401_v14, %v1407_v17 }
 0xac1   : > { %v1409_v19 = vmul.f32 %v1408_v18, %v1408_v18 }
 0xac3   : > { %v1410_v10 = vsel %vm587_vm1, %v1409_v19, 0.0 }
 0xac4   : > { %1411 = vadd.xlane.f32.xlu0 %v1410_v10 }
 0xb51   : > { %v1412_v20 = vpop.xlane.xlu0 %1411 }
 0xb52   : > { %v1413_v21 = vmul.f32 0.03125, %v1412_v20 }
 0xb54   : > { %v1414_v22 = vadd.f32 1e-05, %v1413_v21 }
 0xb56   : > { %1712 = vrsqrt.f32 %v1414_v22 }
 0xb60   : > { %v1713_v23 = vpop.eup %1712 }
 0xb61   : > { %v1416_v25 = vmul.f32 %v1713_v23, %v1408_v18 }
 0xb63   : > { %v1423_v27 = vmul.f32 %v1535_v24, %v1416_v25 }
 0xb65   : > { %v1430_v28 = vadd.f32 %v1536_v26, %v1423_v27 }
 0xb67   : > { %v1431_v29 = vpack.c.bf16 %v1430_v28, %v1430_v28 }
 0xb69   : > { %1433 = vst.msk [vmem:[%s557_s19] sm:$0xf] %vm1432_vm8, %v1431_v29 }
 0xb6a PF: > { %s27_s24 = sadd.s32 1, %s1720_s24  }
 0xb6b   : > { %p24_p4 = scmp.ge.s32.totalorder %s27_s24, 4  }
 0xb6d   :  { %26 = sbr.rel (!%p24_p4) target bundleno = 3 (0x3), region = 121 }

// kernel: seq2seq_forward.7
= control target key start
LH: loop header
LB: loop body
LE: loop exit
PB: predicated region body
PF: predicated region fallthrough
CT: control target
= control target key end

     0   :  { %s2941_s29 = smov 0   ;;  %s3268_s0 = inlined_call_operand.vmem [shape: bf16[2,8,32], index: 0, kind: input, shape index: {}]   ;;  %s3269_s1 = inlined_call_operand.vmem [shape: bf16[2,8,32], index: 1, kind: input, shape index: {}]   ;;  %s3270_s2 = inlined_call_operand.vmem [shape: f32[8,8], index: 2, kind: input, shape index: {}]   ;;  %s3271_s3 = inlined_call_operand.vmem [shape: f32[2,1,8], index: 3, kind: input, shape index: {}]   ;;  %s3272_s4 = inlined_call_operand.vmem [shape: f32[2,1,8], index: 4, kind: input, shape index: {}]   ;;  %s3273_s5 = inlined_call_operand.vmem [shape: bf16[32,96], index: 5, kind: input, shape index: {}]   ;;  %s3274_s6 = inlined_call_operand.vmem [shape: f32[1,96], index: 6, kind: input, shape index: {}]   ;;  %s3275_s7 = inlined_call_operand.vmem [shape: bf16[32,32], index: 7, kind: input, shape index: {}]   ;;  %s3276_s8 = inlined_call_operand.vmem [shape: f32[1,32], index: 8, kind: input, shape index: {}]   ;;  %s3277_s9 = inlined_call_operand.vmem [shape: bf16[32,32], index: 9, kind: input, shape index: {}]   ;;  %s3278_s10 = inlined_call_operand.vmem [shape: f32[1,32], index: 10, kind: input, shape index: {}]   ;;  %s3279_s11 = inlined_call_operand.vmem [shape: bf16[32,64], index: 11, kind: input, shape index: {}]   ;;  %s3280_s12 = inlined_call_operand.vmem [shape: f32[1,64], index: 12, kind: input, shape index: {}]   ;;  %s3281_s13 = inlined_call_operand.vmem [shape: bf16[32,32], index: 13, kind: input, shape index: {}]   ;;  %s3282_s14 = inlined_call_operand.vmem [shape: f32[1,32], index: 14, kind: input, shape index: {}]   ;;  %s3283_s15 = inlined_call_operand.vmem [shape: bf16[32,64], index: 15, kind: input, shape index: {}]   ;;  %s3284_s16 = inlined_call_operand.vmem [shape: f32[1,64], index: 16, kind: input, shape index: {}]   ;;  %s3285_s17 = inlined_call_operand.vmem [shape: bf16[64,32], index: 17, kind: input, shape index: {}]   ;;  %s3286_s18 = inlined_call_operand.vmem [shape: f32[1,32], index: 18, kind: input, shape index: {}]   ;;  %s3287_s19 = inlined_call_operand.vmem [shape: f32[1,32], index: 19, kind: input, shape index: {}]   ;;  %s3288_s20 = inlined_call_operand.vmem [shape: f32[1,32], index: 20, kind: input, shape index: {}]   ;;  %s3289_s21 = inlined_call_operand.vmem [shape: f32[1,32], index: 21, kind: input, shape index: {}]   ;;  %s3290_s22 = inlined_call_operand.vmem [shape: f32[1,32], index: 22, kind: input, shape index: {}]   ;;  %s3291_s23 = inlined_call_operand.vmem [shape: f32[1,32], index: 23, kind: input, shape index: {}]   ;;  %s3292_s24 = inlined_call_operand.vmem [shape: f32[1,32], index: 24, kind: input, shape index: {}]   ;;  %s3293_s25 = inlined_call_operand.vmem [shape: bf16[2,8,32], index: 25, kind: output, shape index: {}]  }
   0x1   :  { %3308 = sst [smem:[#allocation2_spill]] %s3268_s0 }
   0x2   :  { %3309 = sst [smem:[#allocation3_spill]] %s3269_s1 }
   0x3   :  { %3310 = sst [smem:[#allocation4_spill]] %s3270_s2 }
   0x4   :  { %3311 = sst [smem:[#allocation5_spill]] %s3271_s3 }
   0x5   :  { %3312 = sst [smem:[#allocation6_spill]] %s3272_s4 }
   0x6   :  { %3313 = sst [smem:[#allocation7_spill]] %s3273_s5 }
   0x7   :  { %3314 = sst [smem:[#allocation8_spill]] %s3274_s6 }
   0x8   :  { %3315 = sst [smem:[#allocation9_spill]] %s3275_s7 }
   0x9   :  { %3316 = sst [smem:[#allocation10_spill]] %s3276_s8 }
   0xa   :  { %3317 = sst [smem:[#allocation11_spill]] %s3277_s9 }
   0xb LB: > { %s2428_s2 = sadd.s32 4294967295, %s2793_s29   ;;  %p2432_p0 = scmp.ge.s32.totalorder %s2793_s29, 1  ;;  %s2793_s29 = sphi %s2941_s29, %s35_s29  }
   0xc   : > { %p711_p1 = scmp.lt.s32.totalorder %s2793_s29, 3 }
   0xe   : > { %p712_p2 = pnand %p2432_p0, %p711_p1 }
   0xf   : > { %s3318_s7 = sld [smem:[#allocation7_spill]] (!%p712_p2)  ;;  %v2795_v1 = vmov (!%p712_p2), 0.0   ;;  %vm2796_vm0 = vmmov (!%p712_p2), 0   ;;  %p787_p3 = scmp.lt.s32.totalorder (!%p712_p2), %s2428_s2, 1  ;;  %vm836_vm1 = vcmask (!%p712_p2), 261120   ;;  %vm891_vm2 = vcmask (!%p712_p2), 64512  }
  0x10   : > { %715 = sbr.rel (%p712_p2) target bundleno = 4364 (0x110c), region = 120  ;;  %2548 = vmatprep.subr.bf16.mxu1 (!%p712_p2), %v2795_v1  ;;  %2562 = vmatprep.subr.bf16.mxu0 (!%p712_p2), %v2795_v1  ;;  %s3319_s4 = sld [smem:[#allocation2_spill]] (!%p712_p2)  ;;  %vm955_vm3 = vcmask (!%p712_p2), 1043456   ;;  %vm1342_vm4 = vcmask (!%p712_p2), 130048   ;;  %vm1344_vm5 = vcmask (!%p712_p2), 195584   ;;  %vm2268_vm7 = vcmask (!%p712_p2), 523264  }
  0x11   : > { %2552 = vmatprep.mubr.msk.bf16.mxu1 (!%p712_p2), %vm2796_vm0, %v2795_v1  ;;  %2564 = vmatprep.mubr.msk.bf16.mxu0 (!%p712_p2), %vm2796_vm0, %v2795_v1  ;;  %s3320_s0 = sld [smem:[#allocation8_spill]] (!%p712_p2)  ;;  %s2797_s6 = smov (!%p712_p2), 120   ;;  %vm2343_vm8 = vcmask (!%p712_p2), 257024  }
  0x12   : > { %s3303_s30 = smov (!%p712_p2), 96   ;;  %s3299_s3 = smov (!%p712_p2), 80  }
  0x13   : > { %s3297_s26 = smov (!%p712_p2), 88   ;;  %s3298_s8 = smov (!%p712_p2), 72  }
  0x14   : > { %s3306_s27 = smov (!%p712_p2), 112   ;;  %s3321_s5 = sld [smem:[#allocation5_spill]] (!%p712_p2) }
  0x15   : > { %v2728_v0 = vld [vmem:[%s3318_s7] sm:$0xff] (!%p712_p2)   ;;  %v2729_v2 = vld [vmem:[%s3318_s7 + $0x8] sm:$0xff] (!%p712_p2)   ;;  %s3302_s9 = smov (!%p712_p2), 8  }
  0x16   : > { %2549 = vmatpush3.bf16.msra.mxu1 (!%p712_p2), %v2728_v0 }
  0x17   : > { %2550 = vmatprep.subr.bf16.mxu1 %v2795_v1  ;;  %s3338_s2 = smov (!%p787_p3, %s2428_s2), 1  ;;  %v2437_v5 = vld [vmem:[%s3320_s0] ss:$0 sm:$0xff] }
  0x18   : > { %s2965_s1 = sshll.u32 %s3338_s2, 2 }
  0x19   : > { %s790_s28 = scalar_lea.vmem %s3319_s4, %s2965_s1  ;;  %s3304_s4 = smov 104  }
  0x1a   : > { %2551 = vmatpush3.bf16.msra.mxu1 %v2729_v2  ;;  %v2972_v3 = vld [vmem:[%s790_s28] sm:$0xf]  ;;  %s797_s0 = scalar_lea.vmem %s3321_s5, %s3338_s2  ;;  %s2807_s28 = smov 48  }
  0x1b   : > { %2556 = vmatprep.subr.bf16.mxu1 %v2795_v1  ;;  %v2436_v4 = vcombine.low %v2972_v3, %v2972_v3  ;;  %v2441_v24 = vld [vmem:[%s797_s0] ss:$0 sm:$0xff]  ;;  %s3300_s5 = smov 24  }
  0x1d   : > { %2553 = vmatmul.mubr.msk.bf16.vlgmr.msra.gmra.mrb[0].mxu1 %vm836_vm1, %v2436_v4 }
  0x1e   : > { %2558 = vmatprep.mubr.msk.bf16.mxu1 %vm2796_vm0, %v2795_v1 }
  0xf0   : > { %v874_v6 = vpop.f32.mrb[0].mxu1 }
  0xf1   : > { %v875_v7 = vadd.f32 %v2437_v5, %v874_v6  ;;  %v2554_v8 = vpop.f32.mrb[1].mxu1 }
  0xf2   : > { %v877_v9 = vpop.f32.mrb[2].mxu1 }
  0xf3   : > { %v2982_v10 = vpack.c.bf16 %v875_v7, %v875_v7  ;;  %v2555_v11 = vpop.f32.mrb[3].mxu1 }
  0xf5   : > { %999 = vrot.lane.b32.xlu1 %v2982_v10, %s2797_s6  ;;  %889 = vrot.lane.b32.xlu0 %v2982_v10, %s3303_s30  ;;  %s3325_s30 = sld [smem:[#allocation3_spill]] }
  0xf9   : > { %1111 = vrot.lane.b32.xlu1 %v2982_v10, %s3299_s3  ;;  %1001 = vrot.lane.b32.xlu0 %v2982_v10, %s3297_s26  ;;  %s3322_s3 = sld [smem:[#allocation4_spill]]  ;;  %s2805_s26 = smov 64  }
  0xfd   : > { %1221 = vrot.lane.b32.xlu1 %v2982_v10, %s3298_s8  ;;  %1109 = vrot.lane.b32.xlu0 %v2982_v10, %s3306_s27  ;;  %s2806_s8 = smov 40   ;;  %s3326_s27 = sld [smem:[#allocation11_spill]] }
  0xff   : > { %v809_v23 = vld [vmem:[%s3322_s3] sm:$0xff]  ;;  %s2804_s3 = smov 56  }
 0x100   : > { %v886_v25 = vadd.f32 %v2441_v24, %v809_v23 }
 0x101   : > { %1219 = vrot.lane.b32.xlu0 %v2982_v10, %s3304_s4  ;;  %s794_s4 = scalar_lea.vmem %s3325_s30, %s2965_s1 }
 0x167   : > { %v890_v12 = vpop.permute.xlu0 %889  ;;  %v1000_v15 = vpop.permute.xlu1 %999 }
 0x168   : > { %v896_v13 = vsel %vm891_vm2, %v890_v12, 0 }
 0x169   : > { %2557 = vmatpush3.bf16.xpose.msra.mxu1 %v896_v13 }
 0x16a   : > { %2568 = vmatprep.subr.bf16.mxu1 %v2795_v1 }
 0x16b   : > { %v1002_v14 = vpop.permute.xlu0 %1001  ;;  %v1112_v17 = vpop.permute.xlu1 %1111 }
 0x16c   : > { %v1007_v16 = vsel %vm891_vm2, %v1002_v14, 0  ;;  %v1117_v18 = vsel %vm891_vm2, %v1112_v17, 0 }
 0x16f   : > { %v1222_v19 = vpop.permute.xlu1 %1221  ;;  %v1110_v20 = vpop.permute.xlu0 %1109 }
 0x170   : > { %2559 = vmatmul.mubr.msk.bf16.vlgmr.msra.gmra.mrb[4].mxu1 %vm891_vm2, %v2982_v10  ;;  %v1227_v21 = vsel %vm891_vm2, %v1222_v19, 0 }
 0x171   : > { %2569 = vmatpush3.bf16.xpose.msra.mxu1 %v1007_v16  ;;  %2570 = vmatprep.mubr.msk.bf16.mxu1 %vm2796_vm0, %v2795_v1 }
 0x172   : > { %2580 = vmatprep.subr.bf16.mxu1 %v2795_v1 }
 0x173   : > { %v1220_v22 = vpop.permute.xlu0 %1219 }
 0x178   : > { %2571 = vmatmul.mubr.msk.bf16.vlgmr.msra.gmra.mrb[8].mxu1 %vm891_vm2, %v1000_v15 }
 0x179   : > { %2581 = vmatpush3.bf16.xpose.msra.mxu1 %v1117_v18  ;;  %2582 = vmatprep.mubr.msk.bf16.mxu1 %vm2796_vm0, %v2795_v1 }
 0x17a   : > { %2592 = vmatprep.subr.bf16.mxu1 %v2795_v1 }
 0x180   : > { %2583 = vmatmul.mubr.msk.bf16.vlgmr.msra.gmra.mrb[12].mxu1 %vm891_vm2, %v1110_v20 }
 0x181   : > { %2593 = vmatpush3.bf16.xpose.msra.mxu1 %v1227_v21  ;;  %2594 = vmatprep.mubr.msk.bf16.mxu1 %vm2796_vm0, %v2795_v1 }
 0x182   : > { %2604 = vmatprep.subr.bf16.mxu1 %v2795_v1 }
 0x188   : > { %2595 = vmatmul.mubr.msk.bf16.vlgmr.msra.gmra.mrb[16].mxu1 %vm891_vm2, %v1220_v22 }
 0x189   : > { %2608 = vmatprep.mubr.msk.bf16.mxu1 %vm2796_vm0, %v2795_v1 }
 0x243   : > { %v932_v26 = vpop.f32.mrb[4].mxu1 }
 0x244   : > { %v933_v27 = vadd.f32 %v932_v26, %v886_v25  ;;  %v2560_v28 = vpop.f32.mrb[5].mxu1 }
 0x245   : > { %v935_v29 = vpop.f32.mrb[6].mxu1 }
 0x246   : > { %v2561_v30 = vpop.f32.mrb[7].mxu1  ;;  %v938_v31 = vsel %vm891_vm2, %v933_v27, -inf }
 0x247   : > { %939 = vmax.xlane.f32.xlu1 %v938_v31 }
 0x24b   : > { %v1043_v32 = vpop.f32.mrb[8].mxu1 }
 0x24c   : > { %v1044_v33 = vadd.f32 %v1043_v32, %v886_v25  ;;  %v2572_v34 = vpop.f32.mrb[9].mxu1 }
 0x24d   : > { %v1046_v35 = vpop.f32.mrb[10].mxu1 }
 0x24e   : > { %v2573_v36 = vpop.f32.mrb[11].mxu1  ;;  %v1049_v37 = vsel %vm891_vm2, %v1044_v33, -inf }
 0x24f   : > { %1050 = vmax.xlane.f32.xlu0 %v1049_v37 }
 0x253   : > { %v1153_v38 = vpop.f32.mrb[12].mxu1 }
 0x254   : > { %v1154_v39 = vadd.f32 %v1153_v38, %v886_v25  ;;  %v2584_v40 = vpop.f32.mrb[13].mxu1 }
 0x255   : > { %v1156_v41 = vpop.f32.mrb[14].mxu1 }
 0x256   : > { %v2585_v42 = vpop.f32.mrb[15].mxu1  ;;  %v1159_v43 = vsel %vm891_vm2, %v1154_v39, -inf }
 0x257   : > { %1160 = vmax.xlane.f32.xlu0 %v1159_v43 }
 0x25b   : > { %v1263_v44 = vpop.f32.mrb[16].mxu1 }
 0x25c   : > { %v1264_v45 = vadd.f32 %v1263_v44, %v886_v25  ;;  %v2596_v46 = vpop.f32.mrb[17].mxu1 }
 0x25d   : > { %v1266_v47 = vpop.f32.mrb[18].mxu1 }
 0x25e   : > { %v2597_v48 = vpop.f32.mrb[19].mxu1  ;;  %v1269_v49 = vsel %vm891_vm2, %v1264_v45, -inf }
 0x25f   : > { %1270 = vmax.xlane.f32.xlu1 %v1269_v49 }
 0x2d4   : > { %v940_v50 = vpop.xlane.xlu1 %939 }
 0x2d5   : > { %v941_v51 = vsub.f32 %v933_v27, %v940_v50 }
 0x2d7   : > { %v942_v52 = vmul.f32 1.442695, %v941_v51 }
 0x2d9   : > { %2745 = vpow2.f32 %v942_v52 }
 0x2dc   : > { %v1051_v53 = vpop.xlane.xlu0 %1050 }
 0x2dd   : > { %v1052_v54 = vsub.f32 %v1044_v33, %v1051_v53 }
 0x2df   : > { %v1053_v55 = vmul.f32 1.442695, %v1052_v54 }
 0x2e1   : > { %2747 = vpow2.f32 %v1053_v55 }
 0x2e3   : > { %v2746_v56 = vpop.eup %2745 }
 0x2e4   : > { %v1161_v57 = vpop.xlane.xlu0 %1160  ;;  %v944_v58 = vsel %vm891_vm2, %v2746_v56, 0.0 }
 0x2e5   : > { %v1162_v59 = vsub.f32 %v1154_v39, %v1161_v57  ;;  %945 = vadd.xlane.f32.xlu0 %v944_v58  ;;  %v807_v58 = vunpack.c.l.bf16 %v2972_v3  ;;  %v2733_v3 = vld [vmem:[%s3279_s11] sm:$0xff]  }
 0x2e7   : > { %v1163_v60 = vmul.f32 1.442695, %v1162_v59 }
 0x2e9   : > { %2749 = vpow2.f32 %v1163_v60 }
 0x2eb   : > { %v2748_v61 = vpop.eup %2747 }
 0x2ec   : > { %v1055_v62 = vsel %vm891_vm2, %v2748_v61, 0.0  ;;  %v1271_v2 = vpop.xlane.xlu1 %1270 }
 0x2ed   : > { %1056 = vadd.xlane.f32.xlu1 %v1055_v62  ;;  %v1272_v4 = vsub.f32 %v1264_v45, %v1271_v2 }
 0x2ef   : > { %v1273_v5 = vmul.f32 1.442695, %v1272_v4 }
 0x2f1   : > { %2751 = vpow2.f32 %v1273_v5 }
 0x2f3   : > { %v2750_v63 = vpop.eup %2749 }
 0x2f4   : > { %v1165_v0 = vsel %vm891_vm2, %v2750_v63, 0.0 }
 0x2f5   : > { %1166 = vadd.xlane.f32.xlu0 %v1165_v0 }
 0x2fb   : > { %v2752_v6 = vpop.eup %2751 }
 0x2fc   : > { %v1275_v7 = vsel %vm891_vm2, %v2752_v6, 0.0 }
 0x2fe   : > { %1061 = vrot.lane.b32.xlu1 %v2982_v10, %s2804_s3  ;;  %s3323_s3 = sld [smem:[#allocation9_spill]] }
 0x304   : > { %v2731_v40 = vld [vmem:[%s3323_s3] sm:$0xff]   ;;  %v2732_v41 = vld [vmem:[%s3323_s3 + $0x8] sm:$0xff]  }
 0x305   : > { %2605 = vmatpush3.bf16.msra.mxu1 %v2731_v40 }
 0x306   : > { %2606 = vmatprep.subr.bf16.mxu1 %v2795_v1 }
 0x309   : > { %2607 = vmatpush3.bf16.msra.mxu1 %v2732_v41 }
 0x30a   : > { %2620 = vmatprep.subr.bf16.mxu1 %v2795_v1 }
 0x30b   : > { %950 = vrot.lane.b32.xlu0 %v2982_v10, %s2805_s26  ;;  %s3331_s26 = smov 80  }
 0x30f   : > { %1281 = vrot.lane.b32.xlu0 %v2982_v10, %s2806_s8  ;;  %s3324_s8 = sld [smem:[#allocation10_spill]] }
 0x315   : > { %v2450_v57 = vld [vmem:[%s3324_s8] ss:$0 sm:$0xff]  ;;  %s3328_s8 = smov 104  }
 0x322   : > { %1276 = vadd.xlane.f32.xlu1 %v1275_v7 }
 0x333   : > { %1171 = vrot.lane.b32.xlu1 %v2982_v10, %s2807_s28  ;;  %s3301_s28 = smov 16  }
 0x372   : > { %v946_v8 = vpop.xlane.xlu0 %945 }
 0x373   : > { %2753 = vrcp.f32 %v946_v8 }
 0x37a   : > { %v1057_v9 = vpop.xlane.xlu1 %1056 }
 0x37b   : > { %2755 = vrcp.f32 %v1057_v9  ;;  %v2734_v9 = vld [vmem:[%s3279_s11 + $0x8] sm:$0xff]  }
 0x37d   : > { %v2754_v11 = vpop.eup %2753 }
 0x37e   : > { %v948_v13 = vmul.f32 %v2754_v11, %v2746_v56  ;;  %v1062_v16 = vpop.permute.xlu1 %1061  ;;  %v808_v11 = vld [vmem:[%s794_s4] sm:$0xf] }
 0x37f   : > { %v1067_v19 = vsel %vm955_vm3, %v1062_v16, 0 }
 0x380   : > { %v949_v17 = vpack.c.bf16 %v948_v13, %v948_v13  ;;  %v2736_v13 = vld [vmem:[%s3326_s27 + $0x8] sm:$0xff]  }
 0x382   : > { %v1167_v12 = vpop.xlane.xlu0 %1166 }
 0x383   : > { %2757 = vrcp.f32 %v1167_v12  ;;  %v2735_v12 = vld [vmem:[%s3326_s27] sm:$0xff]  }
 0x385   : > { %v2756_v18 = vpop.eup %2755 }
 0x386   : > { %v951_v14 = vpop.permute.xlu0 %950  ;;  %v1059_v10 = vmul.f32 %v2756_v18, %v2748_v61  ;;  %v2454_v18 = vld [vmem:[%s3287_s19] ss:$0 sm:$0xff] }
 0x387   : > { %v957_v15 = vsel %vm955_vm3, %v951_v14, 0 }
 0x388   : > { %2563 = vmatpush3.bf16.msra.mxu0 %v957_v15  ;;  %v1060_v20 = vpack.c.bf16 %v1059_v10, %v1059_v10  ;;  %v2455_v10 = vld [vmem:[%s3288_s20] ss:$0 sm:$0xff] }
 0x389   : > { %2574 = vmatprep.subr.bf16.mxu0 %v2795_v1 }
 0x38a   : > { %v1282_v26 = vpop.permute.xlu0 %1281 }
 0x38b   : > { %2565 = vmatmul.mubr.msk.bf16.vlgmr.msra.gmra.mrb[0].mxu0 %vm891_vm2, %v949_v17  ;;  %v1287_v28 = vsel %vm955_vm3, %v1282_v26, 0 }
 0x38c   : > { %2575 = vmatpush3.bf16.msra.mxu0 %v1067_v19  ;;  %2576 = vmatprep.mubr.msk.bf16.mxu0 %vm2796_vm0, %v2795_v1 }
 0x38d   : > { %2586 = vmatprep.subr.bf16.mxu0 %v2795_v1  ;;  %v2758_v21 = vpop.eup %2757 }
 0x38e   : > { %v1169_v23 = vmul.f32 %v2758_v21, %v2750_v63 }
 0x390   : > { %v1170_v27 = vpack.c.bf16 %v1169_v23, %v1169_v23  ;;  %v2460_v23 = vld [vmem:[%s3280_s12] ss:$0 sm:$0xff] }
 0x393   : > { %2577 = vmatmul.mubr.msk.bf16.vlgmr.msra.gmra.mrb[4].mxu0 %vm891_vm2, %v1060_v20 }
 0x394   : > { %2588 = vmatprep.mubr.msk.bf16.mxu0 %vm2796_vm0, %v2795_v1 }
 0x3af   : > { %v1277_v22 = vpop.xlane.xlu1 %1276 }
 0x3b0   : > { %2759 = vrcp.f32 %v1277_v22 }
 0x3b3   : > { %v1172_v24 = vpop.permute.xlu1 %1171 }
 0x3b4   : > { %v1177_v25 = vsel %vm955_vm3, %v1172_v24, 0 }
 0x3b5   : > { %2587 = vmatpush3.bf16.msra.mxu0 %v1177_v25 }
 0x3b6   : > { %2598 = vmatprep.subr.bf16.mxu0 %v2795_v1 }
 0x3b8   : > { %2589 = vmatmul.mubr.msk.bf16.vlgmr.msra.gmra.mrb[8].mxu0 %vm891_vm2, %v1170_v27 }
 0x3b9   : > { %2599 = vmatpush3.bf16.msra.mxu0 %v1287_v28  ;;  %2600 = vmatprep.mubr.msk.bf16.mxu0 %vm2796_vm0, %v2795_v1 }
 0x3ba   : > { %v2760_v29 = vpop.eup %2759  ;;  %2612 = vmatprep.subr.bf16.mxu0 %v2795_v1 }
 0x3bb   : > { %v1279_v30 = vmul.f32 %v2760_v29, %v2752_v6 }
 0x3bd   : > { %v1280_v31 = vpack.c.bf16 %v1279_v30, %v1279_v30 }
 0x3c0   : > { %2601 = vmatmul.mubr.msk.bf16.vlgmr.msra.gmra.mrb[12].mxu0 %vm891_vm2, %v1280_v31  ;;  %v2456_v31 = vld [vmem:[%s3278_s10] ss:$0 sm:$0xff] }
 0x3c1   : > { %2616 = vmatprep.mubr.msk.bf16.mxu0 %vm2796_vm0, %v2795_v1  ;;  %2613 = vmatpush3.bf16.msra.mxu0 %v2735_v12 }
 0x3c2   : > { %2614 = vmatprep.subr.bf16.mxu0 %v2795_v1 }
 0x3c5   : > { %2615 = vmatpush3.bf16.msra.mxu0 %v2736_v13 }
 0x3c6   : > { %2628 = vmatprep.subr.bf16.mxu0 %v2795_v1 }
 0x45e   : > { %v993_v32 = vpop.f32.mrb[0].mxu0 }
 0x45f   : > { %v2566_v33 = vpop.f32.mrb[1].mxu0 }
 0x460   : > { %v996_v34 = vpop.f32.mrb[2].mxu0 }
 0x461   : > { %v2567_v35 = vpop.f32.mrb[3].mxu0 }
 0x466   : > { %v1103_v36 = vpop.f32.mrb[4].mxu0 }
 0x467   : > { %1330 = vrot.lane.b32.xlu1 %v1103_v36, %s3302_s9  ;;  %v2578_v37 = vpop.f32.mrb[5].mxu0 }
 0x468   : > { %v1106_v38 = vpop.f32.mrb[6].mxu0 }
 0x469   : > { %v2579_v39 = vpop.f32.mrb[7].mxu0 }
 0x48b   : > { %v1213_v42 = vpop.f32.mrb[8].mxu0 }
 0x48c   : > { %1334 = vrot.lane.b32.xlu0 %v1213_v42, %s3301_s28  ;;  %v2590_v43 = vpop.f32.mrb[9].mxu0  ;;  %s3329_s28 = sld [smem:[#allocation6_spill]] }
 0x48d   : > { %v1216_v44 = vpop.f32.mrb[10].mxu0 }
 0x48e   : > { %v2591_v45 = vpop.f32.mrb[11].mxu0 }
 0x492   : > { %s800_s0 = scalar_lea.vmem %s3329_s28, %s3338_s2  ;;  %s3330_s2 = smov 96  }
 0x493   : > { %v1323_v46 = vpop.f32.mrb[12].mxu0 }
 0x494   : > { %1338 = vrot.lane.b32.xlu1 %v1323_v46, %s3300_s5  ;;  %v2602_v47 = vpop.f32.mrb[13].mxu0  ;;  %s3327_s5 = smov 112  }
 0x495   : > { %v1326_v48 = vpop.f32.mrb[14].mxu0  ;;  %v2464_v47 = vld [vmem:[%s800_s0] ss:$0 sm:$0xff]  ;;  %s3335_s0 = smov 16  }
 0x496   : > { %v2603_v49 = vpop.f32.mrb[15].mxu0 }
 0x4d9   : > { %v1331_v50 = vpop.permute.xlu1 %1330 }
 0x4da   : > { %v1341_v52 = vsel %vm891_vm2, %v993_v32, %v1331_v50 }
 0x4fe   : > { %v1335_v51 = vpop.permute.xlu0 %1334 }
 0x4ff   : > { %v1343_v53 = vsel %vm1342_vm4, %v1341_v52, %v1335_v51 }
 0x506   : > { %v1339_v54 = vpop.permute.xlu1 %1338 }
 0x507   : > { %v1345_v55 = vsel %vm1344_vm5, %v1343_v53, %v1339_v54 }
 0x508   : > { %v1350_v56 = vpack.c.bf16 %v1345_v55, %v1345_v55 }
 0x50a   : > { %2609 = vmatmul.mubr.msk.bf16.vlgmr.msra.gmra.mrb[20].mxu1 %vm836_vm1, %v1350_v56 }
 0x50b   : > { %2624 = vmatprep.mubr.msk.bf16.mxu1 %vm2796_vm0, %v2795_v1  ;;  %2621 = vmatpush3.bf16.msra.mxu1 %v2733_v3 }
 0x50c   : > { %2622 = vmatprep.subr.bf16.mxu1 %v2795_v1 }
 0x50f   : > { %2623 = vmatpush3.bf16.msra.mxu1 %v2734_v9 }
 0x510   : > { %2634 = vmatprep.subr.bf16.mxu1 %v2795_v1 }
 0x512   : > { %2625 = vmatmul.mubr.msk.bf16.vlgmr.msra.gmra.mrb[24].mxu1 %vm836_vm1, %v808_v11 }
 0x513   : > { %2636 = vmatprep.mubr.msk.bf16.mxu1 %vm2796_vm0, %v2795_v1 }
 0x5dd   : > { %v1407_v59 = vpop.f32.mrb[20].mxu1 }
 0x5de   : > { %v1408_v60 = vadd.f32 %v2450_v57, %v1407_v59  ;;  %v2610_v61 = vpop.f32.mrb[21].mxu1 }
 0x5df   : > { %v1410_v62 = vpop.f32.mrb[22].mxu1 }
 0x5e0   : > { %v2611_v63 = vpop.f32.mrb[23].mxu1  ;;  %v1413_v0 = vadd.f32 %v1408_v60, %v807_v58 }
 0x5e2   : > { %v1416_v2 = vsel %vm836_vm1, %v1413_v0, 0.0 }
 0x5e3   : > { %1417 = vadd.xlane.f32.xlu0 %v1416_v2 }
 0x5e5   : > { %v1571_v24 = vpop.f32.mrb[24].mxu1 }
 0x5e6   : > { %v1572_v25 = vadd.f32 %v2460_v23, %v1571_v24  ;;  %v2626_v26 = vpop.f32.mrb[25].mxu1 }
 0x5e7   : > { %v1574_v27 = vpop.f32.mrb[26].mxu1 }
 0x5e8   : > { %v3120_v28 = vpack.c.bf16 %v1572_v25, %v1572_v25  ;;  %v2627_v29 = vpop.f32.mrb[27].mxu1 }
 0x5ea   : > { %v1589_v30 = vsel %vm891_vm2, %v3120_v28, 0 }
 0x5f9   : > { %1695 = vrot.lane.b32.xlu0 %v3120_v28, %s2797_s6 }
 0x5fd   : > { %1805 = vrot.lane.b32.xlu0 %v3120_v28, %s3327_s5 }
 0x601   : > { %1915 = vrot.lane.b32.xlu0 %v3120_v28, %s3328_s8 }
 0x670   : > { %v1418_v4 = vpop.xlane.xlu0 %1417 }
 0x671   : > { %v1420_v5 = vmul.f32 0.03125, %v1418_v4 }
 0x673   : > { %v1421_v6 = vsub.f32 %v1413_v0, %v1420_v5 }
 0x674   : > { %v1696_v36 = vpop.permute.xlu0 %1695 }
 0x675   : > { %v1422_v7 = vmul.f32 %v1421_v6, %v1421_v6  ;;  %v1701_v39 = vsel %vm891_vm2, %v1696_v36, 0 }
 0x677   : > { %v1423_v8 = vsel %vm836_vm1, %v1422_v7, 0.0 }
 0x678   : > { %1424 = vadd.xlane.f32.xlu1 %v1423_v8  ;;  %v1806_v40 = vpop.permute.xlu0 %1805 }
 0x679   : > { %v1811_v42 = vsel %vm891_vm2, %v1806_v40, 0 }
 0x67c   : > { %v1916_v43 = vpop.permute.xlu0 %1915 }
 0x67d   : > { %v1921_v45 = vsel %vm891_vm2, %v1916_v43, 0 }
 0x705   : > { %v1425_v14 = vpop.xlane.xlu1 %1424 }
 0x706   : > { %v1426_v15 = vmul.f32 0.03125, %v1425_v14 }
 0x708   : > { %v1427_v16 = vadd.f32 1e-05, %v1426_v15 }
 0x70a   : > { %2761 = vrsqrt.f32 %v1427_v16 }
 0x714   : > { %v2762_v17 = vpop.eup %2761 }
 0x715   : > { %v1429_v19 = vmul.f32 %v2762_v17, %v1421_v6 }
 0x717   : > { %v1436_v20 = vmul.f32 %v2454_v18, %v1429_v19 }
 0x719   : > { %v3110_v21 = vadd.f32 %v2455_v10, %v1436_v20 }
 0x71b   : > { %v1448_v22 = vpack.c.bf16 %v3110_v21, %v3110_v21 }
 0x71d   : > { %2617 = vmatmul.mubr.msk.bf16.vlgmr.msra.gmra.mrb[16].mxu0 %vm836_vm1, %v1448_v22 }
 0x71e   : > { %2630 = vmatprep.mubr.msk.bf16.mxu0 %vm2796_vm0, %v2795_v1  ;;  %2629 = vmatpush3.bf16.xpose.msra.mxu0 %v1589_v30 }
 0x71f   : > { %2640 = vmatprep.subr.bf16.mxu0 %v2795_v1 }
 0x7f0   : > { %v1505_v32 = vpop.f32.mrb[16].mxu0 }
 0x7f1   : > { %v1506_v33 = vadd.f32 %v2456_v31, %v1505_v32  ;;  %v2618_v34 = vpop.f32.mrb[17].mxu0 }
 0x7f2   : > { %v1508_v35 = vpop.f32.mrb[18].mxu0 }
 0x7f3   : > { %v1577_v37 = vpack.c.bf16 %v1506_v33, %v1506_v33  ;;  %v2619_v38 = vpop.f32.mrb[19].mxu0 }
 0x7f5   : > { %1693 = vrot.lane.b32.xlu1 %v1577_v37, %s2797_s6  ;;  %2631 = vmatmul.mubr.msk.bf16.vlgmr.msra.gmra.mrb[20].mxu0 %vm891_vm2, %v1577_v37  ;;  %s3334_s6 = smov 8  }
 0x7f6   : > { %2641 = vmatpush3.bf16.xpose.msra.mxu0 %v1701_v39  ;;  %2642 = vmatprep.mubr.msk.bf16.mxu0 %vm2796_vm0, %v2795_v1 }
 0x7f7   : > { %2652 = vmatprep.subr.bf16.mxu0 %v2795_v1 }
 0x7f9   : > { %1803 = vrot.lane.b32.xlu1 %v1577_v37, %s3327_s5  ;;  %s3332_s5 = smov 72  }
 0x7fd   : > { %1913 = vrot.lane.b32.xlu1 %v1577_v37, %s3328_s8  ;;  %s3333_s8 = smov 88  }
 0x867   : > { %v1694_v41 = vpop.permute.xlu1 %1693 }
 0x868   : > { %2643 = vmatmul.mubr.msk.bf16.vlgmr.msra.gmra.mrb[24].mxu0 %vm891_vm2, %v1694_v41 }
 0x869   : > { %2653 = vmatpush3.bf16.xpose.msra.mxu0 %v1811_v42  ;;  %2654 = vmatprep.mubr.msk.bf16.mxu0 %vm2796_vm0, %v2795_v1 }
 0x86a   : > { %2664 = vmatprep.subr.bf16.mxu0 %v2795_v1 }
 0x86b   : > { %v1804_v44 = vpop.permute.xlu1 %1803 }
 0x86f   : > { %v1914_v46 = vpop.permute.xlu1 %1913 }
 0x870   : > { %2655 = vmatmul.mubr.msk.bf16.vlgmr.msra.gmra.mrb[28].mxu0 %vm891_vm2, %v1804_v44 }
 0x871   : > { %2665 = vmatpush3.bf16.xpose.msra.mxu0 %v1921_v45  ;;  %2666 = vmatprep.mubr.msk.bf16.mxu0 %vm2796_vm0, %v2795_v1 }
 0x872   : > { %2676 = vmatprep.subr.bf16.mxu0 %v2795_v1 }
 0x878   : > { %2667 = vmatmul.mubr.msk.bf16.vlgmr.msra.gmra.mrb[32].mxu0 %vm891_vm2, %v1914_v46 }
 0x879   : > { %2680 = vmatprep.mubr.msk.bf16.mxu0 %vm2796_vm0, %v2795_v1 }
 0x8c8   : > { %v1625_v48 = vpop.f32.mrb[20].mxu0 }
 0x8c9   : > { %v1626_v49 = vadd.f32 %v2464_v47, %v1625_v48  ;;  %v2632_v50 = vpop.f32.mrb[21].mxu0 }
 0x8ca   : > { %v1628_v51 = vpop.f32.mrb[22].mxu0 }
 0x8cb   : > { %v2633_v52 = vpop.f32.mrb[23].mxu0  ;;  %v1631_v53 = vsel %vm891_vm2, %v1626_v49, -inf }
 0x8cc   : > { %1632 = vmax.xlane.f32.xlu0 %v1631_v53 }
 0x93b   : > { %v1737_v54 = vpop.f32.mrb[24].mxu0 }
 0x93c   : > { %v1738_v55 = vadd.f32 %v2464_v47, %v1737_v54  ;;  %v2644_v56 = vpop.f32.mrb[25].mxu0 }
 0x93d   : > { %v1740_v57 = vpop.f32.mrb[26].mxu0 }
 0x93e   : > { %v2645_v58 = vpop.f32.mrb[27].mxu0  ;;  %v1743_v59 = vsel %vm891_vm2, %v1738_v55, -inf }
 0x93f   : > { %1744 = vmax.xlane.f32.xlu1 %v1743_v59  ;;  %v2737_v58 = vld [vmem:[%s3281_s13] sm:$0xff]  }
 0x940   : > { %2677 = vmatpush3.bf16.msra.mxu0 %v2737_v58 }
 0x941   : > { %2678 = vmatprep.subr.bf16.mxu0 %v2795_v1 }
 0x943   : > { %v1847_v60 = vpop.f32.mrb[28].mxu0 }
 0x944   : > { %v1848_v61 = vadd.f32 %v2464_v47, %v1847_v60  ;;  %v2656_v62 = vpop.f32.mrb[29].mxu0 }
 0x945   : > { %v1850_v63 = vpop.f32.mrb[30].mxu0 }
 0x946   : > { %v2657_v0 = vpop.f32.mrb[31].mxu0  ;;  %v1853_v2 = vsel %vm891_vm2, %v1848_v61, -inf  ;;  %v2738_v63 = vld [vmem:[%s3281_s13 + $0x8] sm:$0xff]  }
 0x947   : > { %1854 = vmax.xlane.f32.xlu0 %v1853_v2  ;;  %2679 = vmatpush3.bf16.msra.mxu0 %v2738_v63 }
 0x948   : > { %2692 = vmatprep.subr.bf16.mxu0 %v2795_v1 }
 0x94b   : > { %v1957_v4 = vpop.f32.mrb[32].mxu0 }
 0x94c   : > { %v1958_v5 = vadd.f32 %v2464_v47, %v1957_v4  ;;  %v2668_v6 = vpop.f32.mrb[33].mxu0 }
 0x94d   : > { %v1960_v7 = vpop.f32.mrb[34].mxu0 }
 0x94e   : > { %v2669_v8 = vpop.f32.mrb[35].mxu0  ;;  %v1963_v3 = vsel %vm891_vm2, %v1958_v5, -inf }
 0x94f   : > { %1964 = vmax.xlane.f32.xlu0 %v1963_v3 }
 0x959   : > { %v1633_v9 = vpop.xlane.xlu0 %1632 }
 0x95a   : > { %v1634_v11 = vsub.f32 %v1626_v49, %v1633_v9 }
 0x95c   : > { %v1635_v12 = vmul.f32 1.442695, %v1634_v11 }
 0x95e   : > { %2763 = vpow2.f32 %v1635_v12 }
 0x968   : > { %v2764_v13 = vpop.eup %2763 }
 0x969   : > { %v1637_v14 = vsel %vm891_vm2, %v2764_v13, 0.0 }
 0x96a   : > { %1638 = vadd.xlane.f32.xlu1 %v1637_v14 }
 0x97b   : > { %1644 = vrot.lane.b32.xlu1 %v3120_v28, %s3330_s2  ;;  %s3336_s2 = smov 24  }
 0x9cc   : > { %v1745_v15 = vpop.xlane.xlu1 %1744 }
 0x9cd   : > { %v1746_v16 = vsub.f32 %v1738_v55, %v1745_v15 }
 0x9cf   : > { %v1747_v17 = vmul.f32 1.442695, %v1746_v16 }
 0x9d1   : > { %2765 = vpow2.f32 %v1747_v17  ;;  %v2473_v17 = vld [vmem:[%s3282_s14] ss:$0 sm:$0xff] }
 0x9d4   : > { %v1855_v18 = vpop.xlane.xlu0 %1854 }
 0x9d5   : > { %v1856_v19 = vsub.f32 %v1848_v61, %v1855_v18 }
 0x9d7   : > { %v1857_v10 = vmul.f32 1.442695, %v1856_v19 }
 0x9d9   : > { %2767 = vpow2.f32 %v1857_v10 }
 0x9db   : > { %v2766_v20 = vpop.eup %2765 }
 0x9dc   : > { %v1965_v22 = vpop.xlane.xlu0 %1964  ;;  %v1749_v23 = vsel %vm891_vm2, %v2766_v20, 0.0 }
 0x9dd   : > { %v1966_v24 = vsub.f32 %v1958_v5, %v1965_v22  ;;  %1750 = vadd.xlane.f32.xlu0 %v1749_v23 }
 0x9df   : > { %v1967_v25 = vmul.f32 1.442695, %v1966_v24 }
 0x9e1   : > { %2769 = vpow2.f32 %v1967_v25 }
 0x9e3   : > { %v2768_v26 = vpop.eup %2767 }
 0x9e4   : > { %v1859_v27 = vsel %vm891_vm2, %v2768_v26, 0.0 }
 0x9e5   : > { %1860 = vadd.xlane.f32.xlu1 %v1859_v27 }
 0x9eb   : > { %v2770_v29 = vpop.eup %2769 }
 0x9ec   : > { %v1969_v30 = vsel %vm891_vm2, %v2770_v29, 0.0 }
 0x9ed   : > { %1970 = vadd.xlane.f32.xlu0 %v1969_v30 }
 0x9f6   : > { %1865 = vrot.lane.b32.xlu1 %v3120_v28, %s3331_s26 }
 0x9f7   : > { %v1639_v31 = vpop.xlane.xlu1 %1638 }
 0x9f8   : > { %2771 = vrcp.f32 %v1639_v31  ;;  %v2739_v31 = vld [vmem:[%s3283_s15] sm:$0xff]  }
 0x9fa   : > { %1975 = vrot.lane.b32.xlu1 %v3120_v28, %s3332_s5 }
 0x9fb   : > { %v1645_v32 = vpop.permute.xlu1 %1644 }
 0x9fc   : > { %v1650_v33 = vsel %vm955_vm3, %v1645_v32, 0  ;;  %v2740_v32 = vld [vmem:[%s3283_s15 + $0x8] sm:$0xff]  }
 0x9fd   : > { %2635 = vmatpush3.bf16.msra.mxu1 %v1650_v33 }
 0x9fe   : > { %2646 = vmatprep.subr.bf16.mxu1 %v2795_v1 }
 0xa02   : > { %v2772_v34 = vpop.eup %2771 }
 0xa03   : > { %v1641_v35 = vmul.f32 %v2772_v34, %v2764_v13  ;;  %1755 = vrot.lane.b32.xlu0 %v3120_v28, %s3333_s8 }
 0xa05   : > { %v1642_v36 = vpack.c.bf16 %v1641_v35, %v1641_v35 }
 0xa07   : > { %2637 = vmatmul.mubr.msk.bf16.vlgmr.msra.gmra.mrb[28].mxu1 %vm891_vm2, %v1642_v36  ;;  %v2477_v36 = vld [vmem:[%s3289_s21] ss:$0 sm:$0xff] }
 0xa08   : > { %2648 = vmatprep.mubr.msk.bf16.mxu1 %vm2796_vm0, %v2795_v1 }
 0xa6a   : > { %v1751_v37 = vpop.xlane.xlu0 %1750 }
 0xa6b   : > { %2773 = vrcp.f32 %v1751_v37 }
 0xa72   : > { %v1861_v38 = vpop.xlane.xlu1 %1860 }
 0xa73   : > { %2775 = vrcp.f32 %v1861_v38  ;;  %v2478_v38 = vld [vmem:[%s3290_s22] ss:$0 sm:$0xff] }
 0xa75   : > { %v2774_v39 = vpop.eup %2773 }
 0xa76   : > { %v1753_v41 = vmul.f32 %v2774_v39, %v2766_v20  ;;  %v1866_v44 = vpop.permute.xlu1 %1865 }
 0xa77   : > { %v1871_v46 = vsel %vm955_vm3, %v1866_v44, 0  ;;  %v2743_v44 = vld [vmem:[%s3285_s17 + $0x10] sm:$0xff]  }
 0xa78   : > { %v1754_v28 = vpack.c.bf16 %v1753_v41, %v1753_v41 }
 0xa7a   : > { %v1971_v40 = vpop.xlane.xlu0 %1970  ;;  %v1976_v48 = vpop.permute.xlu1 %1975 }
 0xa7b   : > { %2777 = vrcp.f32 %v1971_v40  ;;  %v1981_v51 = vsel %vm955_vm3, %v1976_v48, 0 }
 0xa7d   : > { %v2776_v45 = vpop.eup %2775 }
 0xa7e   : > { %v1756_v42 = vpop.permute.xlu0 %1755  ;;  %v1863_v47 = vmul.f32 %v2776_v45, %v2768_v26  ;;  %v2479_v45 = vld [vmem:[%s3284_s16] ss:$0 sm:$0xff] }
 0xa7f   : > { %v1761_v43 = vsel %vm955_vm3, %v1756_v42, 0  ;;  %v2741_v42 = vld [vmem:[%s3285_s17] sm:$0xff]  }
 0xa80   : > { %2647 = vmatpush3.bf16.msra.mxu1 %v1761_v43  ;;  %v1864_v49 = vpack.c.bf16 %v1863_v47, %v1863_v47  ;;  %v2742_v43 = vld [vmem:[%s3285_s17 + $0x8] sm:$0xff]  }
 0xa81   : > { %2658 = vmatprep.subr.bf16.mxu1 %v2795_v1 }
 0xa83   : > { %2649 = vmatmul.mubr.msk.bf16.vlgmr.msra.gmra.mrb[32].mxu1 %vm891_vm2, %v1754_v28  ;;  %v2744_v28 = vld [vmem:[%s3285_s17 + $0x18] sm:$0xff]  }
 0xa84   : > { %2659 = vmatpush3.bf16.msra.mxu1 %v1871_v46  ;;  %2660 = vmatprep.mubr.msk.bf16.mxu1 %vm2796_vm0, %v2795_v1 }
 0xa85   : > { %2670 = vmatprep.subr.bf16.mxu1 %v2795_v1  ;;  %v2778_v50 = vpop.eup %2777 }
 0xa86   : > { %v1973_v52 = vmul.f32 %v2778_v50, %v2770_v29 }
 0xa88   : > { %v1974_v53 = vpack.c.bf16 %v1973_v52, %v1973_v52 }
 0xa8b   : > { %2661 = vmatmul.mubr.msk.bf16.vlgmr.msra.gmra.mrb[36].mxu1 %vm891_vm2, %v1864_v49 }
 0xa8c   : > { %2671 = vmatpush3.bf16.msra.mxu1 %v1981_v51  ;;  %2672 = vmatprep.mubr.msk.bf16.mxu1 %vm2796_vm0, %v2795_v1 }
 0xa8d   : > { %2684 = vmatprep.subr.bf16.mxu1 %v2795_v1 }
 0xa93   : > { %2673 = vmatmul.mubr.msk.bf16.vlgmr.msra.gmra.mrb[40].mxu1 %vm891_vm2, %v1974_v53 }
 0xa94   : > { %2688 = vmatprep.mubr.msk.bf16.mxu1 %vm2796_vm0, %v2795_v1  ;;  %2685 = vmatpush3.bf16.msra.mxu1 %v2739_v31 }
 0xa95   : > { %2686 = vmatprep.subr.bf16.mxu1 %v2795_v1 }
 0xa98   : > { %2687 = vmatpush3.bf16.msra.mxu1 %v2740_v32  ;;  %v2489_v32 = vld [vmem:[%s3291_s23] ss:$0 sm:$0xff] }
 0xada   : > { %v1686_v54 = vpop.f32.mrb[28].mxu1 }
 0xadb   : > { %v2638_v55 = vpop.f32.mrb[29].mxu1 }
 0xadc   : > { %v1689_v56 = vpop.f32.mrb[30].mxu1 }
 0xadd   : > { %v2639_v57 = vpop.f32.mrb[31].mxu1 }
 0xb56   : > { %v1797_v59 = vpop.f32.mrb[32].mxu1 }
 0xb57   : > { %2024 = vrot.lane.b32.xlu0 %v1797_v59, %s3334_s6  ;;  %v2650_v60 = vpop.f32.mrb[33].mxu1 }
 0xb58   : > { %v1800_v61 = vpop.f32.mrb[34].mxu1 }
 0xb59   : > { %v2651_v62 = vpop.f32.mrb[35].mxu1 }
 0xb5e   : > { %v1907_v0 = vpop.f32.mrb[36].mxu1 }
 0xb5f   : > { %2028 = vrot.lane.b32.xlu1 %v1907_v0, %s3335_s0  ;;  %v2662_v2 = vpop.f32.mrb[37].mxu1  ;;  %s804_s0 = scalar_lea.vmem %s3293_s25, %s2965_s1 }
 0xb60   : > { %v1910_v4 = vpop.f32.mrb[38].mxu1 }
 0xb61   : > { %v2663_v5 = vpop.f32.mrb[39].mxu1 }
 0xb66   : > { %v2017_v6 = vpop.f32.mrb[40].mxu1 }
 0xb67   : > { %2032 = vrot.lane.b32.xlu0 %v2017_v6, %s3336_s2  ;;  %v2674_v7 = vpop.f32.mrb[41].mxu1 }
 0xb68   : > { %v2020_v8 = vpop.f32.mrb[42].mxu1 }
 0xb69   : > { %v2675_v3 = vpop.f32.mrb[43].mxu1 }
 0xbc9   : > { %v2025_v9 = vpop.permute.xlu0 %2024 }
 0xbca   : > { %v2035_v12 = vsel %vm891_vm2, %v1686_v54, %v2025_v9 }
 0xbd1   : > { %v2029_v11 = vpop.permute.xlu1 %2028 }
 0xbd2   : > { %v2036_v13 = vsel %vm1342_vm4, %v2035_v12, %v2029_v11 }
 0xbd9   : > { %v2033_v14 = vpop.permute.xlu0 %2032 }
 0xbda   : > { %v2037_v15 = vsel %vm1344_vm5, %v2036_v13, %v2033_v14  ;;  %v2483_v14 = vld [vmem:[%s3286_s18] ss:$0 sm:$0xff] }
 0xbdb   : > { %v2042_v16 = vpack.c.bf16 %v2037_v15, %v2037_v15 }
 0xbdd   : > { %2681 = vmatmul.mubr.msk.bf16.vlgmr.msra.gmra.mrb[36].mxu0 %vm836_vm1, %v2042_v16 }
 0xbde   : > { %2700 = vmatprep.mubr.msk.bf16.mxu0 %vm2796_vm0, %v2795_v1  ;;  %2693 = vmatpush3.bf16.msra.mxu0 %v2741_v42 }
 0xbdf   : > { %2694 = vmatprep.subr.bf16.mxu0 %v2795_v1 }
 0xbe2   : > { %2695 = vmatpush3.bf16.msra.mxu0 %v2742_v43 }
 0xbe3   : > { %2696 = vmatprep.subr.bf16.mxu0 %v2795_v1 }
 0xbe6   : > { %2697 = vmatpush3.bf16.msra.mxu0 %v2743_v44 }
 0xbe7   : > { %2698 = vmatprep.subr.bf16.mxu0 %v2795_v1 }
 0xbea   : > { %2699 = vmatpush3.bf16.msra.mxu0 %v2744_v28 }
 0xcb0   : > { %v2099_v18 = vpop.f32.mrb[36].mxu0 }
 0xcb1   : > { %v2100_v19 = vadd.f32 %v2473_v17, %v2099_v18  ;;  %v2682_v10 = vpop.f32.mrb[37].mxu0 }
 0xcb2   : > { %v2102_v20 = vpop.f32.mrb[38].mxu0 }
 0xcb3   : > { %v2683_v22 = vpop.f32.mrb[39].mxu0  ;;  %v2105_v23 = vadd.f32 %v2100_v19, %v3110_v21 }
 0xcb5   : > { %v2108_v24 = vsel %vm836_vm1, %v2105_v23, 0.0 }
 0xcb6   : > { %2109 = vadd.xlane.f32.xlu1 %v2108_v24 }
 0xd43   : > { %v2110_v25 = vpop.xlane.xlu1 %2109 }
 0xd44   : > { %v2111_v26 = vmul.f32 0.03125, %v2110_v25 }
 0xd46   : > { %v2112_v27 = vsub.f32 %v2105_v23, %v2111_v26 }
 0xd48   : > { %v2113_v29 = vmul.f32 %v2112_v27, %v2112_v27 }
 0xd4a   : > { %v2114_v30 = vsel %vm836_vm1, %v2113_v29, 0.0 }
 0xd4b   : > { %2115 = vadd.xlane.f32.xlu0 %v2114_v30 }
 0xdd8   : > { %v2116_v21 = vpop.xlane.xlu0 %2115 }
 0xdd9   : > { %v2117_v33 = vmul.f32 0.03125, %v2116_v21 }
 0xddb   : > { %v2118_v34 = vadd.f32 1e-05, %v2117_v33  ;;  %v2490_v33 = vld [vmem:[%s3292_s24] ss:$0 sm:$0xff] }
 0xddd   : > { %2779 = vrsqrt.f32 %v2118_v34 }
 0xde7   : > { %v2780_v35 = vpop.eup %2779 }
 0xde8   : > { %v2120_v37 = vmul.f32 %v2780_v35, %v2112_v27 }
 0xdea   : > { %v2127_v39 = vmul.f32 %v2477_v36, %v2120_v37 }
 0xdec   : > { %v2134_v40 = vadd.f32 %v2478_v38, %v2127_v39 }
 0xdee   : > { %v2139_v41 = vpack.c.bf16 %v2134_v40, %v2134_v40 }
 0xdf0   : > { %2689 = vmatmul.mubr.msk.bf16.vlgmr.msra.gmra.mrb[44].mxu1 %vm836_vm1, %v2139_v41 }
 0xec3   : > { %v2196_v46 = vpop.f32.mrb[44].mxu1 }
 0xec4   : > { %v2197_v47 = vadd.f32 %v2479_v45, %v2196_v46  ;;  %v2690_v48 = vpop.f32.mrb[45].mxu1 }
 0xec5   : > { %v2199_v49 = vpop.f32.mrb[46].mxu1 }
 0xec6   : > { %v2203_v50 = vmul.f32 0.70710677, %v2197_v47  ;;  %v2691_v51 = vpop.f32.mrb[47].mxu1  ;;  %v2202_v9 = vmul.f32 0.5, %v2197_v47 }
 0xec8   : > { %v2204_v52 = vand.u32 2147483647, %v2203_v50  ;;  %vm2223_vm6 = vcmp.ge.f32.partialorder %v2203_v50, 0.0 }
 0xeca   : > { %v2205_v53 = vmul.f32 0.3275911, %v2204_v52  ;;  %v2217_v1 = vsub.f32 0.0, %v2204_v52 }
 0xecc   : > { %v2206_v54 = vadd.f32 1.0, %v2205_v53  ;;  %v2218_v56 = vmul.f32 %v2217_v1, %v2204_v52 }
 0xece   : > { %2781 = vrcp.f32 %v2206_v54  ;;  %v2219_v59 = vmul.f32 1.442695, %v2218_v56 }
 0xed0   : > { %2783 = vpow2.f32 %v2219_v59 }
 0xed8   : > { %v2782_v55 = vpop.eup %2781 }
 0xed9   : > { %v2208_v57 = vmul.f32 1.0614054, %v2782_v55 }
 0xeda   : > { %v2784_v5 = vpop.eup %2783 }
 0xedb   : > { %v2209_v58 = vadd.f32 -1.4531521, %v2208_v57 }
 0xedd   : > { %v2210_v60 = vmul.f32 %v2782_v55, %v2209_v58 }
 0xedf   : > { %v2211_v61 = vadd.f32 1.4214138, %v2210_v60 }
 0xee1   : > { %v2212_v62 = vmul.f32 %v2782_v55, %v2211_v61 }
 0xee3   : > { %v2213_v63 = vadd.f32 -0.28449672, %v2212_v62 }
 0xee5   : > { %v2214_v0 = vmul.f32 %v2782_v55, %v2213_v63 }
 0xee7   : > { %v2215_v2 = vadd.f32 0.2548296, %v2214_v0 }
 0xee9   : > { %v2216_v4 = vmul.f32 %v2782_v55, %v2215_v2 }
 0xeeb   : > { %v2221_v6 = vmul.f32 %v2784_v5, %v2216_v4 }
 0xeed   : > { %v2222_v7 = vsub.f32 1.0, %v2221_v6 }
 0xeef   : > { %v2224_v8 = vsub.f32 0.0, %v2222_v7 }
 0xef1   : > { %v2225_v3 = vsel %vm2223_vm6, %v2222_v7, %v2224_v8 }
 0xef2   : > { %v2226_v11 = vadd.f32 1.0, %v2225_v3 }
 0xef4   : > { %v2227_v12 = vmul.f32 %v2226_v11, %v2202_v9 }
 0xef6   : > { %v2236_v13 = vpack.c.bf16 %v2227_v12, %v2227_v12 }
 0xef8   : > { %2701 = vmatmul.mubr.msk.bf16.vlgmr.msra.gmra.mrb[40].mxu0 %vm2268_vm7, %v2236_v13 }
 0xfcb   : > { %v2306_v15 = vpop.f32.mrb[40].mxu0 }
 0xfcc   : > { %v2307_v16 = vadd.f32 %v2483_v14, %v2306_v15  ;;  %v2702_v17 = vpop.f32.mrb[41].mxu0 }
 0xfcd   : > { %v2309_v18 = vpop.f32.mrb[42].mxu0 }
 0xfce   : > { %v2703_v19 = vpop.f32.mrb[43].mxu0  ;;  %v2312_v10 = vadd.f32 %v2307_v16, %v2134_v40 }
 0xfd0   : > { %v2315_v20 = vsel %vm836_vm1, %v2312_v10, 0.0 }
 0xfd1   : > { %2316 = vadd.xlane.f32.xlu0 %v2315_v20 }
0x105e   : > { %v2317_v22 = vpop.xlane.xlu0 %2316 }
0x105f   : > { %v2318_v23 = vmul.f32 0.03125, %v2317_v22 }
0x1061   : > { %v2319_v24 = vsub.f32 %v2312_v10, %v2318_v23 }
0x1063   : > { %v2320_v25 = vmul.f32 %v2319_v24, %v2319_v24 }
0x1065   : > { %v2321_v26 = vsel %vm836_vm1, %v2320_v25, 0.0 }
0x1066   : > { %2322 = vadd.xlane.f32.xlu1 %v2321_v26 }
0x10f3   : > { %v2323_v27 = vpop.xlane.xlu1 %2322 }
0x10f4   : > { %v2324_v29 = vmul.f32 0.03125, %v2323_v27 }
0x10f6   : > { %v2325_v30 = vadd.f32 1e-05, %v2324_v29 }
0x10f8   : > { %2785 = vrsqrt.f32 %v2325_v30 }
0x1102   : > { %v2786_v31 = vpop.eup %2785 }
0x1103   : > { %v2327_v21 = vmul.f32 %v2786_v31, %v2319_v24 }
0x1105   : > { %v2334_v34 = vmul.f32 %v2489_v32, %v2327_v21 }
0x1107   : > { %v2341_v35 = vadd.f32 %v2490_v33, %v2334_v34 }
0x1109   : > { %v2342_v36 = vpack.c.bf16 %v2341_v35, %v2341_v35 }
0x110b   : > { %2344 = vst.msk [vmem:[%s804_s0] sm:$0xf] %vm2343_vm8, %v2342_v36 }
0x110c PF: > { %s35_s29 = sadd.s32 1, %s2793_s29  }
0x110d   : > { %p32_p4 = scmp.ge.s32.totalorder %s35_s29, 4  }
0x110f   :  { %34 = sbr.rel (!%p32_p4) target bundleno = 11 (0xb), region = 159 }

// kernel: seq2seq_forward.8
= control target key start
LH: loop header
LB: loop body
LE: loop exit
PB: predicated region body
PF: predicated region fallthrough
CT: control target
= control target key end

     0   :  { %s3375_s0 = inlined_call_operand.vmem [shape: bf16[2,8,32], index: 0, kind: input, shape index: {}]   ;;  %s3376_s1 = inlined_call_operand.vmem [shape: bf16[2,8,32], index: 1, kind: input, shape index: {}]   ;;  %s3377_s2 = inlined_call_operand.vmem [shape: f32[8,8], index: 2, kind: input, shape index: {}]   ;;  %s3378_s3 = inlined_call_operand.vmem [shape: f32[2,1,8], index: 3, kind: input, shape index: {}]   ;;  %s3379_s4 = inlined_call_operand.vmem [shape: f32[2,1,8], index: 4, kind: input, shape index: {}]   ;;  %s3380_s5 = inlined_call_operand.vmem [shape: bf16[32,96], index: 5, kind: input, shape index: {}]   ;;  %s3381_s6 = inlined_call_operand.vmem [shape: f32[1,96], index: 6, kind: input, shape index: {}]   ;;  %s3382_s7 = inlined_call_operand.vmem [shape: bf16[32,32], index: 7, kind: input, shape index: {}]   ;;  %s3383_s8 = inlined_call_operand.vmem [shape: f32[1,32], index: 8, kind: input, shape index: {}]   ;;  %s3384_s9 = inlined_call_operand.vmem [shape: bf16[32,32], index: 9, kind: input, shape index: {}]   ;;  %s3385_s10 = inlined_call_operand.vmem [shape: f32[1,32], index: 10, kind: input, shape index: {}]   ;;  %s3386_s11 = inlined_call_operand.vmem [shape: bf16[32,64], index: 11, kind: input, shape index: {}]   ;;  %s3387_s12 = inlined_call_operand.vmem [shape: f32[1,64], index: 12, kind: input, shape index: {}]   ;;  %s3388_s13 = inlined_call_operand.vmem [shape: bf16[32,32], index: 13, kind: input, shape index: {}]   ;;  %s3389_s14 = inlined_call_operand.vmem [shape: f32[1,32], index: 14, kind: input, shape index: {}]   ;;  %s3390_s15 = inlined_call_operand.vmem [shape: bf16[32,64], index: 15, kind: input, shape index: {}]   ;;  %s3391_s16 = inlined_call_operand.vmem [shape: f32[1,64], index: 16, kind: input, shape index: {}]   ;;  %s3392_s17 = inlined_call_operand.vmem [shape: bf16[64,32], index: 17, kind: input, shape index: {}]   ;;  %s3393_s18 = inlined_call_operand.vmem [shape: f32[1,32], index: 18, kind: input, shape index: {}]   ;;  %s3394_s19 = inlined_call_operand.vmem [shape: f32[1,32], index: 19, kind: input, shape index: {}]   ;;  %s3395_s20 = inlined_call_operand.vmem [shape: f32[1,32], index: 20, kind: input, shape index: {}]   ;;  %s3396_s21 = inlined_call_operand.vmem [shape: f32[1,32], index: 21, kind: input, shape index: {}]   ;;  %s3397_s22 = inlined_call_operand.vmem [shape: f32[1,32], index: 22, kind: input, shape index: {}]   ;;  %s3398_s23 = inlined_call_operand.vmem [shape: f32[1,32], index: 23, kind: input, shape index: {}]   ;;  %s3399_s24 = inlined_call_operand.hbm [shape: f32[1,32], index: 24, kind: input, shape index: {}]   ;;  %s3400_s25 = inlined_call_operand.vmem [shape: bf16[2,8,32], index: 25, kind: output, shape index: {}]  }
   0x1   :  { %3417 = sst [smem:[#allocation5_spill]] %s3375_s0 }
   0x2   :  { %3418 = sst [smem:[#allocation6_spill]] %s3376_s1 }
   0x3   :  { %3419 = sst [smem:[#allocation7_spill]] %s3377_s2 }
   0x4   :  { %3420 = sst [smem:[#allocation8_spill]] %s3378_s3 }
   0x5   :  { %3421 = sst [smem:[#allocation9_spill]] %s3379_s4 }
   0x6   :  { %3422 = sst [smem:[#allocation10_spill]] %s3380_s5 }
   0x7   :  { %3423 = sst [smem:[#allocation11_spill]] %s3381_s6 }
   0x8   :  { %3424 = sst [smem:[#allocation12_spill]] %s3382_s7 }
   0x9   :  { %3425 = sst [smem:[#allocation13_spill]] %s3383_s8 }
   0xa   :  { %3426 = sst [smem:[#allocation14_spill]] %s3384_s9 }
   0xb   :  { %30 = vsyncpa [#allocation3], 0  ;;  %s3012_s29 = smov 0  }
   0xc LB: > { %s3018_s2 = sadd.s32 4294967295, %s2863_s29   ;;  %p2455_p0 = scmp.ge.s32.totalorder %s2863_s29, 1  ;;  %s2863_s29 = sphi %s3012_s29, %s36_s29  }
   0xd   : > { %p612_p1 = scmp.lt.s32.totalorder %s2863_s29, 3  ;;  %p3404_p3 = scmp.eq.s32.totalorder %s3018_s2, 0 }
   0xe   : > { %s2865_s30 = smov [#allocation2]   ;;  %s2825_s8 = scalar_lea.hbm %s3399_s24, 16 }
   0xf   : > { %p3022_p2 = pnand %p2455_p0, %p612_p1  ;;  %s685_s7 = sshll.u32 %s2865_s30, 4  ;;  %s686_s7 = int_to_ptr.vmem [resolvable:$true] %s685_s7 }
  0x10   : > { %p2826_p6 = scmp.ne.s32.totalorder %s3399_s24, %s2825_s8  ;;  %p2832_p10 = scmp.lt.u32.totalorder %s2825_s8, %s3399_s24 }
  0x11   : > { %s3427_s6 = scalar_select %p3022_p2, 1, 0 }
  0x12   : > { %p2735_p4 = pneg %p3022_p2 }
  0x14   : > { %p3031_p5 = pnand %p3404_p3, %p2735_p4 }
  0x16   : > { %p2827_p7 = pneg %p3031_p5 }
  0x18   : > { %p2828_p8 = pnand %p2827_p7, %p2826_p6 }
  0x1a   : > { %p2829_p9 = pneg %p2828_p8 }
  0x1c   : > { %p2834_p11 = pnand %p2832_p10, %p2829_p9 }
  0x1e   : > { %2837 = shalt.err (!%p2834_p11)
}
  0x1f   : > { %s2838_s5 = scalar_lea.vmem %s686_s7, 16  ;;  %s2845_s0 = scalar_lea.vmem %s686_s7, 32 }
  0x20   : > { %p2839_p12 = scmp.ne.s32.totalorder %s686_s7, %s2838_s5  ;;  %p2846_p1 = scmp.lt.s32.totalorder %s686_s7, %s686_s7 }
  0x21   : > { %p2847_p4 = scmp.lt.s32.totalorder %s2845_s0, %s2838_s5 }
  0x22   : > { %p2841_p13 = pnand %p2839_p12, %p2827_p7 }
  0x23   : > { %p2848_p3 = por %p2847_p4, %p2846_p1 }
  0x24   : > { %p2842_p0 = pneg %p2841_p13 }
  0x26   : > { %p2849_p2 = pnand %p2848_p3, %p2842_p0 }
  0x28   : > { %2852 = shalt.err (!%p2849_p2)
}
  0x29   : > { %2738 = dma.hbm_to_vmem [thread:$0]  (!%p3031_p5), %s3399_s24, 16, %s686_s7, [#allocation3]  }
  0x2a   : > { %p3429_p6 = scmp.ne.s32.totalorder %s3427_s6, 0 }
  0x2b   : > { %p3430_p8 = scmp.eq.s32.totalorder (!%p3429_p6), %s3018_s2, 0 }
  0x2c   : > { %724 = sbr.rel (%p3429_p6) target bundleno = 4402 (0x1132), region = 120 }
  0x33   : > { %2858 = dma.done.wait (%p3430_p8), [#allocation3], 16   ;;  %p3431_p7 = pmov %p3430_p8 }
  0x34   : > { %p800_p9 = scmp.lt.s32.totalorder %s3018_s2, 1  ;;  %v2866_v0 = vmov 0.0   ;;  %vm2867_vm0 = vmmov 0   ;;  %s3432_s1 = sld [smem:[#allocation5_spill]]  ;;  %vm849_vm1 = vcmask 261120   ;;  %vm904_vm2 = vcmask 64512  }
  0x35   : > { %2860 = vsyncadd (%p3431_p7), [#allocation3], 4294967280  ;;  %2575 = vmatprep.subr.bf16.mxu1 %v2866_v0  ;;  %2579 = vmatprep.mubr.msk.bf16.mxu1 %vm2867_vm0, %v2866_v0  ;;  %s3433_s28 = sld [smem:[#allocation10_spill]]  ;;  %s3434_s26 = sld [smem:[#allocation11_spill]]  ;;  %vm968_vm3 = vcmask 1043456   ;;  %vm1355_vm4 = vcmask 130048  }
  0x36   : > { %s3452_s2 = smov (!%p800_p9, %s3018_s2), 1  ;;  %2589 = vmatprep.subr.bf16.mxu0 %v2866_v0  ;;  %2591 = vmatprep.mubr.msk.bf16.mxu0 %vm2867_vm0, %v2866_v0  ;;  %s2868_s7 = smov 120   ;;  %vm1357_vm5 = vcmask 195584   ;;  %vm2281_vm7 = vcmask 523264   ;;  %vm2356_vm8 = vcmask 257024  }
  0x37   : > { %s3068_s6 = sshll.u32 %s3452_s2, 2  ;;  %s3412_s3 = smov 96  }
  0x38   : > { %s3407_s27 = smov 72   ;;  %s3415_s4 = smov 112  }
  0x39   : > { %s3413_s9 = smov 104   ;;  %s3435_s30 = sld [smem:[#allocation8_spill]] }
  0x3a   : > { %s803_s8 = scalar_lea.vmem %s3432_s1, %s3068_s6  ;;  %s3408_s1 = smov 80  }
  0x3b   : > { %v2766_v1 = vld [vmem:[%s3433_s28] sm:$0xff]   ;;  %v2767_v2 = vld [vmem:[%s3433_s28 + $0x8] sm:$0xff]   ;;  %s2878_s5 = smov 48   ;;  %s3411_s0 = smov 8  }
  0x3c   : > { %2576 = vmatpush3.bf16.msra.mxu1 %v2766_v1  ;;  %v3080_v3 = vld [vmem:[%s803_s8] sm:$0xf]  ;;  %s3406_s8 = smov 88  }
  0x3d   : > { %2577 = vmatprep.subr.bf16.mxu1 %v2866_v0  ;;  %v2463_v4 = vcombine.low %v3080_v3, %v3080_v3  ;;  %v2464_v5 = vld [vmem:[%s3434_s26] ss:$0 sm:$0xff] }
  0x3f   : > { %s810_s26 = scalar_lea.vmem %s3435_s30, %s3452_s2  ;;  %s3409_s30 = smov 24  }
  0x40   : > { %2578 = vmatpush3.bf16.msra.mxu1 %v2767_v2  ;;  %v2468_v24 = vld [vmem:[%s810_s26] ss:$0 sm:$0xff] }
  0x41   : > { %2583 = vmatprep.subr.bf16.mxu1 %v2866_v0 }
  0x43   : > { %2580 = vmatmul.mubr.msk.bf16.vlgmr.msra.gmra.mrb[0].mxu1 %vm849_vm1, %v2463_v4 }
  0x44   : > { %2585 = vmatprep.mubr.msk.bf16.mxu1 %vm2867_vm0, %v2866_v0 }
 0x116   : > { %v887_v6 = vpop.f32.mrb[0].mxu1 }
 0x117   : > { %v888_v7 = vadd.f32 %v2464_v5, %v887_v6  ;;  %v2581_v8 = vpop.f32.mrb[1].mxu1 }
 0x118   : > { %v890_v9 = vpop.f32.mrb[2].mxu1 }
 0x119   : > { %v3092_v10 = vpack.c.bf16 %v888_v7, %v888_v7  ;;  %v2582_v11 = vpop.f32.mrb[3].mxu1 }
 0x11b   : > { %1012 = vrot.lane.b32.xlu1 %v3092_v10, %s2868_s7  ;;  %902 = vrot.lane.b32.xlu0 %v3092_v10, %s3412_s3  ;;  %s3439_s3 = sld [smem:[#allocation6_spill]] }
 0x11f   : > { %1124 = vrot.lane.b32.xlu1 %v3092_v10, %s3408_s1  ;;  %1014 = vrot.lane.b32.xlu0 %v3092_v10, %s3406_s8  ;;  %s3436_s1 = sld [smem:[#allocation7_spill]]  ;;  %s2876_s8 = smov 64  }
 0x123   : > { %1234 = vrot.lane.b32.xlu1 %v3092_v10, %s3407_s27  ;;  %1122 = vrot.lane.b32.xlu0 %v3092_v10, %s3415_s4  ;;  %s2877_s27 = smov 40   ;;  %s3440_s4 = sld [smem:[#allocation14_spill]] }
 0x125   : > { %v822_v23 = vld [vmem:[%s3436_s1] sm:$0xff]  ;;  %s2875_s1 = smov 56  }
 0x126   : > { %v899_v25 = vadd.f32 %v2468_v24, %v822_v23 }
 0x127   : > { %1232 = vrot.lane.b32.xlu0 %v3092_v10, %s3413_s9  ;;  %s807_s9 = scalar_lea.vmem %s3439_s3, %s3068_s6 }
 0x18d   : > { %v903_v12 = vpop.permute.xlu0 %902  ;;  %v1013_v15 = vpop.permute.xlu1 %1012 }
 0x18e   : > { %v909_v13 = vsel %vm904_vm2, %v903_v12, 0 }
 0x18f   : > { %2584 = vmatpush3.bf16.xpose.msra.mxu1 %v909_v13 }
 0x190   : > { %2595 = vmatprep.subr.bf16.mxu1 %v2866_v0 }
 0x191   : > { %v1015_v14 = vpop.permute.xlu0 %1014  ;;  %v1125_v17 = vpop.permute.xlu1 %1124 }
 0x192   : > { %v1020_v16 = vsel %vm904_vm2, %v1015_v14, 0  ;;  %v1130_v18 = vsel %vm904_vm2, %v1125_v17, 0 }
 0x195   : > { %v1235_v19 = vpop.permute.xlu1 %1234  ;;  %v1123_v20 = vpop.permute.xlu0 %1122 }
 0x196   : > { %2586 = vmatmul.mubr.msk.bf16.vlgmr.msra.gmra.mrb[4].mxu1 %vm904_vm2, %v3092_v10  ;;  %v1240_v21 = vsel %vm904_vm2, %v1235_v19, 0 }
 0x197   : > { %2596 = vmatpush3.bf16.xpose.msra.mxu1 %v1020_v16  ;;  %2597 = vmatprep.mubr.msk.bf16.mxu1 %vm2867_vm0, %v2866_v0 }
 0x198   : > { %2607 = vmatprep.subr.bf16.mxu1 %v2866_v0 }
 0x199   : > { %v1233_v22 = vpop.permute.xlu0 %1232 }
 0x19e   : > { %2598 = vmatmul.mubr.msk.bf16.vlgmr.msra.gmra.mrb[8].mxu1 %vm904_vm2, %v1013_v15 }
 0x19f   : > { %2608 = vmatpush3.bf16.xpose.msra.mxu1 %v1130_v18  ;;  %2609 = vmatprep.mubr.msk.bf16.mxu1 %vm2867_vm0, %v2866_v0 }
 0x1a0   : > { %2619 = vmatprep.subr.bf16.mxu1 %v2866_v0 }
 0x1a6   : > { %2610 = vmatmul.mubr.msk.bf16.vlgmr.msra.gmra.mrb[12].mxu1 %vm904_vm2, %v1123_v20 }
 0x1a7   : > { %2620 = vmatpush3.bf16.xpose.msra.mxu1 %v1240_v21  ;;  %2621 = vmatprep.mubr.msk.bf16.mxu1 %vm2867_vm0, %v2866_v0 }
 0x1a8   : > { %2631 = vmatprep.subr.bf16.mxu1 %v2866_v0 }
 0x1ae   : > { %2622 = vmatmul.mubr.msk.bf16.vlgmr.msra.gmra.mrb[16].mxu1 %vm904_vm2, %v1233_v22 }
 0x1af   : > { %2635 = vmatprep.mubr.msk.bf16.mxu1 %vm2867_vm0, %v2866_v0 }
 0x269   : > { %v945_v26 = vpop.f32.mrb[4].mxu1 }
 0x26a   : > { %v946_v27 = vadd.f32 %v945_v26, %v899_v25  ;;  %v2587_v28 = vpop.f32.mrb[5].mxu1 }
 0x26b   : > { %v948_v29 = vpop.f32.mrb[6].mxu1 }
 0x26c   : > { %v2588_v30 = vpop.f32.mrb[7].mxu1  ;;  %v951_v31 = vsel %vm904_vm2, %v946_v27, -inf }
 0x26d   : > { %952 = vmax.xlane.f32.xlu1 %v951_v31 }
 0x271   : > { %v1056_v32 = vpop.f32.mrb[8].mxu1 }
 0x272   : > { %v1057_v33 = vadd.f32 %v1056_v32, %v899_v25  ;;  %v2599_v34 = vpop.f32.mrb[9].mxu1 }
 0x273   : > { %v1059_v35 = vpop.f32.mrb[10].mxu1 }
 0x274   : > { %v2600_v36 = vpop.f32.mrb[11].mxu1  ;;  %v1062_v37 = vsel %vm904_vm2, %v1057_v33, -inf }
 0x275   : > { %1063 = vmax.xlane.f32.xlu0 %v1062_v37 }
 0x279   : > { %v1166_v38 = vpop.f32.mrb[12].mxu1 }
 0x27a   : > { %v1167_v39 = vadd.f32 %v1166_v38, %v899_v25  ;;  %v2611_v40 = vpop.f32.mrb[13].mxu1 }
 0x27b   : > { %v1169_v41 = vpop.f32.mrb[14].mxu1 }
 0x27c   : > { %v2612_v42 = vpop.f32.mrb[15].mxu1  ;;  %v1172_v43 = vsel %vm904_vm2, %v1167_v39, -inf }
 0x27d   : > { %1173 = vmax.xlane.f32.xlu0 %v1172_v43 }
 0x281   : > { %v1276_v44 = vpop.f32.mrb[16].mxu1 }
 0x282   : > { %v1277_v45 = vadd.f32 %v1276_v44, %v899_v25  ;;  %v2623_v46 = vpop.f32.mrb[17].mxu1 }
 0x283   : > { %v1279_v47 = vpop.f32.mrb[18].mxu1 }
 0x284   : > { %v2624_v48 = vpop.f32.mrb[19].mxu1  ;;  %v1282_v49 = vsel %vm904_vm2, %v1277_v45, -inf }
 0x285   : > { %1283 = vmax.xlane.f32.xlu1 %v1282_v49 }
 0x2fa   : > { %v953_v50 = vpop.xlane.xlu1 %952 }
 0x2fb   : > { %v954_v51 = vsub.f32 %v946_v27, %v953_v50 }
 0x2fd   : > { %v955_v52 = vmul.f32 1.442695, %v954_v51 }
 0x2ff   : > { %2783 = vpow2.f32 %v955_v52 }
 0x302   : > { %v1064_v53 = vpop.xlane.xlu0 %1063 }
 0x303   : > { %v1065_v54 = vsub.f32 %v1057_v33, %v1064_v53 }
 0x305   : > { %v1066_v55 = vmul.f32 1.442695, %v1065_v54 }
 0x307   : > { %2785 = vpow2.f32 %v1066_v55 }
 0x309   : > { %v2784_v56 = vpop.eup %2783 }
 0x30a   : > { %v1174_v57 = vpop.xlane.xlu0 %1173  ;;  %v957_v58 = vsel %vm904_vm2, %v2784_v56, 0.0 }
 0x30b   : > { %v1175_v59 = vsub.f32 %v1167_v39, %v1174_v57  ;;  %958 = vadd.xlane.f32.xlu0 %v957_v58  ;;  %v820_v58 = vunpack.c.l.bf16 %v3080_v3  ;;  %v2771_v3 = vld [vmem:[%s3386_s11] sm:$0xff]  }
 0x30d   : > { %v1176_v60 = vmul.f32 1.442695, %v1175_v59 }
 0x30f   : > { %2787 = vpow2.f32 %v1176_v60 }
 0x311   : > { %v2786_v61 = vpop.eup %2785 }
 0x312   : > { %v1068_v62 = vsel %vm904_vm2, %v2786_v61, 0.0  ;;  %v1284_v2 = vpop.xlane.xlu1 %1283 }
 0x313   : > { %1069 = vadd.xlane.f32.xlu1 %v1068_v62  ;;  %v1285_v4 = vsub.f32 %v1277_v45, %v1284_v2 }
 0x315   : > { %v1286_v5 = vmul.f32 1.442695, %v1285_v4 }
 0x317   : > { %2789 = vpow2.f32 %v1286_v5 }
 0x319   : > { %v2788_v63 = vpop.eup %2787 }
 0x31a   : > { %v1178_v1 = vsel %vm904_vm2, %v2788_v63, 0.0 }
 0x31b   : > { %1179 = vadd.xlane.f32.xlu0 %v1178_v1 }
 0x321   : > { %v2790_v6 = vpop.eup %2789 }
 0x322   : > { %v1288_v7 = vsel %vm904_vm2, %v2790_v6, 0.0 }
 0x324   : > { %1074 = vrot.lane.b32.xlu1 %v3092_v10, %s2875_s1  ;;  %s3437_s1 = sld [smem:[#allocation12_spill]] }
 0x32a   : > { %v2769_v40 = vld [vmem:[%s3437_s1] sm:$0xff]   ;;  %v2770_v41 = vld [vmem:[%s3437_s1 + $0x8] sm:$0xff]  }
 0x32b   : > { %2632 = vmatpush3.bf16.msra.mxu1 %v2769_v40 }
 0x32c   : > { %2633 = vmatprep.subr.bf16.mxu1 %v2866_v0 }
 0x32f   : > { %2634 = vmatpush3.bf16.msra.mxu1 %v2770_v41 }
 0x330   : > { %2647 = vmatprep.subr.bf16.mxu1 %v2866_v0 }
 0x331   : > { %963 = vrot.lane.b32.xlu0 %v3092_v10, %s2876_s8  ;;  %s3445_s8 = smov 80  }
 0x335   : > { %1294 = vrot.lane.b32.xlu0 %v3092_v10, %s2877_s27  ;;  %s3438_s27 = sld [smem:[#allocation13_spill]] }
 0x33b   : > { %v2477_v57 = vld [vmem:[%s3438_s27] ss:$0 sm:$0xff]  ;;  %s3442_s27 = smov 104  }
 0x348   : > { %1289 = vadd.xlane.f32.xlu1 %v1288_v7 }
 0x359   : > { %1184 = vrot.lane.b32.xlu1 %v3092_v10, %s2878_s5  ;;  %s3410_s5 = smov 16  }
 0x398   : > { %v959_v8 = vpop.xlane.xlu0 %958 }
 0x399   : > { %2791 = vrcp.f32 %v959_v8 }
 0x3a0   : > { %v1070_v9 = vpop.xlane.xlu1 %1069 }
 0x3a1   : > { %2793 = vrcp.f32 %v1070_v9  ;;  %v2772_v9 = vld [vmem:[%s3386_s11 + $0x8] sm:$0xff]  }
 0x3a3   : > { %v2792_v11 = vpop.eup %2791 }
 0x3a4   : > { %v961_v13 = vmul.f32 %v2792_v11, %v2784_v56  ;;  %v1075_v16 = vpop.permute.xlu1 %1074  ;;  %v821_v11 = vld [vmem:[%s807_s9] sm:$0xf] }
 0x3a5   : > { %v1080_v19 = vsel %vm968_vm3, %v1075_v16, 0 }
 0x3a6   : > { %v962_v17 = vpack.c.bf16 %v961_v13, %v961_v13  ;;  %v2774_v13 = vld [vmem:[%s3440_s4 + $0x8] sm:$0xff]  }
 0x3a8   : > { %v1180_v12 = vpop.xlane.xlu0 %1179 }
 0x3a9   : > { %2795 = vrcp.f32 %v1180_v12  ;;  %v2773_v12 = vld [vmem:[%s3440_s4] sm:$0xff]  }
 0x3ab   : > { %v2794_v18 = vpop.eup %2793 }
 0x3ac   : > { %v964_v14 = vpop.permute.xlu0 %963  ;;  %v1072_v10 = vmul.f32 %v2794_v18, %v2786_v61  ;;  %v2481_v18 = vld [vmem:[%s3394_s19] ss:$0 sm:$0xff] }
 0x3ad   : > { %v970_v15 = vsel %vm968_vm3, %v964_v14, 0 }
 0x3ae   : > { %2590 = vmatpush3.bf16.msra.mxu0 %v970_v15  ;;  %v1073_v20 = vpack.c.bf16 %v1072_v10, %v1072_v10  ;;  %v2482_v10 = vld [vmem:[%s3395_s20] ss:$0 sm:$0xff] }
 0x3af   : > { %2601 = vmatprep.subr.bf16.mxu0 %v2866_v0 }
 0x3b0   : > { %v1295_v26 = vpop.permute.xlu0 %1294 }
 0x3b1   : > { %2592 = vmatmul.mubr.msk.bf16.vlgmr.msra.gmra.mrb[0].mxu0 %vm904_vm2, %v962_v17  ;;  %v1300_v28 = vsel %vm968_vm3, %v1295_v26, 0 }
 0x3b2   : > { %2602 = vmatpush3.bf16.msra.mxu0 %v1080_v19  ;;  %2603 = vmatprep.mubr.msk.bf16.mxu0 %vm2867_vm0, %v2866_v0 }
 0x3b3   : > { %2613 = vmatprep.subr.bf16.mxu0 %v2866_v0  ;;  %v2796_v21 = vpop.eup %2795 }
 0x3b4   : > { %v1182_v23 = vmul.f32 %v2796_v21, %v2788_v63 }
 0x3b6   : > { %v1183_v27 = vpack.c.bf16 %v1182_v23, %v1182_v23  ;;  %v2487_v23 = vld [vmem:[%s3387_s12] ss:$0 sm:$0xff] }
 0x3b9   : > { %2604 = vmatmul.mubr.msk.bf16.vlgmr.msra.gmra.mrb[4].mxu0 %vm904_vm2, %v1073_v20 }
 0x3ba   : > { %2615 = vmatprep.mubr.msk.bf16.mxu0 %vm2867_vm0, %v2866_v0 }
 0x3d5   : > { %v1290_v22 = vpop.xlane.xlu1 %1289 }
 0x3d6   : > { %2797 = vrcp.f32 %v1290_v22 }
 0x3d9   : > { %v1185_v24 = vpop.permute.xlu1 %1184 }
 0x3da   : > { %v1190_v25 = vsel %vm968_vm3, %v1185_v24, 0 }
 0x3db   : > { %2614 = vmatpush3.bf16.msra.mxu0 %v1190_v25 }
 0x3dc   : > { %2625 = vmatprep.subr.bf16.mxu0 %v2866_v0 }
 0x3de   : > { %2616 = vmatmul.mubr.msk.bf16.vlgmr.msra.gmra.mrb[8].mxu0 %vm904_vm2, %v1183_v27 }
 0x3df   : > { %2626 = vmatpush3.bf16.msra.mxu0 %v1300_v28  ;;  %2627 = vmatprep.mubr.msk.bf16.mxu0 %vm2867_vm0, %v2866_v0 }
 0x3e0   : > { %v2798_v29 = vpop.eup %2797  ;;  %2639 = vmatprep.subr.bf16.mxu0 %v2866_v0 }
 0x3e1   : > { %v1292_v30 = vmul.f32 %v2798_v29, %v2790_v6 }
 0x3e3   : > { %v1293_v31 = vpack.c.bf16 %v1292_v30, %v1292_v30 }
 0x3e6   : > { %2628 = vmatmul.mubr.msk.bf16.vlgmr.msra.gmra.mrb[12].mxu0 %vm904_vm2, %v1293_v31  ;;  %v2483_v31 = vld [vmem:[%s3385_s10] ss:$0 sm:$0xff] }
 0x3e7   : > { %2643 = vmatprep.mubr.msk.bf16.mxu0 %vm2867_vm0, %v2866_v0  ;;  %2640 = vmatpush3.bf16.msra.mxu0 %v2773_v12 }
 0x3e8   : > { %2641 = vmatprep.subr.bf16.mxu0 %v2866_v0 }
 0x3eb   : > { %2642 = vmatpush3.bf16.msra.mxu0 %v2774_v13 }
 0x3ec   : > { %2655 = vmatprep.subr.bf16.mxu0 %v2866_v0 }
 0x484   : > { %v1006_v32 = vpop.f32.mrb[0].mxu0 }
 0x485   : > { %v2593_v33 = vpop.f32.mrb[1].mxu0 }
 0x486   : > { %v1009_v34 = vpop.f32.mrb[2].mxu0 }
 0x487   : > { %v2594_v35 = vpop.f32.mrb[3].mxu0 }
 0x48c   : > { %v1116_v36 = vpop.f32.mrb[4].mxu0 }
 0x48d   : > { %1343 = vrot.lane.b32.xlu1 %v1116_v36, %s3411_s0  ;;  %v2605_v37 = vpop.f32.mrb[5].mxu0  ;;  %s817_s0 = scalar_lea.vmem %s3400_s25, %s3068_s6 }
 0x48e   : > { %v1119_v38 = vpop.f32.mrb[6].mxu0 }
 0x48f   : > { %v2606_v39 = vpop.f32.mrb[7].mxu0 }
 0x4b1   : > { %v1226_v42 = vpop.f32.mrb[8].mxu0 }
 0x4b2   : > { %1347 = vrot.lane.b32.xlu0 %v1226_v42, %s3410_s5  ;;  %v2617_v43 = vpop.f32.mrb[9].mxu0  ;;  %s3443_s5 = sld [smem:[#allocation9_spill]] }
 0x4b3   : > { %v1229_v44 = vpop.f32.mrb[10].mxu0 }
 0x4b4   : > { %v2618_v45 = vpop.f32.mrb[11].mxu0 }
 0x4b8   : > { %s813_s26 = scalar_lea.vmem %s3443_s5, %s3452_s2  ;;  %s3444_s2 = smov 96  }
 0x4b9   : > { %v1336_v46 = vpop.f32.mrb[12].mxu0 }
 0x4ba   : > { %1351 = vrot.lane.b32.xlu1 %v1336_v46, %s3409_s30  ;;  %v2629_v47 = vpop.f32.mrb[13].mxu0  ;;  %s3441_s30 = smov 112  }
 0x4bb   : > { %v1339_v48 = vpop.f32.mrb[14].mxu0  ;;  %v2491_v47 = vld [vmem:[%s813_s26] ss:$0 sm:$0xff]  ;;  %s3449_s26 = smov 16  }
 0x4bc   : > { %v2630_v49 = vpop.f32.mrb[15].mxu0 }
 0x4ff   : > { %v1344_v50 = vpop.permute.xlu1 %1343 }
 0x500   : > { %v1354_v52 = vsel %vm904_vm2, %v1006_v32, %v1344_v50 }
 0x524   : > { %v1348_v51 = vpop.permute.xlu0 %1347 }
 0x525   : > { %v1356_v53 = vsel %vm1355_vm4, %v1354_v52, %v1348_v51 }
 0x52c   : > { %v1352_v54 = vpop.permute.xlu1 %1351 }
 0x52d   : > { %v1358_v55 = vsel %vm1357_vm5, %v1356_v53, %v1352_v54 }
 0x52e   : > { %v1363_v56 = vpack.c.bf16 %v1358_v55, %v1358_v55 }
 0x530   : > { %2636 = vmatmul.mubr.msk.bf16.vlgmr.msra.gmra.mrb[20].mxu1 %vm849_vm1, %v1363_v56 }
 0x531   : > { %2651 = vmatprep.mubr.msk.bf16.mxu1 %vm2867_vm0, %v2866_v0  ;;  %2648 = vmatpush3.bf16.msra.mxu1 %v2771_v3 }
 0x532   : > { %2649 = vmatprep.subr.bf16.mxu1 %v2866_v0 }
 0x535   : > { %2650 = vmatpush3.bf16.msra.mxu1 %v2772_v9 }
 0x536   : > { %2661 = vmatprep.subr.bf16.mxu1 %v2866_v0 }
 0x538   : > { %2652 = vmatmul.mubr.msk.bf16.vlgmr.msra.gmra.mrb[24].mxu1 %vm849_vm1, %v821_v11 }
 0x539   : > { %2663 = vmatprep.mubr.msk.bf16.mxu1 %vm2867_vm0, %v2866_v0 }
 0x603   : > { %v1420_v59 = vpop.f32.mrb[20].mxu1 }
 0x604   : > { %v1421_v60 = vadd.f32 %v2477_v57, %v1420_v59  ;;  %v2637_v61 = vpop.f32.mrb[21].mxu1 }
 0x605   : > { %v1423_v62 = vpop.f32.mrb[22].mxu1 }
 0x606   : > { %v2638_v63 = vpop.f32.mrb[23].mxu1  ;;  %v1426_v1 = vadd.f32 %v1421_v60, %v820_v58 }
 0x608   : > { %v1429_v2 = vsel %vm849_vm1, %v1426_v1, 0.0 }
 0x609   : > { %1430 = vadd.xlane.f32.xlu0 %v1429_v2 }
 0x60b   : > { %v1584_v24 = vpop.f32.mrb[24].mxu1 }
 0x60c   : > { %v1585_v25 = vadd.f32 %v2487_v23, %v1584_v24  ;;  %v2653_v26 = vpop.f32.mrb[25].mxu1 }
 0x60d   : > { %v1587_v27 = vpop.f32.mrb[26].mxu1 }
 0x60e   : > { %v3230_v28 = vpack.c.bf16 %v1585_v25, %v1585_v25  ;;  %v2654_v29 = vpop.f32.mrb[27].mxu1 }
 0x610   : > { %v1602_v30 = vsel %vm904_vm2, %v3230_v28, 0 }
 0x61f   : > { %1708 = vrot.lane.b32.xlu0 %v3230_v28, %s2868_s7 }
 0x623   : > { %1818 = vrot.lane.b32.xlu0 %v3230_v28, %s3441_s30 }
 0x627   : > { %1928 = vrot.lane.b32.xlu0 %v3230_v28, %s3442_s27 }
 0x696   : > { %v1431_v4 = vpop.xlane.xlu0 %1430 }
 0x697   : > { %v1433_v5 = vmul.f32 0.03125, %v1431_v4 }
 0x699   : > { %v1434_v6 = vsub.f32 %v1426_v1, %v1433_v5 }
 0x69a   : > { %v1709_v36 = vpop.permute.xlu0 %1708 }
 0x69b   : > { %v1435_v7 = vmul.f32 %v1434_v6, %v1434_v6  ;;  %v1714_v39 = vsel %vm904_vm2, %v1709_v36, 0 }
 0x69d   : > { %v1436_v8 = vsel %vm849_vm1, %v1435_v7, 0.0 }
 0x69e   : > { %1437 = vadd.xlane.f32.xlu1 %v1436_v8  ;;  %v1819_v40 = vpop.permute.xlu0 %1818 }
 0x69f   : > { %v1824_v42 = vsel %vm904_vm2, %v1819_v40, 0 }
 0x6a2   : > { %v1929_v43 = vpop.permute.xlu0 %1928 }
 0x6a3   : > { %v1934_v45 = vsel %vm904_vm2, %v1929_v43, 0 }
 0x72b   : > { %v1438_v14 = vpop.xlane.xlu1 %1437 }
 0x72c   : > { %v1439_v15 = vmul.f32 0.03125, %v1438_v14 }
 0x72e   : > { %v1440_v16 = vadd.f32 1e-05, %v1439_v15 }
 0x730   : > { %2799 = vrsqrt.f32 %v1440_v16 }
 0x73a   : > { %v2800_v17 = vpop.eup %2799 }
 0x73b   : > { %v1442_v19 = vmul.f32 %v2800_v17, %v1434_v6 }
 0x73d   : > { %v1449_v20 = vmul.f32 %v2481_v18, %v1442_v19 }
 0x73f   : > { %v3220_v21 = vadd.f32 %v2482_v10, %v1449_v20 }
 0x741   : > { %v1461_v22 = vpack.c.bf16 %v3220_v21, %v3220_v21 }
 0x743   : > { %2644 = vmatmul.mubr.msk.bf16.vlgmr.msra.gmra.mrb[16].mxu0 %vm849_vm1, %v1461_v22 }
 0x744   : > { %2657 = vmatprep.mubr.msk.bf16.mxu0 %vm2867_vm0, %v2866_v0  ;;  %2656 = vmatpush3.bf16.xpose.msra.mxu0 %v1602_v30 }
 0x745   : > { %2667 = vmatprep.subr.bf16.mxu0 %v2866_v0 }
 0x816   : > { %v1518_v32 = vpop.f32.mrb[16].mxu0 }
 0x817   : > { %v1519_v33 = vadd.f32 %v2483_v31, %v1518_v32  ;;  %v2645_v34 = vpop.f32.mrb[17].mxu0 }
 0x818   : > { %v1521_v35 = vpop.f32.mrb[18].mxu0 }
 0x819   : > { %v1590_v37 = vpack.c.bf16 %v1519_v33, %v1519_v33  ;;  %v2646_v38 = vpop.f32.mrb[19].mxu0 }
 0x81b   : > { %1706 = vrot.lane.b32.xlu1 %v1590_v37, %s2868_s7  ;;  %2658 = vmatmul.mubr.msk.bf16.vlgmr.msra.gmra.mrb[20].mxu0 %vm904_vm2, %v1590_v37  ;;  %s3448_s7 = smov 8  }
 0x81c   : > { %2668 = vmatpush3.bf16.xpose.msra.mxu0 %v1714_v39  ;;  %2669 = vmatprep.mubr.msk.bf16.mxu0 %vm2867_vm0, %v2866_v0 }
 0x81d   : > { %2679 = vmatprep.subr.bf16.mxu0 %v2866_v0 }
 0x81f   : > { %1816 = vrot.lane.b32.xlu1 %v1590_v37, %s3441_s30  ;;  %s3446_s30 = smov 72  }
 0x823   : > { %1926 = vrot.lane.b32.xlu1 %v1590_v37, %s3442_s27  ;;  %s3447_s27 = smov 88  }
 0x88d   : > { %v1707_v41 = vpop.permute.xlu1 %1706 }
 0x88e   : > { %2670 = vmatmul.mubr.msk.bf16.vlgmr.msra.gmra.mrb[24].mxu0 %vm904_vm2, %v1707_v41 }
 0x88f   : > { %2680 = vmatpush3.bf16.xpose.msra.mxu0 %v1824_v42  ;;  %2681 = vmatprep.mubr.msk.bf16.mxu0 %vm2867_vm0, %v2866_v0 }
 0x890   : > { %2691 = vmatprep.subr.bf16.mxu0 %v2866_v0 }
 0x891   : > { %v1817_v44 = vpop.permute.xlu1 %1816 }
 0x895   : > { %v1927_v46 = vpop.permute.xlu1 %1926 }
 0x896   : > { %2682 = vmatmul.mubr.msk.bf16.vlgmr.msra.gmra.mrb[28].mxu0 %vm904_vm2, %v1817_v44 }
 0x897   : > { %2692 = vmatpush3.bf16.xpose.msra.mxu0 %v1934_v45  ;;  %2693 = vmatprep.mubr.msk.bf16.mxu0 %vm2867_vm0, %v2866_v0 }
 0x898   : > { %2703 = vmatprep.subr.bf16.mxu0 %v2866_v0 }
 0x89e   : > { %2694 = vmatmul.mubr.msk.bf16.vlgmr.msra.gmra.mrb[32].mxu0 %vm904_vm2, %v1927_v46 }
 0x89f   : > { %2707 = vmatprep.mubr.msk.bf16.mxu0 %vm2867_vm0, %v2866_v0 }
 0x8ee   : > { %v1638_v48 = vpop.f32.mrb[20].mxu0 }
 0x8ef   : > { %v1639_v49 = vadd.f32 %v2491_v47, %v1638_v48  ;;  %v2659_v50 = vpop.f32.mrb[21].mxu0 }
 0x8f0   : > { %v1641_v51 = vpop.f32.mrb[22].mxu0 }
 0x8f1   : > { %v2660_v52 = vpop.f32.mrb[23].mxu0  ;;  %v1644_v53 = vsel %vm904_vm2, %v1639_v49, -inf }
 0x8f2   : > { %1645 = vmax.xlane.f32.xlu0 %v1644_v53 }
 0x961   : > { %v1750_v54 = vpop.f32.mrb[24].mxu0 }
 0x962   : > { %v1751_v55 = vadd.f32 %v2491_v47, %v1750_v54  ;;  %v2671_v56 = vpop.f32.mrb[25].mxu0 }
 0x963   : > { %v1753_v57 = vpop.f32.mrb[26].mxu0 }
 0x964   : > { %v2672_v58 = vpop.f32.mrb[27].mxu0  ;;  %v1756_v59 = vsel %vm904_vm2, %v1751_v55, -inf }
 0x965   : > { %1757 = vmax.xlane.f32.xlu1 %v1756_v59  ;;  %v2775_v58 = vld [vmem:[%s3388_s13] sm:$0xff]  }
 0x966   : > { %2704 = vmatpush3.bf16.msra.mxu0 %v2775_v58 }
 0x967   : > { %2705 = vmatprep.subr.bf16.mxu0 %v2866_v0 }
 0x969   : > { %v1860_v60 = vpop.f32.mrb[28].mxu0 }
 0x96a   : > { %v1861_v61 = vadd.f32 %v2491_v47, %v1860_v60  ;;  %v2683_v62 = vpop.f32.mrb[29].mxu0 }
 0x96b   : > { %v1863_v63 = vpop.f32.mrb[30].mxu0 }
 0x96c   : > { %v2684_v1 = vpop.f32.mrb[31].mxu0  ;;  %v1866_v2 = vsel %vm904_vm2, %v1861_v61, -inf  ;;  %v2776_v63 = vld [vmem:[%s3388_s13 + $0x8] sm:$0xff]  }
 0x96d   : > { %1867 = vmax.xlane.f32.xlu0 %v1866_v2  ;;  %2706 = vmatpush3.bf16.msra.mxu0 %v2776_v63 }
 0x96e   : > { %2719 = vmatprep.subr.bf16.mxu0 %v2866_v0 }
 0x971   : > { %v1970_v4 = vpop.f32.mrb[32].mxu0 }
 0x972   : > { %v1971_v5 = vadd.f32 %v2491_v47, %v1970_v4  ;;  %v2695_v6 = vpop.f32.mrb[33].mxu0 }
 0x973   : > { %v1973_v7 = vpop.f32.mrb[34].mxu0 }
 0x974   : > { %v2696_v8 = vpop.f32.mrb[35].mxu0  ;;  %v1976_v3 = vsel %vm904_vm2, %v1971_v5, -inf }
 0x975   : > { %1977 = vmax.xlane.f32.xlu0 %v1976_v3 }
 0x97f   : > { %v1646_v9 = vpop.xlane.xlu0 %1645 }
 0x980   : > { %v1647_v11 = vsub.f32 %v1639_v49, %v1646_v9 }
 0x982   : > { %v1648_v12 = vmul.f32 1.442695, %v1647_v11 }
 0x984   : > { %2801 = vpow2.f32 %v1648_v12 }
 0x98e   : > { %v2802_v13 = vpop.eup %2801 }
 0x98f   : > { %v1650_v14 = vsel %vm904_vm2, %v2802_v13, 0.0 }
 0x990   : > { %1651 = vadd.xlane.f32.xlu1 %v1650_v14 }
 0x9a1   : > { %1657 = vrot.lane.b32.xlu1 %v3230_v28, %s3444_s2  ;;  %s3450_s2 = smov 24  }
 0x9f2   : > { %v1758_v15 = vpop.xlane.xlu1 %1757 }
 0x9f3   : > { %v1759_v16 = vsub.f32 %v1751_v55, %v1758_v15 }
 0x9f5   : > { %v1760_v17 = vmul.f32 1.442695, %v1759_v16 }
 0x9f7   : > { %2803 = vpow2.f32 %v1760_v17  ;;  %v2500_v17 = vld [vmem:[%s3389_s14] ss:$0 sm:$0xff] }
 0x9fa   : > { %v1868_v18 = vpop.xlane.xlu0 %1867 }
 0x9fb   : > { %v1869_v19 = vsub.f32 %v1861_v61, %v1868_v18 }
 0x9fd   : > { %v1870_v10 = vmul.f32 1.442695, %v1869_v19 }
 0x9ff   : > { %2805 = vpow2.f32 %v1870_v10 }
 0xa01   : > { %v2804_v20 = vpop.eup %2803 }
 0xa02   : > { %v1978_v22 = vpop.xlane.xlu0 %1977  ;;  %v1762_v23 = vsel %vm904_vm2, %v2804_v20, 0.0 }
 0xa03   : > { %v1979_v24 = vsub.f32 %v1971_v5, %v1978_v22  ;;  %1763 = vadd.xlane.f32.xlu0 %v1762_v23 }
 0xa05   : > { %v1980_v25 = vmul.f32 1.442695, %v1979_v24 }
 0xa07   : > { %2807 = vpow2.f32 %v1980_v25 }
 0xa09   : > { %v2806_v26 = vpop.eup %2805 }
 0xa0a   : > { %v1872_v27 = vsel %vm904_vm2, %v2806_v26, 0.0 }
 0xa0b   : > { %1873 = vadd.xlane.f32.xlu1 %v1872_v27 }
 0xa11   : > { %v2808_v29 = vpop.eup %2807 }
 0xa12   : > { %v1982_v30 = vsel %vm904_vm2, %v2808_v29, 0.0 }
 0xa13   : > { %1983 = vadd.xlane.f32.xlu0 %v1982_v30 }
 0xa1c   : > { %1878 = vrot.lane.b32.xlu1 %v3230_v28, %s3445_s8 }
 0xa1d   : > { %v1652_v31 = vpop.xlane.xlu1 %1651 }
 0xa1e   : > { %2809 = vrcp.f32 %v1652_v31  ;;  %v2777_v31 = vld [vmem:[%s3390_s15] sm:$0xff]  }
 0xa20   : > { %1988 = vrot.lane.b32.xlu1 %v3230_v28, %s3446_s30 }
 0xa21   : > { %v1658_v32 = vpop.permute.xlu1 %1657 }
 0xa22   : > { %v1663_v33 = vsel %vm968_vm3, %v1658_v32, 0  ;;  %v2778_v32 = vld [vmem:[%s3390_s15 + $0x8] sm:$0xff]  }
 0xa23   : > { %2662 = vmatpush3.bf16.msra.mxu1 %v1663_v33 }
 0xa24   : > { %2673 = vmatprep.subr.bf16.mxu1 %v2866_v0 }
 0xa28   : > { %v2810_v34 = vpop.eup %2809 }
 0xa29   : > { %v1654_v35 = vmul.f32 %v2810_v34, %v2802_v13  ;;  %1768 = vrot.lane.b32.xlu0 %v3230_v28, %s3447_s27 }
 0xa2b   : > { %v1655_v36 = vpack.c.bf16 %v1654_v35, %v1654_v35 }
 0xa2d   : > { %2664 = vmatmul.mubr.msk.bf16.vlgmr.msra.gmra.mrb[28].mxu1 %vm904_vm2, %v1655_v36  ;;  %v2504_v36 = vld [vmem:[%s3396_s21] ss:$0 sm:$0xff] }
 0xa2e   : > { %2675 = vmatprep.mubr.msk.bf16.mxu1 %vm2867_vm0, %v2866_v0 }
 0xa90   : > { %v1764_v37 = vpop.xlane.xlu0 %1763 }
 0xa91   : > { %2811 = vrcp.f32 %v1764_v37 }
 0xa98   : > { %v1874_v38 = vpop.xlane.xlu1 %1873 }
 0xa99   : > { %2813 = vrcp.f32 %v1874_v38  ;;  %v2505_v38 = vld [vmem:[%s3397_s22] ss:$0 sm:$0xff] }
 0xa9b   : > { %v2812_v39 = vpop.eup %2811 }
 0xa9c   : > { %v1766_v41 = vmul.f32 %v2812_v39, %v2804_v20  ;;  %v1879_v44 = vpop.permute.xlu1 %1878 }
 0xa9d   : > { %v1884_v46 = vsel %vm968_vm3, %v1879_v44, 0  ;;  %v2781_v44 = vld [vmem:[%s3392_s17 + $0x10] sm:$0xff]  }
 0xa9e   : > { %v1767_v28 = vpack.c.bf16 %v1766_v41, %v1766_v41 }
 0xaa0   : > { %v1984_v40 = vpop.xlane.xlu0 %1983  ;;  %v1989_v48 = vpop.permute.xlu1 %1988 }
 0xaa1   : > { %2815 = vrcp.f32 %v1984_v40  ;;  %v1994_v51 = vsel %vm968_vm3, %v1989_v48, 0 }
 0xaa3   : > { %v2814_v45 = vpop.eup %2813 }
 0xaa4   : > { %v1769_v42 = vpop.permute.xlu0 %1768  ;;  %v1876_v47 = vmul.f32 %v2814_v45, %v2806_v26  ;;  %v2506_v45 = vld [vmem:[%s3391_s16] ss:$0 sm:$0xff] }
 0xaa5   : > { %v1774_v43 = vsel %vm968_vm3, %v1769_v42, 0  ;;  %v2779_v42 = vld [vmem:[%s3392_s17] sm:$0xff]  }
 0xaa6   : > { %2674 = vmatpush3.bf16.msra.mxu1 %v1774_v43  ;;  %v1877_v49 = vpack.c.bf16 %v1876_v47, %v1876_v47  ;;  %v2780_v43 = vld [vmem:[%s3392_s17 + $0x8] sm:$0xff]  }
 0xaa7   : > { %2685 = vmatprep.subr.bf16.mxu1 %v2866_v0 }
 0xaa9   : > { %2676 = vmatmul.mubr.msk.bf16.vlgmr.msra.gmra.mrb[32].mxu1 %vm904_vm2, %v1767_v28  ;;  %v2782_v28 = vld [vmem:[%s3392_s17 + $0x18] sm:$0xff]  }
 0xaaa   : > { %2686 = vmatpush3.bf16.msra.mxu1 %v1884_v46  ;;  %2687 = vmatprep.mubr.msk.bf16.mxu1 %vm2867_vm0, %v2866_v0 }
 0xaab   : > { %2697 = vmatprep.subr.bf16.mxu1 %v2866_v0  ;;  %v2816_v50 = vpop.eup %2815 }
 0xaac   : > { %v1986_v52 = vmul.f32 %v2816_v50, %v2808_v29 }
 0xaae   : > { %v1987_v53 = vpack.c.bf16 %v1986_v52, %v1986_v52 }
 0xab1   : > { %2688 = vmatmul.mubr.msk.bf16.vlgmr.msra.gmra.mrb[36].mxu1 %vm904_vm2, %v1877_v49 }
 0xab2   : > { %2698 = vmatpush3.bf16.msra.mxu1 %v1994_v51  ;;  %2699 = vmatprep.mubr.msk.bf16.mxu1 %vm2867_vm0, %v2866_v0 }
 0xab3   : > { %2711 = vmatprep.subr.bf16.mxu1 %v2866_v0 }
 0xab9   : > { %2700 = vmatmul.mubr.msk.bf16.vlgmr.msra.gmra.mrb[40].mxu1 %vm904_vm2, %v1987_v53 }
 0xaba   : > { %2715 = vmatprep.mubr.msk.bf16.mxu1 %vm2867_vm0, %v2866_v0  ;;  %2712 = vmatpush3.bf16.msra.mxu1 %v2777_v31 }
 0xabb   : > { %2713 = vmatprep.subr.bf16.mxu1 %v2866_v0 }
 0xabe   : > { %2714 = vmatpush3.bf16.msra.mxu1 %v2778_v32  ;;  %v2516_v32 = vld [vmem:[%s3398_s23] ss:$0 sm:$0xff] }
 0xb00   : > { %v1699_v54 = vpop.f32.mrb[28].mxu1 }
 0xb01   : > { %v2665_v55 = vpop.f32.mrb[29].mxu1 }
 0xb02   : > { %v1702_v56 = vpop.f32.mrb[30].mxu1 }
 0xb03   : > { %v2666_v57 = vpop.f32.mrb[31].mxu1 }
 0xb7c   : > { %v1810_v59 = vpop.f32.mrb[32].mxu1 }
 0xb7d   : > { %2037 = vrot.lane.b32.xlu0 %v1810_v59, %s3448_s7  ;;  %v2677_v60 = vpop.f32.mrb[33].mxu1 }
 0xb7e   : > { %v1813_v61 = vpop.f32.mrb[34].mxu1 }
 0xb7f   : > { %v2678_v62 = vpop.f32.mrb[35].mxu1 }
 0xb84   : > { %v1920_v1 = vpop.f32.mrb[36].mxu1 }
 0xb85   : > { %2041 = vrot.lane.b32.xlu1 %v1920_v1, %s3449_s26  ;;  %v2689_v2 = vpop.f32.mrb[37].mxu1 }
 0xb86   : > { %v1923_v4 = vpop.f32.mrb[38].mxu1 }
 0xb87   : > { %v2690_v5 = vpop.f32.mrb[39].mxu1 }
 0xb8c   : > { %v2030_v6 = vpop.f32.mrb[40].mxu1 }
 0xb8d   : > { %2045 = vrot.lane.b32.xlu0 %v2030_v6, %s3450_s2  ;;  %v2701_v7 = vpop.f32.mrb[41].mxu1 }
 0xb8e   : > { %v2033_v8 = vpop.f32.mrb[42].mxu1 }
 0xb8f   : > { %v2702_v3 = vpop.f32.mrb[43].mxu1 }
 0xbef   : > { %v2038_v9 = vpop.permute.xlu0 %2037 }
 0xbf0   : > { %v2048_v12 = vsel %vm904_vm2, %v1699_v54, %v2038_v9 }
 0xbf7   : > { %v2042_v11 = vpop.permute.xlu1 %2041 }
 0xbf8   : > { %v2049_v13 = vsel %vm1355_vm4, %v2048_v12, %v2042_v11 }
 0xbff   : > { %v2046_v14 = vpop.permute.xlu0 %2045 }
 0xc00   : > { %v2050_v15 = vsel %vm1357_vm5, %v2049_v13, %v2046_v14  ;;  %v2510_v14 = vld [vmem:[%s3393_s18] ss:$0 sm:$0xff] }
 0xc01   : > { %v2055_v16 = vpack.c.bf16 %v2050_v15, %v2050_v15 }
 0xc03   : > { %2708 = vmatmul.mubr.msk.bf16.vlgmr.msra.gmra.mrb[36].mxu0 %vm849_vm1, %v2055_v16 }
 0xc04   : > { %2727 = vmatprep.mubr.msk.bf16.mxu0 %vm2867_vm0, %v2866_v0  ;;  %2720 = vmatpush3.bf16.msra.mxu0 %v2779_v42 }
 0xc05   : > { %2721 = vmatprep.subr.bf16.mxu0 %v2866_v0 }
 0xc08   : > { %2722 = vmatpush3.bf16.msra.mxu0 %v2780_v43 }
 0xc09   : > { %2723 = vmatprep.subr.bf16.mxu0 %v2866_v0 }
 0xc0c   : > { %2724 = vmatpush3.bf16.msra.mxu0 %v2781_v44 }
 0xc0d   : > { %2725 = vmatprep.subr.bf16.mxu0 %v2866_v0 }
 0xc10   : > { %2726 = vmatpush3.bf16.msra.mxu0 %v2782_v28 }
 0xcd6   : > { %v2112_v18 = vpop.f32.mrb[36].mxu0 }
 0xcd7   : > { %v2113_v19 = vadd.f32 %v2500_v17, %v2112_v18  ;;  %v2709_v10 = vpop.f32.mrb[37].mxu0 }
 0xcd8   : > { %v2115_v20 = vpop.f32.mrb[38].mxu0 }
 0xcd9   : > { %v2710_v22 = vpop.f32.mrb[39].mxu0  ;;  %v2118_v23 = vadd.f32 %v2113_v19, %v3220_v21 }
 0xcdb   : > { %v2121_v24 = vsel %vm849_vm1, %v2118_v23, 0.0 }
 0xcdc   : > { %2122 = vadd.xlane.f32.xlu1 %v2121_v24 }
 0xd69   : > { %v2123_v25 = vpop.xlane.xlu1 %2122 }
 0xd6a   : > { %v2124_v26 = vmul.f32 0.03125, %v2123_v25 }
 0xd6c   : > { %v2125_v27 = vsub.f32 %v2118_v23, %v2124_v26 }
 0xd6e   : > { %v2126_v29 = vmul.f32 %v2125_v27, %v2125_v27 }
 0xd70   : > { %v2127_v30 = vsel %vm849_vm1, %v2126_v29, 0.0 }
 0xd71   : > { %2128 = vadd.xlane.f32.xlu0 %v2127_v30 }
 0xdfe   : > { %v2129_v21 = vpop.xlane.xlu0 %2128 }
 0xdff   : > { %v2130_v33 = vmul.f32 0.03125, %v2129_v21 }
 0xe01   : > { %v2131_v34 = vadd.f32 1e-05, %v2130_v33  ;;  %v2517_v33 = vld [vmem:[#allocation2] ss:$0 sm:$0xff] }
 0xe03   : > { %2817 = vrsqrt.f32 %v2131_v34 }
 0xe0d   : > { %v2818_v35 = vpop.eup %2817 }
 0xe0e   : > { %v2133_v37 = vmul.f32 %v2818_v35, %v2125_v27 }
 0xe10   : > { %v2140_v39 = vmul.f32 %v2504_v36, %v2133_v37 }
 0xe12   : > { %v2147_v40 = vadd.f32 %v2505_v38, %v2140_v39 }
 0xe14   : > { %v2152_v41 = vpack.c.bf16 %v2147_v40, %v2147_v40 }
 0xe16   : > { %2716 = vmatmul.mubr.msk.bf16.vlgmr.msra.gmra.mrb[44].mxu1 %vm849_vm1, %v2152_v41 }
 0xee9   : > { %v2209_v46 = vpop.f32.mrb[44].mxu1 }
 0xeea   : > { %v2210_v47 = vadd.f32 %v2506_v45, %v2209_v46  ;;  %v2717_v48 = vpop.f32.mrb[45].mxu1 }
 0xeeb   : > { %v2212_v49 = vpop.f32.mrb[46].mxu1 }
 0xeec   : > { %v2216_v50 = vmul.f32 0.70710677, %v2210_v47  ;;  %v2718_v51 = vpop.f32.mrb[47].mxu1  ;;  %v2215_v9 = vmul.f32 0.5, %v2210_v47 }
 0xeee   : > { %v2217_v52 = vand.u32 2147483647, %v2216_v50  ;;  %vm2236_vm6 = vcmp.ge.f32.partialorder %v2216_v50, 0.0 }
 0xef0   : > { %v2218_v53 = vmul.f32 0.3275911, %v2217_v52  ;;  %v2230_v0 = vsub.f32 0.0, %v2217_v52 }
 0xef2   : > { %v2219_v54 = vadd.f32 1.0, %v2218_v53  ;;  %v2231_v56 = vmul.f32 %v2230_v0, %v2217_v52 }
 0xef4   : > { %2819 = vrcp.f32 %v2219_v54  ;;  %v2232_v59 = vmul.f32 1.442695, %v2231_v56 }
 0xef6   : > { %2821 = vpow2.f32 %v2232_v59 }
 0xefe   : > { %v2820_v55 = vpop.eup %2819 }
 0xeff   : > { %v2221_v57 = vmul.f32 1.0614054, %v2820_v55 }
 0xf00   : > { %v2822_v5 = vpop.eup %2821 }
 0xf01   : > { %v2222_v58 = vadd.f32 -1.4531521, %v2221_v57 }
 0xf03   : > { %v2223_v60 = vmul.f32 %v2820_v55, %v2222_v58 }
 0xf05   : > { %v2224_v61 = vadd.f32 1.4214138, %v2223_v60 }
 0xf07   : > { %v2225_v62 = vmul.f32 %v2820_v55, %v2224_v61 }
 0xf09   : > { %v2226_v63 = vadd.f32 -0.28449672, %v2225_v62 }
 0xf0b   : > { %v2227_v1 = vmul.f32 %v2820_v55, %v2226_v63 }
 0xf0d   : > { %v2228_v2 = vadd.f32 0.2548296, %v2227_v1 }
 0xf0f   : > { %v2229_v4 = vmul.f32 %v2820_v55, %v2228_v2 }
 0xf11   : > { %v2234_v6 = vmul.f32 %v2822_v5, %v2229_v4 }
 0xf13   : > { %v2235_v7 = vsub.f32 1.0, %v2234_v6 }
 0xf15   : > { %v2237_v8 = vsub.f32 0.0, %v2235_v7 }
 0xf17   : > { %v2238_v3 = vsel %vm2236_vm6, %v2235_v7, %v2237_v8 }
 0xf18   : > { %v2239_v11 = vadd.f32 1.0, %v2238_v3 }
 0xf1a   : > { %v2240_v12 = vmul.f32 %v2239_v11, %v2215_v9 }
 0xf1c   : > { %v2249_v13 = vpack.c.bf16 %v2240_v12, %v2240_v12 }
 0xf1e   : > { %2728 = vmatmul.mubr.msk.bf16.vlgmr.msra.gmra.mrb[40].mxu0 %vm2281_vm7, %v2249_v13 }
 0xff1   : > { %v2319_v15 = vpop.f32.mrb[40].mxu0 }
 0xff2   : > { %v2320_v16 = vadd.f32 %v2510_v14, %v2319_v15  ;;  %v2729_v17 = vpop.f32.mrb[41].mxu0 }
 0xff3   : > { %v2322_v18 = vpop.f32.mrb[42].mxu0 }
 0xff4   : > { %v2730_v19 = vpop.f32.mrb[43].mxu0  ;;  %v2325_v10 = vadd.f32 %v2320_v16, %v2147_v40 }
 0xff6   : > { %v2328_v20 = vsel %vm849_vm1, %v2325_v10, 0.0 }
 0xff7   : > { %2329 = vadd.xlane.f32.xlu0 %v2328_v20 }
0x1084   : > { %v2330_v22 = vpop.xlane.xlu0 %2329 }
0x1085   : > { %v2331_v23 = vmul.f32 0.03125, %v2330_v22 }
0x1087   : > { %v2332_v24 = vsub.f32 %v2325_v10, %v2331_v23 }
0x1089   : > { %v2333_v25 = vmul.f32 %v2332_v24, %v2332_v24 }
0x108b   : > { %v2334_v26 = vsel %vm849_vm1, %v2333_v25, 0.0 }
0x108c   : > { %2335 = vadd.xlane.f32.xlu1 %v2334_v26 }
0x1119   : > { %v2336_v27 = vpop.xlane.xlu1 %2335 }
0x111a   : > { %v2337_v29 = vmul.f32 0.03125, %v2336_v27 }
0x111c   : > { %v2338_v30 = vadd.f32 1e-05, %v2337_v29 }
0x111e   : > { %2823 = vrsqrt.f32 %v2338_v30 }
0x1128   : > { %v2824_v31 = vpop.eup %2823 }
0x1129   : > { %v2340_v21 = vmul.f32 %v2824_v31, %v2332_v24 }
0x112b   : > { %v2347_v34 = vmul.f32 %v2516_v32, %v2340_v21 }
0x112d   : > { %v2354_v35 = vadd.f32 %v2517_v33, %v2347_v34 }
0x112f   : > { %v2355_v36 = vpack.c.bf16 %v2354_v35, %v2354_v35 }
0x1131   : > { %2357 = vst.msk [vmem:[%s817_s0] sm:$0xf] %vm2356_vm8, %v2355_v36 }
0x1132 PF: > { %s36_s29 = sadd.s32 1, %s2863_s29  }
0x1133   : > { %p33_p2 = scmp.ge.s32.totalorder %s36_s29, 4  }
0x1135   :  { %35 = sbr.rel (!%p33_p2) target bundleno = 12 (0xc), region = 164 }
0x113c   :  { %2377 = vsyncpa [#allocation3], 1 }
0x113d   :  { %2379 = vsyncpa [#allocation3 + $0x1], 1 }

// kernel: seq2seq_forward.9
= control target key start
LH: loop header
LB: loop body
LE: loop exit
PB: predicated region body
PF: predicated region fallthrough
CT: control target
= control target key end

     0   :  { %s587_s18 = smov 0   ;;  %s589_s19 = smov 0   ;;  %s642_s0 = inlined_call_operand.vmem [shape: bf16[2,8,32], index: 0, kind: input, shape index: {}]   ;;  %s643_s1 = inlined_call_operand.vmem [shape: f32[1,32], index: 1, kind: input, shape index: {}]   ;;  %s644_s2 = inlined_call_operand.vmem [shape: f32[1,32], index: 2, kind: input, shape index: {}]   ;;  %s645_s3 = inlined_call_operand.vmem [shape: bf16[32,16], index: 3, kind: input, shape index: {}]   ;;  %s646_s4 = inlined_call_operand.vmem [shape: f32[1,16], index: 4, kind: input, shape index: {}]   ;;  %s647_s5 = inlined_call_operand.vmem [shape: f32[2,8,16], index: 5, kind: output, shape index: {}]  }
   0x1   :  { %s591_s20 = smov 0  }
   0x2 LB: > { %s27_s21 = sadd.s32 1, %s549_s19  ;;  %p479_p0 = scmp.ge.s32.totalorder %s553_s20, 1  ;;  %s553_s20 = sphi %s591_s20, %s15_s20   ;;  %s549_s19 = sphi %s589_s19, %s649_s19   ;;  %s545_s18 = sphi %s587_s18, %s648_s18  }
   0x3   : > { %p29_p1 = scmp.ge.s32.totalorder %s27_s21, 2  ;;  %p217_p2 = scmp.lt.s32.totalorder %s553_s20, 3 }
   0x5   : > { %s651_s21 = smov (%p29_p1, %s27_s21), 0  ;;  %p218_p3 = pnand %p479_p0, %p217_p2 }
   0x6   : > { %p253_p4 = scmp.lt.s32.totalorder (!%p218_p3), %s545_s18, 1  ;;  %vm276_vm0 = vcmask (!%p218_p3), 261120   ;;  %v527_v8 = vld [vmem:[%s645_s3] sm:$0xff] (!%p218_p3)   ;;  %v555_v9 = vmov (!%p218_p3), 0.0   ;;  %v528_v10 = vld [vmem:[%s645_s3 + $0x8] sm:$0xff] (!%p218_p3)   ;;  %vm556_vm1 = vmmov (!%p218_p3), 0  }
   0x7   : > { %221 = sbr.rel (%p218_p3) target bundleno = 550 (0x226), region = 40  ;;  %493 = vmatprep.subr.bf16.mxu0 (!%p218_p3), %v555_v9  ;;  %497 = vmatprep.mubr.msk.bf16.mxu0 (!%p218_p3), %vm556_vm1, %v555_v9  ;;  %v482_v15 = vld [vmem:[%s643_s1] ss:$0 sm:$0xff] (!%p218_p3)  ;;  %vm372_vm2 = vcmask (!%p218_p3), 130048  }
   0x8   : > { %494 = vmatpush3.bf16.msra.mxu0 (!%p218_p3), %v527_v8  ;;  %v483_v17 = vld [vmem:[%s644_s2] ss:$0 sm:$0xff] (!%p218_p3) }
   0x9   : > { %495 = vmatprep.subr.bf16.mxu0 (!%p218_p3), %v555_v9  ;;  %v484_v21 = vld [vmem:[%s646_s4] ss:$0 sm:$0xff] (!%p218_p3) }
   0xc   : > { %496 = vmatpush3.bf16.msra.mxu0 (!%p218_p3), %v528_v10 }
   0xe   : > { %s653_s18 = smov (!%p253_p4, %s545_s18), 1 }
   0xf   : > { %s480_s22 = sshll.u32 %s653_s18, 2  ;;  %s481_s9 = sshll.u32 %s653_s18, 3 }
  0x10   : > { %s256_s25 = scalar_lea.vmem %s642_s0, %s480_s22  ;;  %s270_s14 = scalar_lea.vmem %s647_s5, %s481_s9 }
  0x11   : > { %v272_v0 = vld [vmem:[%s256_s25] sm:$0xf] }
  0x12   : > { %v273_v1 = vunpack.c.l.bf16 %v272_v0 }
  0x14   : > { %v277_v2 = vsel %vm276_vm0, %v273_v1, 0.0 }
  0x15   : > { %278 = vadd.xlane.f32.xlu0 %v277_v2 }
  0xa2   : > { %v279_v3 = vpop.xlane.xlu0 %278 }
  0xa3   : > { %v281_v4 = vmul.f32 0.03125, %v279_v3 }
  0xa5   : > { %v282_v5 = vsub.f32 %v273_v1, %v281_v4 }
  0xa7   : > { %v283_v6 = vmul.f32 %v282_v5, %v282_v5 }
  0xa9   : > { %v284_v7 = vsel %vm276_vm0, %v283_v6, 0.0 }
  0xaa   : > { %285 = vadd.xlane.f32.xlu0 %v284_v7 }
 0x137   : > { %v286_v11 = vpop.xlane.xlu0 %285 }
 0x138   : > { %v287_v12 = vmul.f32 0.03125, %v286_v11 }
 0x13a   : > { %v288_v13 = vadd.f32 1e-05, %v287_v12 }
 0x13c   : > { %529 = vrsqrt.f32 %v288_v13 }
 0x146   : > { %v530_v14 = vpop.eup %529 }
 0x147   : > { %v290_v16 = vmul.f32 %v530_v14, %v282_v5 }
 0x149   : > { %v297_v18 = vmul.f32 %v482_v15, %v290_v16 }
 0x14b   : > { %v304_v19 = vadd.f32 %v483_v17, %v297_v18 }
 0x14d   : > { %v309_v20 = vpack.c.bf16 %v304_v19, %v304_v19 }
 0x14f   : > { %498 = vmatmul.mubr.msk.bf16.vlgmr.msra.gmra.mrb[0].mxu0 %vm276_vm0, %v309_v20 }
 0x222   : > { %v366_v22 = vpop.f32.mrb[0].mxu0 }
 0x223   : > { %v367_v23 = vadd.f32 %v484_v21, %v366_v22  ;;  %v499_v24 = vpop.f32.mrb[1].mxu0 }
 0x224   : > { %v369_v25 = vpop.f32.mrb[2].mxu0 }
 0x225   : > { %373 = vst.msk [vmem:[%s270_s14] sm:$0xff] %vm372_vm2, %v367_v23  ;;  %v500_v26 = vpop.f32.mrb[3].mxu0 }
 0x226 PF: > { %s15_s20 = sadd.s32 1, %s553_s20   ;;  %s648_s18 = smov %s549_s19 }
 0x227   : > { %p12_p5 = scmp.ge.s32.totalorder %s15_s20, 4   ;;  %s649_s19 = smov %s651_s21 }
 0x229   :  { %14 = sbr.rel (!%p12_p5) target bundleno = 2 (0x2), region = 76 }

</bundles_post_ra>
